<compile_context>
chip_gen: v5e
topology: v5e:2x2
jax: 0.10.0
libtpu: 0.0.40
codegen_flags: <defaults>
</compile_context>

<pallas_src>
import jax
import jax.numpy as jnp
from jax.experimental import pallas as pl
from jax.experimental.pallas import tpu as pltpu

PATCH_W = 32  # horizontal output stride of the backbone


def _pick_div(n, target, mult):
    """Largest multiple of `mult` that divides n and is <= target; else n."""
    t = min(target, (n // mult) * mult)
    while t >= mult:
        if n % t == 0:
            return t
        t -= mult
    return n


# --------------------- fused stem conv + mapSeq kernel ----------------------

def _stem_map_kernel(p_ref, sw_ref, sb_ref, mw_ref, mb_ref, o_ref, acc_ref):
    k = pl.program_id(1)

    @pl.when(k == 0)
    def _():
        acc_ref[...] = jnp.zeros_like(acc_ref)

    acc_ref[...] += jnp.dot(p_ref[...], sw_ref[...],
                            preferred_element_type=jnp.float32)

    @pl.when(k == pl.num_programs(1) - 1)
    def _():
        feat = jnp.maximum(acc_ref[...] + sb_ref[...], 0.0)        # (tm, 2048)
        y = jnp.dot(feat.astype(jnp.bfloat16), mw_ref[...],
                    preferred_element_type=jnp.float32) + mb_ref[...]
        o_ref[...] = jnp.maximum(y, 0.0)                           # mapSeq ReLU


def stem_map(patches, stem_w, stem_b, map_w, map_b):
    """patches:(M,K) bf16, stem_w:(K,2048) bf16, map_w:(2048,512) bf16."""
    M, K = patches.shape
    F = stem_w.shape[1]
    N = map_w.shape[1]
    tm = _pick_div(M, 256, 8)
    tk = _pick_div(K, 256, 128)
    return pl.pallas_call(
        _stem_map_kernel,
        out_shape=jax.ShapeDtypeStruct((M, N), jnp.float32),
        grid_spec=pltpu.PrefetchScalarGridSpec(
            num_scalar_prefetch=0,
            grid=(M // tm, K // tk),
            in_specs=[
                pl.BlockSpec((tm, tk), lambda i, k: (i, k)),
                pl.BlockSpec((tk, F), lambda i, k: (k, 0)),
                pl.BlockSpec((1, F), lambda i, k: (0, 0)),
                pl.BlockSpec((F, N), lambda i, k: (0, 0)),
                pl.BlockSpec((1, N), lambda i, k: (0, 0)),
            ],
            out_specs=pl.BlockSpec((tm, N), lambda i, k: (i, 0)),
            scratch_shapes=[pltpu.VMEM((tm, F), jnp.float32)]),
        compiler_params=pltpu.CompilerParams(
            dimension_semantics=("parallel", "arbitrary")),
    )(patches, stem_w, stem_b, map_w, map_b)


# ------------------- GRU: input gates matmul (both dirs) --------------------

def _matmul_bias_kernel(x_ref, w_ref, b_ref, o_ref):
    o_ref[...] = (jnp.dot(x_ref[...], w_ref[...],
                          preferred_element_type=jnp.float32) + b_ref[...])


def matmul_bias(x, w, b):
    """y = x @ w + b; x:(M,K) bf16, w:(K,N) bf16, b:(1,N) f32.  M-tiled."""
    M, K = x.shape
    N = w.shape[1]
    tm = _pick_div(M, 256, 8)
    return pl.pallas_call(
        _matmul_bias_kernel,
        out_shape=jax.ShapeDtypeStruct((M, N), jnp.float32),
        grid_spec=pltpu.PrefetchScalarGridSpec(
            num_scalar_prefetch=0,
            grid=(M // tm,),
            in_specs=[
                pl.BlockSpec((tm, K), lambda i: (i, 0)),
                pl.BlockSpec((K, N), lambda i: (0, 0)),
                pl.BlockSpec((1, N), lambda i: (0, 0)),
            ],
            out_specs=pl.BlockSpec((tm, N), lambda i: (i, 0))),
        compiler_params=pltpu.CompilerParams(
            dimension_semantics=("parallel",)),
    )(x, w, b)


# ---------------------- GRU: fused recurrent time scan ----------------------

def _gru_scan_kernel(xg_ref, whh_ref, bhh_ref, o_ref, h_ref):
    """One kernel per layer; grid axis = direction (0 fwd, 1 bwd).

    xg_ref: (T, B, 3H) precomputed input gates for this direction.
    whh_ref: (H, 3H), bhh_ref: (1, 3H); o_ref: (T, B, H); h_ref: VMEM (B, H).
    The whole time loop runs inside the kernel (no per-step grid overhead).
    """
    d = pl.program_id(0)
    T, _, threeH = xg_ref.shape
    H = threeH // 3
    h_ref[...] = jnp.zeros_like(h_ref)

    def step(s, carry):
        # backward direction walks t = T-1 .. 0 but writes to original slot tt
        tt = jnp.where(d == 0, s, T - 1 - s)
        xg = xg_ref[tt]                                            # (B, 3H)
        h_prev = h_ref[...]                                        # (B, H)
        hg = jnp.dot(h_prev, whh_ref[...],
                     preferred_element_type=jnp.float32) + bhh_ref[...]
        # PyTorch GRU gate order: r, z, n  (b_hn stays inside r * (...))
        r = jax.nn.sigmoid(xg[:, 0 * H:1 * H] + hg[:, 0 * H:1 * H])
        z = jax.nn.sigmoid(xg[:, 1 * H:2 * H] + hg[:, 1 * H:2 * H])
        n = jnp.tanh(xg[:, 2 * H:3 * H] + r * hg[:, 2 * H:3 * H])
        h_new = (1.0 - z) * n + z * h_prev
        h_ref[...] = h_new
        o_ref[tt] = h_new
        return carry

    jax.lax.fori_loop(0, T, step, 0)


def gru_layer(seq_tm, lp):
    """seq_tm: (T, B, D) time-major -> (T, B, 2H) bidirectional output."""
    T, B, D = seq_tm.shape
    H = lp["w_hh_t"].shape[1]
    # input-side gates for both directions in one MXU matmul: (T*B, 6H)
    gates = matmul_bias(seq_tm.reshape(T * B, D).astype(jnp.bfloat16),
                        lp["w_ih_t"].reshape(D, 6 * H).astype(jnp.bfloat16),
                        lp["b_ih"].reshape(1, 6 * H))
    xg = gates.reshape(T, B, 2, 3 * H).transpose(2, 0, 1, 3)  # (2, T, B, 3H)

    out = pl.pallas_call(
        _gru_scan_kernel,
        out_shape=jax.ShapeDtypeStruct((2, T, B, H), jnp.float32),
        grid_spec=pltpu.PrefetchScalarGridSpec(
            num_scalar_prefetch=0,
            grid=(2,),
            in_specs=[
                pl.BlockSpec((None, T, B, 3 * H), lambda d: (d, 0, 0, 0)),
                pl.BlockSpec((None, H, 3 * H), lambda d: (d, 0, 0)),
                pl.BlockSpec((None, 1, 3 * H), lambda d: (d, 0, 0)),
            ],
            out_specs=pl.BlockSpec((None, T, B, H), lambda d: (d, 0, 0, 0)),
            scratch_shapes=[pltpu.VMEM((B, H), jnp.float32)]),
        compiler_params=pltpu.CompilerParams(
            dimension_semantics=("parallel",)),
    )(xg, lp["w_hh_t"], lp["b_hh"])
    return jnp.concatenate([out[0], out[1]], axis=-1)          # (T, B, 2H)


# --------------- LayerNorm + Linear + LogSoftmax head (fused) ---------------

def _head_kernel(x_ref, g_ref, be_ref, w_ref, b_ref, o_ref):
    x = x_ref[...]
    mean = jnp.mean(x, axis=-1, keepdims=True)
    var = jnp.mean(jnp.square(x - mean), axis=-1, keepdims=True)
    xn = (x - mean) * jax.lax.rsqrt(var + 1e-5)
    y = xn * g_ref[...] + be_ref[...]
    logits = jnp.dot(y, w_ref[...],
                     preferred_element_type=jnp.float32) + b_ref[...]
    m = jnp.max(logits, axis=-1, keepdims=True)
    s = logits - m
    lse = jnp.log(jnp.sum(jnp.exp(s), axis=-1, keepdims=True))
    o_ref[...] = s - lse


def layernorm_linear_logsoftmax(x, gamma, beta, w, b):
    M, D = x.shape
    V = w.shape[1]
    tm = _pick_div(M, 256, 8)
    return pl.pallas_call(
        _head_kernel,
        out_shape=jax.ShapeDtypeStruct((M, V), jnp.float32),
        grid_spec=pltpu.PrefetchScalarGridSpec(
            num_scalar_prefetch=0,
            grid=(M // tm,),
            in_specs=[
                pl.BlockSpec((tm, D), lambda i: (i, 0)),
                pl.BlockSpec((1, D), lambda i: (0, 0)),
                pl.BlockSpec((1, D), lambda i: (0, 0)),
                pl.BlockSpec((D, V), lambda i: (0, 0)),
                pl.BlockSpec((1, V), lambda i: (0, 0)),
            ],
            out_specs=pl.BlockSpec((tm, V), lambda i: (i, 0))),
        compiler_params=pltpu.CompilerParams(
            dimension_semantics=("parallel",)),
    )(x, gamma, beta, w, b)


# ------------------------------ model glue ---------------------------------

def init_params(key, vocab_size, hidden_size, n_layers, in_chans=1, img_h=32):
    feat, mapd = 2048, 512
    ks = iter(jax.random.split(key, 16 + 8 * n_layers))

    def rnd(shape, scale=0.02):
        return (scale * jax.random.normal(next(ks), shape)).astype(jnp.float32)

    p = {
        "stem_w": rnd((in_chans * img_h * PATCH_W, feat)),  # stand-in backbone
        "stem_b": rnd((1, feat)),
        "map_w": rnd((feat, mapd)),                          # mapSeq Linear
        "map_b": rnd((1, mapd)),
        "gru": [],
        "ln_g": jnp.ones((1, 2 * hidden_size), jnp.float32),
        "ln_b": jnp.zeros((1, 2 * hidden_size), jnp.float32),
        "out_w": rnd((2 * hidden_size, vocab_size)),
        "out_b": rnd((1, vocab_size)),
    }
    d_in = mapd
    for _ in range(n_layers):
        p["gru"].append({
            "w_ih_t": rnd((d_in, 2, 3 * hidden_size)),   # [fwd | bwd] on axis 1
            "b_ih": rnd((1, 2, 3 * hidden_size)),
            "w_hh_t": rnd((2, hidden_size, 3 * hidden_size)),
            "b_hh": rnd((2, 1, 3 * hidden_size)),
        })
        d_in = 2 * hidden_size
    return p


def crnn_forward(x, params):
    B, C, Him, W = x.shape                       # NCHW, C == 1
    T = W // PATCH_W
    # backbone stem (stand-in): full-height, stride-32 conv via im2col.
    # rows ordered (w', b) -> time-major everywhere downstream.
    patches = (x.reshape(B, C, Him, T, PATCH_W)
                 .transpose(3, 0, 1, 2, 4)
                 .reshape(T * B, C * Him * PATCH_W))
    # fused: stem conv + ReLU (+ identity AdaptiveAvgPool: H'==1) + mapSeq
    seq = stem_map(patches.astype(jnp.bfloat16),
                   params["stem_w"].astype(jnp.bfloat16), params["stem_b"],
                   params["map_w"].astype(jnp.bfloat16), params["map_b"])
    seq = seq.reshape(T, B, -1)                  # (T, B, 512)
    # bidirectional (multi-layer) GRU
    for lp in params["gru"]:
        seq = gru_layer(seq, lp)                 # (T, B, 2H)
    # LayerNorm + Linear(2H, vocab) + LogSoftmax(dim=2), fused
    twoH = seq.shape[-1]
    out = layernorm_linear_logsoftmax(seq.reshape(T * B, twoH),
                                      params["ln_g"], params["ln_b"],
                                      params["out_w"], params["out_b"])
    # time-major already == x.permute(1, 0, 2) of the PyTorch reference
    return out.reshape(T, B, -1)                 # (T, B, vocab)


if __name__ == "__main__":
    key = jax.random.PRNGKey(0)
    kx, kp = jax.random.split(key)
    vocab_size, hidden_size, n_layers = 32, 32, 1
    B, Him, W = 2, 32, 256                       # -> T = W/32 = 8
    x = jax.random.normal(kx, (B, 1, Him, W), jnp.float32)
    params = init_params(kp, vocab_size, hidden_size, n_layers,
                         in_chans=1, img_h=Him)
    y = jax.jit(crnn_forward)(x, params)
    y = jax.block_until_ready(y)
    assert y.shape == (W // PATCH_W, B, vocab_size)
    assert bool(jnp.all(jnp.isfinite(y)))
    print("KERNEL_OK")
</pallas_src>

<mosaic_0001>
module attributes {stable_mosaic.version = 11 : i64} {
  func.func @_stem_map_kernel(%arg0: i32, %arg1: i32, %arg2: memref<16x256xbf16, #tpu.memory_space<vmem>>, %arg3: memref<256x2048xbf16, #tpu.memory_space<vmem>>, %arg4: memref<1x2048xf32, #tpu.memory_space<vmem>>, %arg5: memref<2048x512xbf16, #tpu.memory_space<vmem>>, %arg6: memref<1x512xf32, #tpu.memory_space<vmem>>, %arg7: memref<16x512xf32, #tpu.memory_space<vmem>>, %arg8: memref<16x2048xf32, #tpu.memory_space<vmem>>) attributes {dimension_semantics = [#tpu.dimension_semantics<parallel>, #tpu.dimension_semantics<arbitrary>], iteration_bounds = array<i64: 1, 4>, scalar_prefetch = 0 : i64, scratch_operands = 1 : i64, tpu.core_type = #tpu.core_type<tc>, window_params = [{transform_indices = @transform_0, window_bounds = array<i64: 16, 256>}, {transform_indices = @transform_1, window_bounds = array<i64: 256, 2048>}, {pipeline_mode = #tpu.pipeline_mode<synchronous>, transform_indices = @transform_2, window_bounds = array<i64: 1, 2048>}, {pipeline_mode = #tpu.pipeline_mode<synchronous>, transform_indices = @transform_3, window_bounds = array<i64: 2048, 512>}, {pipeline_mode = #tpu.pipeline_mode<synchronous>, transform_indices = @transform_4, window_bounds = array<i64: 1, 512>}, {transform_indices = @transform_5, window_bounds = array<i64: 16, 512>}]} {
    %c0_i32 = arith.constant 0 : i32
    %0 = arith.cmpi eq, %arg1, %c0_i32 : i32
    %1 = arith.extui %0 : i1 to i32
    %c0_i32_0 = arith.constant 0 : i32
    %2 = arith.cmpi ne, %1, %c0_i32_0 : i32
    scf.if %2 {
      %cst_9 = arith.constant 0.000000e+00 : f32
      %12 = vector.broadcast %cst_9 : f32 to vector<16x2048xf32>
      %c0_10 = arith.constant 0 : index
      %c0_11 = arith.constant 0 : index
      %13 = vector.load %arg8[%c0_10, %c0_11] : memref<16x2048xf32, #tpu.memory_space<vmem>>, vector<16x2048xf32>
      tpu.vector_store %arg8[%c0_10, %c0_11], %12 {strides = array<i32>} : memref<16x2048xf32, #tpu.memory_space<vmem>>, vector<16x2048xf32>,
    } else {
    }
    %c0 = arith.constant 0 : index
    %c0_1 = arith.constant 0 : index
    %3 = vector.load %arg8[%c0, %c0_1] : memref<16x2048xf32, #tpu.memory_space<vmem>>, vector<16x2048xf32>
    %c0_2 = arith.constant 0 : index
    %c0_3 = arith.constant 0 : index
    %4 = vector.load %arg2[%c0_2, %c0_3] : memref<16x256xbf16, #tpu.memory_space<vmem>>, vector<16x256xbf16>
    %c0_4 = arith.constant 0 : index
    %c0_5 = arith.constant 0 : index
    %5 = vector.load %arg3[%c0_4, %c0_5] : memref<256x2048xbf16, #tpu.memory_space<vmem>>, vector<256x2048xbf16>
    %cst = arith.constant dense<0.000000e+00> : vector<16x2048xf32>
    %6 = tpu.matmul %4, %5, %cst {dimension_numbers = #tpu.dot_dimension_numbers<[1], [0], [0], [1], [0, 0, 1, 1], [], []>} : vector<16x256xbf16>, vector<256x2048xbf16>, vector<16x2048xf32> -> vector<16x2048xf32>
    %7 = arith.addf %3, %6 : vector<16x2048xf32>
    %c0_6 = arith.constant 0 : index
    %c0_7 = arith.constant 0 : index
    %8 = vector.load %arg8[%c0_6, %c0_7] : memref<16x2048xf32, #tpu.memory_space<vmem>>, vector<16x2048xf32>
    tpu.vector_store %arg8[%c0_6, %c0_7], %7 {strides = array<i32>} : memref<16x2048xf32, #tpu.memory_space<vmem>>, vector<16x2048xf32>,
    %c3_i32 = arith.constant 3 : i32
    %9 = arith.cmpi eq, %arg1, %c3_i32 : i32
    %10 = arith.extui %9 : i1 to i32
    %c0_i32_8 = arith.constant 0 : i32
    %11 = arith.cmpi ne, %10, %c0_i32_8 : i32
    scf.if %11 {
      %c0_9 = arith.constant 0 : index
      %c0_10 = arith.constant 0 : index
      %12 = vector.load %arg8[%c0_9, %c0_10] : memref<16x2048xf32, #tpu.memory_space<vmem>>, vector<16x2048xf32>
      %c0_11 = arith.constant 0 : index
      %c0_12 = arith.constant 0 : index
      %13 = vector.load %arg4[%c0_11, %c0_12] : memref<1x2048xf32, #tpu.memory_space<vmem>>, vector<1x2048xf32>
      %14 = vector.broadcast %13 : vector<1x2048xf32> to vector<16x2048xf32>
      %15 = arith.addf %12, %14 : vector<16x2048xf32>
      %cst_13 = arith.constant 0.000000e+00 : f32
      %16 = vector.broadcast %cst_13 : f32 to vector<16x2048xf32>
      %17 = arith.maximumf %15, %16 : vector<16x2048xf32>
      %18 = arith.truncf %17 : vector<16x2048xf32> to vector<16x2048xbf16>
      %c0_14 = arith.constant 0 : index
      %c0_15 = arith.constant 0 : index
      %19 = vector.load %arg5[%c0_14, %c0_15] : memref<2048x512xbf16, #tpu.memory_space<vmem>>, vector<2048x512xbf16>
      %cst_16 = arith.constant dense<0.000000e+00> : vector<16x512xf32>
      %20 = tpu.matmul %18, %19, %cst_16 {dimension_numbers = #tpu.dot_dimension_numbers<[1], [0], [0], [1], [0, 0, 1, 1], [], []>} : vector<16x2048xbf16>, vector<2048x512xbf16>, vector<16x512xf32> -> vector<16x512xf32>
      %c0_17 = arith.constant 0 : index
      %c0_18 = arith.constant 0 : index
      %21 = vector.load %arg6[%c0_17, %c0_18] : memref<1x512xf32, #tpu.memory_space<vmem>>, vector<1x512xf32>
      %22 = vector.broadcast %21 : vector<1x512xf32> to vector<16x512xf32>
      %23 = arith.addf %20, %22 : vector<16x512xf32>
      %cst_19 = arith.constant 0.000000e+00 : f32
      %24 = vector.broadcast %cst_19 : f32 to vector<16x512xf32>
      %25 = arith.maximumf %23, %24 : vector<16x512xf32>
      %c0_20 = arith.constant 0 : index
      %c0_21 = arith.constant 0 : index
      %26 = vector.load %arg7[%c0_20, %c0_21] : memref<16x512xf32, #tpu.memory_space<vmem>>, vector<16x512xf32>
      tpu.vector_store %arg7[%c0_20, %c0_21], %25 {strides = array<i32>} : memref<16x512xf32, #tpu.memory_space<vmem>>, vector<16x512xf32>,
    } else {
    }
    return
  }
  func.func @transform_0(%arg0: i32, %arg1: i32) -> (i32, i32) {
    %c0_i32 = arith.constant 0 : i32
    return %arg0, %arg1 : i32, i32
  }
  func.func @transform_1(%arg0: i32, %arg1: i32) -> (i32, i32) {
    %c0_i32 = arith.constant 0 : i32
    %c0_i32_0 = arith.constant 0 : i32
    return %arg1, %c0_i32 : i32, i32
  }
  func.func @transform_2(%arg0: i32, %arg1: i32) -> (i32, i32) {
    %c0_i32 = arith.constant 0 : i32
    %c0_i32_0 = arith.constant 0 : i32
    %c0_i32_1 = arith.constant 0 : i32
    return %c0_i32, %c0_i32_0 : i32, i32
  }
  func.func @transform_3(%arg0: i32, %arg1: i32) -> (i32, i32) {
    %c0_i32 = arith.constant 0 : i32
    %c0_i32_0 = arith.constant 0 : i32
    %c0_i32_1 = arith.constant 0 : i32
    return %c0_i32, %c0_i32_0 : i32, i32
  }
  func.func @transform_4(%arg0: i32, %arg1: i32) -> (i32, i32) {
    %c0_i32 = arith.constant 0 : i32
    %c0_i32_0 = arith.constant 0 : i32
    %c0_i32_1 = arith.constant 0 : i32
    return %c0_i32, %c0_i32_0 : i32, i32
  }
  func.func @transform_5(%arg0: i32, %arg1: i32) -> (i32, i32) {
    %c0_i32 = arith.constant 0 : i32
    %c0_i32_0 = arith.constant 0 : i32
    return %arg0, %c0_i32 : i32, i32
  }
}

module attributes {stable_mosaic.version = 11 : i64} {
  func.func @_matmul_bias_kernel(%arg0: i32, %arg1: memref<16x512xbf16, #tpu.memory_space<vmem>>, %arg2: memref<512x192xbf16, #tpu.memory_space<vmem>>, %arg3: memref<1x192xf32, #tpu.memory_space<vmem>>, %arg4: memref<16x192xf32, #tpu.memory_space<vmem>>) attributes {dimension_semantics = [#tpu.dimension_semantics<parallel>], iteration_bounds = array<i64: 1>, scalar_prefetch = 0 : i64, scratch_operands = 0 : i64, tpu.core_type = #tpu.core_type<tc>, window_params = [{transform_indices = @transform_0, window_bounds = array<i64: 16, 512>}, {pipeline_mode = #tpu.pipeline_mode<synchronous>, transform_indices = @transform_1, window_bounds = array<i64: 512, 192>}, {pipeline_mode = #tpu.pipeline_mode<synchronous>, transform_indices = @transform_2, window_bounds = array<i64: 1, 192>}, {transform_indices = @transform_3, window_bounds = array<i64: 16, 192>}]} {
    %c0 = arith.constant 0 : index
    %c0_0 = arith.constant 0 : index
    %0 = vector.load %arg1[%c0, %c0_0] : memref<16x512xbf16, #tpu.memory_space<vmem>>, vector<16x512xbf16>
    %c0_1 = arith.constant 0 : index
    %c0_2 = arith.constant 0 : index
    %1 = vector.load %arg2[%c0_1, %c0_2] : memref<512x192xbf16, #tpu.memory_space<vmem>>, vector<512x192xbf16>
    %cst = arith.constant dense<0.000000e+00> : vector<16x192xf32>
    %2 = tpu.matmul %0, %1, %cst {dimension_numbers = #tpu.dot_dimension_numbers<[1], [0], [0], [1], [0, 0, 1, 1], [], []>} : vector<16x512xbf16>, vector<512x192xbf16>, vector<16x192xf32> -> vector<16x192xf32>
    %c0_3 = arith.constant 0 : index
    %c0_4 = arith.constant 0 : index
    %3 = vector.load %arg3[%c0_3, %c0_4] : memref<1x192xf32, #tpu.memory_space<vmem>>, vector<1x192xf32>
    %4 = vector.broadcast %3 : vector<1x192xf32> to vector<16x192xf32>
    %5 = arith.addf %2, %4 : vector<16x192xf32>
    %c0_5 = arith.constant 0 : index
    %c0_6 = arith.constant 0 : index
    %6 = vector.load %arg4[%c0_5, %c0_6] : memref<16x192xf32, #tpu.memory_space<vmem>>, vector<16x192xf32>
    tpu.vector_store %arg4[%c0_5, %c0_6], %5 {strides = array<i32>} : memref<16x192xf32, #tpu.memory_space<vmem>>, vector<16x192xf32>,
    return
  }
  func.func @transform_0(%arg0: i32) -> (i32, i32) {
    %c0_i32 = arith.constant 0 : i32
    %c0_i32_0 = arith.constant 0 : i32
    return %arg0, %c0_i32 : i32, i32
  }
  func.func @transform_1(%arg0: i32) -> (i32, i32) {
    %c0_i32 = arith.constant 0 : i32
    %c0_i32_0 = arith.constant 0 : i32
    %c0_i32_1 = arith.constant 0 : i32
    return %c0_i32, %c0_i32_0 : i32, i32
  }
  func.func @transform_2(%arg0: i32) -> (i32, i32) {
    %c0_i32 = arith.constant 0 : i32
    %c0_i32_0 = arith.constant 0 : i32
    %c0_i32_1 = arith.constant 0 : i32
    return %c0_i32, %c0_i32_0 : i32, i32
  }
  func.func @transform_3(%arg0: i32) -> (i32, i32) {
    %c0_i32 = arith.constant 0 : i32
    %c0_i32_0 = arith.constant 0 : i32
    return %arg0, %c0_i32 : i32, i32
  }
}

module attributes {stable_mosaic.version = 11 : i64} {
  func.func @_head_kernel(%arg0: i32, %arg1: memref<16x64xf32, #tpu.memory_space<vmem>>, %arg2: memref<1x64xf32, #tpu.memory_space<vmem>>, %arg3: memref<1x64xf32, #tpu.memory_space<vmem>>, %arg4: memref<64x32xf32, #tpu.memory_space<vmem>>, %arg5: memref<1x32xf32, #tpu.memory_space<vmem>>, %arg6: memref<16x32xf32, #tpu.memory_space<vmem>>) attributes {dimension_semantics = [#tpu.dimension_semantics<parallel>], iteration_bounds = array<i64: 1>, scalar_prefetch = 0 : i64, scratch_operands = 0 : i64, tpu.core_type = #tpu.core_type<tc>, window_params = [{transform_indices = @transform_0, window_bounds = array<i64: 16, 64>}, {pipeline_mode = #tpu.pipeline_mode<synchronous>, transform_indices = @transform_1, window_bounds = array<i64: 1, 64>}, {pipeline_mode = #tpu.pipeline_mode<synchronous>, transform_indices = @transform_2, window_bounds = array<i64: 1, 64>}, {pipeline_mode = #tpu.pipeline_mode<synchronous>, transform_indices = @transform_3, window_bounds = array<i64: 64, 32>}, {pipeline_mode = #tpu.pipeline_mode<synchronous>, transform_indices = @transform_4, window_bounds = array<i64: 1, 32>}, {transform_indices = @transform_5, window_bounds = array<i64: 16, 32>}]} {
    %c0 = arith.constant 0 : index
    %c0_0 = arith.constant 0 : index
    %0 = vector.load %arg1[%c0, %c0_0] : memref<16x64xf32, #tpu.memory_space<vmem>>, vector<16x64xf32>
    %cst = arith.constant dense<0.000000e+00> : vector<16xf32>
    %1 = vector.multi_reduction <add>, %0, %cst [1] : vector<16x64xf32> to vector<16xf32>
    %2 = vector.shape_cast %1 : vector<16xf32> to vector<16x1xf32>
    %cst_1 = arith.constant 6.400000e+01 : f32
    %3 = vector.broadcast %cst_1 : f32 to vector<16x1xf32>
    %4 = arith.divf %2, %3 : vector<16x1xf32>
    %5 = vector.broadcast %4 : vector<16x1xf32> to vector<16x64xf32>
    %6 = arith.subf %0, %5 : vector<16x64xf32>
    %7 = arith.mulf %6, %6 : vector<16x64xf32>
    %cst_2 = arith.constant dense<0.000000e+00> : vector<16xf32>
    %8 = vector.multi_reduction <add>, %7, %cst_2 [1] : vector<16x64xf32> to vector<16xf32>
    %9 = vector.shape_cast %8 : vector<16xf32> to vector<16x1xf32>
    %cst_3 = arith.constant 6.400000e+01 : f32
    %10 = vector.broadcast %cst_3 : f32 to vector<16x1xf32>
    %11 = arith.divf %9, %10 : vector<16x1xf32>
    %12 = vector.broadcast %4 : vector<16x1xf32> to vector<16x64xf32>
    %13 = arith.subf %0, %12 : vector<16x64xf32>
    %cst_4 = arith.constant 9.99999974E-6 : f32
    %14 = vector.broadcast %cst_4 : f32 to vector<16x1xf32>
    %15 = arith.addf %11, %14 : vector<16x1xf32>
    %16 = math.rsqrt %15 : vector<16x1xf32>
    %17 = vector.broadcast %16 : vector<16x1xf32> to vector<16x64xf32>
    %18 = arith.mulf %13, %17 : vector<16x64xf32>
    %c0_5 = arith.constant 0 : index
    %c0_6 = arith.constant 0 : index
    %19 = vector.load %arg2[%c0_5, %c0_6] : memref<1x64xf32, #tpu.memory_space<vmem>>, vector<1x64xf32>
    %20 = vector.broadcast %19 : vector<1x64xf32> to vector<16x64xf32>
    %21 = arith.mulf %18, %20 : vector<16x64xf32>
    %c0_7 = arith.constant 0 : index
    %c0_8 = arith.constant 0 : index
    %22 = vector.load %arg3[%c0_7, %c0_8] : memref<1x64xf32, #tpu.memory_space<vmem>>, vector<1x64xf32>
    %23 = vector.broadcast %22 : vector<1x64xf32> to vector<16x64xf32>
    %24 = arith.addf %21, %23 : vector<16x64xf32>
    %c0_9 = arith.constant 0 : index
    %c0_10 = arith.constant 0 : index
    %25 = vector.load %arg4[%c0_9, %c0_10] : memref<64x32xf32, #tpu.memory_space<vmem>>, vector<64x32xf32>
    %cst_11 = arith.constant dense<0.000000e+00> : vector<16x32xf32>
    %26 = tpu.matmul %24, %25, %cst_11 {dimension_numbers = #tpu.dot_dimension_numbers<[1], [0], [0], [1], [0, 0, 1, 1], [], []>} : vector<16x64xf32>, vector<64x32xf32>, vector<16x32xf32> -> vector<16x32xf32>
    %c0_12 = arith.constant 0 : index
    %c0_13 = arith.constant 0 : index
    %27 = vector.load %arg5[%c0_12, %c0_13] : memref<1x32xf32, #tpu.memory_space<vmem>>, vector<1x32xf32>
    %28 = vector.broadcast %27 : vector<1x32xf32> to vector<16x32xf32>
    %29 = arith.addf %26, %28 : vector<16x32xf32>
    %cst_14 = arith.constant dense<0xFF800000> : vector<16xf32>
    %30 = vector.multi_reduction <maximumf>, %29, %cst_14 [1] : vector<16x32xf32> to vector<16xf32>
    %31 = vector.shape_cast %30 : vector<16xf32> to vector<16x1xf32>
    %32 = vector.broadcast %31 : vector<16x1xf32> to vector<16x32xf32>
    %33 = arith.subf %29, %32 : vector<16x32xf32>
    %34 = math.exp %33 : vector<16x32xf32>
    %cst_15 = arith.constant dense<0.000000e+00> : vector<16xf32>
    %35 = vector.multi_reduction <add>, %34, %cst_15 [1] : vector<16x32xf32> to vector<16xf32>
    %36 = vector.shape_cast %35 : vector<16xf32> to vector<16x1xf32>
    %37 = math.log %36 : vector<16x1xf32>
    %38 = vector.broadcast %37 : vector<16x1xf32> to vector<16x32xf32>
    %39 = arith.subf %33, %38 : vector<16x32xf32>
    %c0_16 = arith.constant 0 : index
    %c0_17 = arith.constant 0 : index
    %40 = vector.load %arg6[%c0_16, %c0_17] : memref<16x32xf32, #tpu.memory_space<vmem>>, vector<16x32xf32>
    tpu.vector_store %arg6[%c0_16, %c0_17], %39 {strides = array<i32>} : memref<16x32xf32, #tpu.memory_space<vmem>>, vector<16x32xf32>,
    return
  }
  func.func @transform_0(%arg0: i32) -> (i32, i32) {
    %c0_i32 = arith.constant 0 : i32
    %c0_i32_0 = arith.constant 0 : i32
    return %arg0, %c0_i32 : i32, i32
  }
  func.func @transform_1(%arg0: i32) -> (i32, i32) {
    %c0_i32 = arith.constant 0 : i32
    %c0_i32_0 = arith.constant 0 : i32
    %c0_i32_1 = arith.constant 0 : i32
    return %c0_i32, %c0_i32_0 : i32, i32
  }
  func.func @transform_2(%arg0: i32) -> (i32, i32) {
    %c0_i32 = arith.constant 0 : i32
    %c0_i32_0 = arith.constant 0 : i32
    %c0_i32_1 = arith.constant 0 : i32
    return %c0_i32, %c0_i32_0 : i32, i32
  }
  func.func @transform_3(%arg0: i32) -> (i32, i32) {
    %c0_i32 = arith.constant 0 : i32
    %c0_i32_0 = arith.constant 0 : i32
    %c0_i32_1 = arith.constant 0 : i32
    return %c0_i32, %c0_i32_0 : i32, i32
  }
  func.func @transform_4(%arg0: i32) -> (i32, i32) {
    %c0_i32 = arith.constant 0 : i32
    %c0_i32_0 = arith.constant 0 : i32
    %c0_i32_1 = arith.constant 0 : i32
    return %c0_i32, %c0_i32_0 : i32, i32
  }
  func.func @transform_5(%arg0: i32) -> (i32, i32) {
    %c0_i32 = arith.constant 0 : i32
    %c0_i32_0 = arith.constant 0 : i32
    return %arg0, %c0_i32 : i32, i32
  }
}

module attributes {stable_mosaic.version = 11 : i64} {
  func.func @_gru_scan_kernel(%arg0: i32, %arg1: memref<1x8x2x96xf32, #tpu.memory_space<vmem>>, %arg2: memref<1x32x96xf32, #tpu.memory_space<vmem>>, %arg3: memref<1x1x96xf32, #tpu.memory_space<vmem>>, %arg4: memref<1x8x2x32xf32, #tpu.memory_space<vmem>>, %arg5: memref<2x32xf32, #tpu.memory_space<vmem>>) attributes {dimension_semantics = [#tpu.dimension_semantics<parallel>], iteration_bounds = array<i64: 2>, scalar_prefetch = 0 : i64, scratch_operands = 1 : i64, tpu.core_type = #tpu.core_type<tc>, window_params = [{transform_indices = @transform_0, window_bounds = array<i64: 1, 8, 2, 96>}, {transform_indices = @transform_1, window_bounds = array<i64: 1, 32, 96>}, {transform_indices = @transform_2, window_bounds = array<i64: 1, 1, 96>}, {transform_indices = @transform_3, window_bounds = array<i64: 1, 8, 2, 32>}]} {
    %cst = arith.constant 0.000000e+00 : f32
    %0 = vector.broadcast %cst : f32 to vector<2x32xf32>
    %c0 = arith.constant 0 : index
    %c0_0 = arith.constant 0 : index
    %1 = vector.load %arg5[%c0, %c0_0] : memref<2x32xf32, #tpu.memory_space<vmem>>, vector<2x32xf32>
    tpu.vector_store %arg5[%c0, %c0_0], %0 {strides = array<i32>} : memref<2x32xf32, #tpu.memory_space<vmem>>, vector<2x32xf32>,
    %c0_i32 = arith.constant 0 : i32
    %c8_i32 = arith.constant 8 : i32
    %2 = arith.addi %c0_i32, %c8_i32 : i32
    %c1_i32 = arith.constant 1 : i32
    scf.for %arg6 = %c0_i32 to %2 step %c1_i32  : i32 {
      %c0_i32_2 = arith.constant 0 : i32
      %3 = arith.cmpi eq, %arg0, %c0_i32_2 : i32
      %c7_i32 = arith.constant 7 : i32
      %4 = arith.subi %c7_i32, %arg6 : i32
      %5 = arith.select %3, %arg6, %4 : i32
      %c0_3 = arith.constant 0 : index
      %6 = arith.index_cast %5 : i32 to index
      %c0_4 = arith.constant 0 : index
      %c0_5 = arith.constant 0 : index
      %7 = vector.load %arg1[%c0_3, %6, %c0_4, %c0_5] : memref<1x8x2x96xf32, #tpu.memory_space<vmem>>, vector<1x1x2x96xf32>
      %8 = vector.shape_cast %7 : vector<1x1x2x96xf32> to vector<2x96xf32>
      %c0_6 = arith.constant 0 : index
      %c0_7 = arith.constant 0 : index
      %9 = vector.load %arg5[%c0_6, %c0_7] : memref<2x32xf32, #tpu.memory_space<vmem>>, vector<2x32xf32>
      %c0_8 = arith.constant 0 : index
      %c0_9 = arith.constant 0 : index
      %c0_10 = arith.constant 0 : index
      %10 = vector.load %arg2[%c0_8, %c0_9, %c0_10] : memref<1x32x96xf32, #tpu.memory_space<vmem>>, vector<1x32x96xf32>
      %11 = vector.shape_cast %10 : vector<1x32x96xf32> to vector<32x96xf32>
      %cst_11 = arith.constant dense<0.000000e+00> : vector<2x96xf32>
      %12 = tpu.matmul %9, %11, %cst_11 {dimension_numbers = #tpu.dot_dimension_numbers<[1], [0], [0], [1], [0, 0, 1, 1], [], []>} : vector<2x32xf32>, vector<32x96xf32>, vector<2x96xf32> -> vector<2x96xf32>
      %c0_12 = arith.constant 0 : index
      %c0_13 = arith.constant 0 : index
      %c0_14 = arith.constant 0 : index
      %13 = vector.load %arg3[%c0_12, %c0_13, %c0_14] : memref<1x1x96xf32, #tpu.memory_space<vmem>>, vector<1x1x96xf32>
      %14 = vector.shape_cast %13 : vector<1x1x96xf32> to vector<1x96xf32>
      %15 = vector.broadcast %14 : vector<1x96xf32> to vector<2x96xf32>
      %16 = arith.addf %12, %15 : vector<2x96xf32>
      %17 = vector.extract_strided_slice %8 {offsets = [0, 0], sizes = [2, 32], strides = [1, 1]} : vector<2x96xf32> to vector<2x32xf32>
      %18 = vector.extract_strided_slice %16 {offsets = [0, 0], sizes = [2, 32], strides = [1, 1]} : vector<2x96xf32> to vector<2x32xf32>
      %19 = arith.addf %17, %18 : vector<2x32xf32>
      %20 = arith.negf %19 : vector<2x32xf32>
      %21 = math.exp %20 : vector<2x32xf32>
      %cst_15 = arith.constant 1.000000e+00 : f32
      %22 = vector.broadcast %cst_15 : f32 to vector<2x32xf32>
      %23 = arith.addf %22, %21 : vector<2x32xf32>
      %24 = arith.divf %22, %23 : vector<2x32xf32>
      %25 = vector.extract_strided_slice %8 {offsets = [0, 32], sizes = [2, 32], strides = [1, 1]} : vector<2x96xf32> to vector<2x32xf32>
      %26 = vector.extract_strided_slice %16 {offsets = [0, 32], sizes = [2, 32], strides = [1, 1]} : vector<2x96xf32> to vector<2x32xf32>
      %27 = arith.addf %25, %26 : vector<2x32xf32>
      %28 = arith.negf %27 : vector<2x32xf32>
      %29 = math.exp %28 : vector<2x32xf32>
      %cst_16 = arith.constant 1.000000e+00 : f32
      %30 = vector.broadcast %cst_16 : f32 to vector<2x32xf32>
      %31 = arith.addf %30, %29 : vector<2x32xf32>
      %32 = arith.divf %30, %31 : vector<2x32xf32>
      %33 = vector.extract_strided_slice %8 {offsets = [0, 64], sizes = [2, 32], strides = [1, 1]} : vector<2x96xf32> to vector<2x32xf32>
      %34 = vector.extract_strided_slice %16 {offsets = [0, 64], sizes = [2, 32], strides = [1, 1]} : vector<2x96xf32> to vector<2x32xf32>
      %35 = arith.mulf %24, %34 : vector<2x32xf32>
      %36 = arith.addf %33, %35 : vector<2x32xf32>
      %37 = math.tanh %36 : vector<2x32xf32>
      %cst_17 = arith.constant 1.000000e+00 : f32
      %38 = vector.broadcast %cst_17 : f32 to vector<2x32xf32>
      %39 = arith.subf %38, %32 : vector<2x32xf32>
      %40 = arith.mulf %39, %37 : vector<2x32xf32>
      %41 = arith.mulf %32, %9 : vector<2x32xf32>
      %42 = arith.addf %40, %41 : vector<2x32xf32>
      %c0_18 = arith.constant 0 : index
      %c0_19 = arith.constant 0 : index
      %43 = vector.load %arg5[%c0_18, %c0_19] : memref<2x32xf32, #tpu.memory_space<vmem>>, vector<2x32xf32>
      tpu.vector_store %arg5[%c0_18, %c0_19], %42 {strides = array<i32>} : memref<2x32xf32, #tpu.memory_space<vmem>>, vector<2x32xf32>,
      %c0_20 = arith.constant 0 : index
      %44 = arith.index_cast %5 : i32 to index
      %c0_21 = arith.constant 0 : index
      %c0_22 = arith.constant 0 : index
      %45 = vector.load %arg4[%c0_20, %44, %c0_21, %c0_22] : memref<1x8x2x32xf32, #tpu.memory_space<vmem>>, vector<1x1x2x32xf32>
      %46 = vector.shape_cast %45 : vector<1x1x2x32xf32> to vector<2x32xf32>
      %47 = vector.shape_cast %42 : vector<2x32xf32> to vector<1x1x2x32xf32>
      tpu.vector_store %arg4[%c0_20, %44, %c0_21, %c0_22], %47 {strides = array<i32>} : memref<1x8x2x32xf32, #tpu.memory_space<vmem>>, vector<1x1x2x32xf32>,
    }
    %c8_i32_1 = arith.constant 8 : i32
    return
  }
  func.func @transform_0(%arg0: i32) -> (i32, i32, i32, i32) {
    %c0_i32 = arith.constant 0 : i32
    %c0_i32_0 = arith.constant 0 : i32
    %c0_i32_1 = arith.constant 0 : i32
    %c0_i32_2 = arith.constant 0 : i32
    return %arg0, %c0_i32, %c0_i32_0, %c0_i32_1 : i32, i32, i32, i32
  }
  func.func @transform_1(%arg0: i32) -> (i32, i32, i32) {
    %c0_i32 = arith.constant 0 : i32
    %c0_i32_0 = arith.constant 0 : i32
    %c0_i32_1 = arith.constant 0 : i32
    return %arg0, %c0_i32, %c0_i32_0 : i32, i32, i32
  }
  func.func @transform_2(%arg0: i32) -> (i32, i32, i32) {
    %c0_i32 = arith.constant 0 : i32
    %c0_i32_0 = arith.constant 0 : i32
    %c0_i32_1 = arith.constant 0 : i32
    return %arg0, %c0_i32, %c0_i32_0 : i32, i32, i32
  }
  func.func @transform_3(%arg0: i32) -> (i32, i32, i32, i32) {
    %c0_i32 = arith.constant 0 : i32
    %c0_i32_0 = arith.constant 0 : i32
    %c0_i32_1 = arith.constant 0 : i32
    %c0_i32_2 = arith.constant 0 : i32
    return %arg0, %c0_i32, %c0_i32_0, %c0_i32_1 : i32, i32, i32, i32
  }
}

</mosaic_0001>

<bundles_post_ra>
// kernel: crnn_forward.7
= control target key start
LH: loop header
LB: loop body
LE: loop exit
PB: predicated region body
PF: predicated region fallthrough
CT: control target
= control target key end

     0   :  { %vm23_vm0 = vcmask 523264   ;;  %s323_s0 = inlined_call_operand.vmem [shape: f32[16,64], index: 0, kind: input, shape index: {}]   ;;  %s324_s1 = inlined_call_operand.vmem [shape: f32[1,64], index: 1, kind: input, shape index: {}]   ;;  %s325_s2 = inlined_call_operand.vmem [shape: f32[1,64], index: 2, kind: input, shape index: {}]   ;;  %s326_s3 = inlined_call_operand.vmem [shape: f32[64,32], index: 3, kind: input, shape index: {}]   ;;  %s327_s4 = inlined_call_operand.vmem [shape: f32[1,32], index: 4, kind: input, shape index: {}]   ;;  %s328_s5 = inlined_call_operand.hbm [shape: f32[16,32], index: 5, kind: output, shape index: {}]  }
   0x1   :  { %v21_v0 = vld [vmem:[%s323_s0] sm:$0xff] }
   0x2   :  { %v24_v1 = vsel %vm23_vm0, %v21_v0, 0.0 }
   0x3   :  { %25 = vadd.xlane.f32.xlu0 %v24_v1 }
   0x4   :  { %10 = vsyncpa [#allocation3], 0  ;;  %v22_v2 = vld [vmem:[%s323_s0 + $0x8] sm:$0xff]  ;;  %v230_v4 = vmov 64.0   ;;  %v94_v21 = vld [vmem:[%s326_s3 + $0x38] sm:$0xff]  ;;  %vm128_vm8 = vcmask 261120  }
   0x5   :  { %v27_v3 = vsel %vm23_vm0, %v22_v2, 0.0  ;;  %190 = vrcp.f32 %v230_v4  ;;  %113 = vmatpush.msra.mxu0 %v94_v21  ;;  %175 = vmatpush.msra.mxu1 %v94_v21  ;;  %v93_v22 = vld [vmem:[%s326_s3 + $0x30] sm:$0xff]  ;;  %v92_v23 = vld [vmem:[%s326_s3 + $0x28] sm:$0xff]  ;;  %v91_v24 = vld [vmem:[%s326_s3 + $0x20] sm:$0xff]  ;;  %s161_s18 = sshll.u32 %s328_s5, 4  ;;  %s232_s19 = smov 128   ;;  %s162_s18 = int_to_ptr.hbm [resolvable:$true] %s161_s18 }
   0x6   :  { %v90_v25 = vld [vmem:[%s326_s3 + $0x18] sm:$0xff]  ;;  %v89_v26 = vld [vmem:[%s326_s3 + $0x10] sm:$0xff]  ;;  %v88_v27 = vld [vmem:[%s326_s3 + $0x8] sm:$0xff]  ;;  %s233_s20 = smov 8  }
   0x7   :  { %114 = vmatpush.msra.mxu0 %v93_v22  ;;  %176 = vmatpush.msra.mxu1 %v93_v22  ;;  %v87_v28 = vld [vmem:[%s326_s3] sm:$0xff] }
   0x8   :  { %v187_v43 = vld [vmem:[%s324_s1] ss:$0 sm:$0xff] }
   0x9   :  { %115 = vmatpush.msra.mxu0 %v92_v23  ;;  %177 = vmatpush.msra.mxu1 %v92_v23  ;;  %v188_v47 = vld [vmem:[%s325_s2] ss:$0 sm:$0xff]  ;;  %s231_s2 = smov [#allocation2]  }
   0xa   :  { %v189_v57 = vld [vmem:[%s327_s4] ss:$0 sm:$0xff]  ;;  %s159_s4 = sshll.u32 %s231_s2, 4  ;;  %s160_s4 = int_to_ptr.vmem [resolvable:$true] %s159_s4 }
   0xb   :  { %28 = vadd.xlane.f32.xlu0 %v27_v3  ;;  %v191_v5 = vpop.eup %190  ;;  %116 = vmatpush.msra.mxu0 %v91_v24 }
   0xc   :  { %v31_v6 = vmul.f32 64.0, %v191_v5  ;;  %vm35_vm1 = vweird.f32 %v191_v5  ;;  %178 = vmatpush.msra.mxu1 %v91_v24 }
   0xd   :  { %117 = vmatpush.msra.mxu0 %v90_v25 }
   0xe   :  { %v32_v7 = vsub.f32 1.0, %v31_v6  ;;  %179 = vmatpush.msra.mxu1 %v90_v25 }
   0xf   :  { %118 = vmatpush.msra.mxu0 %v89_v26 }
  0x10   :  { %v33_v8 = vmul.f32 %v191_v5, %v32_v7  ;;  %180 = vmatpush.msra.mxu1 %v89_v26 }
  0x11   :  { %119 = vmatpush.msra.mxu0 %v88_v27 }
  0x12   :  { %v34_v9 = vadd.f32 %v191_v5, %v33_v8  ;;  %181 = vmatpush.msra.mxu1 %v88_v27 }
  0x13   :  { %120 = vmatpush.msra.mxu0 %v87_v28 }
  0x14   :  { %v36_v10 = vsel %vm35_vm1, %v191_v5, %v34_v9  ;;  %182 = vmatpush.msra.mxu1 %v87_v28 }
  0x76   :  { %v26_v11 = vpop.xlane.xlu0 %25 }
  0x77   :  { %v37_v12 = vmul.f32 %v36_v10, %v26_v11 }
  0x79   :  { %v39_v13 = vsub.f32 %v21_v0, %v37_v12 }
  0x7b   :  { %v41_v14 = vmul.f32 %v39_v13, %v39_v13 }
  0x7d   :  { %v43_v15 = vsel %vm23_vm0, %v41_v14, 0.0 }
  0x7e   :  { %44 = vadd.xlane.f32.xlu1 %v43_v15  ;;  %v29_v16 = vpop.xlane.xlu0 %28 }
  0x7f   :  { %v38_v17 = vmul.f32 %v36_v10, %v29_v16 }
  0x81   :  { %v273_v18 = vsub.f32 %v22_v2, %v38_v17 }
  0x83   :  { %v42_v19 = vmul.f32 %v273_v18, %v273_v18 }
  0x85   :  { %v46_v20 = vsel %vm23_vm0, %v42_v19, 0.0 }
  0x86   :  { %47 = vadd.xlane.f32.xlu1 %v46_v20 }
  0xf1   :  { %v45_v29 = vpop.xlane.xlu1 %44 }
  0xf2   :  { %v49_v30 = vmul.f32 %v45_v29, %v36_v10 }
  0xf4   :  { %v51_v31 = vadd.f32 1e-05, %v49_v30 }
  0xf6   :  { %192 = vrsqrt.f32 %v51_v31  ;;  %vm59_vm3 = vweird.f32 %v51_v31 }
  0xf9   :  { %v48_v32 = vpop.xlane.xlu1 %47 }
  0xfa   :  { %v50_v33 = vmul.f32 %v48_v32, %v36_v10 }
  0xfc   :  { %v193_v34 = vpop.eup %192  ;;  %v52_v35 = vadd.f32 1e-05, %v50_v33 }
  0xfd   :  { %v54_v36 = vmul.f32 %v193_v34, %v51_v31  ;;  %vm60_vm2 = vweird.f32 %v193_v34 }
  0xfe   :  { %194 = vrsqrt.f32 %v52_v35  ;;  %vm61_vm4 = vmor %vm59_vm3, %vm60_vm2  ;;  %vm69_vm6 = vweird.f32 %v52_v35 }
  0xff   :  { %v55_v37 = vmul.f32 %v193_v34, %v54_v36 }
 0x101   :  { %v56_v38 = vmul.f32 0.5, %v55_v37 }
 0x103   :  { %v57_v39 = vsub.f32 1.5, %v56_v38 }
 0x104   :  { %v195_v40 = vpop.eup %194 }
 0x105   :  { %v58_v41 = vmul.f32 %v193_v34, %v57_v39  ;;  %v64_v42 = vmul.f32 %v195_v40, %v52_v35  ;;  %vm70_vm5 = vweird.f32 %v195_v40 }
 0x106   :  { %vm71_vm7 = vmor %vm69_vm6, %vm70_vm5 }
 0x107   :  { %v62_v44 = vsel %vm61_vm4, %v193_v34, %v58_v41  ;;  %v65_v45 = vmul.f32 %v195_v40, %v64_v42 }
 0x108   :  { %v73_v46 = vmul.f32 %v62_v44, %v39_v13 }
 0x109   :  { %v66_v48 = vmul.f32 0.5, %v65_v45 }
 0x10a   :  { %v79_v49 = vmul.f32 %v187_v43, %v73_v46 }
 0x10b   :  { %v67_v50 = vsub.f32 1.5, %v66_v48 }
 0x10c   :  { %v85_v51 = vadd.f32 %v188_v47, %v79_v49 }
 0x10d   :  { %v68_v52 = vmul.f32 %v195_v40, %v67_v50 }
 0x10e   :  { %173 = vmatmul.msk.f32.vlgmr.msra.gmra.mxu0 %vm23_vm0, %v85_v51 }
 0x10f   :  { %v72_v53 = vsel %vm71_vm7, %v195_v40, %v68_v52 }
 0x110   :  { %v74_v54 = vmul.f32 %v72_v53, %v273_v18 }
 0x112   :  { %v80_v55 = vmul.f32 %v187_v43, %v74_v54 }
 0x114   :  { %v86_v56 = vadd.f32 %v188_v47, %v80_v55 }
 0x116   :  { %174 = vmatmul.msk.f32.vlgmr.msra.gmra.mxu1 %vm23_vm0, %v86_v56 }
 0x18b   :  { %v122_v58 = vpop.f32.mrf.mxu0 }
 0x18c   :  { %v123_v59 = vadd.f32 %v189_v57, %v122_v58 }
 0x18e   :  { %v129_v60 = vsel %vm128_vm8, %v123_v59, -inf }
 0x18f   :  { %130 = vmax.xlane.f32.xlu2 %v129_v60 }
 0x193   :  { %v125_v61 = vpop.f32.mrf.mxu1 }
 0x194   :  { %v126_v62 = vadd.f32 %v189_v57, %v125_v61 }
 0x196   :  { %v132_v63 = vsel %vm128_vm8, %v126_v62, -inf }
 0x197   :  { %133 = vmax.xlane.f32.xlu2 %v132_v63 }
 0x202   :  { %v131_v0 = vpop.xlane.xlu2 %130 }
 0x203   :  { %v135_v1 = vsub.f32 %v123_v59, %v131_v0 }
 0x205   :  { %v137_v2 = vmul.f32 1.442695, %v135_v1 }
 0x207   :  { %196 = vpow2.f32 %v137_v2 }
 0x20a   :  { %v134_v3 = vpop.xlane.xlu2 %133 }
 0x20b   :  { %v136_v4 = vsub.f32 %v126_v62, %v134_v3 }
 0x20d   :  { %v197_v5 = vpop.eup %196  ;;  %v139_v6 = vmul.f32 1.442695, %v136_v4 }
 0x20e   :  { %v141_v7 = vsel %vm128_vm8, %v197_v5, 0.0 }
 0x20f   :  { %198 = vpow2.f32 %v139_v6  ;;  %142 = vadd.xlane.f32.xlu0 %v141_v7 }
 0x215   :  { %v199_v8 = vpop.eup %198 }
 0x216   :  { %v144_v9 = vsel %vm128_vm8, %v199_v8, 0.0 }
 0x217   :  { %145 = vadd.xlane.f32.xlu1 %v144_v9 }
 0x282   :  { %v143_v10 = vpop.xlane.xlu0 %142 }
 0x283   :  { %200 = vlog2.f32 %v143_v10 }
 0x289   :  { %v201_v11 = vpop.eup %200 }
 0x28a   :  { %v148_v12 = vmul.f32 0.6931472, %v201_v11  ;;  %v146_v13 = vpop.xlane.xlu1 %145 }
 0x28b   :  { %202 = vlog2.f32 %v146_v13 }
 0x28c   :  { %v151_v14 = vsub.f32 %v135_v1, %v148_v12 }
 0x28e   :  { %153 = vst.msk [vmem:[#allocation2] sm:$0xff] %vm128_vm8, %v151_v14 }
 0x291   :  { %v203_v15 = vpop.eup %202 }
 0x292   :  { %v150_v16 = vmul.f32 0.6931472, %v203_v15 }
 0x294   :  { %v152_v17 = vsub.f32 %v136_v4, %v150_v16 }
 0x296   :  { %154 = vst.msk [vmem:[#allocation2 + $0x8] sm:$0xff] %vm128_vm8, %v152_v17 }
 0x297   :  { %167 = dma.vmem_to_hbm [thread:$0]  %s160_s4, 256, %s162_s18, [#allocation3], %s232_s19, %s232_s19, %s233_s20  }
 0x298   :  { %228 = dma.done.wait [#allocation3], 256  }
 0x299   :  { %229 = vsyncadd [#allocation3], 4294967040 }
 0x29a   :  { %172 = vsyncpa [#allocation3], 1 }

// kernel: crnn_forward.6
= control target key start
LH: loop header
LB: loop body
LE: loop exit
PB: predicated region body
PF: predicated region fallthrough
CT: control target
= control target key end

     0   :  { %s472_s12 = smov 0   ;;  %s542_s0 = inlined_call_operand.vmem [shape: f32[2,8,2,96], index: 0, kind: input, shape index: {}]   ;;  %s543_s1 = inlined_call_operand.vmem [shape: f32[2,32,96], index: 1, kind: input, shape index: {}]   ;;  %s544_s2 = inlined_call_operand.vmem [shape: f32[2,1,96], index: 2, kind: input, shape index: {}]   ;;  %s545_s3 = inlined_call_operand.vmem [shape: f32[2,8,2,32], index: 3, kind: output, shape index: {}]  }
   0x1 LB: > { %s478_s13 = sadd.s32 4294967295, %s442_s12   ;;  %p390_p0 = scmp.ge.s32.totalorder %s442_s12, 1  ;;  %s442_s12 = sphi %s472_s12, %s13_s12  }
   0x2   : > { %p155_p1 = scmp.lt.s32.totalorder %s442_s12, 3 }
   0x4   : > { %p156_p2 = pnand %p390_p0, %p155_p1 }
   0x5   : > { %p187_p3 = scmp.lt.s32.totalorder (!%p156_p2), %s478_s13, 1  ;;  %s508_s29 = smov (!%p156_p2), 0  }
   0x6   : > { %159 = sbr.rel (%p156_p2) target bundleno = 613 (0x265), region = 32 }
   0xb   : > { %vm205_vm0 = vcmask 254976   ;;  %v448_v0 = vmov 0.0   ;;  %s485_s14 = scalar_select %p187_p3, %s478_s13, 1 }
   0xc   : > { %206 = vst.msk [vmem:[#allocation2] sm:$0x3] %vm205_vm0, %v448_v0 }
   0xd   : > { %s402_s15 = sshll.u32 %s485_s14, 4  ;;  %s403_s16 = sshll.u32 %s485_s14, 5 }
   0xe   : > { %s492_s19 = scalar_lea.vmem %s542_s0, %s402_s15  ;;  %s497_s22 = scalar_lea.vmem %s543_s1, %s403_s16 }
   0xf   : > { %s199_s25 = scalar_lea.vmem %s544_s2, %s485_s14  ;;  %s506_s28 = scalar_lea.vmem %s545_s3, %s402_s15 }
  0x10 LB: >> { %v223_v1 = vld [vmem:[%s497_s22 + $0x18] sm:$0xff]  ;;  %v222_v2 = vld [vmem:[%s497_s22 + $0x10] sm:$0xff]  ;;  %v221_v3 = vld [vmem:[%s497_s22 + $0x8] sm:$0xff]  ;;  %vm228_vm1 = vcmask 261120   ;;  %s449_s5 = smov 64   ;;  %p213_p4 = scmp.eq.s32.totalorder %s478_s13, 0  ;;  %s446_s29 = sphi %s508_s29, %s212_s29  }
  0x11   : >> { %244 = vmatpush.msra.mxu0 %v223_v1  ;;  %v220_v4 = vld [vmem:[%s497_s22] sm:$0xff]  ;;  %s214_s6 = ssub.s32 7, %s446_s29  ;;  %s450_s10 = smov 96  }
  0x12   : >> { %v425_v6 = vld [vmem:[%s199_s25] ss:$0 sm:$0xff]  ;;  %s525_s7 = scalar_select %p213_p4, %s446_s29, %s214_s6 }
  0x13   : >> { %245 = vmatpush.msra.mxu0 %v222_v2  ;;  %v219_v5 = vld [vmem:[#allocation2] sm:$0x3]  ;;  %s451_s11 = smov 32   ;;  %s212_s29 = sadd.s32 1, %s446_s29  }
  0x14   : >> { %s397_s8 = sshll.u32 %s525_s7, 1  ;;  %p209_p5 = scmp.ge.s32.totalorder %s212_s29, 8  }
  0x15   : >> { %246 = vmatpush.msra.mxu0 %v221_v3  ;;  %s217_s9 = scalar_lea.vmem %s492_s19, %s397_s8  ;;  %s299_s15 = scalar_lea.vmem %s506_s28, %s397_s8 }
  0x16   : >> { %v218_v9 = vld [vmem:[%s217_s9] sm:$0x3] }
  0x17   : >> { %247 = vmatpush.msra.mxu0 %v220_v4 }
  0x18   : >> { %398 = vmatmul.msk.f32.vlgmr.msra.gmra.mxu0 %vm228_vm1, %v219_v5 }
  0x95   : >> { %v249_v7 = vpop.f32.mrf.mxu0 }
  0x96   : >> { %v250_v8 = vadd.f32 %v425_v6, %v249_v7 }
  0x98   : >> { %273 = vrot.lane.b32.xlu0 %v250_v8, %s449_s5  ;;  %v252_v10 = vadd.f32 %v250_v8, %v218_v9 }
  0x9a   : >> { %v399_v11 = vmul.f32 -1.442695, %v252_v10 }
  0x9c   : >> { %426 = vpow2.f32 %v399_v11 }
  0xa2   : >> { %v427_v12 = vpop.eup %426 }
  0xa3   : >> { %v256_v13 = vadd.f32 1.0, %v427_v12 }
  0xa5   : >> { %428 = vrcp.f32 %v256_v13  ;;  %v268_v19 = vand.u32 2147483648, %v256_v13  ;;  %vm262_vm3 = vweird.f32 %v256_v13  ;;  %v266_v20 = vand.u32 2147483647, %v256_v13 }
  0xa7   : >> { %v269_v22 = vor.u32 1.1754944e-38, %v268_v19  ;;  %vm267_vm5 = vcmp.eq.f32.partialorder %v266_v20, 8.507059e+37 }
  0xab   : >> { %v429_v14 = vpop.eup %428 }
  0xac   : >> { %v258_v15 = vmul.f32 %v429_v14, %v256_v13  ;;  %vm263_vm2 = vweird.f32 %v429_v14 }
  0xad   : >> { %vm264_vm4 = vmor %vm262_vm3, %vm263_vm2 }
  0xae   : >> { %v259_v16 = vsub.f32 1.0, %v258_v15 }
  0xb0   : >> { %v260_v17 = vmul.f32 %v429_v14, %v259_v16 }
  0xb2   : >> { %v261_v18 = vadd.f32 %v429_v14, %v260_v17 }
  0xb4   : >> { %v265_v21 = vsel %vm264_vm4, %v429_v14, %v261_v18 }
  0xb5   : >> { %v270_v24 = vsel %vm267_vm5, %v269_v22, %v265_v21 }
  0xb6   : >> { %v283_v30 = vsub.f32 1.0, %v270_v24 }
 0x10a   : >> { %v274_v23 = vpop.permute.xlu0 %273 }
 0x10b   : >> { %v276_v25 = vmul.f32 %v274_v23, %v270_v24 }
 0x10d   : >> { %278 = vrot.lane.b32.xlu0 %v276_v25, %s449_s5 }
 0x17f   : >> { %v279_v26 = vpop.permute.xlu0 %278 }
 0x180   : >> { %v281_v27 = vadd.f32 %v279_v26, %v218_v9 }
 0x182   : >> { %430 = vtanh.f32 %v281_v27 }
 0x188   : >> { %v431_v28 = vpop.eup %430 }
 0x189   : >> { %285 = vrot.lane.b32.xlu1 %v431_v28, %s450_s10 }
 0x191   : >> { %289 = vrot.lane.b32.xlu1 %v219_v5, %s451_s11 }
 0x1fb   : >> { %v286_v29 = vpop.permute.xlu1 %285 }
 0x1fc   : >> { %v288_v32 = vmul.f32 %v286_v29, %v283_v30 }
 0x203   : >> { %v290_v31 = vpop.permute.xlu1 %289 }
 0x204   : >> { %v292_v33 = vmul.f32 %v290_v31, %v270_v24 }
 0x206   : >> { %v293_v34 = vadd.f32 %v292_v33, %v288_v32 }
 0x208   : >> { %295 = vrot.lane.b32.xlu2 %v293_v34, %s450_s10 }
 0x260   : > { %211 = sbr.rel (!%p209_p5) target bundleno = 16 (0x10), region = 77 }
 0x262   : >> { %v296_v35 = vpop.permute.xlu2 %295 }
 0x263   : >> { %298 = vst.msk [vmem:[#allocation2] sm:$0x3] %vm205_vm0, %v296_v35 }
 0x264   : >> { %300 = vst.msk [vmem:[%s299_s15] sm:$0x3] %vm205_vm0, %v296_v35 }
 0x265 PF: > { %s13_s12 = sadd.s32 1, %s442_s12  }
 0x266   : > { %p10_p6 = scmp.ge.s32.totalorder %s13_s12, 4  }
 0x268   :  { %12 = sbr.rel (!%p10_p6) target bundleno = 1 (0x1), region = 88 }

// kernel: crnn_forward.5
= control target key start
LH: loop header
LB: loop body
LE: loop exit
PB: predicated region body
PF: predicated region fallthrough
CT: control target
= control target key end

     0   :  { %vm541_vm0 = vcmask 523264   ;;  %s1348_s1 = inlined_call_operand.vmem [shape: bf16[512,192], index: 1, kind: input, shape index: {}]   ;;  %s1349_s0 = inlined_call_operand.vmem [shape: bf16[16,512], index: 0, kind: input, shape index: {}]   ;;  %s1350_s2 = inlined_call_operand.vmem [shape: f32[1,192], index: 2, kind: input, shape index: {}]   ;;  %s1351_s3 = inlined_call_operand.vmem [shape: f32[16,192], index: 3, kind: output, shape index: {}]  }
   0x1   :  { %v623_v0 = vld [vmem:[%s1348_s1 + $0x70] sm:$0xf]  ;;  %v840_v1 = vld [vmem:[%s1348_s1 + $0x74] sm:$0xf0]  ;;  %v615_v11 = vld [vmem:[%s1348_s1 + $0x60] sm:$0xf] }
   0x2   :  { %v687_v2 = vld [vmem:[%s1348_s1 + $0xf0] sm:$0xf]  ;;  %v624_v3 = vor.u32 %v840_v1, %v623_v0  ;;  %v856_v4 = vld [vmem:[%s1348_s1 + $0xf4] sm:$0xf0]  ;;  %v838_v13 = vld [vmem:[%s1348_s1 + $0x64] sm:$0xf0] }
   0x3   :  { %v751_v5 = vld [vmem:[%s1348_s1 + $0x170] sm:$0xf]  ;;  %v872_v6 = vld [vmem:[%s1348_s1 + $0x174] sm:$0xf0]  ;;  %v688_v7 = vor.u32 %v856_v4, %v687_v2  ;;  %v679_v14 = vld [vmem:[%s1348_s1 + $0xe0] sm:$0xf]  ;;  %v616_v16 = vor.u32 %v838_v13, %v615_v11 }
   0x4   :  { %v752_v8 = vor.u32 %v872_v6, %v751_v5  ;;  %v815_v9 = vld [vmem:[%s1348_s1 + $0x1f0] sm:$0xf]  ;;  %v888_v10 = vld [vmem:[%s1348_s1 + $0x1f4] sm:$0xf0]  ;;  %428 = vmatpush.bf16.msra.mxu0 %v624_v3  ;;  %v854_v15 = vld [vmem:[%s1348_s1 + $0xe4] sm:$0xf0] }
   0x5   :  { %v816_v12 = vor.u32 %v888_v10, %v815_v9  ;;  %442 = vmatpush.bf16.msra.mxu1 %v688_v7  ;;  %v680_v17 = vor.u32 %v854_v15, %v679_v14  ;;  %v743_v18 = vld [vmem:[%s1348_s1 + $0x160] sm:$0xf]  ;;  %v870_v19 = vld [vmem:[%s1348_s1 + $0x164] sm:$0xf0]  ;;  %v607_v23 = vld [vmem:[%s1348_s1 + $0x50] sm:$0xf] }
   0x6   :  { %456 = vmatpush.bf16.msra.mxu2 %v752_v8  ;;  %v807_v20 = vld [vmem:[%s1348_s1 + $0x1e0] sm:$0xf]  ;;  %v744_v21 = vor.u32 %v870_v19, %v743_v18  ;;  %v886_v22 = vld [vmem:[%s1348_s1 + $0x1e4] sm:$0xf0]  ;;  %v836_v24 = vld [vmem:[%s1348_s1 + $0x54] sm:$0xf0] }
   0x7   :  { %470 = vmatpush.bf16.msra.mxu3 %v816_v12  ;;  %v808_v25 = vor.u32 %v886_v22, %v807_v20  ;;  %v671_v26 = vld [vmem:[%s1348_s1 + $0xd0] sm:$0xf]  ;;  %v852_v27 = vld [vmem:[%s1348_s1 + $0xd4] sm:$0xf0]  ;;  %v608_v29 = vor.u32 %v836_v24, %v607_v23  ;;  %v599_v35 = vld [vmem:[%s1348_s1 + $0x40] sm:$0xf] }
   0x8   :  { %v735_v28 = vld [vmem:[%s1348_s1 + $0x150] sm:$0xf]  ;;  %429 = vmatpush.bf16.msra.mxu0 %v616_v16  ;;  %v868_v30 = vld [vmem:[%s1348_s1 + $0x154] sm:$0xf0]  ;;  %v672_v33 = vor.u32 %v852_v27, %v671_v26  ;;  %v834_v36 = vld [vmem:[%s1348_s1 + $0x44] sm:$0xf0] }
   0x9   :  { %v799_v31 = vld [vmem:[%s1348_s1 + $0x1d0] sm:$0xf]  ;;  %v884_v32 = vld [vmem:[%s1348_s1 + $0x1d4] sm:$0xf0]  ;;  %443 = vmatpush.bf16.msra.mxu1 %v680_v17  ;;  %v736_v34 = vor.u32 %v868_v30, %v735_v28  ;;  %v663_v37 = vld [vmem:[%s1348_s1 + $0xc0] sm:$0xf]  ;;  %v600_v44 = vor.u32 %v834_v36, %v599_v35 }
   0xa   :  { %457 = vmatpush.bf16.msra.mxu2 %v744_v21  ;;  %v800_v38 = vor.u32 %v884_v32, %v799_v31  ;;  %v850_v39 = vld [vmem:[%s1348_s1 + $0xc4] sm:$0xf0]  ;;  %v727_v40 = vld [vmem:[%s1348_s1 + $0x140] sm:$0xf]  ;;  %v591_v47 = vld [vmem:[%s1348_s1 + $0x30] sm:$0xf] }
   0xb   :  { %471 = vmatpush.bf16.msra.mxu3 %v808_v25  ;;  %v866_v41 = vld [vmem:[%s1348_s1 + $0x144] sm:$0xf0]  ;;  %v791_v42 = vld [vmem:[%s1348_s1 + $0x1c0] sm:$0xf]  ;;  %v664_v45 = vor.u32 %v850_v39, %v663_v37  ;;  %v832_v48 = vld [vmem:[%s1348_s1 + $0x34] sm:$0xf0] }
   0xc   :  { %v882_v43 = vld [vmem:[%s1348_s1 + $0x1c4] sm:$0xf0]  ;;  %430 = vmatpush.bf16.msra.mxu0 %v608_v29  ;;  %v728_v46 = vor.u32 %v866_v41, %v727_v40  ;;  %v655_v49 = vld [vmem:[%s1348_s1 + $0xb0] sm:$0xf]  ;;  %v848_v51 = vld [vmem:[%s1348_s1 + $0xb4] sm:$0xf0]  ;;  %v592_v56 = vor.u32 %v832_v48, %v591_v47 }
   0xd   :  { %444 = vmatpush.bf16.msra.mxu1 %v672_v33  ;;  %v792_v50 = vor.u32 %v882_v43, %v791_v42  ;;  %v719_v52 = vld [vmem:[%s1348_s1 + $0x130] sm:$0xf]  ;;  %v864_v53 = vld [vmem:[%s1348_s1 + $0x134] sm:$0xf0]  ;;  %v656_v57 = vor.u32 %v848_v51, %v655_v49  ;;  %v583_v59 = vld [vmem:[%s1348_s1 + $0x20] sm:$0xf] }
   0xe   :  { %458 = vmatpush.bf16.msra.mxu2 %v736_v34  ;;  %v783_v54 = vld [vmem:[%s1348_s1 + $0x1b0] sm:$0xf]  ;;  %v880_v55 = vld [vmem:[%s1348_s1 + $0x1b4] sm:$0xf0]  ;;  %v720_v58 = vor.u32 %v864_v53, %v719_v52  ;;  %v830_v60 = vld [vmem:[%s1348_s1 + $0x24] sm:$0xf0] }
   0xf   :  { %472 = vmatpush.bf16.msra.mxu3 %v800_v38  ;;  %v647_v61 = vld [vmem:[%s1348_s1 + $0xa0] sm:$0xf]  ;;  %v784_v62 = vor.u32 %v880_v55, %v783_v54  ;;  %v846_v63 = vld [vmem:[%s1348_s1 + $0xa4] sm:$0xf0]  ;;  %v584_v4 = vor.u32 %v830_v60, %v583_v59  ;;  %v575_v7 = vld [vmem:[%s1348_s1 + $0x10] sm:$0xf] }
  0x10   :  { %431 = vmatpush.bf16.msra.mxu0 %v600_v44  ;;  %v711_v0 = vld [vmem:[%s1348_s1 + $0x120] sm:$0xf]  ;;  %v862_v1 = vld [vmem:[%s1348_s1 + $0x124] sm:$0xf0]  ;;  %v648_v5 = vor.u32 %v846_v63, %v647_v61  ;;  %v828_v8 = vld [vmem:[%s1348_s1 + $0x14] sm:$0xf0] }
  0x11   :  { %445 = vmatpush.bf16.msra.mxu1 %v664_v45  ;;  %v775_v2 = vld [vmem:[%s1348_s1 + $0x1a0] sm:$0xf]  ;;  %v878_v3 = vld [vmem:[%s1348_s1 + $0x1a4] sm:$0xf0]  ;;  %v712_v6 = vor.u32 %v862_v1, %v711_v0  ;;  %v639_v9 = vld [vmem:[%s1348_s1 + $0x90] sm:$0xf]  ;;  %v576_v17 = vor.u32 %v828_v8, %v575_v7 }
  0x12   :  { %459 = vmatpush.bf16.msra.mxu2 %v728_v46  ;;  %v776_v10 = vor.u32 %v878_v3, %v775_v2  ;;  %v844_v11 = vld [vmem:[%s1348_s1 + $0x94] sm:$0xf0]  ;;  %v703_v12 = vld [vmem:[%s1348_s1 + $0x110] sm:$0xf]  ;;  %v567_v16 = vld [vmem:[%s1348_s1] sm:$0xf] }
  0x13   :  { %473 = vmatpush.bf16.msra.mxu3 %v792_v50  ;;  %v860_v13 = vld [vmem:[%s1348_s1 + $0x114] sm:$0xf0]  ;;  %v767_v14 = vld [vmem:[%s1348_s1 + $0x190] sm:$0xf]  ;;  %v826_v18 = vld [vmem:[%s1348_s1 + $0x4] sm:$0xf0]  ;;  %v640_v21 = vor.u32 %v844_v11, %v639_v9 }
  0x14   :  { %432 = vmatpush.bf16.msra.mxu0 %v592_v56  ;;  %v876_v15 = vld [vmem:[%s1348_s1 + $0x194] sm:$0xf0]  ;;  %v631_v19 = vld [vmem:[%s1348_s1 + $0x80] sm:$0xf]  ;;  %v842_v20 = vld [vmem:[%s1348_s1 + $0x84] sm:$0xf0]  ;;  %v704_v22 = vor.u32 %v860_v13, %v703_v12  ;;  %v568_v33 = vor.u32 %v826_v18, %v567_v16 }
  0x15   :  { %446 = vmatpush.bf16.msra.mxu1 %v656_v57  ;;  %v695_v23 = vld [vmem:[%s1348_s1 + $0x100] sm:$0xf]  ;;  %v858_v24 = vld [vmem:[%s1348_s1 + $0x104] sm:$0xf0]  ;;  %v768_v26 = vor.u32 %v876_v15, %v767_v14  ;;  %v839_v28 = vld [vmem:[%s1348_s1 + $0x74] sm:$0xf]  ;;  %v632_v37 = vor.u32 %v842_v20, %v631_v19 }
  0x16   :  { %460 = vmatpush.bf16.msra.mxu2 %v720_v58  ;;  %v759_v25 = vld [vmem:[%s1348_s1 + $0x180] sm:$0xf]  ;;  %v874_v27 = vld [vmem:[%s1348_s1 + $0x184] sm:$0xf0]  ;;  %v625_v29 = vld [vmem:[%s1348_s1 + $0x78] sm:$0xf0]  ;;  %v696_v38 = vor.u32 %v858_v24, %v695_v23 }
  0x17   :  { %474 = vmatpush.bf16.msra.mxu3 %v784_v62  ;;  %v855_v30 = vld [vmem:[%s1348_s1 + $0xf4] sm:$0xf]  ;;  %v689_v31 = vld [vmem:[%s1348_s1 + $0xf8] sm:$0xf0]  ;;  %v837_v39 = vld [vmem:[%s1348_s1 + $0x64] sm:$0xf]  ;;  %v760_v43 = vor.u32 %v874_v27, %v759_v25  ;;  %v628_v44 = vor.u32 %v839_v28, %v625_v29 }
  0x18   :  { %433 = vmatpush.bf16.msra.mxu0 %v584_v4  ;;  %v871_v32 = vld [vmem:[%s1348_s1 + $0x174] sm:$0xf]  ;;  %v753_v34 = vld [vmem:[%s1348_s1 + $0x178] sm:$0xf0]  ;;  %v617_v40 = vld [vmem:[%s1348_s1 + $0x68] sm:$0xf0]  ;;  %v692_v49 = vor.u32 %v855_v30, %v689_v31 }
  0x19   :  { %447 = vmatpush.bf16.msra.mxu1 %v648_v5  ;;  %v887_v35 = vld [vmem:[%s1348_s1 + $0x1f4] sm:$0xf]  ;;  %v817_v36 = vld [vmem:[%s1348_s1 + $0x1f8] sm:$0xf0]  ;;  %v559_v41 = vld [vmem:[%s1349_s0 + $0x8] sm:$0xf]  ;;  %v756_v50 = vor.u32 %v871_v32, %v753_v34  ;;  %v620_v63 = vor.u32 %v837_v39, %v617_v40 }
  0x1a   :  { %461 = vmatpush.bf16.msra.mxu2 %v712_v6  ;;  %v824_v42 = vld [vmem:[%s1349_s0 + $0x14] sm:$0xf0]  ;;  %v853_v45 = vld [vmem:[%s1348_s1 + $0xe4] sm:$0xf]  ;;  %v681_v46 = vld [vmem:[%s1348_s1 + $0xe8] sm:$0xf0]  ;;  %v820_v54 = vor.u32 %v887_v35, %v817_v36 }
  0x1b   :  { %475 = vmatpush.bf16.msra.mxu3 %v776_v10  ;;  %v869_v47 = vld [vmem:[%s1348_s1 + $0x164] sm:$0xf]  ;;  %v745_v48 = vld [vmem:[%s1348_s1 + $0x168] sm:$0xf0]  ;;  %v551_v51 = vld [vmem:[%s1349_s0] sm:$0xf]  ;;  %v1158_v55 = vor.u32 %v824_v42, %v559_v41  ;;  %v684_v1 = vor.u32 %v853_v45, %v681_v46 }
  0x1c   :  { %434 = vmatpush.bf16.msra.mxu0 %v576_v17  ;;  %v823_v52 = vld [vmem:[%s1349_s0 + $0xc] sm:$0xf0]  ;;  %v822_v53 = vld [vmem:[%s1349_s0 + $0xc] sm:$0xf]  ;;  %v561_v56 = vld [vmem:[%s1349_s0 + $0x18] sm:$0xf0]  ;;  %v748_v2 = vor.u32 %v869_v47, %v745_v48 }
  0x1d   :  { %448 = vmatpush.bf16.msra.mxu1 %v640_v21  ;;  %v821_v57 = vld [vmem:[%s1349_s0 + $0x4] sm:$0xf]  ;;  %v553_v58 = vld [vmem:[%s1349_s0 + $0x10] sm:$0xf0]  ;;  %v809_v60 = vld [vmem:[%s1348_s1 + $0x1e8] sm:$0xf0]  ;;  %v1175_v61 = vor.u32 %v823_v52, %v551_v51  ;;  %v1177_v62 = vor.u32 %v822_v53, %v561_v56 }
  0x1e   :  { %462 = vmatpush.bf16.msra.mxu2 %v704_v22  ;;  %v885_v59 = vld [vmem:[%s1348_s1 + $0x1e4] sm:$0xf]  ;;  %v1179_v0 = vor.u32 %v821_v57, %v553_v58  ;;  %v835_v3 = vld [vmem:[%s1348_s1 + $0x54] sm:$0xf]  ;;  %v609_v4 = vld [vmem:[%s1348_s1 + $0x58] sm:$0xf0] }
  0x1f   :  { %476 = vmatpush.bf16.msra.mxu3 %v768_v26  ;;  %v851_v5 = vld [vmem:[%s1348_s1 + $0xd4] sm:$0xf]  ;;  %v812_v6 = vor.u32 %v885_v59, %v809_v60  ;;  %v673_v7 = vld [vmem:[%s1348_s1 + $0xd8] sm:$0xf0]  ;;  %v612_v12 = vor.u32 %v835_v3, %v609_v4  ;;  %v833_v15 = vld [vmem:[%s1348_s1 + $0x44] sm:$0xf] }
  0x20   :  { %435 = vmatpush.bf16.msra.mxu0 %v568_v33  ;;  %v867_v8 = vld [vmem:[%s1348_s1 + $0x154] sm:$0xf]  ;;  %v737_v9 = vld [vmem:[%s1348_s1 + $0x158] sm:$0xf0]  ;;  %v676_v13 = vor.u32 %v851_v5, %v673_v7  ;;  %v601_v16 = vld [vmem:[%s1348_s1 + $0x48] sm:$0xf0] }
  0x21   :  { %449 = vmatpush.bf16.msra.mxu1 %v632_v37  ;;  %v883_v10 = vld [vmem:[%s1348_s1 + $0x1d4] sm:$0xf]  ;;  %v801_v11 = vld [vmem:[%s1348_s1 + $0x1d8] sm:$0xf0]  ;;  %v740_v14 = vor.u32 %v867_v8, %v737_v9  ;;  %v849_v17 = vld [vmem:[%s1348_s1 + $0xc4] sm:$0xf]  ;;  %v604_v24 = vor.u32 %v833_v15, %v601_v16 }
  0x22   :  { %463 = vmatpush.bf16.msra.mxu2 %v696_v38  ;;  %v804_v18 = vor.u32 %v883_v10, %v801_v11  ;;  %v665_v19 = vld [vmem:[%s1348_s1 + $0xc8] sm:$0xf0]  ;;  %v865_v20 = vld [vmem:[%s1348_s1 + $0x144] sm:$0xf]  ;;  %v831_v27 = vld [vmem:[%s1348_s1 + $0x34] sm:$0xf] }
  0x23   :  { %477 = vmatpush.bf16.msra.mxu3 %v760_v43  ;;  %436 = vmatmul.bf16.vlgmr.msra.gmra.mxu0 %v1175_v61  ;;  %v729_v21 = vld [vmem:[%s1348_s1 + $0x148] sm:$0xf0]  ;;  %v881_v22 = vld [vmem:[%s1348_s1 + $0x1c4] sm:$0xf]  ;;  %v668_v25 = vor.u32 %v849_v17, %v665_v19  ;;  %v593_v28 = vld [vmem:[%s1348_s1 + $0x38] sm:$0xf0] }
  0x24   :  { %484 = vmatpush.bf16.msrb.mxu0 %v628_v44  ;;  %450 = vmatmul.bf16.vlgmr.msra.gmra.mxu1 %v1179_v0  ;;  %v793_v23 = vld [vmem:[%s1348_s1 + $0x1c8] sm:$0xf0]  ;;  %v732_v26 = vor.u32 %v865_v20, %v729_v21  ;;  %v847_v29 = vld [vmem:[%s1348_s1 + $0xb4] sm:$0xf]  ;;  %v657_v31 = vld [vmem:[%s1348_s1 + $0xb8] sm:$0xf0]  ;;  %v596_v36 = vor.u32 %v831_v27, %v593_v28 }
  0x25   :  { %498 = vmatpush.bf16.msrb.mxu1 %v692_v49  ;;  %464 = vmatmul.bf16.vlgmr.msra.gmra.mxu2 %v1158_v55  ;;  %v796_v30 = vor.u32 %v881_v22, %v793_v23  ;;  %v863_v32 = vld [vmem:[%s1348_s1 + $0x134] sm:$0xf]  ;;  %v721_v33 = vld [vmem:[%s1348_s1 + $0x138] sm:$0xf0]  ;;  %v660_v37 = vor.u32 %v847_v29, %v657_v31  ;;  %v829_v39 = vld [vmem:[%s1348_s1 + $0x24] sm:$0xf] }
  0x26   :  { %512 = vmatpush.bf16.msrb.mxu2 %v756_v50  ;;  %478 = vmatmul.bf16.vlgmr.msra.gmra.mxu3 %v1177_v62  ;;  %v879_v34 = vld [vmem:[%s1348_s1 + $0x1b4] sm:$0xf]  ;;  %v785_v35 = vld [vmem:[%s1348_s1 + $0x1b8] sm:$0xf0]  ;;  %v724_v38 = vor.u32 %v863_v32, %v721_v33  ;;  %v585_v40 = vld [vmem:[%s1348_s1 + $0x28] sm:$0xf0] }
  0x27   :  { %526 = vmatpush.bf16.msrb.mxu3 %v820_v54  ;;  %v845_v41 = vld [vmem:[%s1348_s1 + $0xa4] sm:$0xf]  ;;  %v788_v42 = vor.u32 %v879_v34, %v785_v35  ;;  %v649_v43 = vld [vmem:[%s1348_s1 + $0xa8] sm:$0xf0]  ;;  %v588_v48 = vor.u32 %v829_v39, %v585_v40  ;;  %v827_v51 = vld [vmem:[%s1348_s1 + $0x14] sm:$0xf] }
  0x28   :  { %485 = vmatpush.bf16.msrb.mxu0 %v620_v63  ;;  %v861_v44 = vld [vmem:[%s1348_s1 + $0x124] sm:$0xf]  ;;  %v713_v45 = vld [vmem:[%s1348_s1 + $0x128] sm:$0xf0]  ;;  %v652_v49 = vor.u32 %v845_v41, %v649_v43  ;;  %v577_v52 = vld [vmem:[%s1348_s1 + $0x18] sm:$0xf0] }
  0x29   :  { %499 = vmatpush.bf16.msrb.mxu1 %v684_v1  ;;  %v877_v46 = vld [vmem:[%s1348_s1 + $0x1a4] sm:$0xf]  ;;  %v777_v47 = vld [vmem:[%s1348_s1 + $0x1a8] sm:$0xf0]  ;;  %v716_v50 = vor.u32 %v861_v44, %v713_v45  ;;  %v843_v53 = vld [vmem:[%s1348_s1 + $0x94] sm:$0xf]  ;;  %v580_v63 = vor.u32 %v827_v51, %v577_v52 }
  0x2a   :  { %513 = vmatpush.bf16.msrb.mxu2 %v748_v2  ;;  %v780_v54 = vor.u32 %v877_v46, %v777_v47  ;;  %v641_v56 = vld [vmem:[%s1348_s1 + $0x98] sm:$0xf0]  ;;  %v859_v57 = vld [vmem:[%s1348_s1 + $0x114] sm:$0xf]  ;;  %v825_v3 = vld [vmem:[%s1348_s1 + $0x4] sm:$0xf] }
  0x2b   :  { %527 = vmatpush.bf16.msrb.mxu3 %v812_v6  ;;  %v705_v58 = vld [vmem:[%s1348_s1 + $0x118] sm:$0xf0]  ;;  %v875_v59 = vld [vmem:[%s1348_s1 + $0x194] sm:$0xf]  ;;  %v644_v1 = vor.u32 %v843_v53, %v641_v56  ;;  %v569_v4 = vld [vmem:[%s1348_s1 + $0x8] sm:$0xf0] }
  0x2c   :  { %486 = vmatpush.bf16.msrb.mxu0 %v612_v12  ;;  %v769_v60 = vld [vmem:[%s1348_s1 + $0x198] sm:$0xf0]  ;;  %v708_v2 = vor.u32 %v859_v57, %v705_v58  ;;  %v841_v5 = vld [vmem:[%s1348_s1 + $0x84] sm:$0xf]  ;;  %v633_v7 = vld [vmem:[%s1348_s1 + $0x88] sm:$0xf0]  ;;  %v572_v12 = vor.u32 %v825_v3, %v569_v4 }
  0x2d   :  { %500 = vmatpush.bf16.msrb.mxu1 %v676_v13  ;;  %v772_v6 = vor.u32 %v875_v59, %v769_v60  ;;  %v857_v8 = vld [vmem:[%s1348_s1 + $0x104] sm:$0xf]  ;;  %v697_v9 = vld [vmem:[%s1348_s1 + $0x108] sm:$0xf0]  ;;  %v636_v13 = vor.u32 %v841_v5, %v633_v7  ;;  %v82_v16 = vld [vmem:[%s1350_s2] sm:$0x3] }
  0x2e   :  { %514 = vmatpush.bf16.msrb.mxu2 %v740_v14  ;;  %v873_v10 = vld [vmem:[%s1348_s1 + $0x184] sm:$0xf]  ;;  %v761_v11 = vld [vmem:[%s1348_s1 + $0x188] sm:$0xf0]  ;;  %v700_v14 = vor.u32 %v857_v8, %v697_v9  ;;  %v84_v17 = vperm.slane %v82_v16, 0 }
  0x2f   :  { %528 = vmatpush.bf16.msrb.mxu3 %v804_v18  ;;  %v764_v15 = vor.u32 %v873_v10, %v761_v11 }
  0x30   :  { %487 = vmatpush.bf16.msrb.mxu0 %v604_v24 }
  0x31   :  { %501 = vmatpush.bf16.msrb.mxu1 %v668_v25 }
  0x32   :  { %515 = vmatpush.bf16.msrb.mxu2 %v732_v26 }
  0x33   :  { %529 = vmatpush.bf16.msrb.mxu3 %v796_v30  ;;  %v85_v30 = vperm.slane %v82_v16, 1 }
  0x34   :  { %488 = vmatpush.bf16.msrb.mxu0 %v596_v36 }
  0x35   :  { %502 = vmatpush.bf16.msrb.mxu1 %v660_v37 }
  0x36   :  { %516 = vmatpush.bf16.msrb.mxu2 %v724_v38 }
  0x37   :  { %530 = vmatpush.bf16.msrb.mxu3 %v788_v42 }
  0x38   :  { %489 = vmatpush.bf16.msrb.mxu0 %v588_v48 }
  0x39   :  { %503 = vmatpush.bf16.msrb.mxu1 %v652_v49 }
  0x3a   :  { %517 = vmatpush.bf16.msrb.mxu2 %v716_v50 }
  0x3b   :  { %531 = vmatpush.bf16.msrb.mxu3 %v780_v54 }
  0x3c   :  { %490 = vmatpush.bf16.msrb.mxu0 %v580_v63 }
  0x3d   :  { %504 = vmatpush.bf16.msrb.mxu1 %v644_v1 }
  0x3e   :  { %518 = vmatpush.bf16.msrb.mxu2 %v708_v2 }
  0x3f   :  { %532 = vmatpush.bf16.msrb.mxu3 %v772_v6 }
  0x40   :  { %491 = vmatpush.bf16.msrb.mxu0 %v572_v12 }
  0x41   :  { %505 = vmatpush.bf16.msrb.mxu1 %v636_v13 }
  0x42   :  { %519 = vmatpush.bf16.msrb.mxu2 %v700_v14 }
  0x43   :  { %533 = vmatpush.bf16.msrb.mxu3 %v764_v15  ;;  %492 = vmatmul.bf16.vlgmr.msrb.gmra.mxu0 %v1175_v61 }
  0x44   :  { %506 = vmatmul.bf16.vlgmr.msrb.gmra.mxu1 %v1179_v0 }
  0x45   :  { %520 = vmatmul.bf16.vlgmr.msrb.gmra.mxu2 %v1158_v55 }
  0x46   :  { %534 = vmatmul.bf16.vlgmr.msrb.gmra.mxu3 %v1177_v62 }
  0xa0   :  { %v437_v18 = vpop.f32.mrf.mxu0 }
  0xa1   :  { %v438_v19 = vadd.f32 %v437_v18, %v84_v17  ;;  %v451_v20 = vpop.f32.mrf.mxu1 }
  0xa3   :  { %v452_v21 = vadd.f32 %v451_v20, %v438_v19 }
  0xa8   :  { %v465_v22 = vpop.f32.mrf.mxu2  ;;  %v439_v61 = vpop.f32.mrf.mxu0 }
  0xa9   :  { %v466_v23 = vadd.f32 %v465_v22, %v452_v21  ;;  %v479_v24 = vpop.f32.mrf.mxu3  ;;  %v440_v26 = vadd.f32 %v439_v61, %v84_v17  ;;  %v453_v0 = vpop.f32.mrf.mxu1 }
  0xab   :  { %v480_v25 = vadd.f32 %v479_v24, %v466_v23  ;;  %v454_v55 = vadd.f32 %v453_v0, %v440_v26 }
  0xad   :  { %540 = vst [vmem:[%s1351_s3] sm:$0xff] %v480_v25 }
  0xb0   :  { %v467_v62 = vpop.f32.mrf.mxu2 }
  0xb1   :  { %v468_v27 = vadd.f32 %v467_v62, %v454_v55  ;;  %v481_v28 = vpop.f32.mrf.mxu3 }
  0xb3   :  { %v482_v29 = vadd.f32 %v481_v28, %v468_v27 }
  0xb5   :  { %543 = vst [vmem:[%s1351_s3 + $0x10] sm:$0xff] %v482_v29 }
  0xc0   :  { %v493_v31 = vpop.f32.mrf.mxu0 }
  0xc1   :  { %v494_v32 = vadd.f32 %v493_v31, %v85_v30  ;;  %v507_v33 = vpop.f32.mrf.mxu1 }
  0xc3   :  { %v508_v34 = vadd.f32 %v507_v33, %v494_v32 }
  0xc8   :  { %v521_v35 = vpop.f32.mrf.mxu2  ;;  %v495_v38 = vpop.f32.mrf.mxu0 }
  0xc9   :  { %v522_v36 = vadd.f32 %v521_v35, %v508_v34  ;;  %v535_v37 = vpop.f32.mrf.mxu3  ;;  %v496_v40 = vadd.f32 %v495_v38, %v85_v30  ;;  %v509_v41 = vpop.f32.mrf.mxu1 }
  0xcb   :  { %v536_v39 = vadd.f32 %v535_v37, %v522_v36  ;;  %v510_v42 = vadd.f32 %v509_v41, %v496_v40 }
  0xcd   :  { %542 = vst.msk [vmem:[%s1351_s3 + $0x8] sm:$0xff] %vm541_vm0, %v536_v39 }
  0xd0   :  { %v523_v43 = vpop.f32.mrf.mxu2 }
  0xd1   :  { %v524_v44 = vadd.f32 %v523_v43, %v510_v42  ;;  %v537_v45 = vpop.f32.mrf.mxu3 }
  0xd3   :  { %v538_v46 = vadd.f32 %v537_v45, %v524_v44 }
  0xd5   :  { %544 = vst.msk [vmem:[%s1351_s3 + $0x18] sm:$0xff] %vm541_vm0, %v538_v46 }

// kernel: crnn_forward.4
= control target key start
LH: loop header
LB: loop body
LE: loop exit
PB: predicated region body
PF: predicated region fallthrough
CT: control target
= control target key end

     0   :  { %s10654_s18 = smov 0   ;;  %s10656_s19 = smov 0   ;;  %s14658_s0 = inlined_call_operand.vmem [shape: bf16[16,1024], index: 0, kind: input, shape index: {}]   ;;  %s14659_s1 = inlined_call_operand.vmem [shape: bf16[1024,2048], index: 1, kind: input, shape index: {}]   ;;  %s14660_s2 = inlined_call_operand.vmem [shape: f32[1,2048], index: 2, kind: input, shape index: {}]   ;;  %s14661_s3 = inlined_call_operand.vmem [shape: bf16[2048,512], index: 3, kind: input, shape index: {}]   ;;  %s14662_s4 = inlined_call_operand.vmem [shape: f32[1,512], index: 4, kind: input, shape index: {}]   ;;  %s14663_s5 = inlined_call_operand.vmem [shape: f32[16,512], index: 5, kind: output, shape index: {}]  }
   0x1   :  { %s10658_s20 = smov 0   ;;  %s10660_s21 = smov 0  }
   0x2   :  { %s10662_s22 = smov 0  }
   0x3 LB: > { %s24_s23 = sadd.s32 1, %s10617_s21  ;;  %p43_p1 = scmp.ne.s32.totalorder %s10609_s19, %s10605_s18  ;;  %s10621_s22 = sphi %s10662_s22, %s15_s22   ;;  %s10617_s21 = sphi %s10660_s21, %s14667_s21   ;;  %s10613_s20 = sphi %s10658_s20, %s14666_s20   ;;  %s10609_s19 = sphi %s10656_s19, %s14665_s19   ;;  %s10605_s18 = sphi %s10654_s18, %s14664_s18  }
   0x4   : > { %p25_p0 = scmp.ge.s32.totalorder %s24_s23, 4  ;;  %p44_p2 = scmp.eq.s32.totalorder %s10621_s22, 0 }
   0x5   : > { %s36_s25 = sadd.s32 1, %s10609_s19  ;;  %p6673_p5 = scmp.ge.s32.totalorder %s10621_s22, 4 }
   0x6   : > { %s14669_s23 = smov (%p25_p0, %s24_s23), 0  ;;  %p45_p3 = por %p44_p2, %p43_p1 }
   0x7   : > { %s32_s24 = ssub.s32 %s10617_s21, %s14669_s23  ;;  %193 = sbr.rel (%p6673_p5) target bundleno = 18 (0x12), region = 28 }
   0x8   : > { %p34_p4 = scmp.eq.s32.totalorder %s32_s24, 0 }
   0xa   : > { %s10689_s26 = scalar_select %p34_p4, %s10609_s19, %s36_s25  }
   0xc   : > { %196 = sbr.rel (!%p45_p3) target bundleno = 18 (0x12), region = 32  ;;  %s198_s27 = sand.u32 (%p45_p3), 1, %s10609_s19  }
   0xd   : > { %s9768_s28 = sshll.u32 (%p45_p3), %s10617_s21, 3  ;;  %s6674_s29 = sshll.u32 (%p45_p3), %s198_s27, 4 }
   0xe   : > { %s206_s7 = scalar_lea.vmem (%p45_p3), %s14658_s0, %s9768_s28  ;;  %s200_s8 = scalar_lea.vmem (%p45_p3), [#allocation3], %s6674_s29 }
   0xf   : > { %v237_v0 = vld [vmem:[%s206_s7] sm:$0xff] (%p45_p3) }
  0x10   : > { %v239_v1 = vld [vmem:[%s206_s7 + $0x20] sm:$0xff] (%p45_p3)  ;;  %238 = vst [vmem:[%s200_s8] sm:$0xff] (%p45_p3), %v237_v0 }
  0x11   : > { %240 = vst [vmem:[%s200_s8 + $0x8] sm:$0xff] %v239_v1 }
  0x12 PF: > { %p6677_p6 = scmp.ge.s32.totalorder %s10621_s22, 1  ;;  %p255_p7 = scmp.lt.s32.totalorder %s10621_s22, 5 }
  0x14   : > { %p256_p8 = pnand %p6677_p6, %p255_p7 }
  0x15   : > { %s262_s9 = sand.u32 (!%p256_p8), 1, %s10605_s18   ;;  %s6679_s10 = sshll.u32 (!%p256_p8), %s10613_s20, 5 }
  0x16   : > { %259 = sbr.rel (%p256_p8) target bundleno = 1143 (0x477), region = 74  ;;  %s6678_s11 = sshll.u32 (!%p256_p8), %s262_s9, 4 }
  0x17   : > { %p299_p9 = scmp.lt.s32.totalorder (!%p256_p8), %s6679_s10, 127  ;;  %s10706_s16 = scalar_lea.vmem (!%p256_p8), [#allocation3], %s6678_s11 }
  0x18   : > { %p6682_p10 = scmp.ne.s32.totalorder (!%p256_p8), %s10613_s20, 0 }
  0x1b   : > { %s14671_s10 = smov (!%p299_p9, %s6679_s10), 127  ;;  %315 = sbr.rel (%p6682_p10) target bundleno = 65 (0x41), region = 82 }
  0x1c   : > { %s9769_s12 = sshll.u32 %s14671_s10, 6 }
  0x1d   : > { %s10704_s15 = scalar_lea.vmem %s14659_s1, %s9769_s12 }
  0x20   : > { %v10623_v2 = vmov 0.0  }
  0x21   : > { %316 = vst [vmem:[#allocation2 + $0xb0] sm:$0xff] %v10623_v2 }
  0x22   : > { %317 = vst [vmem:[#allocation2] sm:$0xff] %v10623_v2 }
  0x23   : > { %318 = vst [vmem:[#allocation2 + $0xd8] sm:$0xff] %v10623_v2 }
  0x24   : > { %319 = vst [vmem:[#allocation2 + $0x18] sm:$0xff] %v10623_v2 }
  0x25   : > { %320 = vst [vmem:[#allocation2 + $0x50] sm:$0xff] %v10623_v2 }
  0x26   : > { %321 = vst [vmem:[#allocation2 + $0x68] sm:$0xff] %v10623_v2 }
  0x27   : > { %322 = vst [vmem:[#allocation2 + $0x30] sm:$0xff] %v10623_v2 }
  0x28   : > { %323 = vst [vmem:[#allocation2 + $0x48] sm:$0xff] %v10623_v2 }
  0x29   : > { %324 = vst [vmem:[#allocation2 + $0x80] sm:$0xff] %v10623_v2 }
  0x2a   : > { %325 = vst [vmem:[#allocation2 + $0x88] sm:$0xff] %v10623_v2 }
  0x2b   : > { %326 = vst [vmem:[#allocation2 + $0xe8] sm:$0xff] %v10623_v2 }
  0x2c   : > { %327 = vst [vmem:[#allocation2 + $0xb8] sm:$0xff] %v10623_v2 }
  0x2d   : > { %328 = vst [vmem:[#allocation2 + $0x60] sm:$0xff] %v10623_v2 }
  0x2e   : > { %329 = vst [vmem:[#allocation2 + $0xf0] sm:$0xff] %v10623_v2 }
  0x2f   : > { %330 = vst [vmem:[#allocation2 + $0x8] sm:$0xff] %v10623_v2 }
  0x30   : > { %331 = vst [vmem:[#allocation2 + $0x78] sm:$0xff] %v10623_v2 }
  0x31   : > { %332 = vst [vmem:[#allocation2 + $0x38] sm:$0xff] %v10623_v2 }
  0x32   : > { %333 = vst [vmem:[#allocation2 + $0x58] sm:$0xff] %v10623_v2 }
  0x33   : > { %334 = vst [vmem:[#allocation2 + $0x40] sm:$0xff] %v10623_v2 }
  0x34   : > { %335 = vst [vmem:[#allocation2 + $0xc8] sm:$0xff] %v10623_v2 }
  0x35   : > { %336 = vst [vmem:[#allocation2 + $0xe0] sm:$0xff] %v10623_v2 }
  0x36   : > { %337 = vst [vmem:[#allocation2 + $0x90] sm:$0xff] %v10623_v2 }
  0x37   : > { %338 = vst [vmem:[#allocation2 + $0x70] sm:$0xff] %v10623_v2 }
  0x38   : > { %339 = vst [vmem:[#allocation2 + $0xc0] sm:$0xff] %v10623_v2 }
  0x39   : > { %340 = vst [vmem:[#allocation2 + $0xa8] sm:$0xff] %v10623_v2 }
  0x3a   : > { %341 = vst [vmem:[#allocation2 + $0xd0] sm:$0xff] %v10623_v2 }
  0x3b   : > { %342 = vst [vmem:[#allocation2 + $0x10] sm:$0xff] %v10623_v2 }
  0x3c   : > { %343 = vst [vmem:[#allocation2 + $0x28] sm:$0xff] %v10623_v2 }
  0x3d   : > { %344 = vst [vmem:[#allocation2 + $0xa0] sm:$0xff] %v10623_v2 }
  0x3e   : > { %345 = vst [vmem:[#allocation2 + $0xf8] sm:$0xff] %v10623_v2 }
  0x3f   : > { %346 = vst [vmem:[#allocation2 + $0x20] sm:$0xff] %v10623_v2 }
  0x40   : > { %347 = vst [vmem:[#allocation2 + $0x98] sm:$0xff] %v10623_v2 }
  0x41 PF: > { %v7141_v3 = vld [vmem:[%s10704_s15 + $0x380] sm:$0xf]  ;;  %v9884_v8 = vld [vmem:[%s10704_s15 + $0x384] sm:$0xf]  ;;  %p7715_p11 = scmp.ne.s32.totalorder %s10613_s20, 3 }
  0x42   : > { %v9892_v4 = vld [vmem:[%s10704_s15 + $0x3bc] sm:$0xf0]  ;;  %v7143_v9 = vld [vmem:[%s10704_s15 + $0x3c0] sm:$0xf0] }
  0x43   : > { %v7653_v5 = vld [vmem:[%s10704_s15 + $0x780] sm:$0xf]  ;;  %v7142_v6 = vor.u32 %v9892_v4, %v7141_v3  ;;  %v7146_v11 = vor.u32 %v9884_v8, %v7143_v9  ;;  %v10012_v12 = vld [vmem:[%s10704_s15 + $0x784] sm:$0xf] }
  0x44   : > { %v10020_v7 = vld [vmem:[%s10704_s15 + $0x7bc] sm:$0xf0]  ;;  %v7655_v13 = vld [vmem:[%s10704_s15 + $0x7c0] sm:$0xf0] }
  0x45   : > { %v7654_v10 = vor.u32 %v10020_v7, %v7653_v5  ;;  %v7077_v14 = vld [vmem:[%s10704_s15 + $0x300] sm:$0xf]  ;;  %1928 = vmatpush.bf16.msra.mxu0 %v7142_v6  ;;  %v7658_v15 = vor.u32 %v10012_v12, %v7655_v13  ;;  %1956 = vmatpush.bf16.msra.mxu2 %v7146_v11  ;;  %v9868_v21 = vld [vmem:[%s10704_s15 + $0x304] sm:$0xf] }
  0x46   : > { %v9876_v16 = vld [vmem:[%s10704_s15 + $0x33c] sm:$0xf0]  ;;  %v7079_v22 = vld [vmem:[%s10704_s15 + $0x340] sm:$0xf0] }
  0x47   : > { %v7589_v17 = vld [vmem:[%s10704_s15 + $0x700] sm:$0xf]  ;;  %1942 = vmatpush.bf16.msra.mxu1 %v7654_v10  ;;  %v7078_v19 = vor.u32 %v9876_v16, %v7077_v14  ;;  %v9996_v23 = vld [vmem:[%s10704_s15 + $0x704] sm:$0xf]  ;;  %1970 = vmatpush.bf16.msra.mxu3 %v7658_v15  ;;  %v7082_v24 = vor.u32 %v9868_v21, %v7079_v22 }
  0x48   : > { %v10004_v18 = vld [vmem:[%s10704_s15 + $0x73c] sm:$0xf0]  ;;  %v7591_v25 = vld [vmem:[%s10704_s15 + $0x740] sm:$0xf0] }
  0x49   : > { %v7590_v20 = vor.u32 %v10004_v18, %v7589_v17  ;;  %v7013_v26 = vld [vmem:[%s10704_s15 + $0x280] sm:$0xf]  ;;  %v7594_v28 = vor.u32 %v9996_v23, %v7591_v25  ;;  %v9852_v31 = vld [vmem:[%s10704_s15 + $0x284] sm:$0xf]  ;;  %1929 = vmatpush.bf16.msra.mxu0 %v7078_v19  ;;  %1957 = vmatpush.bf16.msra.mxu2 %v7082_v24 }
  0x4a   : > { %v9860_v27 = vld [vmem:[%s10704_s15 + $0x2bc] sm:$0xf0]  ;;  %v7015_v33 = vld [vmem:[%s10704_s15 + $0x2c0] sm:$0xf0] }
  0x4b   : > { %v7525_v29 = vld [vmem:[%s10704_s15 + $0x680] sm:$0xf]  ;;  %v7014_v32 = vor.u32 %v9860_v27, %v7013_v26  ;;  %v9980_v34 = vld [vmem:[%s10704_s15 + $0x684] sm:$0xf]  ;;  %1943 = vmatpush.bf16.msra.mxu1 %v7590_v20  ;;  %v7018_v37 = vor.u32 %v9852_v31, %v7015_v33  ;;  %1971 = vmatpush.bf16.msra.mxu3 %v7594_v28  ;;  %v7149_v31 = vld [vmem:[%s10704_s15 + $0x388] sm:$0xf] }
  0x4c   : > { %v9988_v30 = vld [vmem:[%s10704_s15 + $0x6bc] sm:$0xf0]  ;;  %v7527_v35 = vld [vmem:[%s10704_s15 + $0x6c0] sm:$0xf0]  ;;  %v7661_v33 = vld [vmem:[%s10704_s15 + $0x788] sm:$0xf] }
  0x4d   : > { %v7526_v36 = vor.u32 %v9988_v30, %v7525_v29  ;;  %v6949_v38 = vld [vmem:[%s10704_s15 + $0x200] sm:$0xf]  ;;  %v7530_v41 = vor.u32 %v9980_v34, %v7527_v35  ;;  %v9836_v43 = vld [vmem:[%s10704_s15 + $0x204] sm:$0xf]  ;;  %1930 = vmatpush.bf16.msra.mxu0 %v7014_v32  ;;  %1958 = vmatpush.bf16.msra.mxu2 %v7018_v37  ;;  %v9893_v32 = vld [vmem:[%s10704_s15 + $0x3c4] sm:$0xf0] }
  0x4e   : > { %v9844_v39 = vld [vmem:[%s10704_s15 + $0x23c] sm:$0xf0]  ;;  %v6951_v44 = vld [vmem:[%s10704_s15 + $0x240] sm:$0xf0]  ;;  %v10021_v35 = vld [vmem:[%s10704_s15 + $0x7c4] sm:$0xf0] }
  0x4f   : > { %v7461_v40 = vld [vmem:[%s10704_s15 + $0x600] sm:$0xf]  ;;  %v9964_v45 = vld [vmem:[%s10704_s15 + $0x604] sm:$0xf]  ;;  %v6950_v47 = vor.u32 %v9844_v39, %v6949_v38  ;;  %1944 = vmatpush.bf16.msra.mxu1 %v7526_v36  ;;  %v6954_v49 = vor.u32 %v9836_v43, %v6951_v44  ;;  %1972 = vmatpush.bf16.msra.mxu3 %v7530_v41  ;;  %v9885_v36 = vld [vmem:[%s10704_s15 + $0x38c] sm:$0xf]  ;;  %v7150_v43 = vor.u32 %v9893_v32, %v7149_v31 }
  0x50   : > { %v9972_v42 = vld [vmem:[%s10704_s15 + $0x63c] sm:$0xf0]  ;;  %v7463_v46 = vld [vmem:[%s10704_s15 + $0x640] sm:$0xf0]  ;;  %v7151_v37 = vld [vmem:[%s10704_s15 + $0x3c8] sm:$0xf0]  ;;  %v7662_v44 = vor.u32 %v10021_v35, %v7661_v33 }
  0x51   : > { %v7462_v48 = vor.u32 %v9972_v42, %v7461_v40  ;;  %v6885_v50 = vld [vmem:[%s10704_s15 + $0x180] sm:$0xf]  ;;  %v7466_v53 = vor.u32 %v9964_v45, %v7463_v46  ;;  %v9820_v55 = vld [vmem:[%s10704_s15 + $0x184] sm:$0xf]  ;;  %1931 = vmatpush.bf16.msra.mxu0 %v6950_v47  ;;  %1959 = vmatpush.bf16.msra.mxu2 %v6954_v49  ;;  %v10013_v40 = vld [vmem:[%s10704_s15 + $0x78c] sm:$0xf]  ;;  %v7154_v45 = vor.u32 %v9885_v36, %v7151_v37 }
  0x52   : > { %v9828_v51 = vld [vmem:[%s10704_s15 + $0x1bc] sm:$0xf0]  ;;  %v6887_v56 = vld [vmem:[%s10704_s15 + $0x1c0] sm:$0xf0]  ;;  %v7663_v41 = vld [vmem:[%s10704_s15 + $0x7c8] sm:$0xf0] }
  0x53   : > { %v7397_v52 = vld [vmem:[%s10704_s15 + $0x580] sm:$0xf]  ;;  %v9948_v57 = vld [vmem:[%s10704_s15 + $0x584] sm:$0xf]  ;;  %v6886_v59 = vor.u32 %v9828_v51, %v6885_v50  ;;  %1945 = vmatpush.bf16.msra.mxu1 %v7462_v48  ;;  %v6890_v61 = vor.u32 %v9820_v55, %v6887_v56  ;;  %1973 = vmatpush.bf16.msra.mxu3 %v7466_v53  ;;  %v7085_v46 = vld [vmem:[%s10704_s15 + $0x308] sm:$0xf]  ;;  %v7666_v49 = vor.u32 %v10013_v40, %v7663_v41 }
  0x54   : > { %v9956_v54 = vld [vmem:[%s10704_s15 + $0x5bc] sm:$0xf0]  ;;  %v7399_v58 = vld [vmem:[%s10704_s15 + $0x5c0] sm:$0xf0]  ;;  %v9877_v47 = vld [vmem:[%s10704_s15 + $0x344] sm:$0xf0] }
  0x55   : > { %v7398_v60 = vor.u32 %v9956_v54, %v7397_v52  ;;  %v6821_v62 = vld [vmem:[%s10704_s15 + $0x100] sm:$0xf]  ;;  %v7402_v1 = vor.u32 %v9948_v57, %v7399_v58  ;;  %v9804_v3 = vld [vmem:[%s10704_s15 + $0x104] sm:$0xf]  ;;  %1932 = vmatpush.bf16.msra.mxu0 %v6886_v59  ;;  %1960 = vmatpush.bf16.msra.mxu2 %v6890_v61  ;;  %v7597_v48 = vld [vmem:[%s10704_s15 + $0x708] sm:$0xf]  ;;  %v7086_v55 = vor.u32 %v9877_v47, %v7085_v46 }
  0x56   : > { %v9812_v63 = vld [vmem:[%s10704_s15 + $0x13c] sm:$0xf0]  ;;  %v6823_v4 = vld [vmem:[%s10704_s15 + $0x140] sm:$0xf0]  ;;  %v10005_v50 = vld [vmem:[%s10704_s15 + $0x744] sm:$0xf0] }
  0x57   : > { %v7333_v0 = vld [vmem:[%s10704_s15 + $0x500] sm:$0xf]  ;;  %v9932_v5 = vld [vmem:[%s10704_s15 + $0x504] sm:$0xf]  ;;  %v6822_v7 = vor.u32 %v9812_v63, %v6821_v62  ;;  %1946 = vmatpush.bf16.msra.mxu1 %v7398_v60  ;;  %v6826_v9 = vor.u32 %v9804_v3, %v6823_v4  ;;  %1974 = vmatpush.bf16.msra.mxu3 %v7402_v1  ;;  %v9869_v51 = vld [vmem:[%s10704_s15 + $0x30c] sm:$0xf]  ;;  %v7598_v56 = vor.u32 %v10005_v50, %v7597_v48 }
  0x58   : > { %v9940_v2 = vld [vmem:[%s10704_s15 + $0x53c] sm:$0xf0]  ;;  %v7335_v6 = vld [vmem:[%s10704_s15 + $0x540] sm:$0xf0]  ;;  %v7087_v52 = vld [vmem:[%s10704_s15 + $0x348] sm:$0xf0] }
  0x59   : > { %v7334_v8 = vor.u32 %v9940_v2, %v7333_v0  ;;  %v6757_v10 = vld [vmem:[%s10704_s15 + $0x80] sm:$0xf]  ;;  %v7338_v13 = vor.u32 %v9932_v5, %v7335_v6  ;;  %v9788_v15 = vld [vmem:[%s10704_s15 + $0x84] sm:$0xf]  ;;  %1933 = vmatpush.bf16.msra.mxu0 %v6822_v7  ;;  %1961 = vmatpush.bf16.msra.mxu2 %v6826_v9  ;;  %v9997_v53 = vld [vmem:[%s10704_s15 + $0x70c] sm:$0xf]  ;;  %v7090_v57 = vor.u32 %v9869_v51, %v7087_v52 }
  0x5a   : > { %v9796_v11 = vld [vmem:[%s10704_s15 + $0xbc] sm:$0xf0]  ;;  %v6759_v16 = vld [vmem:[%s10704_s15 + $0xc0] sm:$0xf0]  ;;  %v7599_v54 = vld [vmem:[%s10704_s15 + $0x748] sm:$0xf0] }
  0x5b   : > { %v7269_v12 = vld [vmem:[%s10704_s15 + $0x480] sm:$0xf]  ;;  %v9916_v17 = vld [vmem:[%s10704_s15 + $0x484] sm:$0xf]  ;;  %v6758_v19 = vor.u32 %v9796_v11, %v6757_v10  ;;  %1947 = vmatpush.bf16.msra.mxu1 %v7334_v8  ;;  %v6762_v23 = vor.u32 %v9788_v15, %v6759_v16  ;;  %1975 = vmatpush.bf16.msra.mxu3 %v7338_v13  ;;  %v7021_v58 = vld [vmem:[%s10704_s15 + $0x288] sm:$0xf]  ;;  %v7602_v61 = vor.u32 %v9997_v53, %v7599_v54 }
  0x5c   : > { %v9924_v14 = vld [vmem:[%s10704_s15 + $0x4bc] sm:$0xf0]  ;;  %v7271_v18 = vld [vmem:[%s10704_s15 + $0x4c0] sm:$0xf0]  ;;  %v9861_v59 = vld [vmem:[%s10704_s15 + $0x2c4] sm:$0xf0] }
  0x5d   : > { %v6693_v20 = vld [vmem:[%s10704_s15] sm:$0xf]  ;;  %v7270_v22 = vor.u32 %v9924_v14, %v7269_v12  ;;  %v9772_v26 = vld [vmem:[%s10704_s15 + $0x4] sm:$0xf]  ;;  %v7274_v27 = vor.u32 %v9916_v17, %v7271_v18  ;;  %1934 = vmatpush.bf16.msra.mxu0 %v6758_v19  ;;  %1962 = vmatpush.bf16.msra.mxu2 %v6762_v23  ;;  %v7533_v60 = vld [vmem:[%s10704_s15 + $0x688] sm:$0xf]  ;;  %v7022_v4 = vor.u32 %v9861_v59, %v7021_v58 }
  0x5e   : > { %v9780_v21 = vld [vmem:[%s10704_s15 + $0x3c] sm:$0xf0]  ;;  %v6695_v28 = vld [vmem:[%s10704_s15 + $0x40] sm:$0xf0]  ;;  %v9989_v62 = vld [vmem:[%s10704_s15 + $0x6c4] sm:$0xf0] }
  0x5f   : > { %v7205_v24 = vld [vmem:[%s10704_s15 + $0x400] sm:$0xf]  ;;  %v9900_v29 = vld [vmem:[%s10704_s15 + $0x404] sm:$0xf]  ;;  %v6694_v34 = vor.u32 %v9780_v21, %v6693_v20  ;;  %1948 = vmatpush.bf16.msra.mxu1 %v7270_v22  ;;  %v6698_v39 = vor.u32 %v9772_v26, %v6695_v28  ;;  %1976 = vmatpush.bf16.msra.mxu3 %v7274_v27  ;;  %v9853_v63 = vld [vmem:[%s10704_s15 + $0x28c] sm:$0xf]  ;;  %v7534_v8 = vor.u32 %v9989_v62, %v7533_v60 }
  0x60   : > { %v9908_v25 = vld [vmem:[%s10704_s15 + $0x43c] sm:$0xf0]  ;;  %v7207_v30 = vld [vmem:[%s10704_s15 + $0x440] sm:$0xf0]  ;;  %v7023_v0 = vld [vmem:[%s10704_s15 + $0x2c8] sm:$0xf0] }
  0x61   : > { %v7206_v38 = vor.u32 %v9908_v25, %v7205_v24  ;;  %v7210_v42 = vor.u32 %v9900_v29, %v7207_v30  ;;  %1935 = vmatpush.bf16.msra.mxu0 %v6694_v34  ;;  %1963 = vmatpush.bf16.msra.mxu2 %v6698_v39  ;;  %v9981_v1 = vld [vmem:[%s10704_s15 + $0x68c] sm:$0xf]  ;;  %v6957_v3 = vld [vmem:[%s10704_s15 + $0x208] sm:$0xf]  ;;  %v6685_v6 = vld [vmem:[%s10706_s16] sm:$0xf]  ;;  %v7026_v9 = vor.u32 %v9853_v63, %v7023_v0 }
  0x62   : > { %v7535_v2 = vld [vmem:[%s10704_s15 + $0x6c8] sm:$0xf0]  ;;  %v9845_v5 = vld [vmem:[%s10704_s15 + $0x244] sm:$0xf0]  ;;  %v9770_v12 = vld [vmem:[%s10706_s16 + $0x4] sm:$0xf] }
  0x63   : > { %1949 = vmatpush.bf16.msra.mxu1 %v7206_v38  ;;  %1977 = vmatpush.bf16.msra.mxu3 %v7210_v42  ;;  %v9771_v7 = vld [vmem:[%s10706_s16 + $0x4] sm:$0xf0]  ;;  %v6687_v13 = vld [vmem:[%s10706_s16 + $0x8] sm:$0xf0]  ;;  %v7538_v14 = vor.u32 %v9981_v1, %v7535_v2  ;;  %v6958_v21 = vor.u32 %v9845_v5, %v6957_v3  ;;  %v7157_v5 = vld [vmem:[%s10704_s15 + $0x390] sm:$0xf] }
  0x64   : > { %v7469_v10 = vld [vmem:[%s10704_s15 + $0x608] sm:$0xf]  ;;  %v10802_v11 = vor.u32 %v9771_v7, %v6685_v6  ;;  %v9837_v16 = vld [vmem:[%s10704_s15 + $0x20c] sm:$0xf]  ;;  %v10809_v18 = vor.u32 %v9770_v12, %v6687_v13  ;;  %v9894_v6 = vld [vmem:[%s10704_s15 + $0x3cc] sm:$0xf0] }
  0x65   : > { %1984 = vmatpush.bf16.msrb.mxu0 %v7150_v43  ;;  %2012 = vmatpush.bf16.msrb.mxu2 %v7154_v45  ;;  %v9973_v15 = vld [vmem:[%s10704_s15 + $0x644] sm:$0xf0]  ;;  %v6959_v17 = vld [vmem:[%s10704_s15 + $0x248] sm:$0xf0]  ;;  %v7669_v7 = vld [vmem:[%s10704_s15 + $0x790] sm:$0xf] }
  0x66   : > { %v9965_v19 = vld [vmem:[%s10704_s15 + $0x60c] sm:$0xf]  ;;  %1964 = vmatmul.bf16.vlgmr.msra.gmra.mxu2 %v10802_v11  ;;  %1936 = vmatmul.bf16.vlgmr.msra.gmra.mxu0 %v10802_v11  ;;  %v7470_v22 = vor.u32 %v9973_v15, %v7469_v10  ;;  %v6962_v23 = vor.u32 %v9837_v16, %v6959_v17  ;;  %v6893_v24 = vld [vmem:[%s10704_s15 + $0x188] sm:$0xf]  ;;  %v9886_v10 = vld [vmem:[%s10704_s15 + $0x394] sm:$0xf] }
  0x67   : > { %1998 = vmatpush.bf16.msrb.mxu1 %v7662_v44  ;;  %2026 = vmatpush.bf16.msrb.mxu3 %v7666_v49  ;;  %v7471_v20 = vld [vmem:[%s10704_s15 + $0x648] sm:$0xf0]  ;;  %v9829_v25 = vld [vmem:[%s10704_s15 + $0x1c4] sm:$0xf0]  ;;  %v7159_v12 = vld [vmem:[%s10704_s15 + $0x3d0] sm:$0xf0] }
  0x68   : > { %1978 = vmatmul.bf16.vlgmr.msra.gmra.mxu3 %v10809_v18  ;;  %v7405_v26 = vld [vmem:[%s10704_s15 + $0x588] sm:$0xf]  ;;  %v7474_v27 = vor.u32 %v9965_v19, %v7471_v20  ;;  %v9821_v29 = vld [vmem:[%s10704_s15 + $0x18c] sm:$0xf]  ;;  %1950 = vmatmul.bf16.vlgmr.msra.gmra.mxu1 %v10809_v18  ;;  %v6894_v33 = vor.u32 %v9829_v25, %v6893_v24  ;;  %v10014_v15 = vld [vmem:[%s10704_s15 + $0x794] sm:$0xf]  ;;  %v7158_v19 = vor.u32 %v9894_v6, %v7157_v5 }
  0x69   : > { %1985 = vmatpush.bf16.msrb.mxu0 %v7086_v55  ;;  %2013 = vmatpush.bf16.msrb.mxu2 %v7090_v57  ;;  %v9957_v28 = vld [vmem:[%s10704_s15 + $0x5c4] sm:$0xf0]  ;;  %v6895_v30 = vld [vmem:[%s10704_s15 + $0x1c8] sm:$0xf0]  ;;  %v7671_v16 = vld [vmem:[%s10704_s15 + $0x7d0] sm:$0xf0] }
  0x6a   : > { %v9949_v31 = vld [vmem:[%s10704_s15 + $0x58c] sm:$0xf]  ;;  %v7406_v34 = vor.u32 %v9957_v28, %v7405_v26  ;;  %v6898_v35 = vor.u32 %v9821_v29, %v6895_v30  ;;  %v6829_v36 = vld [vmem:[%s10704_s15 + $0x108] sm:$0xf]  ;;  %v7605_v24 = vld [vmem:[%s10704_s15 + $0x710] sm:$0xf]  ;;  %v7674_v25 = vor.u32 %v10014_v15, %v7671_v16 }
  0x6b   : > { %1999 = vmatpush.bf16.msrb.mxu1 %v7598_v56  ;;  %2027 = vmatpush.bf16.msrb.mxu3 %v7602_v61  ;;  %v7407_v32 = vld [vmem:[%s10704_s15 + $0x5c8] sm:$0xf0]  ;;  %v9813_v37 = vld [vmem:[%s10704_s15 + $0x144] sm:$0xf0]  ;;  %v10006_v26 = vld [vmem:[%s10704_s15 + $0x74c] sm:$0xf0] }
  0x6c   : > { %v7341_v38 = vld [vmem:[%s10704_s15 + $0x508] sm:$0xf]  ;;  %v7410_v39 = vor.u32 %v9949_v31, %v7407_v32  ;;  %v9805_v41 = vld [vmem:[%s10704_s15 + $0x10c] sm:$0xf]  ;;  %v6830_v45 = vor.u32 %v9813_v37, %v6829_v36  ;;  %v7095_v28 = vld [vmem:[%s10704_s15 + $0x350] sm:$0xf0]  ;;  %v7606_v32 = vor.u32 %v10006_v26, %v7605_v24 }
  0x6d   : > { %1986 = vmatpush.bf16.msrb.mxu0 %v7022_v4  ;;  %2014 = vmatpush.bf16.msrb.mxu2 %v7026_v9  ;;  %v9941_v40 = vld [vmem:[%s10704_s15 + $0x544] sm:$0xf0]  ;;  %v6831_v42 = vld [vmem:[%s10704_s15 + $0x148] sm:$0xf0]  ;;  %v10022_v9 = vld [vmem:[%s10704_s15 + $0x7cc] sm:$0xf0] }
  0x6e   : > { %v9933_v43 = vld [vmem:[%s10704_s15 + $0x50c] sm:$0xf]  ;;  %v7342_v46 = vor.u32 %v9941_v40, %v7341_v38  ;;  %v6834_v47 = vor.u32 %v9805_v41, %v6831_v42  ;;  %v6765_v48 = vld [vmem:[%s10704_s15 + $0x88] sm:$0xf]  ;;  %v7670_v20 = vor.u32 %v10022_v9, %v7669_v7  ;;  %v9998_v29 = vld [vmem:[%s10704_s15 + $0x714] sm:$0xf] }
  0x6f   : > { %2000 = vmatpush.bf16.msrb.mxu1 %v7534_v8  ;;  %2028 = vmatpush.bf16.msrb.mxu3 %v7538_v14  ;;  %v7343_v44 = vld [vmem:[%s10704_s15 + $0x548] sm:$0xf0]  ;;  %v9797_v49 = vld [vmem:[%s10704_s15 + $0xc4] sm:$0xf0]  ;;  %v7607_v30 = vld [vmem:[%s10704_s15 + $0x750] sm:$0xf0] }
  0x70   : > { %v7277_v50 = vld [vmem:[%s10704_s15 + $0x488] sm:$0xf]  ;;  %v7346_v51 = vor.u32 %v9933_v43, %v7343_v44  ;;  %v9789_v53 = vld [vmem:[%s10704_s15 + $0x8c] sm:$0xf]  ;;  %v6766_v57 = vor.u32 %v9797_v49, %v6765_v48  ;;  %v7541_v36 = vld [vmem:[%s10704_s15 + $0x690] sm:$0xf]  ;;  %v7610_v37 = vor.u32 %v9998_v29, %v7607_v30 }
  0x71   : > { %1987 = vmatpush.bf16.msrb.mxu0 %v6958_v21  ;;  %2015 = vmatpush.bf16.msrb.mxu2 %v6962_v23  ;;  %v9925_v52 = vld [vmem:[%s10704_s15 + $0x4c4] sm:$0xf0]  ;;  %v6767_v54 = vld [vmem:[%s10704_s15 + $0xc8] sm:$0xf0]  ;;  %v7162_v21 = vor.u32 %v9886_v10, %v7159_v12  ;;  %v9878_v23 = vld [vmem:[%s10704_s15 + $0x34c] sm:$0xf0] }
  0x72   : > { %v9917_v55 = vld [vmem:[%s10704_s15 + $0x48c] sm:$0xf]  ;;  %v6701_v58 = vld [vmem:[%s10704_s15 + $0x8] sm:$0xf]  ;;  %v7278_v60 = vor.u32 %v9925_v52, %v7277_v50  ;;  %v6770_v61 = vor.u32 %v9789_v53, %v6767_v54  ;;  %v9990_v38 = vld [vmem:[%s10704_s15 + $0x6cc] sm:$0xf0] }
  0x73   : > { %2001 = vmatpush.bf16.msrb.mxu1 %v7470_v22  ;;  %2029 = vmatpush.bf16.msrb.mxu3 %v7474_v27  ;;  %v7279_v56 = vld [vmem:[%s10704_s15 + $0x4c8] sm:$0xf0]  ;;  %v9781_v59 = vld [vmem:[%s10704_s15 + $0x44] sm:$0xf0]  ;;  %v7093_v22 = vld [vmem:[%s10704_s15 + $0x310] sm:$0xf]  ;;  %v7542_v44 = vor.u32 %v9990_v38, %v7541_v36 }
  0x74   : > { %v7213_v62 = vld [vmem:[%s10704_s15 + $0x408] sm:$0xf]  ;;  %v9773_v0 = vld [vmem:[%s10704_s15 + $0xc] sm:$0xf]  ;;  %v7282_v1 = vor.u32 %v9917_v55, %v7279_v56  ;;  %v6702_v8 = vor.u32 %v9781_v59, %v6701_v58  ;;  %v9870_v27 = vld [vmem:[%s10704_s15 + $0x314] sm:$0xf]  ;;  %v7094_v31 = vor.u32 %v9878_v23, %v7093_v22 }
  0x75   : > { %1988 = vmatpush.bf16.msrb.mxu0 %v6894_v33  ;;  %2016 = vmatpush.bf16.msrb.mxu2 %v6898_v35  ;;  %v9909_v63 = vld [vmem:[%s10704_s15 + $0x444] sm:$0xf0]  ;;  %v6703_v2 = vld [vmem:[%s10704_s15 + $0x48] sm:$0xf0]  ;;  %v7098_v33 = vor.u32 %v9870_v27, %v7095_v28  ;;  %v9862_v35 = vld [vmem:[%s10704_s15 + $0x2cc] sm:$0xf0] }
  0x76   : > { %v9901_v3 = vld [vmem:[%s10704_s15 + $0x40c] sm:$0xf]  ;;  %v7214_v13 = vor.u32 %v9909_v63, %v7213_v62  ;;  %v6706_v14 = vor.u32 %v9773_v0, %v6703_v2  ;;  %v7031_v40 = vld [vmem:[%s10704_s15 + $0x2d0] sm:$0xf0]  ;;  %v7477_v48 = vld [vmem:[%s10704_s15 + $0x610] sm:$0xf] }
  0x77   : > { %2002 = vmatpush.bf16.msrb.mxu1 %v7406_v34  ;;  %2030 = vmatpush.bf16.msrb.mxu3 %v7410_v39  ;;  %v7215_v4 = vld [vmem:[%s10704_s15 + $0x448] sm:$0xf0]  ;;  %v7029_v34 = vld [vmem:[%s10704_s15 + $0x290] sm:$0xf]  ;;  %v9854_v39 = vld [vmem:[%s10704_s15 + $0x294] sm:$0xf] }
  0x78   : > { %v7218_v17 = vor.u32 %v9901_v3, %v7215_v4  ;;  %v9982_v41 = vld [vmem:[%s10704_s15 + $0x694] sm:$0xf]  ;;  %v7030_v43 = vor.u32 %v9862_v35, %v7029_v34  ;;  %v9974_v50 = vld [vmem:[%s10704_s15 + $0x64c] sm:$0xf0] }
  0x79   : > { %1989 = vmatpush.bf16.msrb.mxu0 %v6830_v45  ;;  %2017 = vmatpush.bf16.msrb.mxu2 %v6834_v47  ;;  %v7543_v42 = vld [vmem:[%s10704_s15 + $0x6d0] sm:$0xf0]  ;;  %v7034_v45 = vor.u32 %v9854_v39, %v7031_v40  ;;  %v9846_v47 = vld [vmem:[%s10704_s15 + $0x24c] sm:$0xf0]  ;;  %v7478_v56 = vor.u32 %v9974_v50, %v7477_v48  ;;  %v10015_v50 = vld [vmem:[%s10704_s15 + $0x79c] sm:$0xf] }
  0x7a   : > { %v7546_v49 = vor.u32 %v9982_v41, %v7543_v42  ;;  %v6967_v52 = vld [vmem:[%s10704_s15 + $0x250] sm:$0xf0]  ;;  %v6901_v58 = vld [vmem:[%s10704_s15 + $0x190] sm:$0xf]  ;;  %v7165_v41 = vld [vmem:[%s10704_s15 + $0x398] sm:$0xf] }
  0x7b   : > { %2003 = vmatpush.bf16.msrb.mxu1 %v7342_v46  ;;  %2031 = vmatpush.bf16.msrb.mxu3 %v7346_v51  ;;  %v6965_v46 = vld [vmem:[%s10704_s15 + $0x210] sm:$0xf]  ;;  %v9838_v51 = vld [vmem:[%s10704_s15 + $0x214] sm:$0xf]  ;;  %v9895_v42 = vld [vmem:[%s10704_s15 + $0x3d4] sm:$0xf0] }
  0x7c   : > { %v9966_v53 = vld [vmem:[%s10704_s15 + $0x614] sm:$0xf]  ;;  %v6966_v55 = vor.u32 %v9846_v47, %v6965_v46  ;;  %v9830_v59 = vld [vmem:[%s10704_s15 + $0x1cc] sm:$0xf0]  ;;  %v9887_v46 = vld [vmem:[%s10704_s15 + $0x39c] sm:$0xf] }
  0x7d   : > { %1990 = vmatpush.bf16.msrb.mxu0 %v6766_v57  ;;  %2018 = vmatpush.bf16.msrb.mxu2 %v6770_v61  ;;  %v7479_v54 = vld [vmem:[%s10704_s15 + $0x650] sm:$0xf0]  ;;  %v6970_v57 = vor.u32 %v9838_v51, %v6967_v52  ;;  %v9958_v62 = vld [vmem:[%s10704_s15 + $0x5cc] sm:$0xf0]  ;;  %v6902_v3 = vor.u32 %v9830_v59, %v6901_v58  ;;  %v7167_v47 = vld [vmem:[%s10704_s15 + $0x3d8] sm:$0xf0] }
  0x7e   : > { %v7482_v61 = vor.u32 %v9966_v53, %v7479_v54  ;;  %v9822_v63 = vld [vmem:[%s10704_s15 + $0x194] sm:$0xf]  ;;  %v6837_v6 = vld [vmem:[%s10704_s15 + $0x110] sm:$0xf]  ;;  %v7679_v51 = vld [vmem:[%s10704_s15 + $0x7d8] sm:$0xf0]  ;;  %v7166_v53 = vor.u32 %v9895_v42, %v7165_v41 }
  0x7f   : > { %2004 = vmatpush.bf16.msrb.mxu1 %v7278_v60  ;;  %2032 = vmatpush.bf16.msrb.mxu3 %v7282_v1  ;;  %v7413_v60 = vld [vmem:[%s10704_s15 + $0x590] sm:$0xf]  ;;  %v6903_v0 = vld [vmem:[%s10704_s15 + $0x1d0] sm:$0xf0]  ;;  %v7613_v58 = vld [vmem:[%s10704_s15 + $0x718] sm:$0xf]  ;;  %v7682_v59 = vor.u32 %v10015_v50, %v7679_v51 }
  0x80   : > { %v9950_v1 = vld [vmem:[%s10704_s15 + $0x594] sm:$0xf]  ;;  %v7414_v4 = vor.u32 %v9958_v62, %v7413_v60  ;;  %v6906_v5 = vor.u32 %v9822_v63, %v6903_v0  ;;  %v9814_v7 = vld [vmem:[%s10704_s15 + $0x14c] sm:$0xf0]  ;;  %v10007_v60 = vld [vmem:[%s10704_s15 + $0x754] sm:$0xf0] }
  0x81   : > { %1991 = vmatpush.bf16.msrb.mxu0 %v6702_v8  ;;  %2019 = vmatpush.bf16.msrb.mxu2 %v6706_v14  ;;  %v7415_v2 = vld [vmem:[%s10704_s15 + $0x5d0] sm:$0xf0]  ;;  %v7349_v8 = vld [vmem:[%s10704_s15 + $0x510] sm:$0xf]  ;;  %v6838_v16 = vor.u32 %v9814_v7, %v6837_v6  ;;  %v7103_v62 = vld [vmem:[%s10704_s15 + $0x358] sm:$0xf0] }
  0x82   : > { %v7418_v9 = vor.u32 %v9950_v1, %v7415_v2  ;;  %v9942_v10 = vld [vmem:[%s10704_s15 + $0x54c] sm:$0xf0]  ;;  %v9806_v12 = vld [vmem:[%s10704_s15 + $0x114] sm:$0xf]  ;;  %v9999_v63 = vld [vmem:[%s10704_s15 + $0x71c] sm:$0xf]  ;;  %v7614_v2 = vor.u32 %v10007_v60, %v7613_v58 }
  0x83   : > { %2005 = vmatpush.bf16.msrb.mxu1 %v7214_v13  ;;  %2033 = vmatpush.bf16.msrb.mxu3 %v7218_v17  ;;  %v6839_v13 = vld [vmem:[%s10704_s15 + $0x150] sm:$0xf0]  ;;  %v7350_v17 = vor.u32 %v9942_v10, %v7349_v8  ;;  %v7285_v22 = vld [vmem:[%s10704_s15 + $0x490] sm:$0xf]  ;;  %v7615_v0 = vld [vmem:[%s10704_s15 + $0x758] sm:$0xf0] }
  0x84   : > { %2020 = vmatmul.bf16.vlgmr.msrb.gmra.mxu2 %v10802_v11  ;;  %1992 = vmatmul.bf16.vlgmr.msrb.gmra.mxu0 %v10802_v11  ;;  %v9934_v14 = vld [vmem:[%s10704_s15 + $0x514] sm:$0xf]  ;;  %v9926_v24 = vld [vmem:[%s10704_s15 + $0x4cc] sm:$0xf0]  ;;  %v7549_v6 = vld [vmem:[%s10704_s15 + $0x698] sm:$0xf]  ;;  %v7618_v7 = vor.u32 %v9999_v63, %v7615_v0 }
  0x85   : > { %2040 = vmatpush.bf16.msra.mxu0 %v7158_v19  ;;  %2068 = vmatpush.bf16.msra.mxu2 %v7162_v21  ;;  %v7351_v15 = vld [vmem:[%s10704_s15 + $0x550] sm:$0xf0]  ;;  %v6842_v19 = vor.u32 %v9806_v12, %v6839_v13  ;;  %v9798_v21 = vld [vmem:[%s10704_s15 + $0xcc] sm:$0xf0]  ;;  %v9991_v8 = vld [vmem:[%s10704_s15 + $0x6d4] sm:$0xf0] }
  0x86   : > { %2034 = vmatmul.bf16.vlgmr.msrb.gmra.mxu3 %v10809_v18  ;;  %2006 = vmatmul.bf16.vlgmr.msrb.gmra.mxu1 %v10809_v18  ;;  %v7354_v23 = vor.u32 %v9934_v14, %v7351_v15  ;;  %v6775_v26 = vld [vmem:[%s10704_s15 + $0xd0] sm:$0xf0]  ;;  %v6709_v30 = vld [vmem:[%s10704_s15 + $0x10] sm:$0xf]  ;;  %v7039_v10 = vld [vmem:[%s10704_s15 + $0x2d8] sm:$0xf0]  ;;  %v7550_v15 = vor.u32 %v9991_v8, %v7549_v6 }
  0x87   : > { %2054 = vmatpush.bf16.msra.mxu1 %v7670_v20  ;;  %2082 = vmatpush.bf16.msra.mxu3 %v7674_v25  ;;  %v6773_v20 = vld [vmem:[%s10704_s15 + $0x90] sm:$0xf]  ;;  %v9790_v25 = vld [vmem:[%s10704_s15 + $0x94] sm:$0xf]  ;;  %v9983_v12 = vld [vmem:[%s10704_s15 + $0x69c] sm:$0xf] }
  0x88   : > { %v9918_v27 = vld [vmem:[%s10704_s15 + $0x494] sm:$0xf]  ;;  %v6774_v29 = vor.u32 %v9798_v21, %v6773_v20  ;;  %v7221_v34 = vld [vmem:[%s10704_s15 + $0x410] sm:$0xf]  ;;  %v7551_v13 = vld [vmem:[%s10704_s15 + $0x6d8] sm:$0xf0] }
  0x89   : > { %2041 = vmatpush.bf16.msra.mxu0 %v7094_v31  ;;  %2069 = vmatpush.bf16.msra.mxu2 %v7098_v33  ;;  %v7287_v28 = vld [vmem:[%s10704_s15 + $0x4d0] sm:$0xf0]  ;;  %v9782_v31 = vld [vmem:[%s10704_s15 + $0x4c] sm:$0xf0]  ;;  %v6778_v33 = vor.u32 %v9790_v25, %v6775_v26  ;;  %v7485_v20 = vld [vmem:[%s10704_s15 + $0x618] sm:$0xf]  ;;  %v7554_v21 = vor.u32 %v9983_v12, %v7551_v13 }
  0x8a   : > { %v9910_v35 = vld [vmem:[%s10704_s15 + $0x44c] sm:$0xf0]  ;;  %v9774_v36 = vld [vmem:[%s10704_s15 + $0x14] sm:$0xf]  ;;  %v9967_v25 = vld [vmem:[%s10704_s15 + $0x61c] sm:$0xf] }
  0x8b   : > { %2055 = vmatpush.bf16.msra.mxu1 %v7606_v32  ;;  %2083 = vmatpush.bf16.msra.mxu3 %v7610_v37  ;;  %v7286_v32 = vor.u32 %v9926_v24, %v7285_v22  ;;  %v7290_v37 = vor.u32 %v9918_v27, %v7287_v28  ;;  %v6711_v38 = vld [vmem:[%s10704_s15 + $0x50] sm:$0xf0]  ;;  %v7222_v48 = vor.u32 %v9910_v35, %v7221_v34  ;;  %v9975_v22 = vld [vmem:[%s10704_s15 + $0x654] sm:$0xf0]  ;;  %v6975_v24 = vld [vmem:[%s10704_s15 + $0x258] sm:$0xf0] }
  0x8c   : > { %v9902_v39 = vld [vmem:[%s10704_s15 + $0x414] sm:$0xf]  ;;  %v7487_v26 = vld [vmem:[%s10704_s15 + $0x658] sm:$0xf0]  ;;  %v7486_v28 = vor.u32 %v9975_v22, %v7485_v20  ;;  %v9959_v34 = vld [vmem:[%s10704_s15 + $0x5d4] sm:$0xf0] }
  0x8d   : > { %2042 = vmatpush.bf16.msra.mxu0 %v7030_v43  ;;  %2070 = vmatpush.bf16.msra.mxu2 %v7034_v45  ;;  %v7223_v40 = vld [vmem:[%s10704_s15 + $0x450] sm:$0xf0]  ;;  %v7677_v43 = vld [vmem:[%s10704_s15 + $0x798] sm:$0xf]  ;;  %v9823_v35 = vld [vmem:[%s10704_s15 + $0x19c] sm:$0xf] }
  0x8e   : > { %v10023_v45 = vld [vmem:[%s10704_s15 + $0x7d4] sm:$0xf0]  ;;  %v7226_v52 = vor.u32 %v9902_v39, %v7223_v40  ;;  %v7359_v50 = vld [vmem:[%s10704_s15 + $0x558] sm:$0xf0]  ;;  %v7173_v12 = vld [vmem:[%s10704_s15 + $0x3a0] sm:$0xf] }
  0x8f   : > { %2056 = vmatpush.bf16.msra.mxu1 %v7542_v44  ;;  %2084 = vmatpush.bf16.msra.mxu3 %v7546_v49  ;;  %v6710_v44 = vor.u32 %v9782_v31, %v6709_v30  ;;  %v6714_v49 = vor.u32 %v9774_v36, %v6711_v38  ;;  %v7678_v54 = vor.u32 %v10023_v45, %v7677_v43  ;;  %v6909_v30 = vld [vmem:[%s10704_s15 + $0x198] sm:$0xf]  ;;  %v6911_v36 = vld [vmem:[%s10704_s15 + $0x1d8] sm:$0xf0]  ;;  %v9896_v13 = vld [vmem:[%s10704_s15 + $0x3dc] sm:$0xf0] }
  0x90   : > { %v9831_v31 = vld [vmem:[%s10704_s15 + $0x1d4] sm:$0xf0]  ;;  %v7423_v38 = vld [vmem:[%s10704_s15 + $0x5d8] sm:$0xf0]  ;;  %v6914_v41 = vor.u32 %v9823_v35, %v6911_v36  ;;  %v10016_v22 = vld [vmem:[%s10704_s15 + $0x7a4] sm:$0xf] }
  0x91   : > { %2043 = vmatpush.bf16.msra.mxu0 %v6966_v55  ;;  %2071 = vmatpush.bf16.msra.mxu2 %v6970_v57  ;;  %v7170_v55 = vor.u32 %v9887_v46, %v7167_v47  ;;  %v9879_v57 = vld [vmem:[%s10704_s15 + $0x354] sm:$0xf0]  ;;  %v6910_v39 = vor.u32 %v9831_v31, %v6909_v30  ;;  %v9807_v47 = vld [vmem:[%s10704_s15 + $0x11c] sm:$0xf]  ;;  %v7621_v30 = vld [vmem:[%s10704_s15 + $0x720] sm:$0xf] }
  0x92   : > { %v6845_v42 = vld [vmem:[%s10704_s15 + $0x118] sm:$0xf]  ;;  %v6783_v60 = vld [vmem:[%s10704_s15 + $0xd8] sm:$0xf0]  ;;  %v10000_v35 = vld [vmem:[%s10704_s15 + $0x724] sm:$0xf] }
  0x93   : > { %2057 = vmatpush.bf16.msra.mxu1 %v7478_v56  ;;  %2085 = vmatpush.bf16.msra.mxu3 %v7482_v61  ;;  %v7101_v56 = vld [vmem:[%s10704_s15 + $0x318] sm:$0xf]  ;;  %v9871_v61 = vld [vmem:[%s10704_s15 + $0x31c] sm:$0xf]  ;;  %v7623_v36 = vld [vmem:[%s10704_s15 + $0x760] sm:$0xf0] }
  0x94   : > { %v7102_v1 = vor.u32 %v9879_v57, %v7101_v56  ;;  %v9815_v43 = vld [vmem:[%s10704_s15 + $0x154] sm:$0xf0]  ;;  %v9775_v6 = vld [vmem:[%s10704_s15 + $0x1c] sm:$0xf] }
  0x95   : > { %2044 = vmatpush.bf16.msra.mxu0 %v6902_v3  ;;  %2072 = vmatpush.bf16.msra.mxu2 %v6906_v5  ;;  %v7106_v3 = vor.u32 %v9871_v61, %v7103_v62  ;;  %v9863_v5 = vld [vmem:[%s10704_s15 + $0x2d4] sm:$0xf0]  ;;  %v6846_v51 = vor.u32 %v9815_v43, %v6845_v42  ;;  %v9919_v61 = vld [vmem:[%s10704_s15 + $0x49c] sm:$0xf]  ;;  %v7557_v42 = vld [vmem:[%s10704_s15 + $0x6a0] sm:$0xf]  ;;  %v7626_v43 = vor.u32 %v10000_v35, %v7623_v36 }
  0x96   : > { %v9943_v46 = vld [vmem:[%s10704_s15 + $0x554] sm:$0xf0]  ;;  %v7295_v62 = vld [vmem:[%s10704_s15 + $0x4d8] sm:$0xf0]  ;;  %v6725_v36 = vld [vmem:[%s10704_s15 + $0x20] sm:$0xf] }
  0x97   : > { %2058 = vmatpush.bf16.msra.mxu1 %v7414_v4  ;;  %2086 = vmatpush.bf16.msra.mxu3 %v7418_v9  ;;  %v7037_v4 = vld [vmem:[%s10704_s15 + $0x298] sm:$0xf]  ;;  %v9855_v9 = vld [vmem:[%s10704_s15 + $0x29c] sm:$0xf] }
  0x98   : > { %v7038_v14 = vor.u32 %v9863_v5, %v7037_v4  ;;  %v7293_v56 = vld [vmem:[%s10704_s15 + $0x498] sm:$0xf]  ;;  %v6719_v8 = vld [vmem:[%s10704_s15 + $0x58] sm:$0xf0] }
  0x99   : > { %2045 = vmatpush.bf16.msra.mxu0 %v6838_v16  ;;  %2073 = vmatpush.bf16.msra.mxu2 %v6842_v19  ;;  %v7042_v16 = vor.u32 %v9855_v9, %v7039_v10  ;;  %v9847_v19 = vld [vmem:[%s10704_s15 + $0x254] sm:$0xf0]  ;;  %v9903_v9 = vld [vmem:[%s10704_s15 + $0x41c] sm:$0xf] }
  0x9a   : > { %v9927_v58 = vld [vmem:[%s10704_s15 + $0x4d4] sm:$0xf0]  ;;  %v7231_v10 = vld [vmem:[%s10704_s15 + $0x458] sm:$0xf0] }
  0x9b   : > { %2059 = vmatpush.bf16.msra.mxu1 %v7350_v17  ;;  %2087 = vmatpush.bf16.msra.mxu3 %v7354_v23  ;;  %v6973_v17 = vld [vmem:[%s10704_s15 + $0x218] sm:$0xf]  ;;  %v9839_v23 = vld [vmem:[%s10704_s15 + $0x21c] sm:$0xf] }
  0x9c   : > { %v6974_v27 = vor.u32 %v9847_v19, %v6973_v17  ;;  %v6717_v0 = vld [vmem:[%s10704_s15 + $0x18] sm:$0xf]  ;;  %v9888_v17 = vld [vmem:[%s10704_s15 + $0x3a4] sm:$0xf] }
  0x9d   : > { %2046 = vmatpush.bf16.msra.mxu0 %v6774_v29  ;;  %2074 = vmatpush.bf16.msra.mxu2 %v6778_v33  ;;  %v6978_v29 = vor.u32 %v9839_v23, %v6975_v24  ;;  %v7490_v33 = vor.u32 %v9967_v25, %v7487_v26  ;;  %v7229_v4 = vld [vmem:[%s10704_s15 + $0x418] sm:$0xf]  ;;  %v7175_v19 = vld [vmem:[%s10704_s15 + $0x3e0] sm:$0xf0]  ;;  %v7234_v24 = vor.u32 %v9903_v9, %v7231_v10 }
  0x9e   : > { %v9911_v5 = vld [vmem:[%s10704_s15 + $0x454] sm:$0xf0]  ;;  %v7687_v23 = vld [vmem:[%s10704_s15 + $0x7e0] sm:$0xf0]  ;;  %v7174_v25 = vor.u32 %v9896_v13, %v7173_v12  ;;  %v6853_v13 = vld [vmem:[%s10704_s15 + $0x120] sm:$0xf] }
  0x9f   : > { %2060 = vmatpush.bf16.msra.mxu1 %v7286_v32  ;;  %2088 = vmatpush.bf16.msra.mxu3 %v7290_v37  ;;  %v7421_v32 = vld [vmem:[%s10704_s15 + $0x598] sm:$0xf]  ;;  %v9951_v37 = vld [vmem:[%s10704_s15 + $0x59c] sm:$0xf]  ;;  %v7230_v20 = vor.u32 %v9911_v5, %v7229_v4  ;;  %v7690_v31 = vor.u32 %v10016_v22, %v7687_v23  ;;  %v9960_v4 = vld [vmem:[%s10704_s15 + $0x5dc] sm:$0xf0] }
  0xa0   : > { %v7422_v40 = vor.u32 %v9959_v34, %v7421_v32  ;;  %v7426_v45 = vor.u32 %v9951_v37, %v7423_v38  ;;  %v10008_v32 = vld [vmem:[%s10704_s15 + $0x75c] sm:$0xf0]  ;;  %v7111_v34 = vld [vmem:[%s10704_s15 + $0x360] sm:$0xf0] }
  0xa1   : > { %2047 = vmatpush.bf16.msra.mxu0 %v6710_v44  ;;  %2075 = vmatpush.bf16.msra.mxu2 %v6714_v49  ;;  %v7357_v44 = vld [vmem:[%s10704_s15 + $0x518] sm:$0xf]  ;;  %v9935_v49 = vld [vmem:[%s10704_s15 + $0x51c] sm:$0xf]  ;;  %v7622_v38 = vor.u32 %v10008_v32, %v7621_v30  ;;  %v9824_v5 = vld [vmem:[%s10704_s15 + $0x1a4] sm:$0xf] }
  0xa2   : > { %v7362_v57 = vor.u32 %v9935_v49, %v7359_v50  ;;  %v7367_v22 = vld [vmem:[%s10704_s15 + $0x560] sm:$0xf0]  ;;  %v9928_v30 = vld [vmem:[%s10704_s15 + $0x4dc] sm:$0xf0] }
  0xa3   : > { %2061 = vmatpush.bf16.msra.mxu1 %v7222_v48  ;;  %2089 = vmatpush.bf16.msra.mxu3 %v7226_v52  ;;  %v6847_v48 = vld [vmem:[%s10704_s15 + $0x158] sm:$0xf0]  ;;  %v7358_v52 = vor.u32 %v9943_v46, %v7357_v44  ;;  %v9992_v44 = vld [vmem:[%s10704_s15 + $0x6dc] sm:$0xf0]  ;;  %v7047_v46 = vld [vmem:[%s10704_s15 + $0x2e0] sm:$0xf0] }
  0xa4   : > { %2076 = vmatmul.bf16.vlgmr.msra.gmra.mxu2 %v10802_v11  ;;  %2048 = vmatmul.bf16.vlgmr.msra.gmra.mxu0 %v10802_v11  ;;  %v7558_v50 = vor.u32 %v9992_v44, %v7557_v42  ;;  %v6791_v32 = vld [vmem:[%s10704_s15 + $0xe0] sm:$0xf0] }
  0xa5   : > { %2096 = vmatpush.bf16.msrb.mxu0 %v7166_v53  ;;  %2124 = vmatpush.bf16.msrb.mxu2 %v7170_v55  ;;  %v6850_v53 = vor.u32 %v9807_v47, %v6847_v48  ;;  %v9799_v55 = vld [vmem:[%s10704_s15 + $0xd4] sm:$0xf0]  ;;  %v9984_v47 = vld [vmem:[%s10704_s15 + $0x6a4] sm:$0xf] }
  0xa6   : > { %2090 = vmatmul.bf16.vlgmr.msra.gmra.mxu3 %v10809_v18  ;;  %2062 = vmatmul.bf16.vlgmr.msra.gmra.mxu1 %v10809_v18  ;;  %v7559_v48 = vld [vmem:[%s10704_s15 + $0x6e0] sm:$0xf0] }
  0xa7   : > { %2110 = vmatpush.bf16.msrb.mxu1 %v7678_v54  ;;  %2138 = vmatpush.bf16.msrb.mxu3 %v7682_v59  ;;  %v6781_v54 = vld [vmem:[%s10704_s15 + $0x98] sm:$0xf]  ;;  %v9791_v59 = vld [vmem:[%s10704_s15 + $0x9c] sm:$0xf]  ;;  %v9776_v42 = vld [vmem:[%s10704_s15 + $0x24] sm:$0xf] }
  0xa8   : > { %v6782_v63 = vor.u32 %v9799_v55, %v6781_v54  ;;  %v7493_v54 = vld [vmem:[%s10704_s15 + $0x620] sm:$0xf]  ;;  %v7562_v55 = vor.u32 %v9984_v47, %v7559_v48  ;;  %v6727_v44 = vld [vmem:[%s10704_s15 + $0x60] sm:$0xf0]  ;;  %v7181_v47 = vld [vmem:[%s10704_s15 + $0x3a8] sm:$0xf] }
  0xa9   : > { %2097 = vmatpush.bf16.msrb.mxu0 %v7102_v1  ;;  %2125 = vmatpush.bf16.msrb.mxu2 %v7106_v3  ;;  %v9783_v1 = vld [vmem:[%s10704_s15 + $0x54] sm:$0xf0]  ;;  %v6786_v3 = vor.u32 %v9791_v59, %v6783_v60  ;;  %v9968_v59 = vld [vmem:[%s10704_s15 + $0x624] sm:$0xf]  ;;  %v9897_v48 = vld [vmem:[%s10704_s15 + $0x3e4] sm:$0xf0] }
  0xaa   : > { %v7495_v60 = vld [vmem:[%s10704_s15 + $0x660] sm:$0xf0] }
  0xab   : > { %2111 = vmatpush.bf16.msrb.mxu1 %v7614_v2  ;;  %2139 = vmatpush.bf16.msrb.mxu3 %v7618_v7  ;;  %v7294_v2 = vor.u32 %v9927_v58, %v7293_v56  ;;  %v7298_v7 = vor.u32 %v9919_v61, %v7295_v62  ;;  %v9976_v56 = vld [vmem:[%s10704_s15 + $0x65c] sm:$0xf0]  ;;  %v6983_v58 = vld [vmem:[%s10704_s15 + $0x260] sm:$0xf0] }
  0xac   : > { %v7494_v62 = vor.u32 %v9976_v56, %v7493_v54  ;;  %v10017_v56 = vld [vmem:[%s10704_s15 + $0x7ac] sm:$0xf] }
  0xad   : > { %2098 = vmatpush.bf16.msrb.mxu0 %v7038_v14  ;;  %2126 = vmatpush.bf16.msrb.mxu2 %v7042_v16  ;;  %v7685_v14 = vld [vmem:[%s10704_s15 + $0x7a0] sm:$0xf] }
  0xae   : > { %v10024_v16 = vld [vmem:[%s10704_s15 + $0x7dc] sm:$0xf0] }
  0xaf   : > { %2112 = vmatpush.bf16.msrb.mxu1 %v7550_v15  ;;  %2140 = vmatpush.bf16.msrb.mxu3 %v7554_v21  ;;  %v6718_v15 = vor.u32 %v9783_v1, %v6717_v0  ;;  %v6722_v21 = vor.u32 %v9775_v6, %v6719_v8  ;;  %v7686_v26 = vor.u32 %v10024_v16, %v7685_v14  ;;  %v6917_v0 = vld [vmem:[%s10704_s15 + $0x1a0] sm:$0xf]  ;;  %v6919_v6 = vld [vmem:[%s10704_s15 + $0x1e0] sm:$0xf0] }
  0xb0   : > { %v9832_v1 = vld [vmem:[%s10704_s15 + $0x1dc] sm:$0xf0]  ;;  %v7431_v8 = vld [vmem:[%s10704_s15 + $0x5e0] sm:$0xf0]  ;;  %v6922_v12 = vor.u32 %v9824_v5, %v6919_v6  ;;  %v10001_v5 = vld [vmem:[%s10704_s15 + $0x72c] sm:$0xf] }
  0xb1   : > { %2099 = vmatpush.bf16.msrb.mxu0 %v6974_v27  ;;  %2127 = vmatpush.bf16.msrb.mxu2 %v6978_v29  ;;  %v7178_v27 = vor.u32 %v9888_v17, %v7175_v19  ;;  %v9880_v29 = vld [vmem:[%s10704_s15 + $0x35c] sm:$0xf0]  ;;  %v6918_v9 = vor.u32 %v9832_v1, %v6917_v0  ;;  %v9808_v19 = vld [vmem:[%s10704_s15 + $0x124] sm:$0xf]  ;;  %v7629_v0 = vld [vmem:[%s10704_s15 + $0x728] sm:$0xf] }
  0xb2   : > { %v9816_v14 = vld [vmem:[%s10704_s15 + $0x15c] sm:$0xf0]  ;;  %v7631_v6 = vld [vmem:[%s10704_s15 + $0x768] sm:$0xf0] }
  0xb3   : > { %2113 = vmatpush.bf16.msrb.mxu1 %v7486_v28  ;;  %2141 = vmatpush.bf16.msrb.mxu3 %v7490_v33  ;;  %v7109_v28 = vld [vmem:[%s10704_s15 + $0x320] sm:$0xf]  ;;  %v9872_v33 = vld [vmem:[%s10704_s15 + $0x324] sm:$0xf]  ;;  %v6854_v23 = vor.u32 %v9816_v14, %v6853_v13  ;;  %v7565_v13 = vld [vmem:[%s10704_s15 + $0x6a8] sm:$0xf]  ;;  %v7634_v14 = vor.u32 %v10001_v5, %v7631_v6 }
  0xb4   : > { %v7110_v37 = vor.u32 %v9880_v29, %v7109_v28  ;;  %v9944_v17 = vld [vmem:[%s10704_s15 + $0x55c] sm:$0xf0]  ;;  %v6799_v6 = vld [vmem:[%s10704_s15 + $0xe8] sm:$0xf0] }
  0xb5   : > { %2100 = vmatpush.bf16.msrb.mxu0 %v6910_v39  ;;  %2128 = vmatpush.bf16.msrb.mxu2 %v6914_v41  ;;  %v7114_v39 = vor.u32 %v9872_v33, %v7111_v34  ;;  %v9864_v41 = vld [vmem:[%s10704_s15 + $0x2dc] sm:$0xf0]  ;;  %v9920_v33 = vld [vmem:[%s10704_s15 + $0x4a4] sm:$0xf] }
  0xb6   : > { %v7301_v28 = vld [vmem:[%s10704_s15 + $0x4a0] sm:$0xf]  ;;  %v7303_v34 = vld [vmem:[%s10704_s15 + $0x4e0] sm:$0xf0] }
  0xb7   : > { %2114 = vmatpush.bf16.msrb.mxu1 %v7422_v40  ;;  %2142 = vmatpush.bf16.msrb.mxu3 %v7426_v45  ;;  %v7045_v40 = vld [vmem:[%s10704_s15 + $0x2a0] sm:$0xf]  ;;  %v9856_v45 = vld [vmem:[%s10704_s15 + $0x2a4] sm:$0xf] }
  0xb8   : > { %v7046_v49 = vor.u32 %v9864_v41, %v7045_v40  ;;  %v7237_v40 = vld [vmem:[%s10704_s15 + $0x420] sm:$0xf] }
  0xb9   : > { %2101 = vmatpush.bf16.msrb.mxu0 %v6846_v51  ;;  %2129 = vmatpush.bf16.msrb.mxu2 %v6850_v53  ;;  %v7050_v51 = vor.u32 %v9856_v45, %v7047_v46  ;;  %v9848_v53 = vld [vmem:[%s10704_s15 + $0x25c] sm:$0xf0]  ;;  %v9904_v45 = vld [vmem:[%s10704_s15 + $0x424] sm:$0xf] }
  0xba   : > { %v9912_v41 = vld [vmem:[%s10704_s15 + $0x45c] sm:$0xf0]  ;;  %v7239_v46 = vld [vmem:[%s10704_s15 + $0x460] sm:$0xf0] }
  0xbb   : > { %2115 = vmatpush.bf16.msrb.mxu1 %v7358_v52  ;;  %2143 = vmatpush.bf16.msrb.mxu3 %v7362_v57  ;;  %v6981_v52 = vld [vmem:[%s10704_s15 + $0x220] sm:$0xf]  ;;  %v9840_v57 = vld [vmem:[%s10704_s15 + $0x224] sm:$0xf]  ;;  %v7238_v54 = vor.u32 %v9912_v41, %v7237_v40  ;;  %v9961_v40 = vld [vmem:[%s10704_s15 + $0x5e4] sm:$0xf0] }
  0xbc   : > { %v6982_v61 = vor.u32 %v9848_v53, %v6981_v52  ;;  %v9889_v52 = vld [vmem:[%s10704_s15 + $0x3ac] sm:$0xf] }
  0xbd   : > { %2102 = vmatpush.bf16.msrb.mxu0 %v6782_v63  ;;  %2130 = vmatpush.bf16.msrb.mxu2 %v6786_v3  ;;  %v6986_v63 = vor.u32 %v9840_v57, %v6983_v58  ;;  %v7498_v3 = vor.u32 %v9968_v59, %v7495_v60  ;;  %v7183_v53 = vld [vmem:[%s10704_s15 + $0x3e8] sm:$0xf0]  ;;  %v7242_v58 = vor.u32 %v9904_v45, %v7239_v46 }
  0xbe   : > { %v7695_v57 = vld [vmem:[%s10704_s15 + $0x7e8] sm:$0xf0]  ;;  %v7182_v59 = vor.u32 %v9897_v48, %v7181_v47 }
  0xbf   : > { %2116 = vmatpush.bf16.msrb.mxu1 %v7294_v2  ;;  %2144 = vmatpush.bf16.msrb.mxu3 %v7298_v7  ;;  %v7429_v2 = vld [vmem:[%s10704_s15 + $0x5a0] sm:$0xf]  ;;  %v9952_v7 = vld [vmem:[%s10704_s15 + $0x5a4] sm:$0xf]  ;;  %v7698_v1 = vor.u32 %v10017_v56, %v7695_v57  ;;  %v9825_v41 = vld [vmem:[%s10704_s15 + $0x1ac] sm:$0xf] }
  0xc0   : > { %v7430_v10 = vor.u32 %v9960_v4, %v7429_v2  ;;  %v7434_v16 = vor.u32 %v9952_v7, %v7431_v8  ;;  %v10009_v2 = vld [vmem:[%s10704_s15 + $0x764] sm:$0xf0]  ;;  %v7119_v4 = vld [vmem:[%s10704_s15 + $0x368] sm:$0xf0] }
  0xc1   : > { %2103 = vmatpush.bf16.msrb.mxu0 %v6718_v15  ;;  %2131 = vmatpush.bf16.msrb.mxu2 %v6722_v21  ;;  %v7365_v15 = vld [vmem:[%s10704_s15 + $0x520] sm:$0xf]  ;;  %v9936_v21 = vld [vmem:[%s10704_s15 + $0x524] sm:$0xf]  ;;  %v7630_v8 = vor.u32 %v10009_v2, %v7629_v0  ;;  %v9937_v56 = vld [vmem:[%s10704_s15 + $0x52c] sm:$0xf] }
  0xc2   : > { %v7370_v29 = vor.u32 %v9936_v21, %v7367_v22  ;;  %v7375_v57 = vld [vmem:[%s10704_s15 + $0x568] sm:$0xf0]  ;;  %v7309_v2 = vld [vmem:[%s10704_s15 + $0x4a8] sm:$0xf] }
  0xc3   : > { %2117 = vmatpush.bf16.msrb.mxu1 %v7230_v20  ;;  %2145 = vmatpush.bf16.msrb.mxu3 %v7234_v24  ;;  %v6855_v20 = vld [vmem:[%s10704_s15 + $0x160] sm:$0xf0]  ;;  %v7366_v24 = vor.u32 %v9944_v17, %v7365_v15  ;;  %v9993_v15 = vld [vmem:[%s10704_s15 + $0x6e4] sm:$0xf0]  ;;  %v7055_v17 = vld [vmem:[%s10704_s15 + $0x2e8] sm:$0xf0]  ;;  %v7378_v5 = vor.u32 %v9937_v56, %v7375_v57 }
  0xc4   : > { %2132 = vmatmul.bf16.vlgmr.msrb.gmra.mxu2 %v10802_v11  ;;  %2104 = vmatmul.bf16.vlgmr.msrb.gmra.mxu0 %v10802_v11  ;;  %v7566_v22 = vor.u32 %v9993_v15, %v7565_v13  ;;  %v9785_v13 = vld [vmem:[%s10704_s15 + $0x64] sm:$0xf0]  ;;  %v9874_v57 = vld [vmem:[%s10704_s15 + $0x334] sm:$0xf] }
  0xc5   : > { %2152 = vmatpush.bf16.msra.mxu0 %v7174_v25  ;;  %2180 = vmatpush.bf16.msra.mxu2 %v7178_v27  ;;  %v6858_v25 = vor.u32 %v9808_v19, %v6855_v20  ;;  %v9800_v27 = vld [vmem:[%s10704_s15 + $0xdc] sm:$0xf0]  ;;  %v9985_v19 = vld [vmem:[%s10704_s15 + $0x6ac] sm:$0xf] }
  0xc6   : > { %2146 = vmatmul.bf16.vlgmr.msrb.gmra.mxu3 %v10809_v18  ;;  %2118 = vmatmul.bf16.vlgmr.msrb.gmra.mxu1 %v10809_v18  ;;  %v7567_v20 = vld [vmem:[%s10704_s15 + $0x6e8] sm:$0xf0] }
  0xc7   : > { %2166 = vmatpush.bf16.msra.mxu1 %v7686_v26  ;;  %2194 = vmatpush.bf16.msra.mxu3 %v7690_v31  ;;  %v6789_v26 = vld [vmem:[%s10704_s15 + $0xa0] sm:$0xf]  ;;  %v9792_v31 = vld [vmem:[%s10704_s15 + $0xa4] sm:$0xf] }
  0xc8   : > { %v6790_v35 = vor.u32 %v9800_v27, %v6789_v26  ;;  %v7501_v26 = vld [vmem:[%s10704_s15 + $0x628] sm:$0xf]  ;;  %v7570_v27 = vor.u32 %v9985_v19, %v7567_v20 }
  0xc9   : > { %2153 = vmatpush.bf16.msra.mxu0 %v7110_v37  ;;  %2181 = vmatpush.bf16.msra.mxu2 %v7114_v39  ;;  %v9784_v37 = vld [vmem:[%s10704_s15 + $0x5c] sm:$0xf0]  ;;  %v6794_v39 = vor.u32 %v9792_v31, %v6791_v32  ;;  %v9969_v31 = vld [vmem:[%s10704_s15 + $0x62c] sm:$0xf]  ;;  %v9913_v19 = vld [vmem:[%s10704_s15 + $0x464] sm:$0xf0] }
  0xca   : > { %v7503_v32 = vld [vmem:[%s10704_s15 + $0x668] sm:$0xf0] }
  0xcb   : > { %2167 = vmatpush.bf16.msra.mxu1 %v7622_v38  ;;  %2195 = vmatpush.bf16.msra.mxu3 %v7626_v43  ;;  %v7302_v38 = vor.u32 %v9928_v30, %v7301_v28  ;;  %v7306_v43 = vor.u32 %v9920_v33, %v7303_v34  ;;  %v9977_v28 = vld [vmem:[%s10704_s15 + $0x664] sm:$0xf0]  ;;  %v6991_v30 = vld [vmem:[%s10704_s15 + $0x268] sm:$0xf0] }
  0xcc   : > { %v7502_v34 = vor.u32 %v9977_v28, %v7501_v26  ;;  %v7247_v28 = vld [vmem:[%s10704_s15 + $0x468] sm:$0xf0] }
  0xcd   : > { %2154 = vmatpush.bf16.msra.mxu0 %v7046_v49  ;;  %2182 = vmatpush.bf16.msra.mxu2 %v7050_v51  ;;  %v7693_v49 = vld [vmem:[%s10704_s15 + $0x7a8] sm:$0xf] }
  0xce   : > { %v10025_v51 = vld [vmem:[%s10704_s15 + $0x7e4] sm:$0xf0] }
  0xcf   : > { %2168 = vmatpush.bf16.msra.mxu1 %v7558_v50  ;;  %2196 = vmatpush.bf16.msra.mxu3 %v7562_v55  ;;  %v6726_v50 = vor.u32 %v9784_v37, %v6725_v36  ;;  %v6730_v55 = vor.u32 %v9776_v42, %v6727_v44  ;;  %v7694_v60 = vor.u32 %v10025_v51, %v7693_v49  ;;  %v6925_v36 = vld [vmem:[%s10704_s15 + $0x1a8] sm:$0xf]  ;;  %v6927_v42 = vld [vmem:[%s10704_s15 + $0x1e8] sm:$0xf0] }
  0xd0   : > { %v9833_v37 = vld [vmem:[%s10704_s15 + $0x1e4] sm:$0xf0]  ;;  %v7439_v44 = vld [vmem:[%s10704_s15 + $0x5e8] sm:$0xf0]  ;;  %v6930_v48 = vor.u32 %v9825_v41, %v6927_v42  ;;  %v10018_v42 = vld [vmem:[%s10704_s15 + $0x7b4] sm:$0xf] }
  0xd1   : > { %2155 = vmatpush.bf16.msra.mxu0 %v6982_v61  ;;  %2183 = vmatpush.bf16.msra.mxu2 %v6986_v63  ;;  %v7186_v61 = vor.u32 %v9889_v52, %v7183_v53  ;;  %v9881_v63 = vld [vmem:[%s10704_s15 + $0x364] sm:$0xf0]  ;;  %v6926_v45 = vor.u32 %v9833_v37, %v6925_v36  ;;  %v9890_v37 = vld [vmem:[%s10704_s15 + $0x3b4] sm:$0xf] }
  0xd2   : > { %v6861_v49 = vld [vmem:[%s10704_s15 + $0x128] sm:$0xf] }
  0xd3   : > { %2169 = vmatpush.bf16.msra.mxu1 %v7494_v62  ;;  %2197 = vmatpush.bf16.msra.mxu3 %v7498_v3  ;;  %v7117_v62 = vld [vmem:[%s10704_s15 + $0x328] sm:$0xf]  ;;  %v9873_v3 = vld [vmem:[%s10704_s15 + $0x32c] sm:$0xf] }
  0xd4   : > { %v7118_v7 = vor.u32 %v9881_v63, %v7117_v62  ;;  %v7373_v51 = vld [vmem:[%s10704_s15 + $0x528] sm:$0xf] }
  0xd5   : > { %2156 = vmatpush.bf16.msra.mxu0 %v6918_v9  ;;  %2184 = vmatpush.bf16.msra.mxu2 %v6922_v12  ;;  %v7122_v9 = vor.u32 %v9873_v3, %v7119_v4  ;;  %v9865_v12 = vld [vmem:[%s10704_s15 + $0x2e4] sm:$0xf0]  ;;  %v9793_v4 = vld [vmem:[%s10704_s15 + $0xac] sm:$0xf] }
  0xd6   : > { %v9945_v53 = vld [vmem:[%s10704_s15 + $0x564] sm:$0xf0] }
  0xd7   : > { %2170 = vmatpush.bf16.msra.mxu1 %v7430_v10  ;;  %2198 = vmatpush.bf16.msra.mxu3 %v7434_v16  ;;  %v7053_v10 = vld [vmem:[%s10704_s15 + $0x2a8] sm:$0xf]  ;;  %v9857_v16 = vld [vmem:[%s10704_s15 + $0x2ac] sm:$0xf]  ;;  %v7374_v0 = vor.u32 %v9945_v53, %v7373_v51  ;;  %v10010_v53 = vld [vmem:[%s10704_s15 + $0x76c] sm:$0xf0] }
  0xd8   : > { %v7054_v21 = vor.u32 %v9865_v12, %v7053_v10  ;;  %v9801_v62 = vld [vmem:[%s10704_s15 + $0xe4] sm:$0xf0] }
  0xd9   : > { %2157 = vmatpush.bf16.msra.mxu0 %v6854_v23  ;;  %2185 = vmatpush.bf16.msra.mxu2 %v6858_v25  ;;  %v7058_v23 = vor.u32 %v9857_v16, %v7055_v17  ;;  %v9849_v25 = vld [vmem:[%s10704_s15 + $0x264] sm:$0xf0] }
  0xda   : > { %v9929_v3 = vld [vmem:[%s10704_s15 + $0x4e4] sm:$0xf0] }
  0xdb   : > { %2171 = vmatpush.bf16.msra.mxu1 %v7366_v24  ;;  %2199 = vmatpush.bf16.msra.mxu3 %v7370_v29  ;;  %v6989_v24 = vld [vmem:[%s10704_s15 + $0x228] sm:$0xf]  ;;  %v9841_v29 = vld [vmem:[%s10704_s15 + $0x22c] sm:$0xf] }
  0xdc   : > { %v6990_v33 = vor.u32 %v9849_v25, %v6989_v24  ;;  %v6733_v12 = vld [vmem:[%s10704_s15 + $0x28] sm:$0xf]  ;;  %v6735_v24 = vld [vmem:[%s10704_s15 + $0x68] sm:$0xf0] }
  0xdd   : > { %2158 = vmatpush.bf16.msra.mxu0 %v6790_v35  ;;  %2186 = vmatpush.bf16.msra.mxu2 %v6794_v39  ;;  %v6994_v35 = vor.u32 %v9841_v29, %v6991_v30  ;;  %v7506_v39 = vor.u32 %v9969_v31, %v7503_v32  ;;  %v7245_v17 = vld [vmem:[%s10704_s15 + $0x428] sm:$0xf]  ;;  %v9905_v25 = vld [vmem:[%s10704_s15 + $0x42c] sm:$0xf]  ;;  %v7189_v29 = vld [vmem:[%s10704_s15 + $0x3b0] sm:$0xf]  ;;  %v6734_v36 = vor.u32 %v9785_v13, %v6733_v12 }
  0xde   : > { %v9898_v30 = vld [vmem:[%s10704_s15 + $0x3ec] sm:$0xf0] }
  0xdf   : > { %2172 = vmatpush.bf16.msra.mxu1 %v7302_v38  ;;  %2200 = vmatpush.bf16.msra.mxu3 %v7306_v43  ;;  %v7437_v38 = vld [vmem:[%s10704_s15 + $0x5a8] sm:$0xf]  ;;  %v9953_v43 = vld [vmem:[%s10704_s15 + $0x5ac] sm:$0xf]  ;;  %v7701_v32 = vld [vmem:[%s10704_s15 + $0x7b0] sm:$0xf] }
  0xe0   : > { %v7438_v47 = vor.u32 %v9961_v40, %v7437_v38  ;;  %v7442_v52 = vor.u32 %v9953_v43, %v7439_v44  ;;  %v7191_v38 = vld [vmem:[%s10704_s15 + $0x3f0] sm:$0xf0]  ;;  %v7246_v40 = vor.u32 %v9913_v19, %v7245_v17  ;;  %v7250_v44 = vor.u32 %v9905_v25, %v7247_v28  ;;  %v7509_v17 = vld [vmem:[%s10704_s15 + $0x630] sm:$0xf] }
  0xe1   : > { %2159 = vmatpush.bf16.msra.mxu0 %v6726_v50  ;;  %2187 = vmatpush.bf16.msra.mxu2 %v6730_v55  ;;  %v9817_v50 = vld [vmem:[%s10704_s15 + $0x164] sm:$0xf0]  ;;  %v6863_v55 = vld [vmem:[%s10704_s15 + $0x168] sm:$0xf0]  ;;  %v7703_v43 = vld [vmem:[%s10704_s15 + $0x7f0] sm:$0xf0]  ;;  %v7194_v51 = vor.u32 %v9890_v37, %v7191_v38 }
  0xe2   : > { %v7706_v56 = vor.u32 %v10018_v42, %v7703_v43  ;;  %v6935_v37 = vld [vmem:[%s10704_s15 + $0x1f0] sm:$0xf0]  ;;  %v6869_v42 = vld [vmem:[%s10704_s15 + $0x130] sm:$0xf] }
  0xe3   : > { %2173 = vmatpush.bf16.msra.mxu1 %v7238_v54  ;;  %2201 = vmatpush.bf16.msra.mxu3 %v7242_v58  ;;  %v1937_v46 = vpop.f32.mrf.mxu0  ;;  %v9809_v54 = vld [vmem:[%s10704_s15 + $0x12c] sm:$0xf]  ;;  %v348_v58 = vld [vmem:[#allocation2 + $0xb0] sm:$0xff] }
  0xe4   : > { %2188 = vmatmul.bf16.vlgmr.msra.gmra.mxu2 %v10802_v11  ;;  %2160 = vmatmul.bf16.vlgmr.msra.gmra.mxu0 %v10802_v11 }
  0xe5   : > { %2208 = vmatpush.bf16.msrb.mxu0 %v7182_v59  ;;  %2236 = vmatpush.bf16.msrb.mxu2 %v7186_v61  ;;  %v1951_v59 = vpop.f32.mrf.mxu1  ;;  %v6797_v61 = vld [vmem:[%s10704_s15 + $0xa8] sm:$0xf] }
  0xe6   : > { %2202 = vmatmul.bf16.vlgmr.msra.gmra.mxu3 %v10809_v18  ;;  %2174 = vmatmul.bf16.vlgmr.msra.gmra.mxu1 %v10809_v18  ;;  %v1952_v63 = vadd.f32 %v1951_v59, %v1937_v46  ;;  %v6798_v16 = vor.u32 %v9801_v62, %v6797_v61  ;;  %v7125_v46 = vld [vmem:[%s10704_s15 + $0x330] sm:$0xf]  ;;  %v7639_v61 = vld [vmem:[%s10704_s15 + $0x770] sm:$0xf0] }
  0xe7   : > { %2222 = vmatpush.bf16.msrb.mxu1 %v7694_v60  ;;  %2250 = vmatpush.bf16.msrb.mxu3 %v7698_v1  ;;  %v6862_v60 = vor.u32 %v9817_v50, %v6861_v49  ;;  %v6866_v1 = vor.u32 %v9809_v54, %v6863_v55  ;;  %v365_v54 = vld [vmem:[#allocation2 + $0x58] sm:$0xff] }
  0xe9   : > { %2209 = vmatpush.bf16.msrb.mxu0 %v7118_v7  ;;  %2237 = vmatpush.bf16.msrb.mxu2 %v7122_v9  ;;  %v9921_v7 = vld [vmem:[%s10704_s15 + $0x4ac] sm:$0xf]  ;;  %v2376_v9 = vadd.f32 %v1952_v63, %v348_v58  ;;  %v1965_v10 = vpop.f32.mrf.mxu2  ;;  %v7127_v58 = vld [vmem:[%s10704_s15 + $0x370] sm:$0xf0]  ;;  %v7061_v63 = vld [vmem:[%s10704_s15 + $0x2b0] sm:$0xf] }
  0xeb   : > { %2223 = vmatpush.bf16.msrb.mxu1 %v7630_v8  ;;  %2251 = vmatpush.bf16.msrb.mxu3 %v7634_v14  ;;  %v7311_v8 = vld [vmem:[%s10704_s15 + $0x4e8] sm:$0xf0]  ;;  %v349_v14 = vld [vmem:[#allocation2] sm:$0xff]  ;;  %v1979_v15 = vpop.f32.mrf.mxu3  ;;  %2408 = vst [vmem:[#allocation2 + $0xb0] sm:$0xff] %v2376_v9  ;;  %v1939_v26 = vpop.f32.mrf.mxu0  ;;  %v9986_v9 = vld [vmem:[%s10704_s15 + $0x6b4] sm:$0xf] }
  0xec   : > { %v1980_v20 = vadd.f32 %v1979_v15, %v1965_v10  ;;  %v7575_v10 = vld [vmem:[%s10704_s15 + $0x6f0] sm:$0xf0]  ;;  %v6997_v15 = vld [vmem:[%s10704_s15 + $0x230] sm:$0xf] }
  0xed   : > { %2210 = vmatpush.bf16.msrb.mxu0 %v7054_v21  ;;  %2238 = vmatpush.bf16.msrb.mxu2 %v7058_v23  ;;  %v7310_v21 = vor.u32 %v9929_v3, %v7309_v2  ;;  %v9777_v23 = vld [vmem:[%s10704_s15 + $0x2c] sm:$0xf]  ;;  %v7130_v2 = vor.u32 %v9874_v57, %v7127_v58  ;;  %v9866_v3 = vld [vmem:[%s10704_s15 + $0x2ec] sm:$0xf0]  ;;  %v7578_v19 = vor.u32 %v9986_v9, %v7575_v10  ;;  %v9922_v9 = vld [vmem:[%s10704_s15 + $0x4b4] sm:$0xf] }
  0xee   : > { %v2377_v31 = vadd.f32 %v1980_v20, %v349_v14  ;;  %v6738_v41 = vor.u32 %v9777_v23, %v6735_v24  ;;  %v7062_v12 = vor.u32 %v9866_v3, %v7061_v63  ;;  %v9978_v20 = vld [vmem:[%s10704_s15 + $0x66c] sm:$0xf0]  ;;  %v9970_v23 = vld [vmem:[%s10704_s15 + $0x634] sm:$0xf] }
  0xef   : > { %2224 = vmatpush.bf16.msrb.mxu1 %v7566_v22  ;;  %2252 = vmatpush.bf16.msrb.mxu3 %v7570_v27  ;;  %v6802_v22 = vor.u32 %v9793_v4, %v6799_v6  ;;  %v7314_v27 = vor.u32 %v9921_v7, %v7311_v8  ;;  %v7573_v4 = vld [vmem:[%s10704_s15 + $0x6b0] sm:$0xf]  ;;  %v9858_v7 = vld [vmem:[%s10704_s15 + $0x2b4] sm:$0xf]  ;;  %v7510_v28 = vor.u32 %v9978_v20, %v7509_v17 }
  0xf0   : > { %2409 = vst [vmem:[#allocation2] sm:$0xff] %v2377_v31  ;;  %v7063_v8 = vld [vmem:[%s10704_s15 + $0x2f0] sm:$0xf0]  ;;  %v7445_v31 = vld [vmem:[%s10704_s15 + $0x5b0] sm:$0xf] }
  0xf1   : > { %2211 = vmatpush.bf16.msrb.mxu0 %v6990_v33  ;;  %2239 = vmatpush.bf16.msrb.mxu2 %v6994_v35  ;;  %v10026_v33 = vld [vmem:[%s10704_s15 + $0x7ec] sm:$0xf0]  ;;  %v1953_v35 = vpop.f32.mrf.mxu1  ;;  %v1967_v49 = vpop.f32.mrf.mxu2  ;;  %v7066_v14 = vor.u32 %v9858_v7, %v7063_v8  ;;  %v7511_v24 = vld [vmem:[%s10704_s15 + $0x670] sm:$0xf0] }
  0xf2   : > { %v7702_v50 = vor.u32 %v10026_v33, %v7701_v32  ;;  %v350_v32 = vld [vmem:[#allocation2 + $0xd8] sm:$0xff]  ;;  %v9802_v63 = vld [vmem:[%s10704_s15 + $0xec] sm:$0xf0]  ;;  %v6807_v7 = vld [vmem:[%s10704_s15 + $0xf0] sm:$0xf0] }
  0xf3   : > { %2225 = vmatpush.bf16.msrb.mxu1 %v7502_v34  ;;  %2253 = vmatpush.bf16.msrb.mxu3 %v7506_v39  ;;  %v364_v34 = vld [vmem:[#allocation2 + $0x38] sm:$0xff]  ;;  %v1954_v39 = vadd.f32 %v1953_v35, %v1939_v26  ;;  %v1981_v55 = vpop.f32.mrf.mxu3  ;;  %v6933_v26 = vld [vmem:[%s10704_s15 + $0x1b0] sm:$0xf]  ;;  %v7319_v10 = vld [vmem:[%s10704_s15 + $0x4f0] sm:$0xf0] }
  0xf4   : > { %v1982_v59 = vadd.f32 %v1981_v55, %v1967_v49  ;;  %v9962_v35 = vld [vmem:[%s10704_s15 + $0x5ec] sm:$0xf0]  ;;  %v9938_v55 = vld [vmem:[%s10704_s15 + $0x534] sm:$0xf] }
  0xf5   : > { %2212 = vmatpush.bf16.msrb.mxu0 %v6926_v45  ;;  %2240 = vmatpush.bf16.msrb.mxu2 %v6930_v48  ;;  %v7190_v45 = vor.u32 %v9898_v30, %v7189_v29  ;;  %v2392_v48 = vadd.f32 %v1954_v39, %v364_v34  ;;  %v9834_v30 = vld [vmem:[%s10704_s15 + $0x1ec] sm:$0xf0]  ;;  %v7514_v34 = vor.u32 %v9970_v23, %v7511_v24  ;;  %v9954_v39 = vld [vmem:[%s10704_s15 + $0x5b4] sm:$0xf] }
  0xf6   : > { %v9914_v20 = vld [vmem:[%s10704_s15 + $0x46c] sm:$0xf0]  ;;  %v7322_v24 = vor.u32 %v9922_v9, %v7319_v10  ;;  %v9979_v10 = vld [vmem:[%s10704_s15 + $0x674] sm:$0xf0] }
  0xf7   : > { %2226 = vmatpush.bf16.msrb.mxu1 %v7438_v47  ;;  %2254 = vmatpush.bf16.msrb.mxu3 %v7442_v52  ;;  %v9882_v47 = vld [vmem:[%s10704_s15 + $0x36c] sm:$0xf0]  ;;  %2424 = vst [vmem:[#allocation2 + $0x38] sm:$0xff] %v2392_v48 }
  0xf8   : > { %v7637_v52 = vld [vmem:[%s10704_s15 + $0x730] sm:$0xf]  ;;  %v7126_v62 = vor.u32 %v9882_v47, %v7125_v46 }
  0xf9   : > { %2213 = vmatpush.bf16.msrb.mxu0 %v6862_v60  ;;  %2241 = vmatpush.bf16.msrb.mxu2 %v6866_v1  ;;  %v10002_v60 = vld [vmem:[%s10704_s15 + $0x734] sm:$0xf]  ;;  %v7638_v1 = vor.u32 %v10010_v53, %v7637_v52  ;;  %v9818_v46 = vld [vmem:[%s10704_s15 + $0x16c] sm:$0xf0]  ;;  %v351_v53 = vld [vmem:[#allocation2 + $0x18] sm:$0xff] }
  0xfa   : > { %v7642_v6 = vor.u32 %v10002_v60, %v7639_v61  ;;  %v7381_v47 = vld [vmem:[%s10704_s15 + $0x530] sm:$0xf]  ;;  %v6871_v52 = vld [vmem:[%s10704_s15 + $0x170] sm:$0xf0]  ;;  %v6870_v58 = vor.u32 %v9818_v46, %v6869_v42 }
  0xfb   : > { %2227 = vmatpush.bf16.msrb.mxu1 %v7374_v0  ;;  %2255 = vmatpush.bf16.msrb.mxu3 %v7378_v5  ;;  %v2393_v0 = vadd.f32 %v1982_v59, %v365_v54  ;;  %v9994_v5 = vld [vmem:[%s10704_s15 + $0x6ec] sm:$0xf0] }
  0xfc   : > { %v7574_v13 = vor.u32 %v9994_v5, %v7573_v4  ;;  %v9946_v48 = vld [vmem:[%s10704_s15 + $0x56c] sm:$0xf0] }
  0xfd   : > { %2214 = vmatpush.bf16.msrb.mxu0 %v6798_v16  ;;  %2242 = vmatpush.bf16.msrb.mxu2 %v6802_v22  ;;  %2425 = vst [vmem:[#allocation2 + $0x58] sm:$0xff] %v2393_v0  ;;  %v9850_v16 = vld [vmem:[%s10704_s15 + $0x26c] sm:$0xf0]  ;;  %v6999_v22 = vld [vmem:[%s10704_s15 + $0x270] sm:$0xf0]  ;;  %v7382_v61 = vor.u32 %v9946_v48, %v7381_v47 }
  0xfe   : > { %v6998_v25 = vor.u32 %v9850_v16, %v6997_v15  ;;  %v6805_v59 = vld [vmem:[%s10704_s15 + $0xb0] sm:$0xf]  ;;  %v9883_v47 = vld [vmem:[%s10704_s15 + $0x374] sm:$0xf0] }
  0xff   : > { %2228 = vmatpush.bf16.msrb.mxu1 %v7310_v21  ;;  %2256 = vmatpush.bf16.msrb.mxu3 %v7314_v27  ;;  %v9842_v21 = vld [vmem:[%s10704_s15 + $0x234] sm:$0xf]  ;;  %v7317_v0 = vld [vmem:[%s10704_s15 + $0x4b0] sm:$0xf]  ;;  %v7645_v48 = vld [vmem:[%s10704_s15 + $0x738] sm:$0xf] }
 0x100   : > { %v7002_v29 = vor.u32 %v9842_v21, %v6999_v22  ;;  %v9930_v5 = vld [vmem:[%s10704_s15 + $0x4ec] sm:$0xf0]  ;;  %v9778_v21 = vld [vmem:[%s10704_s15 + $0x34] sm:$0xf] }
 0x101   : > { %2215 = vmatpush.bf16.msrb.mxu0 %v6734_v36  ;;  %2243 = vmatpush.bf16.msrb.mxu2 %v6738_v41  ;;  %v1993_v27 = vpop.f32.mrf.mxu0  ;;  %v9826_v36 = vld [vmem:[%s10704_s15 + $0x1b4] sm:$0xf]  ;;  %v6934_v41 = vor.u32 %v9834_v30, %v6933_v26  ;;  %v7253_v15 = vld [vmem:[%s10704_s15 + $0x430] sm:$0xf]  ;;  %v7318_v17 = vor.u32 %v9930_v5, %v7317_v0  ;;  %v9899_v30 = vld [vmem:[%s10704_s15 + $0x3f4] sm:$0xf0] }
 0x102   : > { %v6743_v22 = vld [vmem:[%s10704_s15 + $0x70] sm:$0xf0]  ;;  %v7071_v0 = vld [vmem:[%s10704_s15 + $0x2f8] sm:$0xf0] }
 0x103   : > { %2229 = vmatpush.bf16.msrb.mxu1 %v7246_v40  ;;  %2257 = vmatpush.bf16.msrb.mxu3 %v7250_v44  ;;  %v2007_v33 = vpop.f32.mrf.mxu1  ;;  %v7447_v40 = vld [vmem:[%s10704_s15 + $0x5f0] sm:$0xf0]  ;;  %v7446_v44 = vor.u32 %v9962_v35, %v7445_v31  ;;  %v7709_v31 = vld [vmem:[%s10704_s15 + $0x7b8] sm:$0xf]  ;;  %v9891_v35 = vld [vmem:[%s10704_s15 + $0x3bc] sm:$0xf] }
 0x104   : > { %2244 = vmatmul.bf16.vlgmr.msrb.gmra.mxu2 %v10802_v11  ;;  %2216 = vmatmul.bf16.vlgmr.msrb.gmra.mxu0 %v10802_v11  ;;  %v2008_v38 = vadd.f32 %v2007_v33, %v1993_v27  ;;  %v7255_v26 = vld [vmem:[%s10704_s15 + $0x470] sm:$0xf0]  ;;  %v367_v27 = vld [vmem:[#allocation2 + $0xc8] sm:$0xff] }
 0x105   : > { %2264 = vmatpush.bf16.msra.mxu0 %v7190_v45  ;;  %2292 = vmatpush.bf16.msra.mxu2 %v7194_v51  ;;  %v6938_v45 = vor.u32 %v9826_v36, %v6935_v37  ;;  %v9810_v51 = vld [vmem:[%s10704_s15 + $0x134] sm:$0xf]  ;;  %v7199_v36 = vld [vmem:[%s10704_s15 + $0x3f8] sm:$0xf0]  ;;  %v7254_v37 = vor.u32 %v9914_v20, %v7253_v15 }
 0x106   : > { %2258 = vmatmul.bf16.vlgmr.msrb.gmra.mxu3 %v10809_v18  ;;  %2230 = vmatmul.bf16.vlgmr.msrb.gmra.mxu1 %v10809_v18  ;;  %v2378_v43 = vadd.f32 %v2008_v38, %v350_v32  ;;  %v6746_v38 = vor.u32 %v9778_v21, %v6743_v22  ;;  %v7202_v46 = vor.u32 %v9891_v35, %v7199_v36  ;;  %v7519_v15 = vld [vmem:[%s10704_s15 + $0x678] sm:$0xf0]  ;;  %v9835_v22 = vld [vmem:[%s10704_s15 + $0x1f4] sm:$0xf0] }
 0x107   : > { %2278 = vmatpush.bf16.msra.mxu1 %v7702_v50  ;;  %2306 = vmatpush.bf16.msra.mxu3 %v7706_v56  ;;  %v2021_v49 = vpop.f32.mrf.mxu2  ;;  %v7450_v50 = vor.u32 %v9954_v39, %v7447_v40  ;;  %v7383_v56 = vld [vmem:[%s10704_s15 + $0x570] sm:$0xf0]  ;;  %v10019_v39 = vld [vmem:[%s10704_s15 + $0x7bc] sm:$0xf] }
 0x108   : > { %2410 = vst [vmem:[#allocation2 + $0xd8] sm:$0xff] %v2378_v43  ;;  %v7386_v4 = vor.u32 %v9938_v55, %v7383_v56  ;;  %v7711_v40 = vld [vmem:[%s10704_s15 + $0x7f8] sm:$0xf0] }
 0x109   : > { %2265 = vmatpush.bf16.msra.mxu0 %v7126_v62  ;;  %2293 = vmatpush.bf16.msra.mxu2 %v7130_v2  ;;  %v2035_v54 = vpop.f32.mrf.mxu3  ;;  %v1995_v60 = vpop.f32.mrf.mxu0  ;;  %v6874_v62 = vor.u32 %v9810_v51, %v6871_v52  ;;  %v366_v2 = vld [vmem:[#allocation2 + $0x40] sm:$0xff]  ;;  %v9875_v51 = vld [vmem:[%s10704_s15 + $0x33c] sm:$0xf] }
 0x10a   : > { %v2036_v57 = vadd.f32 %v2035_v54, %v2021_v49  ;;  %v7714_v49 = vor.u32 %v10019_v39, %v7711_v40  ;;  %v7135_v52 = vld [vmem:[%s10704_s15 + $0x378] sm:$0xf0]  ;;  %v7389_v39 = vld [vmem:[%s10704_s15 + $0x538] sm:$0xf] }
 0x10b   : > { %2279 = vmatpush.bf16.msra.mxu1 %v7638_v1  ;;  %2307 = vmatpush.bf16.msra.mxu3 %v7642_v6  ;;  %v2009_v3 = vpop.f32.mrf.mxu1  ;;  %v9794_v6 = vld [vmem:[%s10704_s15 + $0xb4] sm:$0xf]  ;;  %v7647_v54 = vld [vmem:[%s10704_s15 + $0x778] sm:$0xf0]  ;;  %v9947_v40 = vld [vmem:[%s10704_s15 + $0x574] sm:$0xf0] }
 0x10c   : > { %v2379_v1 = vadd.f32 %v2036_v57, %v351_v53  ;;  %v2010_v8 = vadd.f32 %v2009_v3, %v1995_v60  ;;  %v10003_v53 = vld [vmem:[%s10704_s15 + $0x73c] sm:$0xf]  ;;  %v7138_v57 = vor.u32 %v9875_v51, %v7135_v52  ;;  %v7581_v60 = vld [vmem:[%s10704_s15 + $0x6b8] sm:$0xf] }
 0x10d   : > { %2266 = vmatpush.bf16.msra.mxu0 %v7062_v12  ;;  %2294 = vmatpush.bf16.msra.mxu2 %v7066_v14  ;;  %v6806_v12 = vor.u32 %v9802_v63, %v6805_v59  ;;  %v9786_v14 = vld [vmem:[%s10704_s15 + $0x6c] sm:$0xf0]  ;;  %v9867_v59 = vld [vmem:[%s10704_s15 + $0x2f4] sm:$0xf0]  ;;  %v9859_v63 = vld [vmem:[%s10704_s15 + $0x2bc] sm:$0xf] }
 0x10e   : > { %2411 = vst [vmem:[#allocation2 + $0x18] sm:$0xff] %v2379_v1  ;;  %v2394_v16 = vadd.f32 %v2010_v8, %v366_v2  ;;  %v9987_v1 = vld [vmem:[%s10704_s15 + $0x6bc] sm:$0xf]  ;;  %v7074_v5 = vor.u32 %v9859_v63, %v7071_v0  ;;  %v7517_v8 = vld [vmem:[%s10704_s15 + $0x638] sm:$0xf] }
 0x10f   : > { %2280 = vmatpush.bf16.msra.mxu1 %v7574_v13  ;;  %2308 = vmatpush.bf16.msra.mxu3 %v7578_v19  ;;  %v6741_v13 = vld [vmem:[%s10704_s15 + $0x30] sm:$0xf]  ;;  %v6810_v19 = vor.u32 %v9794_v6, %v6807_v7  ;;  %v2023_v23 = vpop.f32.mrf.mxu2  ;;  %v7583_v2 = vld [vmem:[%s10704_s15 + $0x6f8] sm:$0xf0]  ;;  %v7005_v6 = vld [vmem:[%s10704_s15 + $0x238] sm:$0xf]  ;;  %v7518_v20 = vor.u32 %v9979_v10, %v7517_v8 }
 0x110   : > { %2426 = vst [vmem:[#allocation2 + $0x40] sm:$0xff] %v2394_v16  ;;  %v6742_v33 = vor.u32 %v9786_v14, %v6741_v13  ;;  %v9851_v7 = vld [vmem:[%s10704_s15 + $0x274] sm:$0xf0]  ;;  %v7586_v9 = vor.u32 %v9987_v1, %v7583_v2  ;;  %v7007_v13 = vld [vmem:[%s10704_s15 + $0x278] sm:$0xf0] }
 0x111   : > { %2267 = vmatpush.bf16.msra.mxu0 %v6998_v25  ;;  %2295 = vmatpush.bf16.msra.mxu2 %v7002_v29  ;;  %v9906_v25 = vld [vmem:[%s10704_s15 + $0x434] sm:$0xf]  ;;  %v7197_v29 = vld [vmem:[%s10704_s15 + $0x3b8] sm:$0xf]  ;;  %v9971_v14 = vld [vmem:[%s10704_s15 + $0x63c] sm:$0xf]  ;;  %v7006_v16 = vor.u32 %v9851_v7, %v7005_v6 }
 0x112   : > { %v7258_v42 = vor.u32 %v9906_v25, %v7255_v26  ;;  %v7198_v43 = vor.u32 %v9899_v30, %v7197_v29  ;;  %v7522_v26 = vor.u32 %v9971_v14, %v7519_v15  ;;  %v6943_v29 = vld [vmem:[%s10704_s15 + $0x1f8] sm:$0xf0]  ;;  %v6813_v51 = vld [vmem:[%s10704_s15 + $0xb8] sm:$0xf] }
 0x113   : > { %2281 = vmatpush.bf16.msra.mxu1 %v7510_v28  ;;  %2309 = vmatpush.bf16.msra.mxu3 %v7514_v34  ;;  %v2037_v28 = vpop.f32.mrf.mxu3  ;;  %v10027_v34 = vld [vmem:[%s10704_s15 + $0x7f4] sm:$0xf0]  ;;  %v6815_v63 = vld [vmem:[%s10704_s15 + $0xf8] sm:$0xf0] }
 0x114   : > { %v2038_v32 = vadd.f32 %v2037_v28, %v2023_v23  ;;  %v7453_v23 = vld [vmem:[%s10704_s15 + $0x5b8] sm:$0xf]  ;;  %v9827_v28 = vld [vmem:[%s10704_s15 + $0x1bc] sm:$0xf] }
 0x115   : > { %2268 = vmatpush.bf16.msra.mxu0 %v6934_v41  ;;  %2296 = vmatpush.bf16.msra.mxu2 %v6938_v45  ;;  %v7710_v45 = vor.u32 %v10027_v34, %v7709_v31  ;;  %v9955_v31 = vld [vmem:[%s10704_s15 + $0x5bc] sm:$0xf]  ;;  %v6877_v34 = vld [vmem:[%s10704_s15 + $0x138] sm:$0xf] }
 0x116   : > { %v2395_v41 = vadd.f32 %v2038_v32, %v367_v27  ;;  %v9963_v27 = vld [vmem:[%s10704_s15 + $0x5f4] sm:$0xf0]  ;;  %v7455_v32 = vld [vmem:[%s10704_s15 + $0x5f8] sm:$0xf0] }
 0x117   : > { %2282 = vmatpush.bf16.msra.mxu1 %v7446_v44  ;;  %2310 = vmatpush.bf16.msra.mxu3 %v7450_v50  ;;  %v7133_v44 = vld [vmem:[%s10704_s15 + $0x338] sm:$0xf]  ;;  %v7454_v36 = vor.u32 %v9963_v27, %v7453_v23  ;;  %v9923_v1 = vld [vmem:[%s10704_s15 + $0x4bc] sm:$0xf] }
 0x118   : > { %2427 = vst [vmem:[#allocation2 + $0xc8] sm:$0xff] %v2395_v41  ;;  %v10011_v50 = vld [vmem:[%s10704_s15 + $0x774] sm:$0xf0]  ;;  %v7134_v55 = vor.u32 %v9883_v47, %v7133_v44  ;;  %v6879_v44 = vld [vmem:[%s10704_s15 + $0x178] sm:$0xf0] }
 0x119   : > { %2269 = vmatpush.bf16.msra.mxu0 %v6870_v58  ;;  %2297 = vmatpush.bf16.msra.mxu2 %v6874_v62  ;;  %v7646_v56 = vor.u32 %v10011_v50, %v7645_v48  ;;  %v7069_v58 = vld [vmem:[%s10704_s15 + $0x2b8] sm:$0xf]  ;;  %v9939_v47 = vld [vmem:[%s10704_s15 + $0x53c] sm:$0xf] }
 0x11a   : > { %v9995_v62 = vld [vmem:[%s10704_s15 + $0x6f4] sm:$0xf0]  ;;  %v7070_v3 = vor.u32 %v9867_v59, %v7069_v58  ;;  %v7391_v48 = vld [vmem:[%s10704_s15 + $0x578] sm:$0xf0]  ;;  %v368_v58 = vld [vmem:[#allocation2 + $0xe0] sm:$0xff] }
 0x11b   : > { %2283 = vmatpush.bf16.msra.mxu1 %v7382_v61  ;;  %2311 = vmatpush.bf16.msra.mxu3 %v7386_v4  ;;  %v7650_v61 = vor.u32 %v10003_v53, %v7647_v54  ;;  %v7582_v4 = vor.u32 %v9995_v62, %v7581_v60  ;;  %v7390_v53 = vor.u32 %v9947_v40, %v7389_v39  ;;  %v9795_v62 = vld [vmem:[%s10704_s15 + $0xbc] sm:$0xf]  ;;  %v9787_v8 = vld [vmem:[%s10704_s15 + $0x74] sm:$0xf0] }
 0x11c   : > { %v7394_v60 = vor.u32 %v9939_v47, %v7391_v48  ;;  %v7327_v2 = vld [vmem:[%s10704_s15 + $0x4f8] sm:$0xf0]  ;;  %v6818_v7 = vor.u32 %v9795_v62, %v6815_v63  ;;  %v9915_v10 = vld [vmem:[%s10704_s15 + $0x474] sm:$0xf0] }
 0x11d   : > { %2270 = vmatpush.bf16.msra.mxu0 %v6806_v12  ;;  %2298 = vmatpush.bf16.msra.mxu2 %v6810_v19  ;;  %v9843_v12 = vld [vmem:[%s10704_s15 + $0x23c] sm:$0xf] }
 0x11e   : > { %v7010_v21 = vor.u32 %v9843_v12, %v7007_v13  ;;  %v7330_v13 = vor.u32 %v9923_v1, %v7327_v2  ;;  %v9779_v14 = vld [vmem:[%s10704_s15 + $0x3c] sm:$0xf]  ;;  %v358_v2 = vld [vmem:[#allocation2 + $0xe8] sm:$0xff] }
 0x11f   : > { %2284 = vmatpush.bf16.msra.mxu1 %v7318_v17  ;;  %2312 = vmatpush.bf16.msra.mxu3 %v7322_v24  ;;  %v6941_v17 = vld [vmem:[%s10704_s15 + $0x1b8] sm:$0xf]  ;;  %v352_v24 = vld [vmem:[#allocation2 + $0x50] sm:$0xff]  ;;  %v6751_v15 = vld [vmem:[%s10704_s15 + $0x78] sm:$0xf0] }
 0x121   : > { %2271 = vmatpush.bf16.msra.mxu0 %v6742_v33  ;;  %2299 = vmatpush.bf16.msra.mxu2 %v6746_v38  ;;  %v2049_v19 = vpop.f32.mrf.mxu0  ;;  %v6942_v33 = vor.u32 %v9835_v22, %v6941_v17  ;;  %v9819_v38 = vld [vmem:[%s10704_s15 + $0x174] sm:$0xf0] }
 0x122   : > { %v6878_v50 = vor.u32 %v9819_v38, %v6877_v34  ;;  %v370_v38 = vld [vmem:[#allocation2 + $0x70] sm:$0xff] }
 0x123   : > { %2285 = vmatpush.bf16.msra.mxu1 %v7254_v37  ;;  %2313 = vmatpush.bf16.msra.mxu3 %v7258_v42  ;;  %v2063_v25 = vpop.f32.mrf.mxu1  ;;  %v6946_v37 = vor.u32 %v9827_v28, %v6943_v29  ;;  %v7458_v42 = vor.u32 %v9955_v31, %v7455_v32  ;;  %v354_v28 = vld [vmem:[#allocation2 + $0x30] sm:$0xff] }
 0x124   : > { %2300 = vmatmul.bf16.vlgmr.msra.gmra.mxu2 %v10802_v11  ;;  %2272 = vmatmul.bf16.vlgmr.msra.gmra.mxu0 %v10802_v11  ;;  %v2064_v30 = vadd.f32 %v2063_v25, %v2049_v19  ;;  %v9907_v19 = vld [vmem:[%s10704_s15 + $0x43c] sm:$0xf] }
 0x125   : > { %2320 = vmatpush.bf16.msrb.mxu0 %v7198_v43  ;;  %2348 = vmatpush.bf16.msrb.mxu2 %v7202_v46  ;;  %v9811_v43 = vld [vmem:[%s10704_s15 + $0x13c] sm:$0xf] }
 0x126   : > { %2314 = vmatmul.bf16.vlgmr.msra.gmra.mxu3 %v10809_v18  ;;  %2286 = vmatmul.bf16.vlgmr.msra.gmra.mxu1 %v10809_v18  ;;  %v2380_v35 = vadd.f32 %v2064_v30, %v352_v24  ;;  %v6882_v54 = vor.u32 %v9811_v43, %v6879_v44  ;;  %v6754_v24 = vor.u32 %v9779_v14, %v6751_v15 }
 0x127   : > { %2334 = vmatpush.bf16.msrb.mxu1 %v7710_v45  ;;  %2362 = vmatpush.bf16.msrb.mxu3 %v7714_v49  ;;  %v2077_v41 = vpop.f32.mrf.mxu2  ;;  %v353_v45 = vld [vmem:[#allocation2 + $0x68] sm:$0xff] }
 0x128   : > { %2412 = vst [vmem:[#allocation2 + $0x50] sm:$0xff] %v2380_v35 }
 0x129   : > { %2321 = vmatpush.bf16.msrb.mxu0 %v7134_v55  ;;  %2349 = vmatpush.bf16.msrb.mxu2 %v7138_v57  ;;  %v2091_v46 = vpop.f32.mrf.mxu3  ;;  %v2051_v52 = vpop.f32.mrf.mxu0  ;;  %v9803_v55 = vld [vmem:[%s10704_s15 + $0xf4] sm:$0xf0] }
 0x12a   : > { %v2092_v49 = vadd.f32 %v2091_v46, %v2077_v41  ;;  %v356_v46 = vld [vmem:[#allocation2 + $0x80] sm:$0xff] }
 0x12b   : > { %2335 = vmatpush.bf16.msrb.mxu1 %v7646_v56  ;;  %2363 = vmatpush.bf16.msrb.mxu3 %v7650_v61  ;;  %v7325_v56 = vld [vmem:[%s10704_s15 + $0x4b8] sm:$0xf]  ;;  %v2065_v59 = vpop.f32.mrf.mxu1 }
 0x12c   : > { %v2381_v57 = vadd.f32 %v2092_v49, %v353_v45  ;;  %v9931_v61 = vld [vmem:[%s10704_s15 + $0x4f4] sm:$0xf0]  ;;  %v2066_v0 = vadd.f32 %v2065_v59, %v2051_v52 }
 0x12d   : > { %2322 = vmatpush.bf16.msrb.mxu0 %v7070_v3  ;;  %2350 = vmatpush.bf16.msrb.mxu2 %v7074_v5  ;;  %v6814_v3 = vor.u32 %v9803_v55, %v6813_v51  ;;  %v7326_v6 = vor.u32 %v9931_v61, %v7325_v56  ;;  %v357_v51 = vld [vmem:[#allocation2 + $0x88] sm:$0xff]  ;;  %v373_v61 = vld [vmem:[#allocation2 + $0xd0] sm:$0xff] }
 0x12e   : > { %2413 = vst [vmem:[#allocation2 + $0x68] sm:$0xff] %v2381_v57  ;;  %v2396_v5 = vadd.f32 %v2066_v0, %v368_v58  ;;  %v372_v56 = vld [vmem:[#allocation2 + $0xa8] sm:$0xff] }
 0x12f   : > { %2336 = vmatpush.bf16.msrb.mxu1 %v7582_v4  ;;  %2364 = vmatpush.bf16.msrb.mxu3 %v7586_v9  ;;  %v6749_v4 = vld [vmem:[%s10704_s15 + $0x38] sm:$0xf]  ;;  %v2079_v12 = vpop.f32.mrf.mxu2 }
 0x130   : > { %v7261_v9 = vld [vmem:[%s10704_s15 + $0x438] sm:$0xf]  ;;  %2428 = vst [vmem:[#allocation2 + $0xe0] sm:$0xff] %v2396_v5  ;;  %v6750_v22 = vor.u32 %v9787_v8, %v6749_v4 }
 0x131   : > { %2323 = vmatpush.bf16.msrb.mxu0 %v7006_v16  ;;  %2351 = vmatpush.bf16.msrb.mxu2 %v7010_v21  ;;  %v369_v16 = vld [vmem:[#allocation2 + $0x90] sm:$0xff]  ;;  %v2093_v17 = vpop.f32.mrf.mxu3  ;;  %v7262_v23 = vor.u32 %v9915_v10, %v7261_v9 }
 0x132   : > { %v2094_v21 = vadd.f32 %v2093_v17, %v2079_v12 }
 0x133   : > { %2337 = vmatpush.bf16.msrb.mxu1 %v7518_v20  ;;  %2365 = vmatpush.bf16.msrb.mxu3 %v7522_v26  ;;  %v7263_v20 = vld [vmem:[%s10704_s15 + $0x478] sm:$0xf0] }
 0x134   : > { %v2397_v25 = vadd.f32 %v2094_v21, %v369_v16  ;;  %v7266_v26 = vor.u32 %v9907_v19, %v7263_v20  ;;  %v375_v19 = vld [vmem:[#allocation2 + $0x28] sm:$0xff] }
 0x135   : > { %2324 = vmatpush.bf16.msrb.mxu0 %v6942_v33  ;;  %2352 = vmatpush.bf16.msrb.mxu2 %v6946_v37  ;;  %v355_v33 = vld [vmem:[#allocation2 + $0x48] sm:$0xff] }
 0x136   : > { %2429 = vst [vmem:[#allocation2 + $0x90] sm:$0xff] %v2397_v25 }
 0x137   : > { %2338 = vmatpush.bf16.msrb.mxu1 %v7454_v36  ;;  %2366 = vmatpush.bf16.msrb.mxu3 %v7458_v42 }
 0x139   : > { %2325 = vmatpush.bf16.msrb.mxu0 %v6878_v50  ;;  %2353 = vmatpush.bf16.msrb.mxu2 %v6882_v54 }
 0x13b   : > { %2339 = vmatpush.bf16.msrb.mxu1 %v7390_v53  ;;  %2367 = vmatpush.bf16.msrb.mxu3 %v7394_v60 }
 0x13d   : > { %2326 = vmatpush.bf16.msrb.mxu0 %v6814_v3  ;;  %2354 = vmatpush.bf16.msrb.mxu2 %v6818_v7  ;;  %v359_v7 = vld [vmem:[#allocation2 + $0xb8] sm:$0xff] }
 0x13f   : > { %2340 = vmatpush.bf16.msrb.mxu1 %v7326_v6  ;;  %2368 = vmatpush.bf16.msrb.mxu3 %v7330_v13  ;;  %v374_v13 = vld [vmem:[#allocation2 + $0x10] sm:$0xff] }
 0x141   : > { %2327 = vmatpush.bf16.msrb.mxu0 %v6750_v22  ;;  %2355 = vmatpush.bf16.msrb.mxu2 %v6754_v24  ;;  %v2105_v27 = vpop.f32.mrf.mxu0  ;;  %v360_v24 = vld [vmem:[#allocation2 + $0x60] sm:$0xff] }
 0x143   : > { %2341 = vmatpush.bf16.msrb.mxu1 %v7262_v23  ;;  %2369 = vmatpush.bf16.msrb.mxu3 %v7266_v26  ;;  %v2119_v29 = vpop.f32.mrf.mxu1 }
 0x144   : > { %2328 = vmatmul.bf16.vlgmr.msrb.gmra.mxu0 %v10802_v11  ;;  %2356 = vmatmul.bf16.vlgmr.msrb.gmra.mxu2 %v10802_v11  ;;  %v2120_v30 = vadd.f32 %v2119_v29, %v2105_v27  ;;  %v361_v29 = vld [vmem:[#allocation2 + $0xf0] sm:$0xff] }
 0x146   : > { %2342 = vmatmul.bf16.vlgmr.msrb.gmra.mxu1 %v10809_v18  ;;  %2370 = vmatmul.bf16.vlgmr.msrb.gmra.mxu3 %v10809_v18  ;;  %v2382_v31 = vadd.f32 %v2120_v30, %v354_v28  ;;  %v371_v18 = vld [vmem:[#allocation2 + $0xc0] sm:$0xff] }
 0x147   : > { %v2133_v32 = vpop.f32.mrf.mxu2 }
 0x148   : > { %2414 = vst [vmem:[#allocation2 + $0x30] sm:$0xff] %v2382_v31 }
 0x149   : > { %v2147_v34 = vpop.f32.mrf.mxu3  ;;  %v2107_v36 = vpop.f32.mrf.mxu0 }
 0x14a   : > { %v2148_v35 = vadd.f32 %v2147_v34, %v2133_v32  ;;  %v376_v34 = vld [vmem:[#allocation2 + $0xa0] sm:$0xff] }
 0x14b   : > { %v2121_v39 = vpop.f32.mrf.mxu1 }
 0x14c   : > { %v2383_v37 = vadd.f32 %v2148_v35, %v355_v33  ;;  %v2122_v40 = vadd.f32 %v2121_v39, %v2107_v36  ;;  %v377_v39 = vld [vmem:[#allocation2 + $0xf8] sm:$0xff] }
 0x14e   : > { %2415 = vst [vmem:[#allocation2 + $0x48] sm:$0xff] %v2383_v37  ;;  %v2398_v41 = vadd.f32 %v2122_v40, %v370_v38 }
 0x14f   : > { %v2135_v11 = vpop.f32.mrf.mxu2 }
 0x150   : > { %2430 = vst [vmem:[#allocation2 + $0x70] sm:$0xff] %v2398_v41 }
 0x151   : > { %v2149_v42 = vpop.f32.mrf.mxu3 }
 0x152   : > { %v2150_v43 = vadd.f32 %v2149_v42, %v2135_v11  ;;  %v362_v42 = vld [vmem:[#allocation2 + $0x8] sm:$0xff] }
 0x154   : > { %v2399_v44 = vadd.f32 %v2150_v43, %v371_v18 }
 0x156   : > { %2431 = vst [vmem:[#allocation2 + $0xc0] sm:$0xff] %v2399_v44 }
 0x161   : > { %v2161_v45 = vpop.f32.mrf.mxu0 }
 0x163   : > { %v2175_v47 = vpop.f32.mrf.mxu1 }
 0x164   : > { %v2176_v48 = vadd.f32 %v2175_v47, %v2161_v45  ;;  %v363_v47 = vld [vmem:[#allocation2 + $0x78] sm:$0xff] }
 0x166   : > { %v2384_v49 = vadd.f32 %v2176_v48, %v356_v46 }
 0x167   : > { %v2189_v50 = vpop.f32.mrf.mxu2 }
 0x168   : > { %2416 = vst [vmem:[#allocation2 + $0x80] sm:$0xff] %v2384_v49 }
 0x169   : > { %v2203_v52 = vpop.f32.mrf.mxu3  ;;  %v2163_v54 = vpop.f32.mrf.mxu0 }
 0x16a   : > { %v2204_v53 = vadd.f32 %v2203_v52, %v2189_v50 }
 0x16b   : > { %v2177_v57 = vpop.f32.mrf.mxu1 }
 0x16c   : > { %v2385_v55 = vadd.f32 %v2204_v53, %v357_v51  ;;  %v2178_v58 = vadd.f32 %v2177_v57, %v2163_v54  ;;  %v378_v51 = vld [vmem:[#allocation2 + $0x20] sm:$0xff]  ;;  %v379_v57 = vld [vmem:[#allocation2 + $0x98] sm:$0xff] }
 0x16e   : > { %2417 = vst [vmem:[#allocation2 + $0x88] sm:$0xff] %v2385_v55  ;;  %v2400_v59 = vadd.f32 %v2178_v58, %v372_v56 }
 0x16f   : > { %v2191_v60 = vpop.f32.mrf.mxu2 }
 0x170   : > { %2432 = vst [vmem:[#allocation2 + $0xa8] sm:$0xff] %v2400_v59 }
 0x171   : > { %v2205_v62 = vpop.f32.mrf.mxu3 }
 0x172   : > { %v2206_v63 = vadd.f32 %v2205_v62, %v2191_v60 }
 0x174   : > { %v2401_v0 = vadd.f32 %v2206_v63, %v373_v61 }
 0x176   : > { %2433 = vst [vmem:[#allocation2 + $0xd0] sm:$0xff] %v2401_v0 }
 0x181   : > { %v2217_v1 = vpop.f32.mrf.mxu0 }
 0x183   : > { %v2231_v3 = vpop.f32.mrf.mxu1 }
 0x184   : > { %v2232_v4 = vadd.f32 %v2231_v3, %v2217_v1 }
 0x186   : > { %v2386_v5 = vadd.f32 %v2232_v4, %v358_v2 }
 0x187   : > { %v2245_v6 = vpop.f32.mrf.mxu2 }
 0x188   : > { %2418 = vst [vmem:[#allocation2 + $0xe8] sm:$0xff] %v2386_v5 }
 0x189   : > { %v2259_v8 = vpop.f32.mrf.mxu3  ;;  %v2219_v10 = vpop.f32.mrf.mxu0 }
 0x18a   : > { %v2260_v9 = vadd.f32 %v2259_v8, %v2245_v6 }
 0x18b   : > { %v2233_v14 = vpop.f32.mrf.mxu1 }
 0x18c   : > { %v2387_v12 = vadd.f32 %v2260_v9, %v359_v7  ;;  %v2234_v15 = vadd.f32 %v2233_v14, %v2219_v10 }
 0x18e   : > { %2419 = vst [vmem:[#allocation2 + $0xb8] sm:$0xff] %v2387_v12  ;;  %v2402_v16 = vadd.f32 %v2234_v15, %v374_v13 }
 0x18f   : > { %v2247_v17 = vpop.f32.mrf.mxu2 }
 0x190   : > { %2434 = vst [vmem:[#allocation2 + $0x10] sm:$0xff] %v2402_v16 }
 0x191   : > { %v2261_v20 = vpop.f32.mrf.mxu3 }
 0x192   : > { %v2262_v21 = vadd.f32 %v2261_v20, %v2247_v17 }
 0x194   : > { %v2403_v22 = vadd.f32 %v2262_v21, %v375_v19 }
 0x196   : > { %2435 = vst [vmem:[#allocation2 + $0x28] sm:$0xff] %v2403_v22 }
 0x1a1   : > { %v2273_v23 = vpop.f32.mrf.mxu0 }
 0x1a3   : > { %v2287_v25 = vpop.f32.mrf.mxu1 }
 0x1a4   : > { %v2288_v26 = vadd.f32 %v2287_v25, %v2273_v23 }
 0x1a6   : > { %v2388_v27 = vadd.f32 %v2288_v26, %v360_v24 }
 0x1a7   : > { %v2301_v28 = vpop.f32.mrf.mxu2 }
 0x1a8   : > { %2420 = vst [vmem:[#allocation2 + $0x60] sm:$0xff] %v2388_v27 }
 0x1a9   : > { %v2315_v30 = vpop.f32.mrf.mxu3  ;;  %v2275_v32 = vpop.f32.mrf.mxu0 }
 0x1aa   : > { %v2316_v31 = vadd.f32 %v2315_v30, %v2301_v28 }
 0x1ab   : > { %v2289_v35 = vpop.f32.mrf.mxu1 }
 0x1ac   : > { %v2389_v33 = vadd.f32 %v2316_v31, %v361_v29  ;;  %v2290_v36 = vadd.f32 %v2289_v35, %v2275_v32 }
 0x1ae   : > { %2421 = vst [vmem:[#allocation2 + $0xf0] sm:$0xff] %v2389_v33  ;;  %v2404_v37 = vadd.f32 %v2290_v36, %v376_v34 }
 0x1af   : > { %v2303_v38 = vpop.f32.mrf.mxu2 }
 0x1b0   : > { %2436 = vst [vmem:[#allocation2 + $0xa0] sm:$0xff] %v2404_v37 }
 0x1b1   : > { %v2317_v40 = vpop.f32.mrf.mxu3 }
 0x1b2   : > { %v2318_v41 = vadd.f32 %v2317_v40, %v2303_v38 }
 0x1b4   : > { %v2405_v11 = vadd.f32 %v2318_v41, %v377_v39 }
 0x1b6   : > { %2437 = vst [vmem:[#allocation2 + $0xf8] sm:$0xff] %v2405_v11 }
 0x1c1   : > { %v2329_v18 = vpop.f32.mrf.mxu0 }
 0x1c3   : > { %v2343_v43 = vpop.f32.mrf.mxu1 }
 0x1c4   : > { %v2344_v44 = vadd.f32 %v2343_v43, %v2329_v18 }
 0x1c6   : > { %v2390_v45 = vadd.f32 %v2344_v44, %v362_v42 }
 0x1c7   : > { %v2357_v46 = vpop.f32.mrf.mxu2 }
 0x1c8   : > { %2422 = vst [vmem:[#allocation2 + $0x8] sm:$0xff] %v2390_v45 }
 0x1c9   : > { %v2371_v48 = vpop.f32.mrf.mxu3  ;;  %v2331_v49 = vpop.f32.mrf.mxu0 }
 0x1ca   : > { %v2372_v50 = vadd.f32 %v2371_v48, %v2357_v46 }
 0x1cb   : > { %v2345_v52 = vpop.f32.mrf.mxu1 }
 0x1cc   : > { %v2346_v53 = vadd.f32 %v2345_v52, %v2331_v49  ;;  %v2391_v54 = vadd.f32 %v2372_v50, %v363_v47 }
 0x1ce   : > { %v2406_v55 = vadd.f32 %v2346_v53, %v378_v51  ;;  %2423 = vst [vmem:[#allocation2 + $0x78] sm:$0xff] %v2391_v54 }
 0x1cf   : > { %v2359_v56 = vpop.f32.mrf.mxu2 }
 0x1d0   : > { %2438 = vst [vmem:[#allocation2 + $0x20] sm:$0xff] %v2406_v55 }
 0x1d1   : > { %v2373_v58 = vpop.f32.mrf.mxu3 }
 0x1d2   : > { %v2374_v59 = vadd.f32 %v2373_v58, %v2359_v56  ;;  %2443 = sbr.rel (%p7715_p11) target bundleno = 1143 (0x477), region = 86 }
 0x1d4   : > { %v2407_v60 = vadd.f32 %v2374_v59, %v379_v57 }
 0x1d6   : > { %2439 = vst [vmem:[#allocation2 + $0x98] sm:$0xff] %v2407_v60 }
 0x1d7   : > { %v7830_v61 = vld [vmem:[%s14661_s3 + $0xe0] sm:$0xf]  ;;  %v10058_v62 = vld [vmem:[%s14661_s3 + $0xec] sm:$0xf0] }
 0x1d8   : > { %v7958_v63 = vld [vmem:[%s14661_s3 + $0x1e0] sm:$0xf]  ;;  %v7831_v0 = vor.u32 %v10058_v62, %v7830_v61  ;;  %v10090_v1 = vld [vmem:[%s14661_s3 + $0x1ec] sm:$0xf0] }
 0x1d9   : > { %v8086_v2 = vld [vmem:[%s14661_s3 + $0x2e0] sm:$0xf]  ;;  %v10122_v3 = vld [vmem:[%s14661_s3 + $0x2ec] sm:$0xf0]  ;;  %v7959_v4 = vor.u32 %v10090_v1, %v7958_v63 }
 0x1da   : > { %v8087_v5 = vor.u32 %v10122_v3, %v8086_v2  ;;  %v8214_v6 = vld [vmem:[%s14661_s3 + $0x3e0] sm:$0xf]  ;;  %v10154_v7 = vld [vmem:[%s14661_s3 + $0x3ec] sm:$0xf0]  ;;  %5674 = vmatpush.bf16.msra.mxu0 %v7831_v0 }
 0x1db   : > { %v7814_v8 = vld [vmem:[%s14661_s3 + $0xc0] sm:$0xf]  ;;  %v8215_v9 = vor.u32 %v10154_v7, %v8214_v6  ;;  %v10054_v10 = vld [vmem:[%s14661_s3 + $0xcc] sm:$0xf0]  ;;  %5688 = vmatpush.bf16.msra.mxu1 %v7959_v4 }
 0x1dc   : > { %v7942_v12 = vld [vmem:[%s14661_s3 + $0x1c0] sm:$0xf]  ;;  %v10086_v13 = vld [vmem:[%s14661_s3 + $0x1cc] sm:$0xf0]  ;;  %5702 = vmatpush.bf16.msra.mxu2 %v8087_v5  ;;  %v7815_v14 = vor.u32 %v10054_v10, %v7814_v8 }
 0x1dd   : > { %v7943_v15 = vor.u32 %v10086_v13, %v7942_v12  ;;  %v8070_v16 = vld [vmem:[%s14661_s3 + $0x2c0] sm:$0xf]  ;;  %v10118_v17 = vld [vmem:[%s14661_s3 + $0x2cc] sm:$0xf0]  ;;  %5716 = vmatpush.bf16.msra.mxu3 %v8215_v9 }
 0x1de   : > { %v8198_v19 = vld [vmem:[%s14661_s3 + $0x3c0] sm:$0xf]  ;;  %v8071_v20 = vor.u32 %v10118_v17, %v8070_v16  ;;  %v10150_v21 = vld [vmem:[%s14661_s3 + $0x3cc] sm:$0xf0]  ;;  %5675 = vmatpush.bf16.msra.mxu0 %v7815_v14 }
 0x1df   : > { %v7798_v22 = vld [vmem:[%s14661_s3 + $0xa0] sm:$0xf]  ;;  %v10050_v23 = vld [vmem:[%s14661_s3 + $0xac] sm:$0xf0]  ;;  %v8199_v24 = vor.u32 %v10150_v21, %v8198_v19  ;;  %5689 = vmatpush.bf16.msra.mxu1 %v7943_v15 }
 0x1e0   : > { %v7926_v25 = vld [vmem:[%s14661_s3 + $0x1a0] sm:$0xf]  ;;  %v10082_v26 = vld [vmem:[%s14661_s3 + $0x1ac] sm:$0xf0]  ;;  %v7799_v28 = vor.u32 %v10050_v23, %v7798_v22  ;;  %5703 = vmatpush.bf16.msra.mxu2 %v8071_v20 }
 0x1e1   : > { %v8054_v27 = vld [vmem:[%s14661_s3 + $0x2a0] sm:$0xf]  ;;  %v10114_v29 = vld [vmem:[%s14661_s3 + $0x2ac] sm:$0xf0]  ;;  %v7927_v32 = vor.u32 %v10082_v26, %v7926_v25  ;;  %5717 = vmatpush.bf16.msra.mxu3 %v8199_v24 }
 0x1e2   : > { %v8182_v30 = vld [vmem:[%s14661_s3 + $0x3a0] sm:$0xf]  ;;  %v10146_v31 = vld [vmem:[%s14661_s3 + $0x3ac] sm:$0xf0]  ;;  %v8055_v33 = vor.u32 %v10114_v29, %v8054_v27  ;;  %5676 = vmatpush.bf16.msra.mxu0 %v7799_v28 }
 0x1e3   : > { %v7782_v34 = vld [vmem:[%s14661_s3 + $0x80] sm:$0xf]  ;;  %v10046_v35 = vld [vmem:[%s14661_s3 + $0x8c] sm:$0xf0]  ;;  %v8183_v37 = vor.u32 %v10146_v31, %v8182_v30  ;;  %5690 = vmatpush.bf16.msra.mxu1 %v7927_v32 }
 0x1e4   : > { %v7910_v36 = vld [vmem:[%s14661_s3 + $0x180] sm:$0xf]  ;;  %v10078_v38 = vld [vmem:[%s14661_s3 + $0x18c] sm:$0xf0]  ;;  %v7783_v18 = vor.u32 %v10046_v35, %v7782_v34  ;;  %5704 = vmatpush.bf16.msra.mxu2 %v8055_v33 }
 0x1e5   : > { %v8038_v39 = vld [vmem:[%s14661_s3 + $0x280] sm:$0xf]  ;;  %v10110_v40 = vld [vmem:[%s14661_s3 + $0x28c] sm:$0xf0]  ;;  %v7911_v42 = vor.u32 %v10078_v38, %v7910_v36  ;;  %5718 = vmatpush.bf16.msra.mxu3 %v8183_v37 }
 0x1e6   : > { %v8166_v41 = vld [vmem:[%s14661_s3 + $0x380] sm:$0xf]  ;;  %v10142_v11 = vld [vmem:[%s14661_s3 + $0x38c] sm:$0xf0]  ;;  %v8039_v43 = vor.u32 %v10110_v40, %v8038_v39  ;;  %5677 = vmatpush.bf16.msra.mxu0 %v7783_v18 }
 0x1e7   : > { %v7766_v44 = vld [vmem:[%s14661_s3 + $0x60] sm:$0xf]  ;;  %v10042_v45 = vld [vmem:[%s14661_s3 + $0x6c] sm:$0xf0]  ;;  %v8167_v47 = vor.u32 %v10142_v11, %v8166_v41  ;;  %5691 = vmatpush.bf16.msra.mxu1 %v7911_v42 }
 0x1e8   : > { %v7894_v46 = vld [vmem:[%s14661_s3 + $0x160] sm:$0xf]  ;;  %v10074_v48 = vld [vmem:[%s14661_s3 + $0x16c] sm:$0xf0]  ;;  %v7767_v53 = vor.u32 %v10042_v45, %v7766_v44  ;;  %5705 = vmatpush.bf16.msra.mxu2 %v8039_v43 }
 0x1e9   : > { %v8022_v49 = vld [vmem:[%s14661_s3 + $0x260] sm:$0xf]  ;;  %v10106_v50 = vld [vmem:[%s14661_s3 + $0x26c] sm:$0xf0]  ;;  %v7895_v54 = vor.u32 %v10074_v48, %v7894_v46  ;;  %5719 = vmatpush.bf16.msra.mxu3 %v8167_v47 }
 0x1ea   : > { %v8150_v51 = vld [vmem:[%s14661_s3 + $0x360] sm:$0xf]  ;;  %v10138_v52 = vld [vmem:[%s14661_s3 + $0x36c] sm:$0xf0]  ;;  %v8023_v55 = vor.u32 %v10106_v50, %v8022_v49  ;;  %5678 = vmatpush.bf16.msra.mxu0 %v7767_v53  ;;  %v2460_v53 = vld [vmem:[#allocation2 + $0x38] sm:$0xff] }
 0x1eb   : > { %v7750_v56 = vld [vmem:[%s14661_s3 + $0x40] sm:$0xf]  ;;  %v10038_v57 = vld [vmem:[%s14661_s3 + $0x4c] sm:$0xf0]  ;;  %v8151_v59 = vor.u32 %v10138_v52, %v8150_v51  ;;  %5692 = vmatpush.bf16.msra.mxu1 %v7895_v54 }
 0x1ec   : > { %v7878_v58 = vld [vmem:[%s14661_s3 + $0x140] sm:$0xf]  ;;  %v10070_v60 = vld [vmem:[%s14661_s3 + $0x14c] sm:$0xf0]  ;;  %v7751_v1 = vor.u32 %v10038_v57, %v7750_v56  ;;  %5706 = vmatpush.bf16.msra.mxu2 %v8023_v55 }
 0x1ed   : > { %v8006_v61 = vld [vmem:[%s14661_s3 + $0x240] sm:$0xf]  ;;  %v10102_v62 = vld [vmem:[%s14661_s3 + $0x24c] sm:$0xf0]  ;;  %v7879_v2 = vor.u32 %v10070_v60, %v7878_v58  ;;  %5720 = vmatpush.bf16.msra.mxu3 %v8151_v59  ;;  %v2446_v58 = vld [vmem:[#allocation2 + $0xd8] sm:$0xff] }
 0x1ee   : > { %v8134_v63 = vld [vmem:[%s14661_s3 + $0x340] sm:$0xf]  ;;  %v10134_v0 = vld [vmem:[%s14661_s3 + $0x34c] sm:$0xf0]  ;;  %v8007_v3 = vor.u32 %v10102_v62, %v8006_v61  ;;  %5679 = vmatpush.bf16.msra.mxu0 %v7751_v1 }
 0x1ef   : > { %v7734_v4 = vld [vmem:[%s14661_s3 + $0x20] sm:$0xf]  ;;  %v10034_v5 = vld [vmem:[%s14661_s3 + $0x2c] sm:$0xf0]  ;;  %v8135_v7 = vor.u32 %v10134_v0, %v8134_v63  ;;  %5693 = vmatpush.bf16.msra.mxu1 %v7879_v2 }
 0x1f0   : > { %v7862_v6 = vld [vmem:[%s14661_s3 + $0x120] sm:$0xf]  ;;  %v10066_v8 = vld [vmem:[%s14661_s3 + $0x12c] sm:$0xf0]  ;;  %v7735_v14 = vor.u32 %v10034_v5, %v7734_v4  ;;  %5707 = vmatpush.bf16.msra.mxu2 %v8007_v3 }
 0x1f1   : > { %v7990_v9 = vld [vmem:[%s14661_s3 + $0x220] sm:$0xf]  ;;  %v10098_v10 = vld [vmem:[%s14661_s3 + $0x22c] sm:$0xf0]  ;;  %v7863_v19 = vor.u32 %v10066_v8, %v7862_v6  ;;  %5721 = vmatpush.bf16.msra.mxu3 %v8135_v7 }
 0x1f2   : > { %v8118_v12 = vld [vmem:[%s14661_s3 + $0x320] sm:$0xf]  ;;  %v10130_v13 = vld [vmem:[%s14661_s3 + $0x32c] sm:$0xf0]  ;;  %v7991_v20 = vor.u32 %v10098_v10, %v7990_v9  ;;  %5680 = vmatpush.bf16.msra.mxu0 %v7735_v14  ;;  %v2461_v14 = vld [vmem:[#allocation2 + $0x58] sm:$0xff] }
 0x1f3   : > { %v7718_v15 = vld [vmem:[%s14661_s3] sm:$0xf]  ;;  %v10030_v16 = vld [vmem:[%s14661_s3 + $0xc] sm:$0xf0]  ;;  %v8119_v24 = vor.u32 %v10130_v13, %v8118_v12  ;;  %5694 = vmatpush.bf16.msra.mxu1 %v7863_v19 }
 0x1f4   : > { %v7846_v17 = vld [vmem:[%s14661_s3 + $0x100] sm:$0xf]  ;;  %v10062_v21 = vld [vmem:[%s14661_s3 + $0x10c] sm:$0xf0]  ;;  %v7719_v31 = vor.u32 %v10030_v16, %v7718_v15  ;;  %5708 = vmatpush.bf16.msra.mxu2 %v7991_v20 }
 0x1f5   : > { %v7974_v22 = vld [vmem:[%s14661_s3 + $0x200] sm:$0xf]  ;;  %v10094_v23 = vld [vmem:[%s14661_s3 + $0x20c] sm:$0xf0]  ;;  %v7847_v35 = vor.u32 %v10062_v21, %v7846_v17  ;;  %5722 = vmatpush.bf16.msra.mxu3 %v8119_v24  ;;  %v2447_v21 = vld [vmem:[#allocation2 + $0x18] sm:$0xff] }
 0x1f6   : > { %v8102_v25 = vld [vmem:[%s14661_s3 + $0x300] sm:$0xf]  ;;  %v10126_v26 = vld [vmem:[%s14661_s3 + $0x30c] sm:$0xf0]  ;;  %v7975_v36 = vor.u32 %v10094_v23, %v7974_v22  ;;  %5681 = vmatpush.bf16.msra.mxu0 %v7719_v31  ;;  %v2463_v22 = vld [vmem:[#allocation2 + $0xc8] sm:$0xff] }
 0x1f7   : > { %v8342_v27 = vld [vmem:[%s14661_s3 + $0x4e0] sm:$0xf]  ;;  %v10186_v28 = vld [vmem:[%s14661_s3 + $0x4ec] sm:$0xf0]  ;;  %v8103_v40 = vor.u32 %v10126_v26, %v8102_v25  ;;  %5695 = vmatpush.bf16.msra.mxu1 %v7847_v35 }
 0x1f8   : > { %v8470_v29 = vld [vmem:[%s14661_s3 + $0x5e0] sm:$0xf]  ;;  %v10218_v30 = vld [vmem:[%s14661_s3 + $0x5ec] sm:$0xf0]  ;;  %v8343_v41 = vor.u32 %v10186_v28, %v8342_v27  ;;  %5709 = vmatpush.bf16.msra.mxu2 %v7975_v36 }
 0x1f9   : > { %v8598_v32 = vld [vmem:[%s14661_s3 + $0x6e0] sm:$0xf]  ;;  %v10250_v33 = vld [vmem:[%s14661_s3 + $0x6ec] sm:$0xf0]  ;;  %v8471_v43 = vor.u32 %v10218_v30, %v8470_v29  ;;  %5723 = vmatpush.bf16.msra.mxu3 %v8103_v40 }
 0x1fa   : > { %v8726_v34 = vld [vmem:[%s14661_s3 + $0x7e0] sm:$0xf]  ;;  %v10282_v37 = vld [vmem:[%s14661_s3 + $0x7ec] sm:$0xf0]  ;;  %v8599_v44 = vor.u32 %v10250_v33, %v8598_v32  ;;  %5730 = vmatpush.bf16.msrb.mxu0 %v8343_v41 }
 0x1fb   : > { %v8326_v38 = vld [vmem:[%s14661_s3 + $0x4c0] sm:$0xf]  ;;  %v10182_v39 = vld [vmem:[%s14661_s3 + $0x4cc] sm:$0xf0]  ;;  %v8727_v48 = vor.u32 %v10282_v37, %v8726_v34  ;;  %5744 = vmatpush.bf16.msrb.mxu1 %v8471_v43 }
 0x1fc   : > { %v8454_v11 = vld [vmem:[%s14661_s3 + $0x5c0] sm:$0xf]  ;;  %v10214_v18 = vld [vmem:[%s14661_s3 + $0x5cc] sm:$0xf0]  ;;  %v8327_v55 = vor.u32 %v10182_v39, %v8326_v38  ;;  %5758 = vmatpush.bf16.msrb.mxu2 %v8599_v44 }
 0x1fd   : > { %v8582_v42 = vld [vmem:[%s14661_s3 + $0x6c0] sm:$0xf]  ;;  %v10246_v45 = vld [vmem:[%s14661_s3 + $0x6cc] sm:$0xf0]  ;;  %v8455_v61 = vor.u32 %v10214_v18, %v8454_v11  ;;  %5772 = vmatpush.bf16.msrb.mxu3 %v8727_v48 }
 0x1fe   : > { %v8710_v46 = vld [vmem:[%s14661_s3 + $0x7c0] sm:$0xf]  ;;  %v10278_v47 = vld [vmem:[%s14661_s3 + $0x7cc] sm:$0xf0]  ;;  %v8583_v62 = vor.u32 %v10246_v45, %v8582_v42  ;;  %5731 = vmatpush.bf16.msrb.mxu0 %v8327_v55 }
 0x1ff   : > { %v11505_v49 = vld [vmem:[%s14661_s3 + $0x4a0] sm:$0xf]  ;;  %v11510_v50 = vld [vmem:[%s14661_s3 + $0x4ac] sm:$0xf0]  ;;  %v8711_v63 = vor.u32 %v10278_v47, %v8710_v46  ;;  %5745 = vmatpush.bf16.msrb.mxu1 %v8455_v61 }
 0x200   : > { %v11515_v51 = vld [vmem:[%s14661_s3 + $0x5a0] sm:$0xf]  ;;  %v2444_v52 = vld [vmem:[#allocation2 + $0xb0] sm:$0xff]  ;;  %v8311_v8 = vor.u32 %v11510_v50, %v11505_v49  ;;  %5759 = vmatpush.bf16.msrb.mxu2 %v8583_v62 }
 0x201   : > { %v11520_v54 = vld [vmem:[%s14660_s2] sm:$0xff]  ;;  %v10210_v56 = vld [vmem:[%s14661_s3 + $0x5ac] sm:$0xf0]  ;;  %5773 = vmatpush.bf16.msrb.mxu3 %v8711_v63 }
 0x202   : > { %v2480_v57 = vperm.slane %v11520_v54, 0  ;;  %v2462_v59 = vld [vmem:[#allocation2 + $0x40] sm:$0xff]  ;;  %v2482_v60 = vperm.slane %v11520_v54, 2  ;;  %v10242_v1 = vld [vmem:[%s14661_s3 + $0x6ac] sm:$0xf0]  ;;  %v8439_v9 = vor.u32 %v10210_v56, %v11515_v51  ;;  %v2481_v15 = vperm.slane %v11520_v54, 1  ;;  %5732 = vmatpush.bf16.msrb.mxu0 %v8311_v8 }
 0x203   : > { %v8566_v0 = vld [vmem:[%s14661_s3 + $0x6a0] sm:$0xf]  ;;  %v10274_v3 = vld [vmem:[%s14661_s3 + $0x7ac] sm:$0xf0]  ;;  %v2483_v28 = vperm.slane %v11520_v54, 3 }
 0x204   : > { %v8694_v2 = vld [vmem:[%s14661_s3 + $0x7a0] sm:$0xf]  ;;  %v2512_v4 = vadd.f32 %v2480_v57, %v2444_v52  ;;  %v2528_v5 = vadd.f32 %v2480_v57, %v2460_v53  ;;  %v2514_v6 = vadd.f32 %v2482_v60, %v2446_v58  ;;  %v2530_v7 = vadd.f32 %v2482_v60, %v2462_v59  ;;  %v10174_v12 = vld [vmem:[%s14661_s3 + $0x48c] sm:$0xf0]  ;;  %5746 = vmatpush.bf16.msrb.mxu1 %v8439_v9 }
 0x205   : > { %v8294_v10 = vld [vmem:[%s14661_s3 + $0x480] sm:$0xf]  ;;  %v8567_v23 = vor.u32 %v10242_v1, %v8566_v0  ;;  %v10206_v25 = vld [vmem:[%s14661_s3 + $0x58c] sm:$0xf0]  ;;  %v2529_v27 = vadd.f32 %v2481_v15, %v2461_v14  ;;  %v8695_v29 = vor.u32 %v10274_v3, %v8694_v2  ;;  %v2515_v38 = vadd.f32 %v2483_v28, %v2447_v21 }
 0x206   : > { %v2445_v13 = vld [vmem:[#allocation2] sm:$0xff]  ;;  %v2544_v16 = vmax.f32 %v2512_v4, 0.0  ;;  %v2560_v17 = vmax.f32 %v2528_v5, 0.0  ;;  %v2546_v19 = vmax.f32 %v2514_v6, 0.0  ;;  %v2562_v20 = vmax.f32 %v2530_v7, 0.0 }
 0x207   : > { %v8422_v24 = vld [vmem:[%s14661_s3 + $0x580] sm:$0xf]  ;;  %v2513_v26 = vadd.f32 %v2481_v15, %v2445_v13  ;;  %v10238_v31 = vld [vmem:[%s14661_s3 + $0x68c] sm:$0xf0]  ;;  %v2561_v37 = vmax.f32 %v2529_v27, 0.0  ;;  %v2531_v39 = vadd.f32 %v2483_v28, %v2463_v22  ;;  %v8295_v40 = vor.u32 %v10174_v12, %v8294_v10  ;;  %5760 = vmatpush.bf16.msrb.mxu2 %v8567_v23  ;;  %5774 = vmatpush.bf16.msrb.mxu3 %v8695_v29 }
 0x208   : > { %v8550_v30 = vld [vmem:[%s14661_s3 + $0x680] sm:$0xf]  ;;  %v11562_v32 = vpack.c.bf16 %v2560_v17, %v2544_v16  ;;  %v11564_v33 = vpack.c.bf16 %v2562_v20, %v2546_v19  ;;  %v10270_v35 = vld [vmem:[%s14661_s3 + $0x78c] sm:$0xf0]  ;;  %v8423_v41 = vor.u32 %v10206_v25, %v8422_v24  ;;  %v2547_v45 = vmax.f32 %v2515_v38, 0.0  ;;  %v2449_v24 = vld [vmem:[#allocation2 + $0x68] sm:$0xff] }
 0x209   : > { %v8678_v34 = vld [vmem:[%s14661_s3 + $0x780] sm:$0xf]  ;;  %v2545_v36 = vmax.f32 %v2513_v26, 0.0  ;;  %v8551_v18 = vor.u32 %v10238_v31, %v8550_v30  ;;  %v10170_v42 = vld [vmem:[%s14661_s3 + $0x46c] sm:$0xf0]  ;;  %v2563_v46 = vmax.f32 %v2531_v39, 0.0  ;;  %5733 = vmatpush.bf16.msrb.mxu0 %v8295_v40 }
 0x20a   : > { %5710 = vmatmul.bf16.vlgmr.msra.gmra.mxu2 %v11564_v33  ;;  %v8278_v11 = vld [vmem:[%s14661_s3 + $0x460] sm:$0xf]  ;;  %v8679_v47 = vor.u32 %v10270_v35, %v8678_v34  ;;  %5682 = vmatmul.bf16.vlgmr.msra.gmra.mxu0 %v11562_v32  ;;  %v10202_v48 = vld [vmem:[%s14661_s3 + $0x56c] sm:$0xf0]  ;;  %v2484_v12 = vperm.slane %v11520_v54, 4  ;;  %v2486_v20 = vperm.slane %v11520_v54, 6 }
 0x20b   : > { %v8406_v43 = vld [vmem:[%s14661_s3 + $0x560] sm:$0xf]  ;;  %v11582_v44 = vpack.c.bf16 %v2561_v37, %v2545_v36  ;;  %v10234_v50 = vld [vmem:[%s14661_s3 + $0x66c] sm:$0xf0]  ;;  %v11601_v53 = vpack.c.bf16 %v2563_v46, %v2547_v45  ;;  %v8279_v55 = vor.u32 %v10170_v42, %v8278_v11  ;;  %5747 = vmatpush.bf16.msrb.mxu1 %v8423_v41  ;;  %5761 = vmatpush.bf16.msrb.mxu2 %v8551_v18  ;;  %v2485_v21 = vperm.slane %v11520_v54, 5  ;;  %v2451_v30 = vld [vmem:[#allocation2 + $0x48] sm:$0xff] }
 0x20c   : > { %v8534_v49 = vld [vmem:[%s14661_s3 + $0x660] sm:$0xf]  ;;  %v10266_v52 = vld [vmem:[%s14661_s3 + $0x76c] sm:$0xf0]  ;;  %v8407_v59 = vor.u32 %v10202_v48, %v8406_v43  ;;  %5775 = vmatpush.bf16.msrb.mxu3 %v8679_v47  ;;  %v2487_v26 = vperm.slane %v11520_v54, 7 }
 0x20d   : > { %v8662_v51 = vld [vmem:[%s14661_s3 + $0x760] sm:$0xf]  ;;  %5696 = vmatmul.bf16.vlgmr.msra.gmra.mxu1 %v11582_v44  ;;  %v10166_v57 = vld [vmem:[%s14661_s3 + $0x44c] sm:$0xf0]  ;;  %v8535_v60 = vor.u32 %v10234_v50, %v8534_v49  ;;  %5724 = vmatmul.bf16.vlgmr.msra.gmra.mxu3 %v11601_v53  ;;  %v2517_v42 = vadd.f32 %v2485_v21, %v2449_v24 }
 0x20e   : > { %v8262_v56 = vld [vmem:[%s14661_s3 + $0x440] sm:$0xf]  ;;  %v10198_v61 = vld [vmem:[%s14661_s3 + $0x54c] sm:$0xf0]  ;;  %v8663_v0 = vor.u32 %v10266_v52, %v8662_v51  ;;  %5734 = vmatpush.bf16.msrb.mxu0 %v8279_v55  ;;  %v2519_v49 = vadd.f32 %v2487_v26, %v2451_v30 }
 0x20f   : > { %v8390_v58 = vld [vmem:[%s14661_s3 + $0x540] sm:$0xf]  ;;  %v10230_v63 = vld [vmem:[%s14661_s3 + $0x64c] sm:$0xf0]  ;;  %v8263_v7 = vor.u32 %v10166_v57, %v8262_v56  ;;  %5748 = vmatpush.bf16.msrb.mxu1 %v8407_v59  ;;  %5762 = vmatpush.bf16.msrb.mxu2 %v8535_v60 }
 0x210   : > { %v8518_v62 = vld [vmem:[%s14661_s3 + $0x640] sm:$0xf]  ;;  %v10262_v2 = vld [vmem:[%s14661_s3 + $0x74c] sm:$0xf0]  ;;  %v8391_v13 = vor.u32 %v10198_v61, %v8390_v58  ;;  %5776 = vmatpush.bf16.msrb.mxu3 %v8663_v0 }
 0x211   : > { %v8646_v1 = vld [vmem:[%s14661_s3 + $0x740] sm:$0xf]  ;;  %v10162_v4 = vld [vmem:[%s14661_s3 + $0x42c] sm:$0xf0]  ;;  %v8519_v14 = vor.u32 %v10230_v63, %v8518_v62 }
 0x212   : > { %v8246_v3 = vld [vmem:[%s14661_s3 + $0x420] sm:$0xf]  ;;  %v10194_v6 = vld [vmem:[%s14661_s3 + $0x52c] sm:$0xf0]  ;;  %v8647_v22 = vor.u32 %v10262_v2, %v8646_v1  ;;  %5735 = vmatpush.bf16.msrb.mxu0 %v8263_v7  ;;  %v2549_v2 = vmax.f32 %v2517_v42, 0.0 }
 0x213   : > { %v11637_v5 = vld [vmem:[%s14661_s3 + $0x520] sm:$0xf]  ;;  %v10226_v9 = vld [vmem:[%s14661_s3 + $0x62c] sm:$0xf0]  ;;  %v8247_v27 = vor.u32 %v10162_v4, %v8246_v3  ;;  %5749 = vmatpush.bf16.msrb.mxu1 %v8391_v13  ;;  %5763 = vmatpush.bf16.msrb.mxu2 %v8519_v14 }
 0x214   : > { %v8502_v8 = vld [vmem:[%s14661_s3 + $0x620] sm:$0xf]  ;;  %v2448_v10 = vld [vmem:[#allocation2 + $0x50] sm:$0xff]  ;;  %v8375_v28 = vor.u32 %v10194_v6, %v11637_v5  ;;  %5777 = vmatpush.bf16.msrb.mxu3 %v8647_v22  ;;  %v2551_v6 = vmax.f32 %v2519_v49, 0.0 }
 0x215   : > { %v8630_v15 = vld [vmem:[%s14661_s3 + $0x720] sm:$0xf]  ;;  %v10258_v16 = vld [vmem:[%s14661_s3 + $0x72c] sm:$0xf0]  ;;  %v8503_v34 = vor.u32 %v10226_v9, %v8502_v8  ;;  %v2516_v37 = vadd.f32 %v2484_v12, %v2448_v10 }
 0x216   : > { %v2464_v17 = vld [vmem:[#allocation2 + $0xe0] sm:$0xff]  ;;  %v2450_v19 = vld [vmem:[#allocation2 + $0x30] sm:$0xff]  ;;  %v8631_v45 = vor.u32 %v10258_v16, %v8630_v15  ;;  %5736 = vmatpush.bf16.msrb.mxu0 %v8247_v27 }
 0x217   : > { %v2466_v23 = vld [vmem:[#allocation2 + $0x70] sm:$0xff]  ;;  %v8230_v29 = vld [vmem:[%s14661_s3 + $0x400] sm:$0xf]  ;;  %v2532_v38 = vadd.f32 %v2484_v12, %v2464_v17  ;;  %v2518_v39 = vadd.f32 %v2486_v20, %v2450_v19  ;;  %v2548_v61 = vmax.f32 %v2516_v37, 0.0  ;;  %5750 = vmatpush.bf16.msrb.mxu1 %v8375_v28  ;;  %5764 = vmatpush.bf16.msrb.mxu2 %v8503_v34 }
 0x218   : > { %v2465_v25 = vld [vmem:[#allocation2 + $0x90] sm:$0xff]  ;;  %v2467_v31 = vld [vmem:[#allocation2 + $0xc0] sm:$0xff]  ;;  %v2534_v18 = vadd.f32 %v2486_v20, %v2466_v23  ;;  %5778 = vmatpush.bf16.msrb.mxu3 %v8631_v45 }
 0x219   : > { %v10158_v35 = vld [vmem:[%s14661_s3 + $0x40c] sm:$0xf0]  ;;  %v8358_v36 = vld [vmem:[%s14661_s3 + $0x500] sm:$0xf]  ;;  %v2533_v43 = vadd.f32 %v2485_v21, %v2465_v25  ;;  %v2535_v50 = vadd.f32 %v2487_v26, %v2467_v31  ;;  %v2564_v62 = vmax.f32 %v2532_v38, 0.0  ;;  %v2550_v0 = vmax.f32 %v2518_v39, 0.0 }
 0x21a   : > { %v10190_v54 = vld [vmem:[%s14661_s3 + $0x50c] sm:$0xf0]  ;;  %v8486_v40 = vld [vmem:[%s14661_s3 + $0x600] sm:$0xf]  ;;  %v8231_v51 = vor.u32 %v10158_v35, %v8230_v29  ;;  %v2566_v1 = vmax.f32 %v2534_v18, 0.0 }
 0x21b   : > { %v10222_v41 = vld [vmem:[%s14661_s3 + $0x60c] sm:$0xf0]  ;;  %v8614_v11 = vld [vmem:[%s14661_s3 + $0x700] sm:$0xf]  ;;  %v8359_v57 = vor.u32 %v10190_v54, %v8358_v36  ;;  %v2565_v3 = vmax.f32 %v2533_v43, 0.0  ;;  %v2567_v7 = vmax.f32 %v2535_v50, 0.0  ;;  %v11716_v15 = vpack.c.bf16 %v2564_v62, %v2548_v61 }
 0x21c   : > { %v10254_v46 = vld [vmem:[%s14661_s3 + $0x70c] sm:$0xf0]  ;;  %v8854_v47 = vld [vmem:[%s14661_s3 + $0x8e0] sm:$0xf]  ;;  %v8487_v58 = vor.u32 %v10222_v41, %v8486_v40  ;;  %5737 = vmatpush.bf16.msrb.mxu0 %v8231_v51  ;;  %v11727_v20 = vpack.c.bf16 %v2566_v1, %v2550_v0 }
 0x21d   : > { %v10314_v48 = vld [vmem:[%s14661_s3 + $0x8ec] sm:$0xf0]  ;;  %v8982_v52 = vld [vmem:[%s14661_s3 + $0x9e0] sm:$0xf]  ;;  %v8615_v4 = vor.u32 %v10254_v46, %v8614_v11  ;;  %5751 = vmatpush.bf16.msrb.mxu1 %v8359_v57  ;;  %v11729_v21 = vpack.c.bf16 %v2565_v3, %v2549_v2  ;;  %v11737_v24 = vpack.c.bf16 %v2567_v7, %v2551_v6 }
 0x21e   : > { %v10346_v55 = vld [vmem:[%s14661_s3 + $0x9ec] sm:$0xf0]  ;;  %v9110_v56 = vld [vmem:[%s14661_s3 + $0xae0] sm:$0xf]  ;;  %v8855_v5 = vor.u32 %v10314_v48, %v8854_v47  ;;  %5765 = vmatpush.bf16.msrb.mxu2 %v8487_v58 }
 0x21f   : > { %v10378_v59 = vld [vmem:[%s14661_s3 + $0xaec] sm:$0xf0]  ;;  %v9238_v60 = vld [vmem:[%s14661_s3 + $0xbe0] sm:$0xf]  ;;  %v8983_v8 = vor.u32 %v10346_v55, %v8982_v52  ;;  %5779 = vmatpush.bf16.msrb.mxu3 %v8615_v4  ;;  %5738 = vmatmul.bf16.vlgmr.msrb.gmra.mxu0 %v11716_v15 }
 0x220   : > { %v10410_v63 = vld [vmem:[%s14661_s3 + $0xbec] sm:$0xf0]  ;;  %v9111_v9 = vor.u32 %v10378_v59, %v9110_v56  ;;  %v8838_v10 = vld [vmem:[%s14661_s3 + $0x8c0] sm:$0xf]  ;;  %5786 = vmatpush.bf16.msra.mxu0 %v8855_v5  ;;  %5752 = vmatmul.bf16.vlgmr.msrb.gmra.mxu1 %v11729_v21 }
 0x221   : > { %v10310_v12 = vld [vmem:[%s14661_s3 + $0x8cc] sm:$0xf0]  ;;  %v8966_v13 = vld [vmem:[%s14661_s3 + $0x9c0] sm:$0xf]  ;;  %v9239_v14 = vor.u32 %v10410_v63, %v9238_v60  ;;  %5800 = vmatpush.bf16.msra.mxu1 %v8983_v8  ;;  %5766 = vmatmul.bf16.vlgmr.msrb.gmra.mxu2 %v11727_v20  ;;  %v11836_v8 = vld [vmem:[%s14660_s2 + $0x8] sm:$0xff] }
 0x222   : > { %v10342_v16 = vld [vmem:[%s14661_s3 + $0x9cc] sm:$0xf0]  ;;  %v9094_v17 = vld [vmem:[%s14661_s3 + $0xac0] sm:$0xf]  ;;  %v8839_v25 = vor.u32 %v10310_v12, %v8838_v10  ;;  %5814 = vmatpush.bf16.msra.mxu2 %v9111_v9  ;;  %5780 = vmatmul.bf16.vlgmr.msrb.gmra.mxu3 %v11737_v24 }
 0x223   : > { %v10374_v19 = vld [vmem:[%s14661_s3 + $0xacc] sm:$0xf0]  ;;  %v9222_v22 = vld [vmem:[%s14661_s3 + $0xbc0] sm:$0xf]  ;;  %v8967_v26 = vor.u32 %v10342_v16, %v8966_v13  ;;  %5828 = vmatpush.bf16.msra.mxu3 %v9239_v14 }
 0x224   : > { %v10406_v23 = vld [vmem:[%s14661_s3 + $0xbcc] sm:$0xf0]  ;;  %v9095_v27 = vor.u32 %v10374_v19, %v9094_v17  ;;  %v8822_v28 = vld [vmem:[%s14661_s3 + $0x8a0] sm:$0xf]  ;;  %5787 = vmatpush.bf16.msra.mxu0 %v8839_v25  ;;  %v2488_v25 = vperm.slane %v11836_v8, 0 }
 0x225   : > { %v10306_v29 = vld [vmem:[%s14661_s3 + $0x8ac] sm:$0xf0]  ;;  %v8950_v30 = vld [vmem:[%s14661_s3 + $0x9a0] sm:$0xf]  ;;  %v9223_v31 = vor.u32 %v10406_v23, %v9222_v22  ;;  %5801 = vmatpush.bf16.msra.mxu1 %v8967_v26  ;;  %v2490_v26 = vperm.slane %v11836_v8, 2 }
 0x226   : > { %v10338_v34 = vld [vmem:[%s14661_s3 + $0x9ac] sm:$0xf0]  ;;  %v9078_v35 = vld [vmem:[%s14661_s3 + $0xaa0] sm:$0xf]  ;;  %v8823_v38 = vor.u32 %v10306_v29, %v8822_v28  ;;  %5815 = vmatpush.bf16.msra.mxu2 %v9095_v27 }
 0x227   : > { %v10370_v36 = vld [vmem:[%s14661_s3 + $0xaac] sm:$0xf0]  ;;  %v9206_v54 = vld [vmem:[%s14661_s3 + $0xba0] sm:$0xf]  ;;  %v8951_v39 = vor.u32 %v10338_v34, %v8950_v30  ;;  %5829 = vmatpush.bf16.msra.mxu3 %v9223_v31  ;;  %v2468_v34 = vld [vmem:[#allocation2 + $0xa8] sm:$0xff] }
 0x228   : > { %v10402_v37 = vld [vmem:[%s14661_s3 + $0xbac] sm:$0xf0]  ;;  %v9079_v40 = vor.u32 %v10370_v36, %v9078_v35  ;;  %v8806_v41 = vld [vmem:[%s14661_s3 + $0x880] sm:$0xf]  ;;  %5788 = vmatpush.bf16.msra.mxu0 %v8823_v38  ;;  %v2454_v35 = vld [vmem:[#allocation2 + $0xe8] sm:$0xff]  ;;  %v2489_v36 = vperm.slane %v11836_v8, 1 }
 0x229   : > { %v10302_v11 = vld [vmem:[%s14661_s3 + $0x88c] sm:$0xf0]  ;;  %v8934_v18 = vld [vmem:[%s14661_s3 + $0x980] sm:$0xf]  ;;  %v9207_v42 = vor.u32 %v10402_v37, %v9206_v54  ;;  %5802 = vmatpush.bf16.msra.mxu1 %v8951_v39  ;;  %v2453_v38 = vld [vmem:[#allocation2 + $0x88] sm:$0xff] }
 0x22a   : > { %v10334_v43 = vld [vmem:[%s14661_s3 + $0x98c] sm:$0xf0]  ;;  %v9062_v45 = vld [vmem:[%s14661_s3 + $0xa80] sm:$0xf]  ;;  %v8807_v49 = vor.u32 %v10302_v11, %v8806_v41  ;;  %5816 = vmatpush.bf16.msra.mxu2 %v9079_v40  ;;  %v2491_v40 = vperm.slane %v11836_v8, 3 }
 0x22b   : > { %v10366_v46 = vld [vmem:[%s14661_s3 + $0xa8c] sm:$0xf0]  ;;  %v9190_v47 = vld [vmem:[%s14661_s3 + $0xb80] sm:$0xf]  ;;  %v8935_v50 = vor.u32 %v10334_v43, %v8934_v18  ;;  %5830 = vmatpush.bf16.msra.mxu3 %v9207_v42  ;;  %v2455_v42 = vld [vmem:[#allocation2 + $0xb8] sm:$0xff] }
 0x22c   : > { %v10398_v48 = vld [vmem:[%s14661_s3 + $0xb8c] sm:$0xf0]  ;;  %v9063_v51 = vor.u32 %v10366_v46, %v9062_v45  ;;  %v8790_v52 = vld [vmem:[%s14661_s3 + $0x860] sm:$0xf]  ;;  %5789 = vmatpush.bf16.msra.mxu0 %v8807_v49  ;;  %v2471_v43 = vld [vmem:[#allocation2 + $0x28] sm:$0xff] }
 0x22d   : > { %v10298_v55 = vld [vmem:[%s14661_s3 + $0x86c] sm:$0xf0]  ;;  %v8918_v56 = vld [vmem:[%s14661_s3 + $0x960] sm:$0xf]  ;;  %v9191_v57 = vor.u32 %v10398_v48, %v9190_v47  ;;  %5803 = vmatpush.bf16.msra.mxu1 %v8935_v50  ;;  %v2536_v50 = vadd.f32 %v2488_v25, %v2468_v34 }
 0x22e   : > { %v10330_v58 = vld [vmem:[%s14661_s3 + $0x96c] sm:$0xf0]  ;;  %v9046_v59 = vld [vmem:[%s14661_s3 + $0xa60] sm:$0xf]  ;;  %v8791_v0 = vor.u32 %v10298_v55, %v8790_v52  ;;  %5817 = vmatpush.bf16.msra.mxu2 %v9063_v51  ;;  %v2522_v51 = vadd.f32 %v2490_v26, %v2454_v35 }
 0x22f   : > { %v10362_v60 = vld [vmem:[%s14661_s3 + $0xa6c] sm:$0xf0]  ;;  %v9174_v61 = vld [vmem:[%s14661_s3 + $0xb60] sm:$0xf]  ;;  %v8919_v4 = vor.u32 %v10330_v58, %v8918_v56  ;;  %5831 = vmatpush.bf16.msra.mxu3 %v9191_v57  ;;  %v2521_v58 = vadd.f32 %v2489_v36, %v2453_v38 }
 0x230   : > { %v10394_v62 = vld [vmem:[%s14661_s3 + $0xb6c] sm:$0xf0]  ;;  %v8774_v63 = vld [vmem:[%s14661_s3 + $0x840] sm:$0xf]  ;;  %v9047_v5 = vor.u32 %v10362_v60, %v9046_v59  ;;  %5790 = vmatpush.bf16.msra.mxu0 %v8791_v0  ;;  %v2523_v0 = vadd.f32 %v2491_v40, %v2455_v42 }
 0x231   : > { %v10294_v1 = vld [vmem:[%s14661_s3 + $0x84c] sm:$0xf0]  ;;  %v8902_v2 = vld [vmem:[%s14661_s3 + $0x940] sm:$0xf]  ;;  %v9175_v9 = vor.u32 %v10394_v62, %v9174_v61  ;;  %5804 = vmatpush.bf16.msra.mxu1 %v8919_v4 }
 0x232   : > { %v10326_v3 = vld [vmem:[%s14661_s3 + $0x94c] sm:$0xf0]  ;;  %v9030_v6 = vld [vmem:[%s14661_s3 + $0xa40] sm:$0xf]  ;;  %v8775_v19 = vor.u32 %v10294_v1, %v8774_v63  ;;  %5818 = vmatpush.bf16.msra.mxu2 %v9047_v5  ;;  %v2539_v1 = vadd.f32 %v2491_v40, %v2471_v43 }
 0x233   : > { %v10358_v7 = vld [vmem:[%s14661_s3 + $0xa4c] sm:$0xf0]  ;;  %v9158_v10 = vld [vmem:[%s14661_s3 + $0xb40] sm:$0xf]  ;;  %v8903_v27 = vor.u32 %v10326_v3, %v8902_v2  ;;  %5832 = vmatpush.bf16.msra.mxu3 %v9175_v9 }
 0x234   : > { %v10390_v12 = vld [vmem:[%s14661_s3 + $0xb4c] sm:$0xf0]  ;;  %v8758_v13 = vld [vmem:[%s14661_s3 + $0x820] sm:$0xf]  ;;  %v9031_v28 = vor.u32 %v10358_v7, %v9030_v6  ;;  %5791 = vmatpush.bf16.msra.mxu0 %v8775_v19  ;;  %v2553_v19 = vmax.f32 %v2521_v58, 0.0 }
 0x235   : > { %v10290_v14 = vld [vmem:[%s14661_s3 + $0x82c] sm:$0xf0]  ;;  %v11853_v16 = vld [vmem:[%s14661_s3 + $0x920] sm:$0xf]  ;;  %v9159_v54 = vor.u32 %v10390_v12, %v9158_v10  ;;  %5805 = vmatpush.bf16.msra.mxu1 %v8903_v27  ;;  %v2571_v27 = vmax.f32 %v2539_v1, 0.0 }
 0x236   : > { %v10322_v17 = vld [vmem:[%s14661_s3 + $0x92c] sm:$0xf0]  ;;  %v9014_v22 = vld [vmem:[%s14661_s3 + $0xa20] sm:$0xf]  ;;  %v8759_v41 = vor.u32 %v10290_v14, %v8758_v13  ;;  %5819 = vmatpush.bf16.msra.mxu2 %v9031_v28  ;;  %v2568_v13 = vmax.f32 %v2536_v50, 0.0 }
 0x237   : > { %v10354_v23 = vld [vmem:[%s14661_s3 + $0xa2c] sm:$0xf0]  ;;  %v9142_v29 = vld [vmem:[%s14661_s3 + $0xb20] sm:$0xf]  ;;  %v8887_v11 = vor.u32 %v10322_v17, %v11853_v16  ;;  %5833 = vmatpush.bf16.msra.mxu3 %v9159_v54  ;;  %v2554_v16 = vmax.f32 %v2522_v51, 0.0 }
 0x238   : > { %v10386_v30 = vld [vmem:[%s14661_s3 + $0xb2c] sm:$0xf0]  ;;  %v2452_v31 = vld [vmem:[#allocation2 + $0x80] sm:$0xff]  ;;  %v9015_v45 = vor.u32 %v10354_v23, %v9014_v22  ;;  %5792 = vmatpush.bf16.msra.mxu0 %v8759_v41 }
 0x239   : > { %v2470_v37 = vld [vmem:[#allocation2 + $0x10] sm:$0xff]  ;;  %v8742_v18 = vld [vmem:[%s14661_s3 + $0x800] sm:$0xf]  ;;  %v2520_v49 = vadd.f32 %v2488_v25, %v2452_v31  ;;  %v9143_v60 = vor.u32 %v10386_v30, %v9142_v29  ;;  %5806 = vmatpush.bf16.msra.mxu1 %v8887_v11 }
 0x23a   : > { %v2469_v39 = vld [vmem:[#allocation2 + $0xd0] sm:$0xff]  ;;  %v8870_v47 = vld [vmem:[%s14661_s3 + $0x900] sm:$0xf]  ;;  %v2538_v57 = vadd.f32 %v2490_v26, %v2470_v37  ;;  %5820 = vmatpush.bf16.msra.mxu2 %v9015_v45  ;;  %v2555_v26 = vmax.f32 %v2523_v0, 0.0 }
 0x23b   : > { %v10286_v46 = vld [vmem:[%s14661_s3 + $0x80c] sm:$0xf0]  ;;  %v8998_v52 = vld [vmem:[%s14661_s3 + $0xa00] sm:$0xf]  ;;  %v2537_v59 = vadd.f32 %v2489_v36, %v2469_v39  ;;  %v2552_v12 = vmax.f32 %v2520_v49, 0.0  ;;  %5834 = vmatpush.bf16.msra.mxu3 %v9143_v60 }
 0x23c   : > { %v10318_v48 = vld [vmem:[%s14661_s3 + $0x90c] sm:$0xf0]  ;;  %v9126_v56 = vld [vmem:[%s14661_s3 + $0xb00] sm:$0xf]  ;;  %v8743_v2 = vor.u32 %v10286_v46, %v8742_v18  ;;  %v2570_v17 = vmax.f32 %v2538_v57, 0.0  ;;  %v11953_v18 = vpack.c.bf16 %v2571_v27, %v2555_v26 }
 0x23d   : > { %v10350_v55 = vld [vmem:[%s14661_s3 + $0xa0c] sm:$0xf0]  ;;  %v9366_v62 = vld [vmem:[%s14661_s3 + $0xce0] sm:$0xf]  ;;  %v8871_v6 = vor.u32 %v10318_v48, %v8870_v47  ;;  %v2569_v22 = vmax.f32 %v2537_v59, 0.0  ;;  %v11932_v36 = vpack.c.bf16 %v2568_v13, %v2552_v12 }
 0x23e   : > { %v10382_v61 = vld [vmem:[%s14661_s3 + $0xb0c] sm:$0xf0]  ;;  %v9494_v3 = vld [vmem:[%s14661_s3 + $0xde0] sm:$0xf]  ;;  %v8999_v7 = vor.u32 %v10350_v55, %v8998_v52  ;;  %5793 = vmatpush.bf16.msra.mxu0 %v8743_v2  ;;  %v11943_v39 = vpack.c.bf16 %v2570_v17, %v2554_v16 }
 0x23f   : > { %v10442_v63 = vld [vmem:[%s14661_s3 + $0xcec] sm:$0xf0]  ;;  %v9622_v5 = vld [vmem:[%s14661_s3 + $0xee0] sm:$0xf]  ;;  %v9127_v23 = vor.u32 %v10382_v61, %v9126_v56  ;;  %5807 = vmatpush.bf16.msra.mxu1 %v8871_v6  ;;  %v11945_v40 = vpack.c.bf16 %v2569_v22, %v2553_v19 }
 0x240   : > { %v10474_v4 = vld [vmem:[%s14661_s3 + $0xdec] sm:$0xf0]  ;;  %v9750_v10 = vld [vmem:[%s14661_s3 + $0xfe0] sm:$0xf]  ;;  %v9367_v25 = vor.u32 %v10442_v63, %v9366_v62  ;;  %5821 = vmatpush.bf16.msra.mxu2 %v8999_v7 }
 0x241   : > { %v10506_v9 = vld [vmem:[%s14661_s3 + $0xeec] sm:$0xf0]  ;;  %v9495_v28 = vor.u32 %v10474_v4, %v9494_v3  ;;  %v9350_v30 = vld [vmem:[%s14661_s3 + $0xcc0] sm:$0xf]  ;;  %5835 = vmatpush.bf16.msra.mxu3 %v9127_v23  ;;  %5794 = vmatmul.bf16.vlgmr.msra.gmra.mxu0 %v11932_v36 }
 0x242   : > { %v10538_v14 = vld [vmem:[%s14661_s3 + $0xfec] sm:$0xf0]  ;;  %v9623_v29 = vor.u32 %v10506_v9, %v9622_v5  ;;  %v9478_v34 = vld [vmem:[%s14661_s3 + $0xdc0] sm:$0xf]  ;;  %5842 = vmatpush.bf16.msrb.mxu0 %v9367_v25  ;;  %5808 = vmatmul.bf16.vlgmr.msra.gmra.mxu1 %v11945_v40 }
 0x243   : > { %v10438_v31 = vld [vmem:[%s14661_s3 + $0xccc] sm:$0xf0]  ;;  %v9751_v35 = vor.u32 %v10538_v14, %v9750_v10  ;;  %v9606_v37 = vld [vmem:[%s14661_s3 + $0xec0] sm:$0xf]  ;;  %5856 = vmatpush.bf16.msrb.mxu1 %v9495_v28  ;;  %5822 = vmatmul.bf16.vlgmr.msra.gmra.mxu2 %v11943_v39 }
 0x244   : > { %v10470_v54 = vld [vmem:[%s14661_s3 + $0xdcc] sm:$0xf0]  ;;  %v9734_v41 = vld [vmem:[%s14661_s3 + $0xfc0] sm:$0xf]  ;;  %v9351_v42 = vor.u32 %v10438_v31, %v9350_v30  ;;  %5870 = vmatpush.bf16.msrb.mxu2 %v9623_v29  ;;  %5836 = vmatmul.bf16.vlgmr.msra.gmra.mxu3 %v11953_v18 }
 0x245   : > { %v10502_v38 = vld [vmem:[%s14661_s3 + $0xecc] sm:$0xf0]  ;;  %v9479_v43 = vor.u32 %v10470_v54, %v9478_v34  ;;  %v9334_v46 = vld [vmem:[%s14661_s3 + $0xca0] sm:$0xf]  ;;  %5884 = vmatpush.bf16.msrb.mxu3 %v9751_v35 }
 0x246   : > { %v10534_v11 = vld [vmem:[%s14661_s3 + $0xfcc] sm:$0xf0]  ;;  %v9607_v45 = vor.u32 %v10502_v38, %v9606_v37  ;;  %v9462_v48 = vld [vmem:[%s14661_s3 + $0xda0] sm:$0xf]  ;;  %5843 = vmatpush.bf16.msrb.mxu0 %v9351_v42 }
 0x247   : > { %v10434_v47 = vld [vmem:[%s14661_s3 + $0xcac] sm:$0xf0]  ;;  %v9735_v49 = vor.u32 %v10534_v11, %v9734_v41  ;;  %v9590_v51 = vld [vmem:[%s14661_s3 + $0xea0] sm:$0xf]  ;;  %5857 = vmatpush.bf16.msrb.mxu1 %v9479_v43 }
 0x248   : > { %v10466_v50 = vld [vmem:[%s14661_s3 + $0xdac] sm:$0xf0]  ;;  %v9718_v55 = vld [vmem:[%s14661_s3 + $0xfa0] sm:$0xf]  ;;  %v9335_v57 = vor.u32 %v10434_v47, %v9334_v46  ;;  %5871 = vmatpush.bf16.msrb.mxu2 %v9607_v45  ;;  %v2492_v47 = vperm.slane %v11836_v8, 4 }
 0x249   : > { %v10498_v52 = vld [vmem:[%s14661_s3 + $0xeac] sm:$0xf0]  ;;  %v9463_v58 = vor.u32 %v10466_v50, %v9462_v48  ;;  %v9318_v60 = vld [vmem:[%s14661_s3 + $0xc80] sm:$0xf]  ;;  %5885 = vmatpush.bf16.msrb.mxu3 %v9735_v49  ;;  %v2494_v48 = vperm.slane %v11836_v8, 6 }
 0x24a   : > { %v10530_v56 = vld [vmem:[%s14661_s3 + $0xfac] sm:$0xf0]  ;;  %v9591_v59 = vor.u32 %v10498_v52, %v9590_v51  ;;  %v9446_v62 = vld [vmem:[%s14661_s3 + $0xd80] sm:$0xf]  ;;  %5844 = vmatpush.bf16.msrb.mxu0 %v9335_v57  ;;  %v2458_v57 = vld [vmem:[#allocation2 + $0x8] sm:$0xff] }
 0x24b   : > { %v10430_v61 = vld [vmem:[%s14661_s3 + $0xc8c] sm:$0xf0]  ;;  %v9719_v63 = vor.u32 %v10530_v56, %v9718_v55  ;;  %v9574_v1 = vld [vmem:[%s14661_s3 + $0xe80] sm:$0xf]  ;;  %5858 = vmatpush.bf16.msrb.mxu1 %v9463_v58  ;;  %v2493_v58 = vperm.slane %v11836_v8, 5 }
 0x24c   : > { %v10462_v0 = vld [vmem:[%s14661_s3 + $0xd8c] sm:$0xf0]  ;;  %v9702_v3 = vld [vmem:[%s14661_s3 + $0xf80] sm:$0xf]  ;;  %v9319_v5 = vor.u32 %v10430_v61, %v9318_v60  ;;  %5872 = vmatpush.bf16.msrb.mxu2 %v9591_v59 }
 0x24d   : > { %v10494_v2 = vld [vmem:[%s14661_s3 + $0xe8c] sm:$0xf0]  ;;  %v9447_v6 = vor.u32 %v10462_v0, %v9446_v62  ;;  %v9302_v9 = vld [vmem:[%s14661_s3 + $0xc60] sm:$0xf]  ;;  %5886 = vmatpush.bf16.msrb.mxu3 %v9719_v63  ;;  %v2473_v62 = vld [vmem:[#allocation2 + $0xf8] sm:$0xff]  ;;  %v2495_v63 = vperm.slane %v11836_v8, 7 }
 0x24e   : > { %v10526_v4 = vld [vmem:[%s14661_s3 + $0xf8c] sm:$0xf0]  ;;  %v9575_v7 = vor.u32 %v10494_v2, %v9574_v1  ;;  %v9430_v12 = vld [vmem:[%s14661_s3 + $0xd60] sm:$0xf]  ;;  %5845 = vmatpush.bf16.msrb.mxu0 %v9319_v5 }
 0x24f   : > { %v10426_v10 = vld [vmem:[%s14661_s3 + $0xc6c] sm:$0xf0]  ;;  %v9703_v13 = vor.u32 %v10526_v4, %v9702_v3  ;;  %v9558_v16 = vld [vmem:[%s14661_s3 + $0xe60] sm:$0xf]  ;;  %5859 = vmatpush.bf16.msrb.mxu1 %v9447_v6  ;;  %v2459_v3 = vld [vmem:[#allocation2 + $0x78] sm:$0xff] }
 0x250   : > { %v10458_v14 = vld [vmem:[%s14661_s3 + $0xd6c] sm:$0xf0]  ;;  %v9686_v19 = vld [vmem:[%s14661_s3 + $0xf60] sm:$0xf]  ;;  %v9303_v23 = vor.u32 %v10426_v10, %v9302_v9  ;;  %5873 = vmatpush.bf16.msrb.mxu2 %v9575_v7  ;;  %v2475_v4 = vld [vmem:[#allocation2 + $0x98] sm:$0xff] }
 0x251   : > { %v10490_v17 = vld [vmem:[%s14661_s3 + $0xe6c] sm:$0xf0]  ;;  %v9286_v25 = vld [vmem:[%s14661_s3 + $0xc40] sm:$0xf]  ;;  %v9431_v28 = vor.u32 %v10458_v14, %v9430_v12  ;;  %5887 = vmatpush.bf16.msrb.mxu3 %v9703_v13  ;;  %v2526_v12 = vadd.f32 %v2494_v48, %v2458_v57  ;;  %v10052_v57 = vld [vmem:[%s14661_s3 + $0xc4] sm:$0xf] }
 0x252   : > { %v10522_v22 = vld [vmem:[%s14661_s3 + $0xf6c] sm:$0xf0]  ;;  %v9414_v27 = vld [vmem:[%s14661_s3 + $0xd40] sm:$0xf]  ;;  %v9559_v29 = vor.u32 %v10490_v17, %v9558_v16  ;;  %5846 = vmatpush.bf16.msrb.mxu0 %v9303_v23 }
 0x253   : > { %v10422_v26 = vld [vmem:[%s14661_s3 + $0xc4c] sm:$0xf0]  ;;  %v9542_v31 = vld [vmem:[%s14661_s3 + $0xe40] sm:$0xf]  ;;  %v9687_v35 = vor.u32 %v10522_v22, %v9686_v19  ;;  %5860 = vmatpush.bf16.msrb.mxu1 %v9431_v28  ;;  %v2541_v22 = vadd.f32 %v2493_v58, %v2473_v62  ;;  %v2527_v28 = vadd.f32 %v2495_v63, %v2459_v3  ;;  %v7944_v62 = vld [vmem:[%s14661_s3 + $0x1d0] sm:$0xf0] }
 0x254   : > { %v10454_v30 = vld [vmem:[%s14661_s3 + $0xd4c] sm:$0xf0]  ;;  %v9670_v54 = vld [vmem:[%s14661_s3 + $0xf40] sm:$0xf]  ;;  %v9287_v43 = vor.u32 %v10422_v26, %v9286_v25  ;;  %5874 = vmatpush.bf16.msrb.mxu2 %v9559_v29  ;;  %v10056_v26 = vld [vmem:[%s14661_s3 + $0xe4] sm:$0xf]  ;;  %v2543_v29 = vadd.f32 %v2495_v63, %v2475_v4 }
 0x255   : > { %v10486_v34 = vld [vmem:[%s14661_s3 + $0xe4c] sm:$0xf0]  ;;  %v9270_v38 = vld [vmem:[%s14661_s3 + $0xc20] sm:$0xf]  ;;  %v9415_v49 = vor.u32 %v10454_v30, %v9414_v27  ;;  %5888 = vmatpush.bf16.msrb.mxu3 %v9687_v35  ;;  %v7832_v27 = vld [vmem:[%s14661_s3 + $0xf0] sm:$0xf0] }
 0x256   : > { %v10518_v37 = vld [vmem:[%s14661_s3 + $0xf4c] sm:$0xf0]  ;;  %v12064_v11 = vld [vmem:[%s14661_s3 + $0xd20] sm:$0xf]  ;;  %v9543_v50 = vor.u32 %v10486_v34, %v9542_v31  ;;  %5847 = vmatpush.bf16.msrb.mxu0 %v9287_v43  ;;  %v10088_v31 = vld [vmem:[%s14661_s3 + $0x1e4] sm:$0xf] }
 0x257   : > { %v10418_v41 = vld [vmem:[%s14661_s3 + $0xc2c] sm:$0xf0]  ;;  %v9526_v45 = vld [vmem:[%s14661_s3 + $0xe20] sm:$0xf]  ;;  %v9671_v59 = vor.u32 %v10518_v37, %v9670_v54  ;;  %5861 = vmatpush.bf16.msrb.mxu1 %v9415_v49  ;;  %v7960_v34 = vld [vmem:[%s14661_s3 + $0x1f0] sm:$0xf0] }
 0x258   : > { %v10450_v42 = vld [vmem:[%s14661_s3 + $0xd2c] sm:$0xf0]  ;;  %v9654_v51 = vld [vmem:[%s14661_s3 + $0xf20] sm:$0xf]  ;;  %v9271_v0 = vor.u32 %v10418_v41, %v9270_v38  ;;  %5875 = vmatpush.bf16.msrb.mxu2 %v9543_v50  ;;  %v10120_v35 = vld [vmem:[%s14661_s3 + $0x2e4] sm:$0xf]  ;;  %v7835_v50 = vor.u32 %v10056_v26, %v7832_v27 }
 0x259   : > { %v10482_v46 = vld [vmem:[%s14661_s3 + $0xe2c] sm:$0xf0]  ;;  %v2456_v55 = vld [vmem:[#allocation2 + $0x60] sm:$0xff]  ;;  %v9399_v1 = vor.u32 %v10450_v42, %v12064_v11  ;;  %5889 = vmatpush.bf16.msrb.mxu3 %v9671_v59  ;;  %v8088_v38 = vld [vmem:[%s14661_s3 + $0x2f0] sm:$0xf0] }
 0x25a   : > { %v10514_v52 = vld [vmem:[%s14661_s3 + $0xf2c] sm:$0xf0]  ;;  %v2472_v56 = vld [vmem:[#allocation2 + $0xa0] sm:$0xff]  ;;  %v9527_v5 = vor.u32 %v10482_v46, %v9526_v45  ;;  %v2524_v9 = vadd.f32 %v2492_v47, %v2456_v55  ;;  %5848 = vmatpush.bf16.msrb.mxu0 %v9271_v0  ;;  %v8216_v43 = vld [vmem:[%s14661_s3 + $0x3f0] sm:$0xf0]  ;;  %v2558_v45 = vmax.f32 %v2526_v12, 0.0  ;;  %v7963_v55 = vor.u32 %v10088_v31, %v7960_v34 }
 0x25b   : > { %v2474_v60 = vld [vmem:[#allocation2 + $0x20] sm:$0xff]  ;;  %v2457_v61 = vld [vmem:[#allocation2 + $0xf0] sm:$0xff]  ;;  %v2540_v10 = vadd.f32 %v2492_v47, %v2472_v56  ;;  %v9655_v23 = vor.u32 %v10514_v52, %v9654_v51  ;;  %5862 = vmatpush.bf16.msrb.mxu1 %v9399_v1  ;;  %v2559_v51 = vmax.f32 %v2527_v28, 0.0  ;;  %v2575_v52 = vmax.f32 %v2543_v29, 0.0 }
 0x25c   : > { %v9254_v2 = vld [vmem:[%s14661_s3 + $0xc00] sm:$0xf]  ;;  %v10414_v6 = vld [vmem:[%s14661_s3 + $0xc0c] sm:$0xf0]  ;;  %v2542_v17 = vadd.f32 %v2494_v48, %v2474_v60  ;;  %v2525_v19 = vadd.f32 %v2493_v58, %v2457_v61  ;;  %v10152_v41 = vld [vmem:[%s14661_s3 + $0x3e4] sm:$0xf]  ;;  %5876 = vmatpush.bf16.msrb.mxu2 %v9527_v5  ;;  %v8091_v56 = vor.u32 %v10120_v35, %v8088_v38 }
 0x25d   : > { %v9382_v7 = vld [vmem:[%s14661_s3 + $0xd00] sm:$0xf]  ;;  %v10446_v8 = vld [vmem:[%s14661_s3 + $0xd0c] sm:$0xf0]  ;;  %v9255_v30 = vor.u32 %v10414_v6, %v9254_v2  ;;  %v2556_v11 = vmax.f32 %v2524_v9, 0.0  ;;  %v2572_v42 = vmax.f32 %v2540_v10, 0.0  ;;  %5890 = vmatpush.bf16.msrb.mxu3 %v9655_v23  ;;  %v8219_v60 = vor.u32 %v10152_v41, %v8216_v43 }
 0x25e   : > { %v9510_v13 = vld [vmem:[%s14661_s3 + $0xe00] sm:$0xf]  ;;  %v10478_v14 = vld [vmem:[%s14661_s3 + $0xe0c] sm:$0xf0]  ;;  %v9383_v54 = vor.u32 %v10446_v8, %v9382_v7  ;;  %v2574_v46 = vmax.f32 %v2542_v17, 0.0  ;;  %v2557_v47 = vmax.f32 %v2525_v19, 0.0  ;;  %v12164_v5 = vpack.c.bf16 %v2575_v52, %v2559_v51 }
 0x25f   : > { %v9638_v16 = vld [vmem:[%s14661_s3 + $0xf00] sm:$0xf]  ;;  %v10510_v25 = vld [vmem:[%s14661_s3 + $0xf0c] sm:$0xf0]  ;;  %v9511_v37 = vor.u32 %v10478_v14, %v9510_v13  ;;  %v2573_v48 = vmax.f32 %v2541_v22, 0.0  ;;  %5849 = vmatpush.bf16.msrb.mxu0 %v9255_v30  ;;  %v12143_v61 = vpack.c.bf16 %v2572_v42, %v2556_v11 }
 0x260   : > { %v9639_v49 = vor.u32 %v10510_v25, %v9638_v16  ;;  %v7816_v58 = vld [vmem:[%s14661_s3 + $0xd0] sm:$0xf0]  ;;  %v10084_v59 = vld [vmem:[%s14661_s3 + $0x1c4] sm:$0xf]  ;;  %5863 = vmatpush.bf16.msrb.mxu1 %v9383_v54  ;;  %v12154_v1 = vpack.c.bf16 %v2574_v46, %v2558_v45 }
 0x261   : > { %v10116_v63 = vld [vmem:[%s14661_s3 + $0x2c4] sm:$0xf]  ;;  %v8072_v0 = vld [vmem:[%s14661_s3 + $0x2d0] sm:$0xf0]  ;;  %5877 = vmatpush.bf16.msrb.mxu2 %v9511_v37  ;;  %v12156_v2 = vpack.c.bf16 %v2573_v48, %v2557_v47  ;;  %v7819_v6 = vor.u32 %v10052_v57, %v7816_v58  ;;  %v7947_v7 = vor.u32 %v10084_v59, %v7944_v62 }
 0x262   : > { %v10148_v3 = vld [vmem:[%s14661_s3 + $0x3c4] sm:$0xf]  ;;  %v8200_v4 = vld [vmem:[%s14661_s3 + $0x3d0] sm:$0xf0]  ;;  %5891 = vmatpush.bf16.msrb.mxu3 %v9639_v49  ;;  %v8075_v8 = vor.u32 %v10116_v63, %v8072_v0  ;;  %5850 = vmatmul.bf16.vlgmr.msrb.gmra.mxu0 %v12143_v61 }
 0x263   : > { %5898 = vmatpush.bf16.msra.mxu0 %v7835_v50  ;;  %v10048_v9 = vld [vmem:[%s14661_s3 + $0xa4] sm:$0xf]  ;;  %v7800_v10 = vld [vmem:[%s14661_s3 + $0xb0] sm:$0xf0]  ;;  %v8203_v13 = vor.u32 %v10148_v3, %v8200_v4  ;;  %5864 = vmatmul.bf16.vlgmr.msrb.gmra.mxu1 %v12156_v2 }
 0x264   : > { %5912 = vmatpush.bf16.msra.mxu1 %v7963_v55  ;;  %v10080_v12 = vld [vmem:[%s14661_s3 + $0x1a4] sm:$0xf]  ;;  %v7928_v14 = vld [vmem:[%s14661_s3 + $0x1b0] sm:$0xf0]  ;;  %5878 = vmatmul.bf16.vlgmr.msrb.gmra.mxu2 %v12154_v1  ;;  %v7803_v23 = vor.u32 %v10048_v9, %v7800_v10 }
 0x265   : > { %5926 = vmatpush.bf16.msra.mxu2 %v8091_v56  ;;  %v10112_v16 = vld [vmem:[%s14661_s3 + $0x2a4] sm:$0xf]  ;;  %v8056_v17 = vld [vmem:[%s14661_s3 + $0x2b0] sm:$0xf0]  ;;  %5892 = vmatmul.bf16.vlgmr.msrb.gmra.mxu3 %v12164_v5  ;;  %v7931_v25 = vor.u32 %v10080_v12, %v7928_v14 }
 0x266   : > { %5940 = vmatpush.bf16.msra.mxu3 %v8219_v60  ;;  %v10144_v19 = vld [vmem:[%s14661_s3 + $0x3a4] sm:$0xf]  ;;  %v8184_v22 = vld [vmem:[%s14661_s3 + $0x3b0] sm:$0xf0]  ;;  %v8059_v26 = vor.u32 %v10112_v16, %v8056_v17 }
 0x267   : > { %5899 = vmatpush.bf16.msra.mxu0 %v7819_v6  ;;  %v10044_v27 = vld [vmem:[%s14661_s3 + $0x84] sm:$0xf]  ;;  %v7784_v28 = vld [vmem:[%s14661_s3 + $0x90] sm:$0xf0]  ;;  %v8187_v30 = vor.u32 %v10144_v19, %v8184_v22 }
 0x268   : > { %5913 = vmatpush.bf16.msra.mxu1 %v7947_v7  ;;  %v10076_v29 = vld [vmem:[%s14661_s3 + $0x184] sm:$0xf]  ;;  %v7912_v31 = vld [vmem:[%s14661_s3 + $0x190] sm:$0xf0]  ;;  %v7787_v38 = vor.u32 %v10044_v27, %v7784_v28 }
 0x269   : > { %5927 = vmatpush.bf16.msra.mxu2 %v8075_v8  ;;  %v10108_v34 = vld [vmem:[%s14661_s3 + $0x284] sm:$0xf]  ;;  %v8040_v35 = vld [vmem:[%s14661_s3 + $0x290] sm:$0xf0]  ;;  %v7915_v41 = vor.u32 %v10076_v29, %v7912_v31 }
 0x26a   : > { %5941 = vmatpush.bf16.msra.mxu3 %v8203_v13  ;;  %v10140_v54 = vld [vmem:[%s14661_s3 + $0x384] sm:$0xf]  ;;  %v8168_v37 = vld [vmem:[%s14661_s3 + $0x390] sm:$0xf0]  ;;  %v8043_v11 = vor.u32 %v10108_v34, %v8040_v35 }
 0x26b   : > { %5900 = vmatpush.bf16.msra.mxu0 %v7803_v23  ;;  %v10040_v42 = vld [vmem:[%s14661_s3 + $0x64] sm:$0xf]  ;;  %v7768_v43 = vld [vmem:[%s14661_s3 + $0x70] sm:$0xf0]  ;;  %v8171_v46 = vor.u32 %v10140_v54, %v8168_v37 }
 0x26c   : > { %5914 = vmatpush.bf16.msra.mxu1 %v7931_v25  ;;  %v10072_v45 = vld [vmem:[%s14661_s3 + $0x164] sm:$0xf]  ;;  %v7896_v47 = vld [vmem:[%s14661_s3 + $0x170] sm:$0xf0]  ;;  %v7771_v52 = vor.u32 %v10040_v42, %v7768_v43 }
 0x26d   : > { %5928 = vmatpush.bf16.msra.mxu2 %v8059_v26  ;;  %v10104_v48 = vld [vmem:[%s14661_s3 + $0x264] sm:$0xf]  ;;  %v8024_v49 = vld [vmem:[%s14661_s3 + $0x270] sm:$0xf0]  ;;  %v7899_v55 = vor.u32 %v10072_v45, %v7896_v47 }
 0x26e   : > { %5942 = vmatpush.bf16.msra.mxu3 %v8187_v30  ;;  %v10136_v50 = vld [vmem:[%s14661_s3 + $0x364] sm:$0xf]  ;;  %v8152_v51 = vld [vmem:[%s14661_s3 + $0x370] sm:$0xf0]  ;;  %v8027_v56 = vor.u32 %v10104_v48, %v8024_v49 }
 0x26f   : > { %5901 = vmatpush.bf16.msra.mxu0 %v7787_v38  ;;  %v10036_v57 = vld [vmem:[%s14661_s3 + $0x44] sm:$0xf]  ;;  %v7752_v58 = vld [vmem:[%s14661_s3 + $0x50] sm:$0xf0]  ;;  %v8155_v60 = vor.u32 %v10136_v50, %v8152_v51 }
 0x270   : > { %5915 = vmatpush.bf16.msra.mxu1 %v7915_v41  ;;  %v10068_v59 = vld [vmem:[%s14661_s3 + $0x144] sm:$0xf]  ;;  %v7880_v62 = vld [vmem:[%s14661_s3 + $0x150] sm:$0xf0]  ;;  %v7755_v6 = vor.u32 %v10036_v57, %v7752_v58 }
 0x271   : > { %5929 = vmatpush.bf16.msra.mxu2 %v8043_v11  ;;  %v10100_v63 = vld [vmem:[%s14661_s3 + $0x244] sm:$0xf]  ;;  %v8008_v0 = vld [vmem:[%s14661_s3 + $0x250] sm:$0xf0]  ;;  %v7883_v7 = vor.u32 %v10068_v59, %v7880_v62 }
 0x272   : > { %5943 = vmatpush.bf16.msra.mxu3 %v8171_v46  ;;  %v10132_v3 = vld [vmem:[%s14661_s3 + $0x344] sm:$0xf]  ;;  %v8136_v4 = vld [vmem:[%s14661_s3 + $0x350] sm:$0xf0]  ;;  %v8011_v8 = vor.u32 %v10100_v63, %v8008_v0 }
 0x273   : > { %5902 = vmatpush.bf16.msra.mxu0 %v7771_v52  ;;  %v10032_v9 = vld [vmem:[%s14661_s3 + $0x24] sm:$0xf]  ;;  %v7736_v10 = vld [vmem:[%s14661_s3 + $0x30] sm:$0xf0]  ;;  %v8139_v13 = vor.u32 %v10132_v3, %v8136_v4 }
 0x274   : > { %5916 = vmatpush.bf16.msra.mxu1 %v7899_v55  ;;  %v10064_v12 = vld [vmem:[%s14661_s3 + $0x124] sm:$0xf]  ;;  %v7864_v14 = vld [vmem:[%s14661_s3 + $0x130] sm:$0xf0]  ;;  %v7739_v23 = vor.u32 %v10032_v9, %v7736_v10 }
 0x275   : > { %5930 = vmatpush.bf16.msra.mxu2 %v8027_v56  ;;  %v10096_v16 = vld [vmem:[%s14661_s3 + $0x224] sm:$0xf]  ;;  %v7992_v17 = vld [vmem:[%s14661_s3 + $0x230] sm:$0xf0]  ;;  %v7867_v27 = vor.u32 %v10064_v12, %v7864_v14 }
 0x276   : > { %5944 = vmatpush.bf16.msra.mxu3 %v8155_v60  ;;  %v10128_v19 = vld [vmem:[%s14661_s3 + $0x324] sm:$0xf]  ;;  %v8120_v22 = vld [vmem:[%s14661_s3 + $0x330] sm:$0xf0]  ;;  %v7995_v28 = vor.u32 %v10096_v16, %v7992_v17 }
 0x277   : > { %5903 = vmatpush.bf16.msra.mxu0 %v7755_v6  ;;  %v10028_v25 = vld [vmem:[%s14661_s3 + $0x4] sm:$0xf]  ;;  %v7720_v26 = vld [vmem:[%s14661_s3 + $0x10] sm:$0xf0]  ;;  %v8123_v34 = vor.u32 %v10128_v19, %v8120_v22 }
 0x278   : > { %5917 = vmatpush.bf16.msra.mxu1 %v7883_v7  ;;  %v10060_v29 = vld [vmem:[%s14661_s3 + $0x104] sm:$0xf]  ;;  %v7848_v30 = vld [vmem:[%s14661_s3 + $0x110] sm:$0xf0]  ;;  %v7723_v42 = vor.u32 %v10028_v25, %v7720_v26 }
 0x279   : > { %5931 = vmatpush.bf16.msra.mxu2 %v8011_v8  ;;  %v10092_v31 = vld [vmem:[%s14661_s3 + $0x204] sm:$0xf]  ;;  %v7976_v35 = vld [vmem:[%s14661_s3 + $0x210] sm:$0xf0]  ;;  %v7851_v47 = vor.u32 %v10060_v29, %v7848_v30 }
 0x27a   : > { %5945 = vmatpush.bf16.msra.mxu3 %v8139_v13  ;;  %v10124_v54 = vld [vmem:[%s14661_s3 + $0x304] sm:$0xf]  ;;  %v8104_v37 = vld [vmem:[%s14661_s3 + $0x310] sm:$0xf0]  ;;  %v7979_v48 = vor.u32 %v10092_v31, %v7976_v35 }
 0x27b   : > { %v10184_v38 = vld [vmem:[%s14661_s3 + $0x4e4] sm:$0xf]  ;;  %v8344_v41 = vld [vmem:[%s14661_s3 + $0x4f0] sm:$0xf0]  ;;  %5904 = vmatpush.bf16.msra.mxu0 %v7739_v23  ;;  %v8107_v51 = vor.u32 %v10124_v54, %v8104_v37 }
 0x27c   : > { %v10216_v11 = vld [vmem:[%s14661_s3 + $0x5e4] sm:$0xf]  ;;  %v8472_v43 = vld [vmem:[%s14661_s3 + $0x5f0] sm:$0xf0]  ;;  %5918 = vmatpush.bf16.msra.mxu1 %v7867_v27  ;;  %v8347_v52 = vor.u32 %v10184_v38, %v8344_v41 }
 0x27d   : > { %v10248_v45 = vld [vmem:[%s14661_s3 + $0x6e4] sm:$0xf]  ;;  %v8600_v46 = vld [vmem:[%s14661_s3 + $0x6f0] sm:$0xf0]  ;;  %5932 = vmatpush.bf16.msra.mxu2 %v7995_v28  ;;  %v8475_v55 = vor.u32 %v10216_v11, %v8472_v43 }
 0x27e   : > { %v10280_v49 = vld [vmem:[%s14661_s3 + $0x7e4] sm:$0xf]  ;;  %v8728_v50 = vld [vmem:[%s14661_s3 + $0x7f0] sm:$0xf0]  ;;  %5946 = vmatpush.bf16.msra.mxu3 %v8123_v34  ;;  %v8603_v56 = vor.u32 %v10248_v45, %v8600_v46 }
 0x27f   : > { %v10180_v57 = vld [vmem:[%s14661_s3 + $0x4c4] sm:$0xf]  ;;  %v8328_v58 = vld [vmem:[%s14661_s3 + $0x4d0] sm:$0xf0]  ;;  %5905 = vmatpush.bf16.msra.mxu0 %v7723_v42  ;;  %v8731_v60 = vor.u32 %v10280_v49, %v8728_v50 }
 0x280   : > { %v10212_v59 = vld [vmem:[%s14661_s3 + $0x5c4] sm:$0xf]  ;;  %v8456_v62 = vld [vmem:[%s14661_s3 + $0x5d0] sm:$0xf0]  ;;  %5919 = vmatpush.bf16.msra.mxu1 %v7851_v47  ;;  %v8331_v6 = vor.u32 %v10180_v57, %v8328_v58 }
 0x281   : > { %v10244_v63 = vld [vmem:[%s14661_s3 + $0x6c4] sm:$0xf]  ;;  %v8584_v0 = vld [vmem:[%s14661_s3 + $0x6d0] sm:$0xf0]  ;;  %5933 = vmatpush.bf16.msra.mxu2 %v7979_v48  ;;  %v8459_v7 = vor.u32 %v10212_v59, %v8456_v62 }
 0x282   : > { %v10276_v3 = vld [vmem:[%s14661_s3 + $0x7c4] sm:$0xf]  ;;  %v8712_v4 = vld [vmem:[%s14661_s3 + $0x7d0] sm:$0xf0]  ;;  %5947 = vmatpush.bf16.msra.mxu3 %v8107_v51  ;;  %v8587_v8 = vor.u32 %v10244_v63, %v8584_v0  ;;  %5906 = vmatmul.bf16.vlgmr.msra.gmra.mxu0 %v11562_v32 }
 0x283   : > { %5954 = vmatpush.bf16.msrb.mxu0 %v8347_v52  ;;  %v10176_v9 = vld [vmem:[%s14661_s3 + $0x4a4] sm:$0xf]  ;;  %v8312_v10 = vld [vmem:[%s14661_s3 + $0x4b0] sm:$0xf0]  ;;  %v8715_v13 = vor.u32 %v10276_v3, %v8712_v4  ;;  %5920 = vmatmul.bf16.vlgmr.msra.gmra.mxu1 %v11582_v44 }
 0x284   : > { %5968 = vmatpush.bf16.msrb.mxu1 %v8475_v55  ;;  %v10208_v12 = vld [vmem:[%s14661_s3 + $0x5a4] sm:$0xf]  ;;  %v8440_v14 = vld [vmem:[%s14661_s3 + $0x5b0] sm:$0xf0]  ;;  %5934 = vmatmul.bf16.vlgmr.msra.gmra.mxu2 %v11564_v33  ;;  %v8315_v23 = vor.u32 %v10176_v9, %v8312_v10 }
 0x285   : > { %5982 = vmatpush.bf16.msrb.mxu2 %v8603_v56  ;;  %v10240_v16 = vld [vmem:[%s14661_s3 + $0x6a4] sm:$0xf]  ;;  %v8568_v17 = vld [vmem:[%s14661_s3 + $0x6b0] sm:$0xf0]  ;;  %5948 = vmatmul.bf16.vlgmr.msra.gmra.mxu3 %v11601_v53  ;;  %v8443_v25 = vor.u32 %v10208_v12, %v8440_v14 }
 0x286   : > { %5996 = vmatpush.bf16.msrb.mxu3 %v8731_v60  ;;  %v10272_v19 = vld [vmem:[%s14661_s3 + $0x7a4] sm:$0xf]  ;;  %v8696_v22 = vld [vmem:[%s14661_s3 + $0x7b0] sm:$0xf0]  ;;  %v8571_v26 = vor.u32 %v10240_v16, %v8568_v17 }
 0x287   : > { %5955 = vmatpush.bf16.msrb.mxu0 %v8331_v6  ;;  %v10172_v27 = vld [vmem:[%s14661_s3 + $0x484] sm:$0xf]  ;;  %v8296_v28 = vld [vmem:[%s14661_s3 + $0x490] sm:$0xf0]  ;;  %v8699_v30 = vor.u32 %v10272_v19, %v8696_v22 }
 0x288   : > { %5969 = vmatpush.bf16.msrb.mxu1 %v8459_v7  ;;  %v10204_v29 = vld [vmem:[%s14661_s3 + $0x584] sm:$0xf]  ;;  %v8424_v31 = vld [vmem:[%s14661_s3 + $0x590] sm:$0xf0]  ;;  %v8299_v38 = vor.u32 %v10172_v27, %v8296_v28 }
 0x289   : > { %5983 = vmatpush.bf16.msrb.mxu2 %v8587_v8  ;;  %v10236_v34 = vld [vmem:[%s14661_s3 + $0x684] sm:$0xf]  ;;  %v8552_v35 = vld [vmem:[%s14661_s3 + $0x690] sm:$0xf0]  ;;  %v8427_v41 = vor.u32 %v10204_v29, %v8424_v31 }
 0x28a   : > { %5997 = vmatpush.bf16.msrb.mxu3 %v8715_v13  ;;  %v10268_v54 = vld [vmem:[%s14661_s3 + $0x784] sm:$0xf]  ;;  %v8680_v37 = vld [vmem:[%s14661_s3 + $0x790] sm:$0xf0]  ;;  %v8555_v11 = vor.u32 %v10236_v34, %v8552_v35 }
 0x28b   : > { %5956 = vmatpush.bf16.msrb.mxu0 %v8315_v23  ;;  %v10168_v42 = vld [vmem:[%s14661_s3 + $0x464] sm:$0xf]  ;;  %v8280_v43 = vld [vmem:[%s14661_s3 + $0x470] sm:$0xf0]  ;;  %v8683_v46 = vor.u32 %v10268_v54, %v8680_v37 }
 0x28c   : > { %5970 = vmatpush.bf16.msrb.mxu1 %v8443_v25  ;;  %v10200_v45 = vld [vmem:[%s14661_s3 + $0x564] sm:$0xf]  ;;  %v8408_v47 = vld [vmem:[%s14661_s3 + $0x570] sm:$0xf0]  ;;  %v8283_v52 = vor.u32 %v10168_v42, %v8280_v43 }
 0x28d   : > { %5984 = vmatpush.bf16.msrb.mxu2 %v8571_v26  ;;  %v10232_v48 = vld [vmem:[%s14661_s3 + $0x664] sm:$0xf]  ;;  %v8536_v49 = vld [vmem:[%s14661_s3 + $0x670] sm:$0xf0]  ;;  %v8411_v55 = vor.u32 %v10200_v45, %v8408_v47 }
 0x28e   : > { %5998 = vmatpush.bf16.msrb.mxu3 %v8699_v30  ;;  %v10264_v50 = vld [vmem:[%s14661_s3 + $0x764] sm:$0xf]  ;;  %v8664_v51 = vld [vmem:[%s14661_s3 + $0x770] sm:$0xf0]  ;;  %v8539_v56 = vor.u32 %v10232_v48, %v8536_v49 }
 0x28f   : > { %5957 = vmatpush.bf16.msrb.mxu0 %v8299_v38  ;;  %v10164_v57 = vld [vmem:[%s14661_s3 + $0x444] sm:$0xf]  ;;  %v8264_v58 = vld [vmem:[%s14661_s3 + $0x450] sm:$0xf0]  ;;  %v8667_v60 = vor.u32 %v10264_v50, %v8664_v51 }
 0x290   : > { %5971 = vmatpush.bf16.msrb.mxu1 %v8427_v41  ;;  %v10196_v59 = vld [vmem:[%s14661_s3 + $0x544] sm:$0xf]  ;;  %v8392_v62 = vld [vmem:[%s14661_s3 + $0x550] sm:$0xf0]  ;;  %v8267_v6 = vor.u32 %v10164_v57, %v8264_v58 }
 0x291   : > { %5985 = vmatpush.bf16.msrb.mxu2 %v8555_v11  ;;  %v10228_v63 = vld [vmem:[%s14661_s3 + $0x644] sm:$0xf]  ;;  %v8520_v0 = vld [vmem:[%s14661_s3 + $0x650] sm:$0xf0]  ;;  %v8395_v7 = vor.u32 %v10196_v59, %v8392_v62 }
 0x292   : > { %5999 = vmatpush.bf16.msrb.mxu3 %v8683_v46  ;;  %v10260_v3 = vld [vmem:[%s14661_s3 + $0x744] sm:$0xf]  ;;  %v8648_v4 = vld [vmem:[%s14661_s3 + $0x750] sm:$0xf0]  ;;  %v8523_v8 = vor.u32 %v10228_v63, %v8520_v0 }
 0x293   : > { %5958 = vmatpush.bf16.msrb.mxu0 %v8283_v52  ;;  %v10160_v9 = vld [vmem:[%s14661_s3 + $0x424] sm:$0xf]  ;;  %v8248_v10 = vld [vmem:[%s14661_s3 + $0x430] sm:$0xf0]  ;;  %v8651_v13 = vor.u32 %v10260_v3, %v8648_v4 }
 0x294   : > { %5972 = vmatpush.bf16.msrb.mxu1 %v8411_v55  ;;  %v10192_v12 = vld [vmem:[%s14661_s3 + $0x524] sm:$0xf]  ;;  %v8376_v14 = vld [vmem:[%s14661_s3 + $0x530] sm:$0xf0]  ;;  %v8251_v23 = vor.u32 %v10160_v9, %v8248_v10 }
 0x295   : > { %5986 = vmatpush.bf16.msrb.mxu2 %v8539_v56  ;;  %v10224_v16 = vld [vmem:[%s14661_s3 + $0x624] sm:$0xf]  ;;  %v8504_v17 = vld [vmem:[%s14661_s3 + $0x630] sm:$0xf0]  ;;  %v8379_v27 = vor.u32 %v10192_v12, %v8376_v14 }
 0x296   : > { %6000 = vmatpush.bf16.msrb.mxu3 %v8667_v60  ;;  %v10256_v19 = vld [vmem:[%s14661_s3 + $0x724] sm:$0xf]  ;;  %v8632_v22 = vld [vmem:[%s14661_s3 + $0x730] sm:$0xf0]  ;;  %v8507_v28 = vor.u32 %v10224_v16, %v8504_v17 }
 0x297   : > { %5959 = vmatpush.bf16.msrb.mxu0 %v8267_v6  ;;  %v10156_v25 = vld [vmem:[%s14661_s3 + $0x404] sm:$0xf]  ;;  %v8232_v26 = vld [vmem:[%s14661_s3 + $0x410] sm:$0xf0]  ;;  %v8635_v34 = vor.u32 %v10256_v19, %v8632_v22 }
 0x298   : > { %5973 = vmatpush.bf16.msrb.mxu1 %v8395_v7  ;;  %v10188_v29 = vld [vmem:[%s14661_s3 + $0x504] sm:$0xf]  ;;  %v8360_v30 = vld [vmem:[%s14661_s3 + $0x510] sm:$0xf0]  ;;  %v8235_v42 = vor.u32 %v10156_v25, %v8232_v26 }
 0x299   : > { %5987 = vmatpush.bf16.msrb.mxu2 %v8523_v8  ;;  %v10220_v31 = vld [vmem:[%s14661_s3 + $0x604] sm:$0xf]  ;;  %v8488_v35 = vld [vmem:[%s14661_s3 + $0x610] sm:$0xf0]  ;;  %v8363_v47 = vor.u32 %v10188_v29, %v8360_v30 }
 0x29a   : > { %6001 = vmatpush.bf16.msrb.mxu3 %v8651_v13  ;;  %v10252_v54 = vld [vmem:[%s14661_s3 + $0x704] sm:$0xf]  ;;  %v8616_v37 = vld [vmem:[%s14661_s3 + $0x710] sm:$0xf0]  ;;  %v8491_v48 = vor.u32 %v10220_v31, %v8488_v35 }
 0x29b   : > { %v10312_v38 = vld [vmem:[%s14661_s3 + $0x8e4] sm:$0xf]  ;;  %v8856_v41 = vld [vmem:[%s14661_s3 + $0x8f0] sm:$0xf0]  ;;  %5960 = vmatpush.bf16.msrb.mxu0 %v8251_v23  ;;  %v8619_v51 = vor.u32 %v10252_v54, %v8616_v37 }
 0x29c   : > { %v10344_v11 = vld [vmem:[%s14661_s3 + $0x9e4] sm:$0xf]  ;;  %v8984_v43 = vld [vmem:[%s14661_s3 + $0x9f0] sm:$0xf0]  ;;  %5974 = vmatpush.bf16.msrb.mxu1 %v8379_v27  ;;  %v8859_v52 = vor.u32 %v10312_v38, %v8856_v41 }
 0x29d   : > { %v10376_v45 = vld [vmem:[%s14661_s3 + $0xae4] sm:$0xf]  ;;  %v9112_v46 = vld [vmem:[%s14661_s3 + $0xaf0] sm:$0xf0]  ;;  %5988 = vmatpush.bf16.msrb.mxu2 %v8507_v28  ;;  %v8987_v55 = vor.u32 %v10344_v11, %v8984_v43 }
 0x29e   : > { %v10408_v49 = vld [vmem:[%s14661_s3 + $0xbe4] sm:$0xf]  ;;  %v9240_v50 = vld [vmem:[%s14661_s3 + $0xbf0] sm:$0xf0]  ;;  %6002 = vmatpush.bf16.msrb.mxu3 %v8635_v34  ;;  %v9115_v56 = vor.u32 %v10376_v45, %v9112_v46 }
 0x29f   : > { %v10308_v57 = vld [vmem:[%s14661_s3 + $0x8c4] sm:$0xf]  ;;  %v8840_v58 = vld [vmem:[%s14661_s3 + $0x8d0] sm:$0xf0]  ;;  %5961 = vmatpush.bf16.msrb.mxu0 %v8235_v42  ;;  %v9243_v60 = vor.u32 %v10408_v49, %v9240_v50  ;;  %v12628_v50 = vpop.f32.mrf.mxu0 }
 0x2a0   : > { %v10340_v59 = vld [vmem:[%s14661_s3 + $0x9c4] sm:$0xf]  ;;  %v8968_v62 = vld [vmem:[%s14661_s3 + $0x9d0] sm:$0xf0]  ;;  %5975 = vmatpush.bf16.msrb.mxu1 %v8363_v47  ;;  %v8843_v6 = vor.u32 %v10308_v57, %v8840_v58 }
 0x2a1   : > { %v10372_v63 = vld [vmem:[%s14661_s3 + $0xac4] sm:$0xf]  ;;  %v9096_v0 = vld [vmem:[%s14661_s3 + $0xad0] sm:$0xf0]  ;;  %5989 = vmatpush.bf16.msrb.mxu2 %v8491_v48  ;;  %v8971_v7 = vor.u32 %v10340_v59, %v8968_v62 }
 0x2a2   : > { %v10404_v3 = vld [vmem:[%s14661_s3 + $0xbc4] sm:$0xf]  ;;  %v9224_v4 = vld [vmem:[%s14661_s3 + $0xbd0] sm:$0xf0]  ;;  %6003 = vmatpush.bf16.msrb.mxu3 %v8619_v51  ;;  %v9099_v8 = vor.u32 %v10372_v63, %v9096_v0  ;;  %5962 = vmatmul.bf16.vlgmr.msrb.gmra.mxu0 %v11716_v15 }
 0x2a3   : > { %6010 = vmatpush.bf16.msra.mxu0 %v8859_v52  ;;  %v10304_v9 = vld [vmem:[%s14661_s3 + $0x8a4] sm:$0xf]  ;;  %v8824_v10 = vld [vmem:[%s14661_s3 + $0x8b0] sm:$0xf0]  ;;  %v9227_v13 = vor.u32 %v10404_v3, %v9224_v4  ;;  %5976 = vmatmul.bf16.vlgmr.msrb.gmra.mxu1 %v11729_v21 }
 0x2a4   : > { %6024 = vmatpush.bf16.msra.mxu1 %v8987_v55  ;;  %v10336_v12 = vld [vmem:[%s14661_s3 + $0x9a4] sm:$0xf]  ;;  %v8952_v14 = vld [vmem:[%s14661_s3 + $0x9b0] sm:$0xf0]  ;;  %5990 = vmatmul.bf16.vlgmr.msrb.gmra.mxu2 %v11727_v20  ;;  %v8827_v23 = vor.u32 %v10304_v9, %v8824_v10  ;;  %v12636_v55 = vpop.f32.mrf.mxu1 }
 0x2a5   : > { %6038 = vmatpush.bf16.msra.mxu2 %v9115_v56  ;;  %v10368_v16 = vld [vmem:[%s14661_s3 + $0xaa4] sm:$0xf]  ;;  %v9080_v17 = vld [vmem:[%s14661_s3 + $0xab0] sm:$0xf0]  ;;  %6004 = vmatmul.bf16.vlgmr.msrb.gmra.mxu3 %v11737_v24  ;;  %v8955_v25 = vor.u32 %v10336_v12, %v8952_v14 }
 0x2a6   : > { %6052 = vmatpush.bf16.msra.mxu3 %v9243_v60  ;;  %v10400_v19 = vld [vmem:[%s14661_s3 + $0xba4] sm:$0xf]  ;;  %v9208_v22 = vld [vmem:[%s14661_s3 + $0xbb0] sm:$0xf0]  ;;  %v9083_v26 = vor.u32 %v10368_v16, %v9080_v17  ;;  %v12676_v17 = vpop.f32.mrf.mxu2 }
 0x2a7   : > { %6011 = vmatpush.bf16.msra.mxu0 %v8843_v6  ;;  %v10300_v27 = vld [vmem:[%s14661_s3 + $0x884] sm:$0xf]  ;;  %v8808_v28 = vld [vmem:[%s14661_s3 + $0x890] sm:$0xf0]  ;;  %v9211_v30 = vor.u32 %v10400_v19, %v9208_v22 }
 0x2a8   : > { %6025 = vmatpush.bf16.msra.mxu1 %v8971_v7  ;;  %v10332_v29 = vld [vmem:[%s14661_s3 + $0x984] sm:$0xf]  ;;  %v8936_v31 = vld [vmem:[%s14661_s3 + $0x990] sm:$0xf0]  ;;  %v8811_v38 = vor.u32 %v10300_v27, %v8808_v28 }
 0x2a9   : > { %6039 = vmatpush.bf16.msra.mxu2 %v9099_v8  ;;  %v10364_v34 = vld [vmem:[%s14661_s3 + $0xa84] sm:$0xf]  ;;  %v9064_v35 = vld [vmem:[%s14661_s3 + $0xa90] sm:$0xf0]  ;;  %v8939_v41 = vor.u32 %v10332_v29, %v8936_v31  ;;  %v12665_v8 = vld [vmem:[%s14662_s4] sm:$0xf] }
 0x2aa   : > { %6053 = vmatpush.bf16.msra.mxu3 %v9227_v13  ;;  %v10396_v54 = vld [vmem:[%s14661_s3 + $0xb84] sm:$0xf]  ;;  %v9192_v37 = vld [vmem:[%s14661_s3 + $0xb90] sm:$0xf0]  ;;  %v9067_v11 = vor.u32 %v10364_v34, %v9064_v35  ;;  %v3106_v29 = vperm.slane %v12665_v8, 0  ;;  %v12702_v35 = vpop.f32.mrf.mxu0 }
 0x2ab   : > { %6012 = vmatpush.bf16.msra.mxu0 %v8827_v23  ;;  %v10296_v42 = vld [vmem:[%s14661_s3 + $0x864] sm:$0xf]  ;;  %v8792_v43 = vld [vmem:[%s14661_s3 + $0x870] sm:$0xf0]  ;;  %v9195_v46 = vor.u32 %v10396_v54, %v9192_v37 }
 0x2ac   : > { %6026 = vmatpush.bf16.msra.mxu1 %v8955_v25  ;;  %v10328_v45 = vld [vmem:[%s14661_s3 + $0x964] sm:$0xf]  ;;  %v8920_v47 = vld [vmem:[%s14661_s3 + $0x970] sm:$0xf0]  ;;  %v8795_v56 = vor.u32 %v10296_v42, %v8792_v43  ;;  %v12713_v42 = vpop.f32.mrf.mxu1 }
 0x2ad   : > { %6040 = vmatpush.bf16.msra.mxu2 %v9083_v26  ;;  %v10360_v48 = vld [vmem:[%s14661_s3 + $0xa64] sm:$0xf]  ;;  %v9048_v49 = vld [vmem:[%s14661_s3 + $0xa70] sm:$0xf0]  ;;  %v8923_v57 = vor.u32 %v10328_v45, %v8920_v47  ;;  %v12687_v26 = vpop.f32.mrf.mxu3 }
 0x2ae   : > { %6054 = vmatpush.bf16.msra.mxu3 %v9211_v30  ;;  %v10392_v51 = vld [vmem:[%s14661_s3 + $0xb64] sm:$0xf]  ;;  %v9176_v52 = vld [vmem:[%s14661_s3 + $0xb70] sm:$0xf0]  ;;  %v9051_v58 = vor.u32 %v10360_v48, %v9048_v49 }
 0x2af   : > { %6013 = vmatpush.bf16.msra.mxu0 %v8811_v38  ;;  %v10292_v59 = vld [vmem:[%s14661_s3 + $0x844] sm:$0xf]  ;;  %v8776_v60 = vld [vmem:[%s14661_s3 + $0x850] sm:$0xf0]  ;;  %v9179_v63 = vor.u32 %v10392_v51, %v9176_v52 }
 0x2b0   : > { %6027 = vmatpush.bf16.msra.mxu1 %v8939_v41  ;;  %v10324_v62 = vld [vmem:[%s14661_s3 + $0x944] sm:$0xf]  ;;  %v8904_v0 = vld [vmem:[%s14661_s3 + $0x950] sm:$0xf0]  ;;  %v8779_v9 = vor.u32 %v10292_v59, %v8776_v60 }
 0x2b1   : > { %6041 = vmatpush.bf16.msra.mxu2 %v9067_v11  ;;  %v10356_v3 = vld [vmem:[%s14661_s3 + $0xa44] sm:$0xf]  ;;  %v9032_v4 = vld [vmem:[%s14661_s3 + $0xa50] sm:$0xf0]  ;;  %v8907_v10 = vor.u32 %v10324_v62, %v8904_v0 }
 0x2b2   : > { %6055 = vmatpush.bf16.msra.mxu3 %v9195_v46  ;;  %v10388_v6 = vld [vmem:[%s14661_s3 + $0xb44] sm:$0xf]  ;;  %v9160_v7 = vld [vmem:[%s14661_s3 + $0xb50] sm:$0xf0]  ;;  %v9035_v12 = vor.u32 %v10356_v3, %v9032_v4  ;;  %v5684_v4 = vadd.f32 %v12628_v50, %v3106_v29 }
 0x2b3   : > { %6014 = vmatpush.bf16.msra.mxu0 %v8795_v56  ;;  %v10288_v13 = vld [vmem:[%s14661_s3 + $0x824] sm:$0xf]  ;;  %v8760_v14 = vld [vmem:[%s14661_s3 + $0x830] sm:$0xf0]  ;;  %v9163_v19 = vor.u32 %v10388_v6, %v9160_v7 }
 0x2b4   : > { %6028 = vmatpush.bf16.msra.mxu1 %v8923_v57  ;;  %v10320_v16 = vld [vmem:[%s14661_s3 + $0x924] sm:$0xf]  ;;  %v8888_v22 = vld [vmem:[%s14661_s3 + $0x930] sm:$0xf0]  ;;  %v8763_v30 = vor.u32 %v10288_v13, %v8760_v14  ;;  %v12760_v13 = vpop.f32.mrf.mxu2 }
 0x2b5   : > { %6042 = vmatpush.bf16.msra.mxu2 %v9051_v58  ;;  %v10352_v23 = vld [vmem:[%s14661_s3 + $0xa24] sm:$0xf]  ;;  %v9016_v25 = vld [vmem:[%s14661_s3 + $0xa30] sm:$0xf0]  ;;  %v8891_v54 = vor.u32 %v10320_v16, %v8888_v22  ;;  %v12771_v22 = vpop.f32.mrf.mxu3 }
 0x2b6   : > { %6056 = vmatpush.bf16.msra.mxu3 %v9179_v63  ;;  %v10384_v27 = vld [vmem:[%s14661_s3 + $0xb24] sm:$0xf]  ;;  %v9144_v28 = vld [vmem:[%s14661_s3 + $0xb30] sm:$0xf0]  ;;  %v9019_v37 = vor.u32 %v10352_v23, %v9016_v25 }
 0x2b7   : > { %6015 = vmatpush.bf16.msra.mxu0 %v8779_v9  ;;  %v10284_v31 = vld [vmem:[%s14661_s3 + $0x804] sm:$0xf]  ;;  %v8744_v34 = vld [vmem:[%s14661_s3 + $0x810] sm:$0xf0]  ;;  %v9147_v43 = vor.u32 %v10384_v27, %v9144_v28  ;;  %v5698_v28 = vadd.f32 %v12636_v55, %v5684_v4 }
 0x2b8   : > { %6029 = vmatpush.bf16.msra.mxu1 %v8907_v10  ;;  %v10316_v38 = vld [vmem:[%s14661_s3 + $0x904] sm:$0xf]  ;;  %v8872_v41 = vld [vmem:[%s14661_s3 + $0x910] sm:$0xf0]  ;;  %v8747_v52 = vor.u32 %v10284_v31, %v8744_v34 }
 0x2b9   : > { %6043 = vmatpush.bf16.msra.mxu2 %v9035_v12  ;;  %v10348_v11 = vld [vmem:[%s14661_s3 + $0xa04] sm:$0xf]  ;;  %v9000_v45 = vld [vmem:[%s14661_s3 + $0xa10] sm:$0xf0]  ;;  %v8875_v59 = vor.u32 %v10316_v38, %v8872_v41  ;;  %v12789_v41 = vpop.f32.mrf.mxu1 }
 0x2ba   : > { %6057 = vmatpush.bf16.msra.mxu3 %v9163_v19  ;;  %v10380_v46 = vld [vmem:[%s14661_s3 + $0xb04] sm:$0xf]  ;;  %v9128_v47 = vld [vmem:[%s14661_s3 + $0xb10] sm:$0xf0]  ;;  %v9003_v60 = vor.u32 %v10348_v11, %v9000_v45 }
 0x2bb   : > { %v10440_v48 = vld [vmem:[%s14661_s3 + $0xce4] sm:$0xf]  ;;  %v9368_v49 = vld [vmem:[%s14661_s3 + $0xcf0] sm:$0xf0]  ;;  %6016 = vmatpush.bf16.msra.mxu0 %v8763_v30  ;;  %v9131_v0 = vor.u32 %v10380_v46, %v9128_v47  ;;  %v5739_v30 = vpop.f32.mrf.mxu0 }
 0x2bc   : > { %v10472_v51 = vld [vmem:[%s14661_s3 + $0xde4] sm:$0xf]  ;;  %v9496_v56 = vld [vmem:[%s14661_s3 + $0xdf0] sm:$0xf0]  ;;  %6030 = vmatpush.bf16.msra.mxu1 %v8891_v54  ;;  %v9371_v3 = vor.u32 %v10440_v48, %v9368_v49  ;;  %v5712_v49 = vadd.f32 %v12676_v17, %v5698_v28  ;;  %v12838_v4 = vpop.f32.mrf.mxu2 }
 0x2bd   : > { %v10504_v57 = vld [vmem:[%s14661_s3 + $0xee4] sm:$0xf]  ;;  %v9624_v58 = vld [vmem:[%s14661_s3 + $0xef0] sm:$0xf0]  ;;  %6044 = vmatpush.bf16.msra.mxu2 %v9019_v37  ;;  %v9499_v6 = vor.u32 %v10472_v51, %v9496_v56 }
 0x2be   : > { %v10536_v62 = vld [vmem:[%s14661_s3 + $0xfe4] sm:$0xf]  ;;  %v9752_v63 = vld [vmem:[%s14661_s3 + $0xff0] sm:$0xf0]  ;;  %6058 = vmatpush.bf16.msra.mxu3 %v9147_v43  ;;  %v9627_v7 = vor.u32 %v10504_v57, %v9624_v58 }
 0x2bf   : > { %v10436_v9 = vld [vmem:[%s14661_s3 + $0xcc4] sm:$0xf]  ;;  %v9352_v10 = vld [vmem:[%s14661_s3 + $0xcd0] sm:$0xf0]  ;;  %6017 = vmatpush.bf16.msra.mxu0 %v8747_v52  ;;  %v9755_v14 = vor.u32 %v10536_v62, %v9752_v63  ;;  %v5686_v63 = vadd.f32 %v12702_v35, %v3106_v29 }
 0x2c0   : > { %v10468_v12 = vld [vmem:[%s14661_s3 + $0xdc4] sm:$0xf]  ;;  %v9480_v50 = vld [vmem:[%s14661_s3 + $0xdd0] sm:$0xf0]  ;;  %6031 = vmatpush.bf16.msra.mxu1 %v8875_v59  ;;  %v9355_v27 = vor.u32 %v10436_v9, %v9352_v10  ;;  %v12841_v9 = vpop.f32.mrf.mxu3 }
 0x2c1   : > { %v10500_v16 = vld [vmem:[%s14661_s3 + $0xec4] sm:$0xf]  ;;  %v9608_v19 = vld [vmem:[%s14661_s3 + $0xed0] sm:$0xf0]  ;;  %6045 = vmatpush.bf16.msra.mxu2 %v9003_v60  ;;  %v9483_v31 = vor.u32 %v10468_v12, %v9480_v50  ;;  %v12868_v28 = vpop.f32.mrf.mxu1 }
 0x2c2   : > { %v10532_v23 = vld [vmem:[%s14661_s3 + $0xfc4] sm:$0xf]  ;;  %v9736_v25 = vld [vmem:[%s14661_s3 + $0xfd0] sm:$0xf0]  ;;  %6059 = vmatpush.bf16.msra.mxu3 %v9131_v0  ;;  %v9611_v34 = vor.u32 %v10500_v16, %v9608_v19  ;;  %6018 = vmatmul.bf16.vlgmr.msra.gmra.mxu0 %v11932_v36  ;;  %v5700_v19 = vadd.f32 %v12713_v42, %v5686_v63 }
 0x2c3   : > { %6066 = vmatpush.bf16.msrb.mxu0 %v9371_v3  ;;  %v10432_v54 = vld [vmem:[%s14661_s3 + $0xca4] sm:$0xf]  ;;  %v9336_v37 = vld [vmem:[%s14661_s3 + $0xcb0] sm:$0xf0]  ;;  %v9739_v55 = vor.u32 %v10532_v23, %v9736_v25  ;;  %6032 = vmatmul.bf16.vlgmr.msra.gmra.mxu1 %v11945_v40  ;;  %v5741_v23 = vpop.f32.mrf.mxu0 }
 0x2c4   : > { %6080 = vmatpush.bf16.msrb.mxu1 %v9499_v6  ;;  %v10464_v38 = vld [vmem:[%s14661_s3 + $0xda4] sm:$0xf]  ;;  %v9464_v11 = vld [vmem:[%s14661_s3 + $0xdb0] sm:$0xf0]  ;;  %6046 = vmatmul.bf16.vlgmr.msra.gmra.mxu2 %v11943_v39  ;;  %v9339_v48 = vor.u32 %v10432_v54, %v9336_v37 }
 0x2c5   : > { %6094 = vmatpush.bf16.msrb.mxu2 %v9627_v7  ;;  %v10496_v43 = vld [vmem:[%s14661_s3 + $0xea4] sm:$0xf]  ;;  %v9592_v45 = vld [vmem:[%s14661_s3 + $0xeb0] sm:$0xf0]  ;;  %6060 = vmatmul.bf16.vlgmr.msra.gmra.mxu3 %v11953_v18  ;;  %v9467_v51 = vor.u32 %v10464_v38, %v9464_v11  ;;  %v5726_v7 = vadd.f32 %v12687_v26, %v5712_v49 }
 0x2c6   : > { %6108 = vmatpush.bf16.msrb.mxu3 %v9755_v14  ;;  %v10528_v46 = vld [vmem:[%s14661_s3 + $0xfa4] sm:$0xf]  ;;  %v9720_v47 = vld [vmem:[%s14661_s3 + $0xfb0] sm:$0xf0]  ;;  %v9595_v52 = vor.u32 %v10496_v43, %v9592_v45 }
 0x2c7   : > { %6067 = vmatpush.bf16.msrb.mxu0 %v9355_v27  ;;  %v10428_v56 = vld [vmem:[%s14661_s3 + $0xc84] sm:$0xf]  ;;  %v9320_v57 = vld [vmem:[%s14661_s3 + $0xc90] sm:$0xf0]  ;;  %v9723_v59 = vor.u32 %v10528_v46, %v9720_v47  ;;  %v5714_v46 = vadd.f32 %v12760_v13, %v5700_v19 }
 0x2c8   : > { %6081 = vmatpush.bf16.msrb.mxu1 %v9483_v31  ;;  %v10460_v58 = vld [vmem:[%s14661_s3 + $0xd84] sm:$0xf]  ;;  %v9448_v17 = vld [vmem:[%s14661_s3 + $0xd90] sm:$0xf0]  ;;  %v9323_v6 = vor.u32 %v10428_v56, %v9320_v57 }
 0x2c9   : > { %6095 = vmatpush.bf16.msrb.mxu2 %v9611_v34  ;;  %v10492_v60 = vld [vmem:[%s14661_s3 + $0xe84] sm:$0xf]  ;;  %v9576_v62 = vld [vmem:[%s14661_s3 + $0xe90] sm:$0xf0]  ;;  %v9451_v8 = vor.u32 %v10460_v58, %v9448_v17  ;;  %v5740_v34 = vadd.f32 %v5739_v30, %v5726_v7  ;;  %v5728_v63 = vadd.f32 %v12771_v22, %v5714_v46  ;;  %v10155_v46 = vld [vmem:[%s14661_s3 + $0x3f4] sm:$0xf0] }
 0x2ca   : > { %6109 = vmatpush.bf16.msrb.mxu3 %v9739_v55  ;;  %v10524_v0 = vld [vmem:[%s14661_s3 + $0xf84] sm:$0xf]  ;;  %v9704_v3 = vld [vmem:[%s14661_s3 + $0xf90] sm:$0xf0]  ;;  %v9579_v29 = vor.u32 %v10492_v60, %v9576_v62 }
 0x2cb   : > { %6068 = vmatpush.bf16.msrb.mxu0 %v9339_v48  ;;  %v10424_v35 = vld [vmem:[%s14661_s3 + $0xc64] sm:$0xf]  ;;  %v9304_v10 = vld [vmem:[%s14661_s3 + $0xc70] sm:$0xf0]  ;;  %v9707_v26 = vor.u32 %v10524_v0, %v9704_v3  ;;  %v12915_v0 = vpop.f32.mrf.mxu3  ;;  %v5795_v3 = vpop.f32.mrf.mxu0 }
 0x2cc   : > { %6082 = vmatpush.bf16.msrb.mxu1 %v9467_v51  ;;  %v10456_v12 = vld [vmem:[%s14661_s3 + $0xd64] sm:$0xf]  ;;  %v9432_v14 = vld [vmem:[%s14661_s3 + $0xd70] sm:$0xf0]  ;;  %v9307_v31 = vor.u32 %v10424_v35, %v9304_v10  ;;  %v5754_v51 = vadd.f32 %v12789_v41, %v5740_v34  ;;  %v7838_v34 = vld [vmem:[%s14661_s3 + $0xe8] sm:$0xf] }
 0x2cd   : > { %6096 = vmatpush.bf16.msrb.mxu2 %v9595_v52  ;;  %v10488_v50 = vld [vmem:[%s14661_s3 + $0xe64] sm:$0xf]  ;;  %v9560_v16 = vld [vmem:[%s14661_s3 + $0xe70] sm:$0xf0]  ;;  %v9435_v54 = vor.u32 %v10456_v12, %v9432_v14 }
 0x2ce   : > { %6110 = vmatpush.bf16.msrb.mxu3 %v9723_v59  ;;  %v10520_v25 = vld [vmem:[%s14661_s3 + $0xf64] sm:$0xf]  ;;  %v9688_v27 = vld [vmem:[%s14661_s3 + $0xf70] sm:$0xf0]  ;;  %v9563_v37 = vor.u32 %v10488_v50, %v9560_v16  ;;  %v5769_v59 = vpop.f32.mrf.mxu2  ;;  %v5768_v10 = vadd.f32 %v12838_v4, %v5754_v51 }
 0x2cf   : > { %6069 = vmatpush.bf16.msrb.mxu0 %v9323_v6  ;;  %v10420_v42 = vld [vmem:[%s14661_s3 + $0xc44] sm:$0xf]  ;;  %v9288_v38 = vld [vmem:[%s14661_s3 + $0xc50] sm:$0xf0]  ;;  %v9691_v11 = vor.u32 %v10520_v25, %v9688_v27 }
 0x2d0   : > { %6083 = vmatpush.bf16.msrb.mxu1 %v9451_v8  ;;  %v10452_v55 = vld [vmem:[%s14661_s3 + $0xd44] sm:$0xf]  ;;  %v9416_v30 = vld [vmem:[%s14661_s3 + $0xd50] sm:$0xf0]  ;;  %v9291_v49 = vor.u32 %v10420_v42, %v9288_v38  ;;  %v5809_v8 = vpop.f32.mrf.mxu1  ;;  %v10091_v38 = vld [vmem:[%s14661_s3 + $0x1f4] sm:$0xf0] }
 0x2d1   : > { %6097 = vmatpush.bf16.msrb.mxu2 %v9579_v29  ;;  %v10484_v43 = vld [vmem:[%s14661_s3 + $0xe44] sm:$0xf]  ;;  %v9544_v45 = vld [vmem:[%s14661_s3 + $0xe50] sm:$0xf0]  ;;  %v9419_v52 = vor.u32 %v10452_v55, %v9416_v30  ;;  %v10123_v55 = vld [vmem:[%s14661_s3 + $0x2f4] sm:$0xf0] }
 0x2d2   : > { %6111 = vmatpush.bf16.msrb.mxu3 %v9707_v26  ;;  %v10516_v47 = vld [vmem:[%s14661_s3 + $0xf44] sm:$0xf]  ;;  %v9672_v48 = vld [vmem:[%s14661_s3 + $0xf50] sm:$0xf0]  ;;  %v9547_v56 = vor.u32 %v10484_v43, %v9544_v45  ;;  %v8222_v45 = vld [vmem:[%s14661_s3 + $0x3e8] sm:$0xf] }
 0x2d3   : > { %6070 = vmatpush.bf16.msrb.mxu0 %v9307_v31  ;;  %v10416_v13 = vld [vmem:[%s14661_s3 + $0xc24] sm:$0xf]  ;;  %v9272_v57 = vld [vmem:[%s14661_s3 + $0xc30] sm:$0xf0]  ;;  %v9675_v17 = vor.u32 %v10516_v47, %v9672_v48  ;;  %v5742_v31 = vadd.f32 %v5741_v23, %v5728_v63  ;;  %v8094_v23 = vld [vmem:[%s14661_s3 + $0x2e8] sm:$0xf] }
 0x2d4   : > { %6084 = vmatpush.bf16.msrb.mxu1 %v9435_v54  ;;  %v10448_v58 = vld [vmem:[%s14661_s3 + $0xd24] sm:$0xf]  ;;  %v9400_v41 = vld [vmem:[%s14661_s3 + $0xd30] sm:$0xf0]  ;;  %v9275_v29 = vor.u32 %v10416_v13, %v9272_v57  ;;  %v10059_v54 = vld [vmem:[%s14661_s3 + $0xf4] sm:$0xf0]  ;;  %v8095_v13 = vor.u32 %v10123_v55, %v8094_v23 }
 0x2d5   : > { %6098 = vmatpush.bf16.msrb.mxu2 %v9563_v37  ;;  %v10480_v60 = vld [vmem:[%s14661_s3 + $0xe24] sm:$0xf]  ;;  %v9528_v62 = vld [vmem:[%s14661_s3 + $0xe30] sm:$0xf0]  ;;  %v9403_v12 = vor.u32 %v10448_v58, %v9400_v41  ;;  %v7966_v37 = vld [vmem:[%s14661_s3 + $0x1e8] sm:$0xf]  ;;  %v5756_v51 = vadd.f32 %v12868_v28, %v5742_v31  ;;  %v8223_v41 = vor.u32 %v10155_v46, %v8222_v45 }
 0x2d6   : > { %6112 = vmatpush.bf16.msrb.mxu3 %v9691_v11  ;;  %v10512_v6 = vld [vmem:[%s14661_s3 + $0xf24] sm:$0xf]  ;;  %v9656_v7 = vld [vmem:[%s14661_s3 + $0xf30] sm:$0xf0]  ;;  %v9531_v26 = vor.u32 %v10480_v60, %v9528_v62  ;;  %v5782_v11 = vadd.f32 %v12841_v9, %v5768_v10  ;;  %v5823_v47 = vpop.f32.mrf.mxu2  ;;  %v5837_v9 = vpop.f32.mrf.mxu3  ;;  %v7822_v57 = vld [vmem:[%s14661_s3 + $0xc8] sm:$0xf] }
 0x2d7   : > { %6071 = vmatpush.bf16.msrb.mxu0 %v9291_v49  ;;  %v10412_v35 = vld [vmem:[%s14661_s3 + $0xc04] sm:$0xf]  ;;  %v9256_v22 = vld [vmem:[%s14661_s3 + $0xc10] sm:$0xf0]  ;;  %v9659_v19 = vor.u32 %v10512_v6, %v9656_v7  ;;  %v7839_v49 = vor.u32 %v10059_v54, %v7838_v34  ;;  %v10055_v58 = vld [vmem:[%s14661_s3 + $0xd4] sm:$0xf0]  ;;  %v5770_v63 = vadd.f32 %v5769_v59, %v5756_v51 }
 0x2d8   : > { %6085 = vmatpush.bf16.msrb.mxu1 %v9419_v52  ;;  %v10444_v14 = vld [vmem:[%s14661_s3 + $0xd04] sm:$0xf]  ;;  %v9384_v50 = vld [vmem:[%s14661_s3 + $0xd10] sm:$0xf0]  ;;  %v9259_v42 = vor.u32 %v10412_v35, %v9256_v22  ;;  %v5796_v52 = vadd.f32 %v5795_v3, %v5782_v11  ;;  %v10087_v28 = vld [vmem:[%s14661_s3 + $0x1d4] sm:$0xf0]  ;;  %v5797_v3 = vpop.f32.mrf.mxu0  ;;  %v7823_v35 = vor.u32 %v10055_v58, %v7822_v57 }
 0x2d9   : > { %6099 = vmatpush.bf16.msrb.mxu2 %v9547_v56  ;;  %v10476_v16 = vld [vmem:[%s14661_s3 + $0xe04] sm:$0xf]  ;;  %v9512_v4 = vld [vmem:[%s14661_s3 + $0xe10] sm:$0xf0]  ;;  %v9387_v30 = vor.u32 %v10444_v14, %v9384_v50  ;;  %v7967_v56 = vor.u32 %v10091_v38, %v7966_v37  ;;  %v8078_v60 = vld [vmem:[%s14661_s3 + $0x2c8] sm:$0xf] }
 0x2da   : > { %6113 = vmatpush.bf16.msrb.mxu3 %v9675_v17  ;;  %v10508_v25 = vld [vmem:[%s14661_s3 + $0xf04] sm:$0xf]  ;;  %v9640_v27 = vld [vmem:[%s14661_s3 + $0xf10] sm:$0xf0]  ;;  %v9515_v43 = vor.u32 %v10476_v16, %v9512_v4  ;;  %v7950_v17 = vld [vmem:[%s14661_s3 + $0x1c8] sm:$0xf]  ;;  %v5810_v22 = vadd.f32 %v5809_v8, %v5796_v52  ;;  %v5784_v4 = vadd.f32 %v12915_v0, %v5770_v63 }
 0x2db   : > { %6072 = vmatpush.bf16.msrb.mxu0 %v9275_v29  ;;  %v9643_v48 = vor.u32 %v10508_v25, %v9640_v27  ;;  %v10119_v62 = vld [vmem:[%s14661_s3 + $0x2d4] sm:$0xf0]  ;;  %v8206_v6 = vld [vmem:[%s14661_s3 + $0x3c8] sm:$0xf]  ;;  %v5811_v29 = vpop.f32.mrf.mxu1  ;;  %v7951_v10 = vor.u32 %v10087_v28, %v7950_v17 }
 0x2dc   : > { %6086 = vmatpush.bf16.msrb.mxu1 %v9403_v12  ;;  %v10151_v7 = vld [vmem:[%s14661_s3 + $0x3d4] sm:$0xf0]  ;;  %v8079_v59 = vor.u32 %v10119_v62, %v8078_v60  ;;  %v7806_v12 = vld [vmem:[%s14661_s3 + $0xa8] sm:$0xf]  ;;  %v5824_v25 = vadd.f32 %v5823_v47, %v5810_v22  ;;  %v5798_v54 = vadd.f32 %v5797_v3, %v5784_v4 }
 0x2dd   : > { %6100 = vmatpush.bf16.msrb.mxu2 %v9531_v26  ;;  %v10051_v26 = vld [vmem:[%s14661_s3 + $0xb4] sm:$0xf0]  ;;  %v7934_v14 = vld [vmem:[%s14661_s3 + $0x1a8] sm:$0xf]  ;;  %v8207_v8 = vor.u32 %v10151_v7, %v8206_v6 }
 0x2de   : > { %6114 = vmatpush.bf16.msrb.mxu3 %v9659_v19  ;;  %v10083_v50 = vld [vmem:[%s14661_s3 + $0x1b4] sm:$0xf0]  ;;  %v8062_v16 = vld [vmem:[%s14661_s3 + $0x2a8] sm:$0xf]  ;;  %v7807_v34 = vor.u32 %v10051_v26, %v7806_v12  ;;  %v5825_v11 = vpop.f32.mrf.mxu2  ;;  %v5838_v46 = vadd.f32 %v5837_v9, %v5824_v25  ;;  %v5839_v47 = vpop.f32.mrf.mxu3  ;;  %v5812_v57 = vadd.f32 %v5811_v29, %v5798_v54 }
 0x2df   : > { %6073 = vmatpush.bf16.msrb.mxu0 %v9259_v42  ;;  %v10115_v19 = vld [vmem:[%s14661_s3 + $0x2b4] sm:$0xf0]  ;;  %v8190_v27 = vld [vmem:[%s14661_s3 + $0x3a8] sm:$0xf]  ;;  %v7935_v37 = vor.u32 %v10083_v50, %v7934_v14 }
 0x2e0   : > { %6087 = vmatpush.bf16.msrb.mxu1 %v9387_v30  ;;  %v10147_v31 = vld [vmem:[%s14661_s3 + $0x3b4] sm:$0xf0]  ;;  %v7790_v0 = vld [vmem:[%s14661_s3 + $0x88] sm:$0xf]  ;;  %v8063_v42 = vor.u32 %v10115_v19, %v8062_v16  ;;  %v5826_v6 = vadd.f32 %v5825_v11, %v5812_v57 }
 0x2e1   : > { %6101 = vmatpush.bf16.msrb.mxu2 %v9515_v43  ;;  %v10047_v38 = vld [vmem:[%s14661_s3 + $0x94] sm:$0xf0]  ;;  %v7918_v23 = vld [vmem:[%s14661_s3 + $0x188] sm:$0xf]  ;;  %v8191_v30 = vor.u32 %v10147_v31, %v8190_v27 }
 0x2e2   : > { %6115 = vmatpush.bf16.msrb.mxu3 %v9643_v48  ;;  %6074 = vmatmul.bf16.vlgmr.msrb.gmra.mxu0 %v12143_v61  ;;  %v10079_v55 = vld [vmem:[%s14661_s3 + $0x194] sm:$0xf0]  ;;  %v8046_v43 = vld [vmem:[%s14661_s3 + $0x288] sm:$0xf]  ;;  %v5851_v48 = vpop.f32.mrf.mxu0  ;;  %v7791_v52 = vor.u32 %v10047_v38, %v7790_v0  ;;  %v5840_v25 = vadd.f32 %v5839_v47, %v5826_v6 }
 0x2e3   : > { %6122 = vmatpush.bf16.msra.mxu0 %v7839_v49  ;;  %6088 = vmatmul.bf16.vlgmr.msrb.gmra.mxu1 %v12156_v2  ;;  %v10111_v45 = vld [vmem:[%s14661_s3 + $0x294] sm:$0xf0]  ;;  %v8174_v49 = vld [vmem:[%s14661_s3 + $0x388] sm:$0xf]  ;;  %v5852_v58 = vadd.f32 %v5851_v48, %v5838_v46 }
 0x2e4   : > { %6136 = vmatpush.bf16.msra.mxu1 %v7967_v56  ;;  %6102 = vmatmul.bf16.vlgmr.msrb.gmra.mxu2 %v12154_v1  ;;  %v10143_v51 = vld [vmem:[%s14661_s3 + $0x394] sm:$0xf0]  ;;  %v7919_v56 = vor.u32 %v10079_v55, %v7918_v23  ;;  %v8047_v17 = vor.u32 %v10111_v45, %v8046_v43  ;;  %v7774_v9 = vld [vmem:[%s14661_s3 + $0x68] sm:$0xf] }
 0x2e5   : > { %6150 = vmatpush.bf16.msra.mxu2 %v8095_v13  ;;  %6116 = vmatmul.bf16.vlgmr.msrb.gmra.mxu3 %v12164_v5  ;;  %v5865_v13 = vpop.f32.mrf.mxu1  ;;  %v7902_v28 = vld [vmem:[%s14661_s3 + $0x168] sm:$0xf]  ;;  %v8175_v60 = vor.u32 %v10143_v51, %v8174_v49  ;;  %v10075_v62 = vld [vmem:[%s14661_s3 + $0x174] sm:$0xf0] }
 0x2e6   : > { %6164 = vmatpush.bf16.msra.mxu3 %v8223_v41  ;;  %v10043_v41 = vld [vmem:[%s14661_s3 + $0x74] sm:$0xf0]  ;;  %v8030_v63 = vld [vmem:[%s14661_s3 + $0x268] sm:$0xf] }
 0x2e7   : > { %6123 = vmatpush.bf16.msra.mxu0 %v7823_v35  ;;  %v10107_v3 = vld [vmem:[%s14661_s3 + $0x274] sm:$0xf0]  ;;  %v8158_v7 = vld [vmem:[%s14661_s3 + $0x368] sm:$0xf]  ;;  %v7775_v35 = vor.u32 %v10043_v41, %v7774_v9  ;;  %v5879_v16 = vpop.f32.mrf.mxu2 }
 0x2e8   : > { %6137 = vmatpush.bf16.msra.mxu1 %v7951_v10  ;;  %v10139_v29 = vld [vmem:[%s14661_s3 + $0x374] sm:$0xf0]  ;;  %v7758_v22 = vld [vmem:[%s14661_s3 + $0x48] sm:$0xf]  ;;  %v5866_v10 = vadd.f32 %v5865_v13, %v5852_v58  ;;  %v8031_v12 = vor.u32 %v10107_v3, %v8030_v63 }
 0x2e9   : > { %6151 = vmatpush.bf16.msra.mxu2 %v8079_v59  ;;  %v7903_v59 = vor.u32 %v10075_v62, %v7902_v28  ;;  %v10039_v26 = vld [vmem:[%s14661_s3 + $0x54] sm:$0xf0]  ;;  %v7886_v14 = vld [vmem:[%s14661_s3 + $0x148] sm:$0xf]  ;;  %v8159_v50 = vor.u32 %v10139_v29, %v8158_v7 }
 0x2ea   : > { %6165 = vmatpush.bf16.msra.mxu3 %v8207_v8  ;;  %v10071_v8 = vld [vmem:[%s14661_s3 + $0x154] sm:$0xf0]  ;;  %v8014_v19 = vld [vmem:[%s14661_s3 + $0x248] sm:$0xf]  ;;  %v5880_v27 = vadd.f32 %v5879_v16, %v5866_v10  ;;  %v5853_v31 = vpop.f32.mrf.mxu0 }
 0x2eb   : > { %6124 = vmatpush.bf16.msra.mxu0 %v7807_v34  ;;  %v10103_v4 = vld [vmem:[%s14661_s3 + $0x254] sm:$0xf0]  ;;  %v5893_v34 = vpop.f32.mrf.mxu3  ;;  %v8142_v0 = vld [vmem:[%s14661_s3 + $0x348] sm:$0xf]  ;;  %v5854_v38 = vadd.f32 %v5853_v31, %v5840_v25 }
 0x2ec   : > { %6138 = vmatpush.bf16.msra.mxu1 %v7935_v37  ;;  %v10135_v54 = vld [vmem:[%s14661_s3 + $0x354] sm:$0xf0]  ;;  %v7759_v37 = vor.u32 %v10039_v26, %v7758_v22  ;;  %v5894_v23 = vadd.f32 %v5893_v34, %v5880_v27  ;;  %v8015_v55 = vor.u32 %v10103_v4, %v8014_v19  ;;  %v7742_v11 = vld [vmem:[%s14661_s3 + $0x28] sm:$0xf] }
 0x2ed   : > { %6152 = vmatpush.bf16.msra.mxu2 %v8063_v42  ;;  %v7887_v42 = vor.u32 %v10071_v8, %v7886_v14  ;;  %v7870_v43 = vld [vmem:[%s14661_s3 + $0x128] sm:$0xf]  ;;  %v8143_v45 = vor.u32 %v10135_v54, %v8142_v0  ;;  %v5867_v46 = vpop.f32.mrf.mxu1  ;;  %v10067_v47 = vld [vmem:[%s14661_s3 + $0x134] sm:$0xf0] }
 0x2ee   : > { %6166 = vmatpush.bf16.msra.mxu3 %v8191_v30  ;;  %v10035_v30 = vld [vmem:[%s14661_s3 + $0x34] sm:$0xf0]  ;;  %v7998_v48 = vld [vmem:[%s14661_s3 + $0x228] sm:$0xf]  ;;  %v6570_v51 = vmax.f32 %v5894_v23, 0.0  ;;  %v7871_v9 = vor.u32 %v10067_v47, %v7870_v43 }
 0x2ef   : > { %6125 = vmatpush.bf16.msra.mxu0 %v7791_v52  ;;  %v10099_v49 = vld [vmem:[%s14661_s3 + $0x234] sm:$0xf0]  ;;  %v8126_v52 = vld [vmem:[%s14661_s3 + $0x328] sm:$0xf]  ;;  %v7743_v13 = vor.u32 %v10035_v30, %v7742_v11  ;;  %v5881_v3 = vpop.f32.mrf.mxu2 }
 0x2f0   : > { %6139 = vmatpush.bf16.msra.mxu1 %v7919_v56  ;;  %v10131_v56 = vld [vmem:[%s14661_s3 + $0x334] sm:$0xf0]  ;;  %v7726_v57 = vld [vmem:[%s14661_s3 + $0x8] sm:$0xf]  ;;  %6578 = vst [vmem:[%s14663_s5] sm:$0xff] %v6570_v51  ;;  %v7999_v41 = vor.u32 %v10099_v49, %v7998_v48 }
 0x2f1   : > { %6153 = vmatpush.bf16.msra.mxu2 %v8047_v17  ;;  %v10031_v58 = vld [vmem:[%s14661_s3 + $0x14] sm:$0xf0]  ;;  %v5868_v17 = vadd.f32 %v5867_v46, %v5854_v38  ;;  %v7854_v28 = vld [vmem:[%s14661_s3 + $0x108] sm:$0xf]  ;;  %v8127_v63 = vor.u32 %v10131_v56, %v8126_v52 }
 0x2f2   : > { %6167 = vmatpush.bf16.msra.mxu3 %v8175_v60  ;;  %v10063_v60 = vld [vmem:[%s14661_s3 + $0x114] sm:$0xf0]  ;;  %v7982_v62 = vld [vmem:[%s14661_s3 + $0x208] sm:$0xf]  ;;  %v7727_v26 = vor.u32 %v10031_v58, %v7726_v57 }
 0x2f3   : > { %6126 = vmatpush.bf16.msra.mxu0 %v7775_v35  ;;  %v10095_v6 = vld [vmem:[%s14661_s3 + $0x214] sm:$0xf0]  ;;  %v8110_v7 = vld [vmem:[%s14661_s3 + $0x308] sm:$0xf]  ;;  %v5882_v35 = vadd.f32 %v5881_v3, %v5868_v17  ;;  %v5895_v22 = vpop.f32.mrf.mxu3  ;;  %v7855_v19 = vor.u32 %v10063_v60, %v7854_v28 }
 0x2f4   : > { %6140 = vmatpush.bf16.msra.mxu1 %v7903_v59  ;;  %v10127_v29 = vld [vmem:[%s14661_s3 + $0x314] sm:$0xf0]  ;;  %v8350_v10 = vld [vmem:[%s14661_s3 + $0x4e8] sm:$0xf]  ;;  %v7983_v4 = vor.u32 %v10095_v6, %v7982_v62 }
 0x2f5   : > { %6154 = vmatpush.bf16.msra.mxu2 %v8031_v12  ;;  %v10187_v59 = vld [vmem:[%s14661_s3 + $0x4f4] sm:$0xf0]  ;;  %v8478_v12 = vld [vmem:[%s14661_s3 + $0x5e8] sm:$0xf]  ;;  %v5896_v16 = vadd.f32 %v5895_v22, %v5882_v35  ;;  %v8111_v31 = vor.u32 %v10127_v29, %v8110_v7 }
 0x2f6   : > { %6168 = vmatpush.bf16.msra.mxu3 %v8159_v50  ;;  %v10219_v14 = vld [vmem:[%s14661_s3 + $0x5f4] sm:$0xf0]  ;;  %v8606_v8 = vld [vmem:[%s14661_s3 + $0x6e8] sm:$0xf]  ;;  %v8351_v34 = vor.u32 %v10187_v59, %v8350_v10 }
 0x2f7   : > { %6127 = vmatpush.bf16.msra.mxu0 %v7759_v37  ;;  %v10251_v50 = vld [vmem:[%s14661_s3 + $0x6f4] sm:$0xf0]  ;;  %v8734_v25 = vld [vmem:[%s14661_s3 + $0x7e8] sm:$0xf]  ;;  %v6574_v54 = vmax.f32 %v5896_v16, 0.0  ;;  %v8479_v37 = vor.u32 %v10219_v14, %v8478_v12 }
 0x2f8   : > { %6141 = vmatpush.bf16.msra.mxu1 %v7887_v42  ;;  %v10283_v27 = vld [vmem:[%s14661_s3 + $0x7f4] sm:$0xf0]  ;;  %v8334_v0 = vld [vmem:[%s14661_s3 + $0x4c8] sm:$0xf]  ;;  %v8607_v42 = vor.u32 %v10251_v50, %v8606_v8 }
 0x2f9   : > { %6155 = vmatpush.bf16.msra.mxu2 %v8015_v55  ;;  %v10183_v38 = vld [vmem:[%s14661_s3 + $0x4d4] sm:$0xf0]  ;;  %v8462_v23 = vld [vmem:[%s14661_s3 + $0x5c8] sm:$0xf]  ;;  %v8735_v55 = vor.u32 %v10283_v27, %v8734_v25  ;;  %6582 = vst [vmem:[%s14663_s5 + $0x20] sm:$0xff] %v6574_v54 }
 0x2fa   : > { %6169 = vmatpush.bf16.msra.mxu3 %v8143_v45  ;;  %v10215_v11 = vld [vmem:[%s14661_s3 + $0x5d4] sm:$0xf0]  ;;  %v8590_v30 = vld [vmem:[%s14661_s3 + $0x6c8] sm:$0xf]  ;;  %v8335_v47 = vor.u32 %v10183_v38, %v8334_v0 }
 0x2fb   : > { %6128 = vmatpush.bf16.msra.mxu0 %v7743_v13  ;;  %v10247_v43 = vld [vmem:[%s14661_s3 + $0x6d4] sm:$0xf0]  ;;  %v8718_v45 = vld [vmem:[%s14661_s3 + $0x7c8] sm:$0xf]  ;;  %v8463_v48 = vor.u32 %v10215_v11, %v8462_v23 }
 0x2fc   : > { %6142 = vmatpush.bf16.msra.mxu1 %v7871_v9  ;;  %v10279_v46 = vld [vmem:[%s14661_s3 + $0x7d4] sm:$0xf0]  ;;  %v8591_v49 = vor.u32 %v10247_v43, %v8590_v30  ;;  %v8318_v51 = vld [vmem:[%s14661_s3 + $0x4a8] sm:$0xf] }
 0x2fd   : > { %6156 = vmatpush.bf16.msra.mxu2 %v7999_v41  ;;  %v10179_v52 = vld [vmem:[%s14661_s3 + $0x4b4] sm:$0xf0]  ;;  %v8446_v56 = vld [vmem:[%s14661_s3 + $0x5a8] sm:$0xf]  ;;  %v8719_v13 = vor.u32 %v10279_v46, %v8718_v45 }
 0x2fe   : > { %6170 = vmatpush.bf16.msra.mxu3 %v8127_v63  ;;  %v10211_v57 = vld [vmem:[%s14661_s3 + $0x5b4] sm:$0xf0]  ;;  %v8574_v58 = vld [vmem:[%s14661_s3 + $0x6a8] sm:$0xf]  ;;  %v8319_v28 = vor.u32 %v10179_v52, %v8318_v51 }
 0x2ff   : > { %6129 = vmatpush.bf16.msra.mxu0 %v7727_v26  ;;  %v10243_v17 = vld [vmem:[%s14661_s3 + $0x6b4] sm:$0xf0]  ;;  %v8702_v9 = vld [vmem:[%s14661_s3 + $0x7a8] sm:$0xf]  ;;  %v8447_v60 = vor.u32 %v10211_v57, %v8446_v56 }
 0x300   : > { %6143 = vmatpush.bf16.msra.mxu1 %v7855_v19  ;;  %v10275_v41 = vld [vmem:[%s14661_s3 + $0x7b4] sm:$0xf0]  ;;  %v8575_v62 = vor.u32 %v10243_v17, %v8574_v58  ;;  %v8302_v63 = vld [vmem:[%s14661_s3 + $0x488] sm:$0xf] }
 0x301   : > { %6157 = vmatpush.bf16.msra.mxu2 %v7983_v4  ;;  %v10175_v3 = vld [vmem:[%s14661_s3 + $0x494] sm:$0xf0]  ;;  %v8430_v6 = vld [vmem:[%s14661_s3 + $0x588] sm:$0xf]  ;;  %v8703_v7 = vor.u32 %v10275_v41, %v8702_v9 }
 0x302   : > { %6171 = vmatpush.bf16.msra.mxu3 %v8111_v31  ;;  %6130 = vmatmul.bf16.vlgmr.msra.gmra.mxu0 %v11562_v32  ;;  %v10207_v29 = vld [vmem:[%s14661_s3 + $0x594] sm:$0xf0]  ;;  %v8558_v35 = vld [vmem:[%s14661_s3 + $0x688] sm:$0xf]  ;;  %v8303_v12 = vor.u32 %v10175_v3, %v8302_v63 }
 0x303   : > { %6178 = vmatpush.bf16.msrb.mxu0 %v8351_v34  ;;  %6144 = vmatmul.bf16.vlgmr.msra.gmra.mxu1 %v11582_v44  ;;  %v10239_v22 = vld [vmem:[%s14661_s3 + $0x694] sm:$0xf0]  ;;  %v8686_v10 = vld [vmem:[%s14661_s3 + $0x788] sm:$0xf]  ;;  %v8431_v26 = vor.u32 %v10207_v29, %v8430_v6 }
 0x304   : > { %6192 = vmatpush.bf16.msrb.mxu1 %v8479_v37  ;;  %6158 = vmatmul.bf16.vlgmr.msra.gmra.mxu2 %v11564_v33  ;;  %v10271_v59 = vld [vmem:[%s14661_s3 + $0x794] sm:$0xf0]  ;;  %v8559_v14 = vor.u32 %v10239_v22, %v8558_v35  ;;  %v8286_v8 = vld [vmem:[%s14661_s3 + $0x468] sm:$0xf] }
 0x305   : > { %6206 = vmatpush.bf16.msrb.mxu2 %v8607_v42  ;;  %6172 = vmatmul.bf16.vlgmr.msra.gmra.mxu3 %v11601_v53  ;;  %v10171_v50 = vld [vmem:[%s14661_s3 + $0x474] sm:$0xf0]  ;;  %v8414_v16 = vld [vmem:[%s14661_s3 + $0x568] sm:$0xf]  ;;  %v8687_v19 = vor.u32 %v10271_v59, %v8686_v10 }
 0x306   : > { %6220 = vmatpush.bf16.msrb.mxu3 %v8735_v55  ;;  %v10203_v4 = vld [vmem:[%s14661_s3 + $0x574] sm:$0xf0]  ;;  %v8542_v25 = vld [vmem:[%s14661_s3 + $0x668] sm:$0xf]  ;;  %v8287_v0 = vor.u32 %v10171_v50, %v8286_v8 }
 0x307   : > { %6179 = vmatpush.bf16.msrb.mxu0 %v8335_v47  ;;  %v10235_v27 = vld [vmem:[%s14661_s3 + $0x674] sm:$0xf0]  ;;  %v8670_v31 = vld [vmem:[%s14661_s3 + $0x768] sm:$0xf]  ;;  %v8415_v54 = vor.u32 %v10203_v4, %v8414_v16 }
 0x308   : > { %6193 = vmatpush.bf16.msrb.mxu1 %v8463_v48  ;;  %v10267_v34 = vld [vmem:[%s14661_s3 + $0x774] sm:$0xf0]  ;;  %v8543_v37 = vor.u32 %v10235_v27, %v8542_v25  ;;  %v8270_v42 = vld [vmem:[%s14661_s3 + $0x448] sm:$0xf] }
 0x309   : > { %6207 = vmatpush.bf16.msrb.mxu2 %v8591_v49  ;;  %v10167_v38 = vld [vmem:[%s14661_s3 + $0x454] sm:$0xf0]  ;;  %v8398_v23 = vld [vmem:[%s14661_s3 + $0x548] sm:$0xf]  ;;  %v8671_v55 = vor.u32 %v10267_v34, %v8670_v31 }
 0x30a   : > { %6221 = vmatpush.bf16.msrb.mxu3 %v8719_v13  ;;  %v10199_v11 = vld [vmem:[%s14661_s3 + $0x554] sm:$0xf0]  ;;  %v8526_v30 = vld [vmem:[%s14661_s3 + $0x648] sm:$0xf]  ;;  %v8271_v47 = vor.u32 %v10167_v38, %v8270_v42 }
 0x30b   : > { %6180 = vmatpush.bf16.msrb.mxu0 %v8319_v28  ;;  %v10231_v43 = vld [vmem:[%s14661_s3 + $0x654] sm:$0xf0]  ;;  %v8654_v45 = vld [vmem:[%s14661_s3 + $0x748] sm:$0xf]  ;;  %v8399_v48 = vor.u32 %v10199_v11, %v8398_v23 }
 0x30c   : > { %6194 = vmatpush.bf16.msrb.mxu1 %v8447_v60  ;;  %v10263_v46 = vld [vmem:[%s14661_s3 + $0x754] sm:$0xf0]  ;;  %v8527_v49 = vor.u32 %v10231_v43, %v8526_v30  ;;  %v8254_v51 = vld [vmem:[%s14661_s3 + $0x428] sm:$0xf] }
 0x30d   : > { %6208 = vmatpush.bf16.msrb.mxu2 %v8575_v62  ;;  %v10163_v52 = vld [vmem:[%s14661_s3 + $0x434] sm:$0xf0]  ;;  %v8382_v56 = vld [vmem:[%s14661_s3 + $0x528] sm:$0xf]  ;;  %v8655_v13 = vor.u32 %v10263_v46, %v8654_v45 }
 0x30e   : > { %6222 = vmatpush.bf16.msrb.mxu3 %v8703_v7  ;;  %v10195_v57 = vld [vmem:[%s14661_s3 + $0x534] sm:$0xf0]  ;;  %v8510_v58 = vld [vmem:[%s14661_s3 + $0x628] sm:$0xf]  ;;  %v8255_v28 = vor.u32 %v10163_v52, %v8254_v51 }
 0x30f   : > { %6181 = vmatpush.bf16.msrb.mxu0 %v8303_v12  ;;  %v10227_v17 = vld [vmem:[%s14661_s3 + $0x634] sm:$0xf0]  ;;  %v8638_v9 = vld [vmem:[%s14661_s3 + $0x728] sm:$0xf]  ;;  %v8383_v63 = vor.u32 %v10195_v57, %v8382_v56 }
 0x310   : > { %6195 = vmatpush.bf16.msrb.mxu1 %v8431_v26  ;;  %v10259_v41 = vld [vmem:[%s14661_s3 + $0x734] sm:$0xf0]  ;;  %v8238_v60 = vld [vmem:[%s14661_s3 + $0x408] sm:$0xf]  ;;  %v8511_v3 = vor.u32 %v10227_v17, %v8510_v58 }
 0x311   : > { %6209 = vmatpush.bf16.msrb.mxu2 %v8559_v14  ;;  %v10159_v62 = vld [vmem:[%s14661_s3 + $0x414] sm:$0xf0]  ;;  %v8366_v6 = vld [vmem:[%s14661_s3 + $0x508] sm:$0xf]  ;;  %v8639_v35 = vor.u32 %v10259_v41, %v8638_v9 }
 0x312   : > { %6223 = vmatpush.bf16.msrb.mxu3 %v8687_v19  ;;  %v10191_v7 = vld [vmem:[%s14661_s3 + $0x514] sm:$0xf0]  ;;  %v8494_v29 = vld [vmem:[%s14661_s3 + $0x608] sm:$0xf]  ;;  %v8239_v8 = vor.u32 %v10159_v62, %v8238_v60 }
 0x313   : > { %6182 = vmatpush.bf16.msrb.mxu0 %v8287_v0  ;;  %v10223_v22 = vld [vmem:[%s14661_s3 + $0x614] sm:$0xf0]  ;;  %v8622_v10 = vld [vmem:[%s14661_s3 + $0x708] sm:$0xf]  ;;  %v8367_v4 = vor.u32 %v10191_v7, %v8366_v6 }
 0x314   : > { %6196 = vmatpush.bf16.msrb.mxu1 %v8415_v54  ;;  %v10255_v59 = vld [vmem:[%s14661_s3 + $0x714] sm:$0xf0]  ;;  %v8862_v12 = vld [vmem:[%s14661_s3 + $0x8e8] sm:$0xf]  ;;  %v8495_v25 = vor.u32 %v10223_v22, %v8494_v29 }
 0x315   : > { %6210 = vmatpush.bf16.msrb.mxu2 %v8543_v37  ;;  %v10315_v26 = vld [vmem:[%s14661_s3 + $0x8f4] sm:$0xf0]  ;;  %v8990_v14 = vld [vmem:[%s14661_s3 + $0x9e8] sm:$0xf]  ;;  %v8623_v34 = vor.u32 %v10255_v59, %v8622_v10 }
 0x316   : > { %6224 = vmatpush.bf16.msrb.mxu3 %v8671_v55  ;;  %v10347_v50 = vld [vmem:[%s14661_s3 + $0x9f4] sm:$0xf0]  ;;  %v9118_v16 = vld [vmem:[%s14661_s3 + $0xae8] sm:$0xf]  ;;  %v8863_v0 = vor.u32 %v10315_v26, %v8862_v12 }
 0x317   : > { %6183 = vmatpush.bf16.msrb.mxu0 %v8271_v47  ;;  %v10379_v19 = vld [vmem:[%s14661_s3 + $0xaf4] sm:$0xf0]  ;;  %v9246_v27 = vld [vmem:[%s14661_s3 + $0xbe8] sm:$0xf]  ;;  %v8991_v54 = vor.u32 %v10347_v50, %v8990_v14 }
 0x318   : > { %6197 = vmatpush.bf16.msrb.mxu1 %v8399_v48  ;;  %v10411_v31 = vld [vmem:[%s14661_s3 + $0xbf4] sm:$0xf0]  ;;  %v9119_v37 = vor.u32 %v10379_v19, %v9118_v16  ;;  %v8846_v42 = vld [vmem:[%s14661_s3 + $0x8c8] sm:$0xf] }
 0x319   : > { %6211 = vmatpush.bf16.msrb.mxu2 %v8527_v49  ;;  %v10311_v38 = vld [vmem:[%s14661_s3 + $0x8d4] sm:$0xf0]  ;;  %v8974_v23 = vld [vmem:[%s14661_s3 + $0x9c8] sm:$0xf]  ;;  %v9247_v55 = vor.u32 %v10411_v31, %v9246_v27  ;;  %v13467_v31 = vpop.f32.mrf.mxu0 }
 0x31a   : > { %6225 = vmatpush.bf16.msrb.mxu3 %v8655_v13  ;;  %v10343_v11 = vld [vmem:[%s14661_s3 + $0x9d4] sm:$0xf0]  ;;  %v9102_v30 = vld [vmem:[%s14661_s3 + $0xac8] sm:$0xf]  ;;  %v8847_v47 = vor.u32 %v10311_v38, %v8846_v42 }
 0x31b   : > { %6184 = vmatpush.bf16.msrb.mxu0 %v8255_v28  ;;  %v10375_v43 = vld [vmem:[%s14661_s3 + $0xad4] sm:$0xf0]  ;;  %v9230_v45 = vld [vmem:[%s14661_s3 + $0xbc8] sm:$0xf]  ;;  %v8975_v48 = vor.u32 %v10343_v11, %v8974_v23 }
 0x31c   : > { %6198 = vmatpush.bf16.msrb.mxu1 %v8383_v63  ;;  %v10407_v46 = vld [vmem:[%s14661_s3 + $0xbd4] sm:$0xf0]  ;;  %v9103_v49 = vor.u32 %v10375_v43, %v9102_v30  ;;  %v8830_v51 = vld [vmem:[%s14661_s3 + $0x8a8] sm:$0xf] }
 0x31d   : > { %6212 = vmatpush.bf16.msrb.mxu2 %v8511_v3  ;;  %v10307_v52 = vld [vmem:[%s14661_s3 + $0x8b4] sm:$0xf0]  ;;  %v8958_v56 = vld [vmem:[%s14661_s3 + $0x9a8] sm:$0xf]  ;;  %v9231_v13 = vor.u32 %v10407_v46, %v9230_v45 }
 0x31e   : > { %6226 = vmatpush.bf16.msrb.mxu3 %v8639_v35  ;;  %v10339_v57 = vld [vmem:[%s14661_s3 + $0x9b4] sm:$0xf0]  ;;  %v9086_v58 = vld [vmem:[%s14661_s3 + $0xaa8] sm:$0xf]  ;;  %v8831_v28 = vor.u32 %v10307_v52, %v8830_v51 }
 0x31f   : > { %6185 = vmatpush.bf16.msrb.mxu0 %v8239_v8  ;;  %v10371_v17 = vld [vmem:[%s14661_s3 + $0xab4] sm:$0xf0]  ;;  %v9214_v9 = vld [vmem:[%s14661_s3 + $0xba8] sm:$0xf]  ;;  %v8959_v60 = vor.u32 %v10339_v57, %v8958_v56 }
 0x320   : > { %6199 = vmatpush.bf16.msrb.mxu1 %v8367_v4  ;;  %v10403_v41 = vld [vmem:[%s14661_s3 + $0xbb4] sm:$0xf0]  ;;  %v9087_v62 = vor.u32 %v10371_v17, %v9086_v58  ;;  %v8814_v63 = vld [vmem:[%s14661_s3 + $0x888] sm:$0xf]  ;;  %v13510_v58 = vpop.f32.mrf.mxu2 }
 0x321   : > { %6213 = vmatpush.bf16.msrb.mxu2 %v8495_v25  ;;  %v10303_v3 = vld [vmem:[%s14661_s3 + $0x894] sm:$0xf0]  ;;  %v8942_v6 = vld [vmem:[%s14661_s3 + $0x988] sm:$0xf]  ;;  %v9215_v7 = vor.u32 %v10403_v41, %v9214_v9 }
 0x322   : > { %6227 = vmatpush.bf16.msrb.mxu3 %v8623_v34  ;;  %6186 = vmatmul.bf16.vlgmr.msrb.gmra.mxu0 %v11716_v15  ;;  %v10335_v29 = vld [vmem:[%s14661_s3 + $0x994] sm:$0xf0]  ;;  %v9070_v35 = vld [vmem:[%s14661_s3 + $0xa88] sm:$0xf]  ;;  %v8815_v12 = vor.u32 %v10303_v3, %v8814_v63  ;;  %v13532_v3 = vld [vmem:[%s14662_s4] sm:$0xf] }
 0x323   : > { %6234 = vmatpush.bf16.msra.mxu0 %v8863_v0  ;;  %6200 = vmatmul.bf16.vlgmr.msrb.gmra.mxu1 %v11729_v21  ;;  %v10367_v22 = vld [vmem:[%s14661_s3 + $0xa94] sm:$0xf0]  ;;  %v9198_v10 = vld [vmem:[%s14661_s3 + $0xb88] sm:$0xf]  ;;  %v8943_v26 = vor.u32 %v10335_v29, %v8942_v6  ;;  %v3107_v6 = vperm.slane %v13532_v3, 1 }
 0x324   : > { %6248 = vmatpush.bf16.msra.mxu1 %v8991_v54  ;;  %6214 = vmatmul.bf16.vlgmr.msrb.gmra.mxu2 %v11727_v20  ;;  %v10399_v59 = vld [vmem:[%s14661_s3 + $0xb94] sm:$0xf0]  ;;  %v9071_v14 = vor.u32 %v10367_v22, %v9070_v35  ;;  %v8798_v8 = vld [vmem:[%s14661_s3 + $0x868] sm:$0xf]  ;;  %v13475_v54 = vpop.f32.mrf.mxu1  ;;  %v13541_v22 = vpop.f32.mrf.mxu0 }
 0x325   : > { %6262 = vmatpush.bf16.msra.mxu2 %v9119_v37  ;;  %6228 = vmatmul.bf16.vlgmr.msrb.gmra.mxu3 %v11737_v24  ;;  %v10299_v50 = vld [vmem:[%s14661_s3 + $0x874] sm:$0xf0]  ;;  %v8926_v16 = vld [vmem:[%s14661_s3 + $0x968] sm:$0xf]  ;;  %v9199_v19 = vor.u32 %v10399_v59, %v9198_v10 }
 0x326   : > { %6276 = vmatpush.bf16.msra.mxu3 %v9247_v55  ;;  %v10331_v4 = vld [vmem:[%s14661_s3 + $0x974] sm:$0xf0]  ;;  %v9054_v25 = vld [vmem:[%s14661_s3 + $0xa68] sm:$0xf]  ;;  %v8799_v37 = vor.u32 %v10299_v50, %v8798_v8 }
 0x327   : > { %6235 = vmatpush.bf16.msra.mxu0 %v8847_v47  ;;  %v10363_v27 = vld [vmem:[%s14661_s3 + $0xa74] sm:$0xf0]  ;;  %v9182_v34 = vld [vmem:[%s14661_s3 + $0xb68] sm:$0xf]  ;;  %v8927_v42 = vor.u32 %v10331_v4, %v8926_v16 }
 0x328   : > { %6249 = vmatpush.bf16.msra.mxu1 %v8975_v48  ;;  %v10395_v0 = vld [vmem:[%s14661_s3 + $0xb74] sm:$0xf0]  ;;  %v9055_v38 = vor.u32 %v10363_v27, %v9054_v25  ;;  %v8782_v23 = vld [vmem:[%s14661_s3 + $0x848] sm:$0xf] }
 0x329   : > { %6263 = vmatpush.bf16.msra.mxu2 %v9103_v49  ;;  %v10295_v55 = vld [vmem:[%s14661_s3 + $0x854] sm:$0xf0]  ;;  %v8910_v11 = vld [vmem:[%s14661_s3 + $0x948] sm:$0xf]  ;;  %v9183_v30 = vor.u32 %v10395_v0, %v9182_v34 }
 0x32a   : > { %6277 = vmatpush.bf16.msra.mxu3 %v9231_v13  ;;  %v10327_v43 = vld [vmem:[%s14661_s3 + $0x954] sm:$0xf0]  ;;  %v9038_v45 = vld [vmem:[%s14661_s3 + $0xa48] sm:$0xf]  ;;  %v8783_v49 = vor.u32 %v10295_v55, %v8782_v23 }
 0x32b   : > { %6236 = vmatpush.bf16.msra.mxu0 %v8831_v28  ;;  %v10359_v46 = vld [vmem:[%s14661_s3 + $0xa54] sm:$0xf0]  ;;  %v9166_v47 = vld [vmem:[%s14661_s3 + $0xb48] sm:$0xf]  ;;  %v8911_v51 = vor.u32 %v10327_v43, %v8910_v11 }
 0x32c   : > { %6250 = vmatpush.bf16.msra.mxu1 %v8959_v60  ;;  %v10391_v48 = vld [vmem:[%s14661_s3 + $0xb54] sm:$0xf0]  ;;  %v9039_v52 = vor.u32 %v10359_v46, %v9038_v45  ;;  %v8766_v56 = vld [vmem:[%s14661_s3 + $0x828] sm:$0xf]  ;;  %v13521_v60 = vpop.f32.mrf.mxu3  ;;  %v13552_v8 = vpop.f32.mrf.mxu1  ;;  %v5908_v46 = vadd.f32 %v13467_v31, %v3107_v6 }
 0x32d   : > { %6264 = vmatpush.bf16.msra.mxu2 %v9087_v62  ;;  %v10291_v13 = vld [vmem:[%s14661_s3 + $0x834] sm:$0xf0]  ;;  %v8894_v57 = vld [vmem:[%s14661_s3 + $0x928] sm:$0xf]  ;;  %v9167_v17 = vor.u32 %v10391_v48, %v9166_v47 }
 0x32e   : > { %6278 = vmatpush.bf16.msra.mxu3 %v9215_v7  ;;  %v10323_v9 = vld [vmem:[%s14661_s3 + $0x934] sm:$0xf0]  ;;  %v9022_v41 = vld [vmem:[%s14661_s3 + $0xa28] sm:$0xf]  ;;  %v8767_v7 = vor.u32 %v10291_v13, %v8766_v56  ;;  %v13599_v56 = vpop.f32.mrf.mxu2 }
 0x32f   : > { %6237 = vmatpush.bf16.msra.mxu0 %v8815_v12  ;;  %v10355_v28 = vld [vmem:[%s14661_s3 + $0xa34] sm:$0xf0]  ;;  %v9150_v62 = vld [vmem:[%s14661_s3 + $0xb28] sm:$0xf]  ;;  %v8895_v10 = vor.u32 %v10323_v9, %v8894_v57 }
 0x330   : > { %6251 = vmatpush.bf16.msra.mxu1 %v8943_v26  ;;  %v10387_v63 = vld [vmem:[%s14661_s3 + $0xb34] sm:$0xf0]  ;;  %v8750_v29 = vld [vmem:[%s14661_s3 + $0x808] sm:$0xf]  ;;  %v9023_v59 = vor.u32 %v10355_v28, %v9022_v41 }
 0x331   : > { %6265 = vmatpush.bf16.msra.mxu2 %v9071_v14  ;;  %v10287_v35 = vld [vmem:[%s14661_s3 + $0x814] sm:$0xf0]  ;;  %v8878_v12 = vld [vmem:[%s14661_s3 + $0x908] sm:$0xf]  ;;  %v9151_v50 = vor.u32 %v10387_v63, %v9150_v62  ;;  %v5922_v63 = vadd.f32 %v13475_v54, %v5908_v46 }
 0x332   : > { %6279 = vmatpush.bf16.msra.mxu3 %v9199_v19  ;;  %v10319_v26 = vld [vmem:[%s14661_s3 + $0x914] sm:$0xf0]  ;;  %v9006_v14 = vld [vmem:[%s14661_s3 + $0xa08] sm:$0xf]  ;;  %v8751_v0 = vor.u32 %v10287_v35, %v8750_v29 }
 0x333   : > { %6238 = vmatpush.bf16.msra.mxu0 %v8799_v37  ;;  %v10351_v16 = vld [vmem:[%s14661_s3 + $0xa14] sm:$0xf0]  ;;  %v9134_v19 = vld [vmem:[%s14661_s3 + $0xb08] sm:$0xf]  ;;  %v8879_v23 = vor.u32 %v10319_v26, %v8878_v12 }
 0x334   : > { %6252 = vmatpush.bf16.msra.mxu1 %v8927_v42  ;;  %v10383_v4 = vld [vmem:[%s14661_s3 + $0xb14] sm:$0xf0]  ;;  %v9374_v25 = vld [vmem:[%s14661_s3 + $0xce8] sm:$0xf]  ;;  %v9007_v55 = vor.u32 %v10351_v16, %v9006_v14  ;;  %v13610_v9 = vpop.f32.mrf.mxu3  ;;  %v13628_v26 = vpop.f32.mrf.mxu1 }
 0x335   : > { %6266 = vmatpush.bf16.msra.mxu2 %v9055_v38  ;;  %v10443_v27 = vld [vmem:[%s14661_s3 + $0xcf4] sm:$0xf0]  ;;  %v9502_v34 = vld [vmem:[%s14661_s3 + $0xde8] sm:$0xf]  ;;  %v9135_v43 = vor.u32 %v10383_v4, %v9134_v19 }
 0x336   : > { %6280 = vmatpush.bf16.msra.mxu3 %v9183_v30  ;;  %v10475_v37 = vld [vmem:[%s14661_s3 + $0xdf4] sm:$0xf0]  ;;  %v9630_v42 = vld [vmem:[%s14661_s3 + $0xee8] sm:$0xf]  ;;  %v9375_v45 = vor.u32 %v10443_v27, %v9374_v25  ;;  %v5936_v27 = vadd.f32 %v13510_v58, %v5922_v63  ;;  %v13677_v46 = vpop.f32.mrf.mxu2 }
 0x337   : > { %6239 = vmatpush.bf16.msra.mxu0 %v8783_v49  ;;  %v10507_v38 = vld [vmem:[%s14661_s3 + $0xef4] sm:$0xf0]  ;;  %v9758_v11 = vld [vmem:[%s14661_s3 + $0xfe8] sm:$0xf]  ;;  %v9503_v47 = vor.u32 %v10475_v37, %v9502_v34 }
 0x338   : > { %6253 = vmatpush.bf16.msra.mxu1 %v8911_v51  ;;  %v10539_v30 = vld [vmem:[%s14661_s3 + $0xff4] sm:$0xf0]  ;;  %v9631_v48 = vor.u32 %v10507_v38, %v9630_v42  ;;  %v9358_v49 = vld [vmem:[%s14661_s3 + $0xcc8] sm:$0xf] }
 0x339   : > { %6267 = vmatpush.bf16.msra.mxu2 %v9039_v52  ;;  %v10439_v51 = vld [vmem:[%s14661_s3 + $0xcd4] sm:$0xf0]  ;;  %v9486_v52 = vld [vmem:[%s14661_s3 + $0xdc8] sm:$0xf]  ;;  %v9759_v13 = vor.u32 %v10539_v30, %v9758_v11  ;;  %v5910_v30 = vadd.f32 %v13541_v22, %v3107_v6 }
 0x33a   : > { %6281 = vmatpush.bf16.msra.mxu3 %v9167_v17  ;;  %v10471_v31 = vld [vmem:[%s14661_s3 + $0xdd4] sm:$0xf0]  ;;  %v9614_v57 = vld [vmem:[%s14661_s3 + $0xec8] sm:$0xf]  ;;  %v9359_v62 = vor.u32 %v10439_v51, %v9358_v49 }
 0x33b   : > { %6240 = vmatpush.bf16.msra.mxu0 %v8767_v7  ;;  %v10503_v17 = vld [vmem:[%s14661_s3 + $0xed4] sm:$0xf0]  ;;  %v9742_v41 = vld [vmem:[%s14661_s3 + $0xfc8] sm:$0xf]  ;;  %v5963_v7 = vpop.f32.mrf.mxu0  ;;  %v9487_v29 = vor.u32 %v10471_v31, %v9486_v52 }
 0x33c   : > { %6254 = vmatpush.bf16.msra.mxu1 %v8895_v10  ;;  %v10535_v28 = vld [vmem:[%s14661_s3 + $0xfd4] sm:$0xf0]  ;;  %v9615_v35 = vor.u32 %v10503_v17, %v9614_v57  ;;  %v9342_v10 = vld [vmem:[%s14661_s3 + $0xca8] sm:$0xf]  ;;  %v13680_v49 = vpop.f32.mrf.mxu3  ;;  %v5924_v17 = vadd.f32 %v13552_v8, %v5910_v30  ;;  %v13707_v63 = vpop.f32.mrf.mxu1 }
 0x33d   : > { %6268 = vmatpush.bf16.msra.mxu2 %v9023_v59  ;;  %v10435_v59 = vld [vmem:[%s14661_s3 + $0xcb4] sm:$0xf0]  ;;  %v9470_v12 = vld [vmem:[%s14661_s3 + $0xda8] sm:$0xf]  ;;  %v9743_v54 = vor.u32 %v10535_v28, %v9742_v41 }
 0x33e   : > { %6282 = vmatpush.bf16.msra.mxu3 %v9151_v50  ;;  %v10467_v14 = vld [vmem:[%s14661_s3 + $0xdb4] sm:$0xf0]  ;;  %v9598_v50 = vld [vmem:[%s14661_s3 + $0xea8] sm:$0xf]  ;;  %v9343_v25 = vor.u32 %v10435_v59, %v9342_v10 }
 0x33f   : > { %6241 = vmatpush.bf16.msra.mxu0 %v8751_v0  ;;  %v10499_v16 = vld [vmem:[%s14661_s3 + $0xeb4] sm:$0xf0]  ;;  %v9726_v19 = vld [vmem:[%s14661_s3 + $0xfa8] sm:$0xf]  ;;  %v9471_v34 = vor.u32 %v10467_v14, %v9470_v12 }
 0x340   : > { %6255 = vmatpush.bf16.msra.mxu1 %v8879_v23  ;;  %v10531_v4 = vld [vmem:[%s14661_s3 + $0xfb4] sm:$0xf0]  ;;  %v9599_v0 = vor.u32 %v10499_v16, %v9598_v50  ;;  %v9326_v37 = vld [vmem:[%s14661_s3 + $0xc88] sm:$0xf] }
 0x341   : > { %6269 = vmatpush.bf16.msra.mxu2 %v9007_v55  ;;  %v10431_v42 = vld [vmem:[%s14661_s3 + $0xc94] sm:$0xf0]  ;;  %v9454_v38 = vld [vmem:[%s14661_s3 + $0xd88] sm:$0xf]  ;;  %v9727_v23 = vor.u32 %v10531_v4, %v9726_v19  ;;  %v5938_v19 = vadd.f32 %v13599_v56, %v5924_v17 }
 0x342   : > { %6283 = vmatpush.bf16.msra.mxu3 %v9135_v43  ;;  %6242 = vmatmul.bf16.vlgmr.msra.gmra.mxu0 %v11932_v36  ;;  %v10463_v58 = vld [vmem:[%s14661_s3 + $0xd94] sm:$0xf0]  ;;  %v9582_v55 = vld [vmem:[%s14661_s3 + $0xe88] sm:$0xf] }
 0x343   : > { %6290 = vmatpush.bf16.msrb.mxu0 %v9375_v45  ;;  %6256 = vmatmul.bf16.vlgmr.msra.gmra.mxu1 %v11945_v40  ;;  %v10495_v11 = vld [vmem:[%s14661_s3 + $0xe94] sm:$0xf0]  ;;  %v9710_v43 = vld [vmem:[%s14661_s3 + $0xf88] sm:$0xf]  ;;  %v9455_v3 = vor.u32 %v10463_v58, %v9454_v38  ;;  %v5965_v41 = vpop.f32.mrf.mxu0  ;;  %v5952_v30 = vadd.f32 %v13610_v9, %v5938_v19  ;;  %v8224_v19 = vld [vmem:[%s14661_s3 + $0x3f8] sm:$0xf0] }
 0x344   : > { %6304 = vmatpush.bf16.msrb.mxu1 %v9503_v47  ;;  %6270 = vmatmul.bf16.vlgmr.msra.gmra.mxu2 %v11943_v39  ;;  %v10527_v45 = vld [vmem:[%s14661_s3 + $0xf94] sm:$0xf0]  ;;  %v9327_v47 = vor.u32 %v10431_v42, %v9326_v37  ;;  %v9583_v6 = vor.u32 %v10495_v11, %v9582_v55  ;;  %v9310_v22 = vld [vmem:[%s14661_s3 + $0xc68] sm:$0xf] }
 0x345   : > { %6318 = vmatpush.bf16.msrb.mxu2 %v9631_v48  ;;  %6284 = vmatmul.bf16.vlgmr.msra.gmra.mxu3 %v11953_v18  ;;  %v5950_v48 = vadd.f32 %v13521_v60, %v5936_v27  ;;  %v10427_v51 = vld [vmem:[%s14661_s3 + $0xc74] sm:$0xf0]  ;;  %v9438_v52 = vld [vmem:[%s14661_s3 + $0xd68] sm:$0xf]  ;;  %v9711_v60 = vor.u32 %v10527_v45, %v9710_v43  ;;  %v13754_v43 = vpop.f32.mrf.mxu3 }
 0x346   : > { %6332 = vmatpush.bf16.msrb.mxu3 %v9759_v13  ;;  %v10459_v13 = vld [vmem:[%s14661_s3 + $0xd74] sm:$0xf0]  ;;  %v9566_v31 = vld [vmem:[%s14661_s3 + $0xe68] sm:$0xf] }
 0x347   : > { %6291 = vmatpush.bf16.msrb.mxu0 %v9359_v62  ;;  %v10491_v57 = vld [vmem:[%s14661_s3 + $0xe74] sm:$0xf0]  ;;  %v9694_v28 = vld [vmem:[%s14661_s3 + $0xf68] sm:$0xf]  ;;  %v9439_v10 = vor.u32 %v10459_v13, %v9438_v52 }
 0x348   : > { %6305 = vmatpush.bf16.msrb.mxu1 %v9487_v29  ;;  %v10523_v62 = vld [vmem:[%s14661_s3 + $0xf74] sm:$0xf0]  ;;  %v9311_v29 = vor.u32 %v10427_v51, %v9310_v22  ;;  %v9567_v59 = vor.u32 %v10491_v57, %v9566_v31  ;;  %v9294_v8 = vld [vmem:[%s14661_s3 + $0xc48] sm:$0xf] }
 0x349   : > { %6319 = vmatpush.bf16.msrb.mxu2 %v9615_v35  ;;  %v5964_v35 = vadd.f32 %v5963_v7, %v5950_v48  ;;  %v10423_v12 = vld [vmem:[%s14661_s3 + $0xc54] sm:$0xf0]  ;;  %v9695_v14 = vor.u32 %v10523_v62, %v9694_v28  ;;  %v9550_v50 = vld [vmem:[%s14661_s3 + $0xe48] sm:$0xf] }
 0x34a   : > { %6333 = vmatpush.bf16.msrb.mxu3 %v9743_v54  ;;  %v9422_v54 = vld [vmem:[%s14661_s3 + $0xd48] sm:$0xf]  ;;  %v10455_v7 = vld [vmem:[%s14661_s3 + $0xd54] sm:$0xf0]  ;;  %v9295_v27 = vor.u32 %v10423_v12, %v9294_v8  ;;  %v7968_v12 = vld [vmem:[%s14661_s3 + $0x1f8] sm:$0xf0] }
 0x34b   : > { %6292 = vmatpush.bf16.msrb.mxu0 %v9343_v25  ;;  %v10487_v16 = vld [vmem:[%s14661_s3 + $0xe54] sm:$0xf0]  ;;  %v9678_v4 = vld [vmem:[%s14661_s3 + $0xf48] sm:$0xf]  ;;  %v6019_v45 = vpop.f32.mrf.mxu0 }
 0x34c   : > { %6306 = vmatpush.bf16.msrb.mxu1 %v9471_v34  ;;  %v10519_v25 = vld [vmem:[%s14661_s3 + $0xf54] sm:$0xf0]  ;;  %v5978_v34 = vadd.f32 %v13628_v26, %v5964_v35  ;;  %v9551_v37 = vor.u32 %v10487_v16, %v9550_v50  ;;  %v9278_v56 = vld [vmem:[%s14661_s3 + $0xc28] sm:$0xf]  ;;  %v10057_v35 = vld [vmem:[%s14661_s3 + $0xec] sm:$0xf] }
 0x34d   : > { %6320 = vmatpush.bf16.msrb.mxu2 %v9599_v0  ;;  %v9423_v0 = vor.u32 %v10455_v7, %v9422_v54  ;;  %v10419_v42 = vld [vmem:[%s14661_s3 + $0xc34] sm:$0xf0]  ;;  %v9406_v38 = vld [vmem:[%s14661_s3 + $0xd28] sm:$0xf]  ;;  %v9679_v58 = vor.u32 %v10519_v25, %v9678_v4  ;;  %v8096_v54 = vld [vmem:[%s14661_s3 + $0x2f8] sm:$0xf0] }
 0x34e   : > { %6334 = vmatpush.bf16.msrb.mxu3 %v9727_v23  ;;  %v5993_v23 = vpop.f32.mrf.mxu2  ;;  %v10451_v26 = vld [vmem:[%s14661_s3 + $0xd34] sm:$0xf0]  ;;  %v9534_v55 = vld [vmem:[%s14661_s3 + $0xe28] sm:$0xf]  ;;  %v5992_v51 = vadd.f32 %v13677_v46, %v5978_v34  ;;  %v10153_v16 = vld [vmem:[%s14661_s3 + $0x3ec] sm:$0xf] }
 0x34f   : > { %6293 = vmatpush.bf16.msrb.mxu0 %v9327_v47  ;;  %v10483_v11 = vld [vmem:[%s14661_s3 + $0xe34] sm:$0xf0]  ;;  %v9662_v47 = vld [vmem:[%s14661_s3 + $0xf28] sm:$0xf]  ;;  %v9407_v52 = vor.u32 %v10451_v26, %v9406_v38  ;;  %v7824_v38 = vld [vmem:[%s14661_s3 + $0xd8] sm:$0xf0]  ;;  %v8227_v26 = vor.u32 %v10153_v16, %v8224_v19 }
 0x350   : > { %6307 = vmatpush.bf16.msrb.mxu1 %v9455_v3  ;;  %v10515_v48 = vld [vmem:[%s14661_s3 + $0xf34] sm:$0xf0]  ;;  %v6033_v3 = vpop.f32.mrf.mxu1  ;;  %v9262_v22 = vld [vmem:[%s14661_s3 + $0xc08] sm:$0xf]  ;;  %v8048_v16 = vld [vmem:[%s14661_s3 + $0x298] sm:$0xf0] }
 0x351   : > { %6321 = vmatpush.bf16.msrb.mxu2 %v9583_v6  ;;  %v9279_v6 = vor.u32 %v10419_v42, %v9278_v56  ;;  %v10415_v9 = vld [vmem:[%s14661_s3 + $0xc14] sm:$0xf0]  ;;  %v9390_v13 = vld [vmem:[%s14661_s3 + $0xd08] sm:$0xf]  ;;  %v9663_v17 = vor.u32 %v10515_v48, %v9662_v47  ;;  %v10053_v42 = vld [vmem:[%s14661_s3 + $0xcc] sm:$0xf] }
 0x352   : > { %6335 = vmatpush.bf16.msrb.mxu3 %v9711_v60  ;;  %v9535_v60 = vor.u32 %v10483_v11, %v9534_v55  ;;  %v10447_v31 = vld [vmem:[%s14661_s3 + $0xd14] sm:$0xf0]  ;;  %v9518_v57 = vld [vmem:[%s14661_s3 + $0xe08] sm:$0xf]  ;;  %v9263_v8 = vor.u32 %v10415_v9, %v9262_v22  ;;  %v10117_v55 = vld [vmem:[%s14661_s3 + $0x2cc] sm:$0xf]  ;;  %v7827_v22 = vor.u32 %v10053_v42, %v7824_v38 }
 0x353   : > { %6294 = vmatpush.bf16.msrb.mxu0 %v9311_v29  ;;  %v10479_v46 = vld [vmem:[%s14661_s3 + $0xe14] sm:$0xf0]  ;;  %v9646_v28 = vld [vmem:[%s14661_s3 + $0xf08] sm:$0xf]  ;;  %v5966_v29 = vadd.f32 %v5965_v41, %v5952_v30  ;;  %v10121_v41 = vld [vmem:[%s14661_s3 + $0x2ec] sm:$0xf]  ;;  %v9391_v7 = vor.u32 %v10447_v31, %v9390_v13 }
 0x354   : > { %6308 = vmatpush.bf16.msrb.mxu1 %v9439_v10  ;;  %v10511_v62 = vld [vmem:[%s14661_s3 + $0xf14] sm:$0xf0]  ;;  %v7840_v10 = vld [vmem:[%s14661_s3 + $0xf8] sm:$0xf0]  ;;  %v9519_v50 = vor.u32 %v10479_v46, %v9518_v57  ;;  %v8099_v56 = vor.u32 %v10121_v41, %v8096_v54  ;;  %v10149_v47 = vld [vmem:[%s14661_s3 + $0x3cc] sm:$0xf] }
 0x355   : > { %6322 = vmatpush.bf16.msrb.mxu2 %v9567_v59  ;;  %v10089_v59 = vld [vmem:[%s14661_s3 + $0x1ec] sm:$0xf]  ;;  %v9647_v25 = vor.u32 %v10511_v62, %v9646_v28  ;;  %v5980_v34 = vadd.f32 %v13707_v63, %v5966_v29  ;;  %v7952_v63 = vld [vmem:[%s14661_s3 + $0x1d8] sm:$0xf0] }
 0x356   : > { %6336 = vmatpush.bf16.msrb.mxu3 %v9695_v14  ;;  %v6006_v14 = vadd.f32 %v13680_v49, %v5992_v51  ;;  %v6047_v4 = vpop.f32.mrf.mxu2  ;;  %v6061_v49 = vpop.f32.mrf.mxu3  ;;  %v8080_v11 = vld [vmem:[%s14661_s3 + $0x2d8] sm:$0xf0]  ;;  %v10081_v13 = vld [vmem:[%s14661_s3 + $0x1ac] sm:$0xf] }
 0x357   : > { %6295 = vmatpush.bf16.msrb.mxu0 %v9295_v27  ;;  %v7843_v27 = vor.u32 %v10057_v35, %v7840_v10  ;;  %v5994_v30 = vadd.f32 %v5993_v23, %v5980_v34  ;;  %v8208_v48 = vld [vmem:[%s14661_s3 + $0x3d8] sm:$0xf0]  ;;  %v8083_v23 = vor.u32 %v10117_v55, %v8080_v11  ;;  %v10113_v57 = vld [vmem:[%s14661_s3 + $0x2ac] sm:$0xf] }
 0x358   : > { %6309 = vmatpush.bf16.msrb.mxu1 %v9423_v0  ;;  %v6020_v0 = vadd.f32 %v6019_v45, %v6006_v14  ;;  %v6021_v45 = vpop.f32.mrf.mxu0  ;;  %v7936_v31 = vld [vmem:[%s14661_s3 + $0x1b8] sm:$0xf0]  ;;  %v10145_v62 = vld [vmem:[%s14661_s3 + $0x3ac] sm:$0xf] }
 0x359   : > { %6323 = vmatpush.bf16.msrb.mxu2 %v9551_v37  ;;  %v7971_v37 = vor.u32 %v10089_v59, %v7968_v12  ;;  %v6008_v46 = vadd.f32 %v13754_v43, %v5994_v30  ;;  %v8192_v29 = vld [vmem:[%s14661_s3 + $0x3b8] sm:$0xf0]  ;;  %v10045_v43 = vld [vmem:[%s14661_s3 + $0x8c] sm:$0xf]  ;;  %v7939_v59 = vor.u32 %v10081_v13, %v7936_v31 }
 0x35a   : > { %6337 = vmatpush.bf16.msrb.mxu3 %v9679_v58  ;;  %v10085_v58 = vld [vmem:[%s14661_s3 + $0x1cc] sm:$0xf]  ;;  %v6034_v9 = vadd.f32 %v6033_v3, %v6020_v0  ;;  %v8211_v3 = vor.u32 %v10149_v47, %v8208_v48  ;;  %v7792_v12 = vld [vmem:[%s14661_s3 + $0x98] sm:$0xf0] }
 0x35b   : > { %6296 = vmatpush.bf16.msrb.mxu0 %v9279_v6  ;;  %v6035_v6 = vpop.f32.mrf.mxu1  ;;  %v7955_v51 = vor.u32 %v10085_v58, %v7952_v63  ;;  %v6022_v10 = vadd.f32 %v6021_v45, %v6008_v46  ;;  %v10077_v41 = vld [vmem:[%s14661_s3 + $0x18c] sm:$0xf]  ;;  %v7920_v54 = vld [vmem:[%s14661_s3 + $0x198] sm:$0xf0]  ;;  %v7795_v0 = vor.u32 %v10045_v43, %v7792_v12 }
 0x35c   : > { %6310 = vmatpush.bf16.msrb.mxu1 %v9407_v52  ;;  %v10049_v52 = vld [vmem:[%s14661_s3 + $0xac] sm:$0xf]  ;;  %v6048_v28 = vadd.f32 %v6047_v4, %v6034_v9  ;;  %v8176_v34 = vld [vmem:[%s14661_s3 + $0x398] sm:$0xf0] }
 0x35d   : > { %6324 = vmatpush.bf16.msrb.mxu2 %v9535_v60  ;;  %v7808_v60 = vld [vmem:[%s14661_s3 + $0xb8] sm:$0xf0]  ;;  %v6036_v42 = vadd.f32 %v6035_v6, %v6022_v10  ;;  %v10073_v63 = vld [vmem:[%s14661_s3 + $0x16c] sm:$0xf] }
 0x35e   : > { %6338 = vmatpush.bf16.msrb.mxu3 %v9663_v17  ;;  %v8064_v17 = vld [vmem:[%s14661_s3 + $0x2b8] sm:$0xf0]  ;;  %v7811_v35 = vor.u32 %v10049_v52, %v7808_v60  ;;  %v6049_v14 = vpop.f32.mrf.mxu2  ;;  %v6062_v19 = vadd.f32 %v6061_v49, %v6048_v28  ;;  %v6063_v4 = vpop.f32.mrf.mxu3  ;;  %v10041_v49 = vld [vmem:[%s14661_s3 + $0x6c] sm:$0xf] }
 0x35f   : > { %6297 = vmatpush.bf16.msrb.mxu0 %v9263_v8  ;;  %v8067_v8 = vor.u32 %v10113_v57, %v8064_v17  ;;  %v7904_v11 = vld [vmem:[%s14661_s3 + $0x178] sm:$0xf0]  ;;  %v10105_v30 = vld [vmem:[%s14661_s3 + $0x26c] sm:$0xf]  ;;  %v6050_v47 = vadd.f32 %v6049_v14, %v6036_v42 }
 0x360   : > { %6311 = vmatpush.bf16.msrb.mxu1 %v9391_v7  ;;  %v8195_v7 = vor.u32 %v10145_v62, %v8192_v29  ;;  %v8032_v45 = vld [vmem:[%s14661_s3 + $0x278] sm:$0xf0]  ;;  %v10137_v48 = vld [vmem:[%s14661_s3 + $0x36c] sm:$0xf] }
 0x361   : > { %6325 = vmatpush.bf16.msrb.mxu2 %v9519_v50  ;;  %v10109_v50 = vld [vmem:[%s14661_s3 + $0x28c] sm:$0xf]  ;;  %v8160_v6 = vld [vmem:[%s14661_s3 + $0x378] sm:$0xf0]  ;;  %v8035_v52 = vor.u32 %v10105_v30, %v8032_v45  ;;  %v6064_v28 = vadd.f32 %v6063_v4, %v6050_v47 }
 0x362   : > { %6339 = vmatpush.bf16.msrb.mxu3 %v9647_v25  ;;  %6298 = vmatmul.bf16.vlgmr.msrb.gmra.mxu0 %v12143_v61  ;;  %v6075_v25 = vpop.f32.mrf.mxu0  ;;  %v8051_v58 = vor.u32 %v10109_v50, %v8048_v16  ;;  %v10037_v9 = vld [vmem:[%s14661_s3 + $0x4c] sm:$0xf]  ;;  %v7760_v60 = vld [vmem:[%s14661_s3 + $0x58] sm:$0xf0]  ;;  %v8163_v31 = vor.u32 %v10137_v48, %v8160_v6 }
 0x363   : > { %6346 = vmatpush.bf16.msra.mxu0 %v7843_v27  ;;  %6312 = vmatmul.bf16.vlgmr.msrb.gmra.mxu1 %v12156_v2  ;;  %v10141_v27 = vld [vmem:[%s14661_s3 + $0x38c] sm:$0xf]  ;;  %v6076_v38 = vadd.f32 %v6075_v25, %v6062_v19  ;;  %v8016_v46 = vld [vmem:[%s14661_s3 + $0x258] sm:$0xf0] }
 0x364   : > { %6360 = vmatpush.bf16.msra.mxu1 %v7971_v37  ;;  %6326 = vmatmul.bf16.vlgmr.msrb.gmra.mxu2 %v12154_v1  ;;  %v7923_v37 = vor.u32 %v10077_v41, %v7920_v54  ;;  %v8179_v55 = vor.u32 %v10141_v27, %v8176_v34  ;;  %v10069_v13 = vld [vmem:[%s14661_s3 + $0x14c] sm:$0xf]  ;;  %v8144_v10 = vld [vmem:[%s14661_s3 + $0x358] sm:$0xf0] }
 0x365   : > { %6374 = vmatpush.bf16.msra.mxu2 %v8099_v56  ;;  %6340 = vmatmul.bf16.vlgmr.msrb.gmra.mxu3 %v12164_v5  ;;  %v6089_v56 = vpop.f32.mrf.mxu1  ;;  %v10101_v17 = vld [vmem:[%s14661_s3 + $0x24c] sm:$0xf]  ;;  %v7872_v4 = vld [vmem:[%s14661_s3 + $0x138] sm:$0xf0] }
 0x366   : > { %6388 = vmatpush.bf16.msra.mxu3 %v8227_v26  ;;  %v7776_v26 = vld [vmem:[%s14661_s3 + $0x78] sm:$0xf0]  ;;  %v10133_v43 = vld [vmem:[%s14661_s3 + $0x34c] sm:$0xf]  ;;  %v8019_v54 = vor.u32 %v10101_v17, %v8016_v46 }
 0x367   : > { %6347 = vmatpush.bf16.msra.mxu0 %v7827_v22  ;;  %v7779_v22 = vor.u32 %v10041_v49, %v7776_v26  ;;  %v6103_v57 = vpop.f32.mrf.mxu2  ;;  %v10033_v14 = vld [vmem:[%s14661_s3 + $0x2c] sm:$0xf]  ;;  %v8147_v16 = vor.u32 %v10133_v43, %v8144_v10  ;;  %v8000_v27 = vld [vmem:[%s14661_s3 + $0x238] sm:$0xf0] }
 0x368   : > { %6361 = vmatpush.bf16.msra.mxu1 %v7955_v51  ;;  %v6090_v51 = vadd.f32 %v6089_v56, %v6076_v38  ;;  %v10065_v50 = vld [vmem:[%s14661_s3 + $0x12c] sm:$0xf]  ;;  %v7728_v38 = vld [vmem:[%s14661_s3 + $0x18] sm:$0xf0] }
 0x369   : > { %6375 = vmatpush.bf16.msra.mxu2 %v8083_v23  ;;  %v7907_v23 = vor.u32 %v10073_v63, %v7904_v11  ;;  %v10097_v25 = vld [vmem:[%s14661_s3 + $0x22c] sm:$0xf]  ;;  %v7875_v26 = vor.u32 %v10065_v50, %v7872_v4  ;;  %v7984_v47 = vld [vmem:[%s14661_s3 + $0x218] sm:$0xf0] }
 0x36a   : > { %6389 = vmatpush.bf16.msra.mxu3 %v8211_v3  ;;  %v7888_v3 = vld [vmem:[%s14661_s3 + $0x158] sm:$0xf0]  ;;  %v6104_v62 = vadd.f32 %v6103_v57, %v6090_v51  ;;  %v6077_v29 = vpop.f32.mrf.mxu0  ;;  %v10029_v42 = vld [vmem:[%s14661_s3 + $0xc] sm:$0xf]  ;;  %v8003_v63 = vor.u32 %v10097_v25, %v8000_v27 }
 0x36b   : > { %6348 = vmatpush.bf16.msra.mxu0 %v7811_v35  ;;  %v6117_v35 = vpop.f32.mrf.mxu3  ;;  %v6078_v12 = vadd.f32 %v6077_v29, %v6064_v28  ;;  %v10093_v11 = vld [vmem:[%s14661_s3 + $0x20c] sm:$0xf]  ;;  %v8112_v6 = vld [vmem:[%s14661_s3 + $0x318] sm:$0xf0] }
 0x36c   : > { %6362 = vmatpush.bf16.msra.mxu1 %v7939_v59  ;;  %v7763_v59 = vor.u32 %v10037_v9, %v7760_v60  ;;  %v6118_v41 = vadd.f32 %v6117_v35, %v6104_v62  ;;  %v10125_v48 = vld [vmem:[%s14661_s3 + $0x30c] sm:$0xf]  ;;  %v7731_v60 = vor.u32 %v10029_v42, %v7728_v38  ;;  %v7987_v46 = vor.u32 %v10093_v11, %v7984_v47  ;;  %v8736_v62 = vld [vmem:[%s14661_s3 + $0x7f8] sm:$0xf0] }
 0x36d   : > { %6376 = vmatpush.bf16.msra.mxu2 %v8067_v8  ;;  %v7891_v8 = vor.u32 %v10069_v13, %v7888_v3  ;;  %v6091_v19 = vpop.f32.mrf.mxu1  ;;  %v10185_v51 = vld [vmem:[%s14661_s3 + $0x4ec] sm:$0xf]  ;;  %v8480_v13 = vld [vmem:[%s14661_s3 + $0x5f8] sm:$0xf0]  ;;  %v8115_v29 = vor.u32 %v10125_v48, %v8112_v6 }
 0x36e   : > { %6390 = vmatpush.bf16.msra.mxu3 %v8195_v7  ;;  %v7744_v7 = vld [vmem:[%s14661_s3 + $0x38] sm:$0xf0]  ;;  %v6571_v34 = vmax.f32 %v6118_v41, 0.0  ;;  %v6092_v49 = vadd.f32 %v6091_v19, %v6078_v12  ;;  %v10249_v3 = vld [vmem:[%s14661_s3 + $0x6ec] sm:$0xf] }
 0x36f   : > { %6349 = vmatpush.bf16.msra.mxu0 %v7795_v0  ;;  %v10129_v0 = vld [vmem:[%s14661_s3 + $0x32c] sm:$0xf]  ;;  %v7747_v56 = vor.u32 %v10033_v14, %v7744_v7  ;;  %v6105_v45 = vpop.f32.mrf.mxu2  ;;  %v8336_v12 = vld [vmem:[%s14661_s3 + $0x4d8] sm:$0xf0] }
 0x370   : > { %6363 = vmatpush.bf16.msra.mxu1 %v7923_v37  ;;  %v8128_v37 = vld [vmem:[%s14661_s3 + $0x338] sm:$0xf0]  ;;  %6579 = vst [vmem:[%s14663_s5 + $0x8] sm:$0xff] %v6571_v34  ;;  %v10281_v28 = vld [vmem:[%s14661_s3 + $0x7ec] sm:$0xf] }
 0x371   : > { %6377 = vmatpush.bf16.msra.mxu2 %v8051_v58  ;;  %v10061_v58 = vld [vmem:[%s14661_s3 + $0x10c] sm:$0xf]  ;;  %v8131_v30 = vor.u32 %v10129_v0, %v8128_v37  ;;  %v8464_v14 = vld [vmem:[%s14661_s3 + $0x5d8] sm:$0xf0] }
 0x372   : > { %6391 = vmatpush.bf16.msra.mxu3 %v8179_v55  ;;  %v7856_v55 = vld [vmem:[%s14661_s3 + $0x118] sm:$0xf0]  ;;  %v10181_v43 = vld [vmem:[%s14661_s3 + $0x4cc] sm:$0xf] }
 0x373   : > { %6350 = vmatpush.bf16.msra.mxu0 %v7779_v22  ;;  %v6106_v22 = vadd.f32 %v6105_v45, %v6092_v49  ;;  %v6119_v9 = vpop.f32.mrf.mxu3  ;;  %v7859_v17 = vor.u32 %v10061_v58, %v7856_v55  ;;  %v10213_v41 = vld [vmem:[%s14661_s3 + $0x5cc] sm:$0xf]  ;;  %v8592_v50 = vld [vmem:[%s14661_s3 + $0x6d8] sm:$0xf0]  ;;  %v8339_v4 = vor.u32 %v10181_v43, %v8336_v12 }
 0x374   : > { %6364 = vmatpush.bf16.msra.mxu1 %v7907_v23  ;;  %v8352_v23 = vld [vmem:[%s14661_s3 + $0x4f8] sm:$0xf0]  ;;  %v10245_v7 = vld [vmem:[%s14661_s3 + $0x6cc] sm:$0xf]  ;;  %v8467_v25 = vor.u32 %v10213_v41, %v8464_v14 }
 0x375   : > { %6378 = vmatpush.bf16.msra.mxu2 %v8035_v52  ;;  %v10217_v52 = vld [vmem:[%s14661_s3 + $0x5ec] sm:$0xf]  ;;  %v6120_v57 = vadd.f32 %v6119_v9, %v6106_v22  ;;  %v8355_v35 = vor.u32 %v10185_v51, %v8352_v23  ;;  %v8720_v19 = vld [vmem:[%s14661_s3 + $0x7d8] sm:$0xf0]  ;;  %v8595_v27 = vor.u32 %v10245_v7, %v8592_v50 }
 0x376   : > { %6392 = vmatpush.bf16.msra.mxu3 %v8163_v31  ;;  %v8608_v31 = vld [vmem:[%s14661_s3 + $0x6f8] sm:$0xf0]  ;;  %v10177_v34 = vld [vmem:[%s14661_s3 + $0x4ac] sm:$0xf] }
 0x377   : > { %6351 = vmatpush.bf16.msra.mxu0 %v7763_v59  ;;  %v6575_v10 = vmax.f32 %v6120_v57, 0.0  ;;  %v8483_v59 = vor.u32 %v10217_v52, %v8480_v13  ;;  %v8320_v0 = vld [vmem:[%s14661_s3 + $0x4b8] sm:$0xf0]  ;;  %v10209_v37 = vld [vmem:[%s14661_s3 + $0x5ac] sm:$0xf] }
 0x378   : > { %6365 = vmatpush.bf16.msra.mxu1 %v7891_v8  ;;  %v8611_v8 = vor.u32 %v10249_v3, %v8608_v31  ;;  %v8448_v42 = vld [vmem:[%s14661_s3 + $0x5b8] sm:$0xf0]  ;;  %v10241_v38 = vld [vmem:[%s14661_s3 + $0x6ac] sm:$0xf] }
 0x379   : > { %6379 = vmatpush.bf16.msra.mxu2 %v8019_v54  ;;  %v8739_v54 = vor.u32 %v10281_v28, %v8736_v62  ;;  %6583 = vst [vmem:[%s14663_s5 + $0x28] sm:$0xff] %v6575_v10  ;;  %v8576_v58 = vld [vmem:[%s14661_s3 + $0x6b8] sm:$0xf0]  ;;  %v10273_v49 = vld [vmem:[%s14661_s3 + $0x7ac] sm:$0xf]  ;;  %v8451_v55 = vor.u32 %v10209_v37, %v8448_v42 }
 0x37a   : > { %6393 = vmatpush.bf16.msra.mxu3 %v8147_v16  ;;  %v10277_v16 = vld [vmem:[%s14661_s3 + $0x7cc] sm:$0xf]  ;;  %v8560_v47 = vld [vmem:[%s14661_s3 + $0x698] sm:$0xf0] }
 0x37b   : > { %6352 = vmatpush.bf16.msra.mxu0 %v7747_v56  ;;  %v8723_v56 = vor.u32 %v10277_v16, %v8720_v19  ;;  %v10173_v11 = vld [vmem:[%s14661_s3 + $0x48c] sm:$0xf]  ;;  %v8688_v6 = vld [vmem:[%s14661_s3 + $0x798] sm:$0xf0] }
 0x37c   : > { %6366 = vmatpush.bf16.msra.mxu1 %v7875_v26  ;;  %v8704_v26 = vld [vmem:[%s14661_s3 + $0x7b8] sm:$0xf0]  ;;  %v10237_v45 = vld [vmem:[%s14661_s3 + $0x68c] sm:$0xf] }
 0x37d   : > { %6380 = vmatpush.bf16.msra.mxu2 %v8003_v63  ;;  %v8323_v63 = vor.u32 %v10177_v34, %v8320_v0  ;;  %v10269_v48 = vld [vmem:[%s14661_s3 + $0x78c] sm:$0xf]  ;;  %v8563_v51 = vor.u32 %v10237_v45, %v8560_v47  ;;  %v8288_v52 = vld [vmem:[%s14661_s3 + $0x478] sm:$0xf0] }
 0x37e   : > { %6394 = vmatpush.bf16.msra.mxu3 %v8131_v30  ;;  %v8304_v30 = vld [vmem:[%s14661_s3 + $0x498] sm:$0xf0]  ;;  %v10169_v23 = vld [vmem:[%s14661_s3 + $0x46c] sm:$0xf]  ;;  %v8691_v13 = vor.u32 %v10269_v48, %v8688_v6 }
 0x37f   : > { %6353 = vmatpush.bf16.msra.mxu0 %v7731_v60  ;;  %v8307_v22 = vor.u32 %v10173_v11, %v8304_v30  ;;  %v10201_v60 = vld [vmem:[%s14661_s3 + $0x56c] sm:$0xf]  ;;  %v8416_v3 = vld [vmem:[%s14661_s3 + $0x578] sm:$0xf0]  ;;  %v8291_v28 = vor.u32 %v10169_v23, %v8288_v52 }
 0x380   : > { %6367 = vmatpush.bf16.msra.mxu1 %v7859_v17  ;;  %v10233_v31 = vld [vmem:[%s14661_s3 + $0x66c] sm:$0xf]  ;;  %v8544_v57 = vld [vmem:[%s14661_s3 + $0x678] sm:$0xf0]  ;;  %v8419_v62 = vor.u32 %v10201_v60, %v8416_v3 }
 0x381   : > { %6381 = vmatpush.bf16.msra.mxu2 %v7987_v46  ;;  %v10265_v17 = vld [vmem:[%s14661_s3 + $0x76c] sm:$0xf]  ;;  %v8672_v46 = vld [vmem:[%s14661_s3 + $0x778] sm:$0xf0] }
 0x382   : > { %6395 = vmatpush.bf16.msra.mxu3 %v8115_v29  ;;  %6354 = vmatmul.bf16.vlgmr.msra.gmra.mxu0 %v11562_v32  ;;  %v8579_v32 = vor.u32 %v10241_v38, %v8576_v58  ;;  %v8547_v29 = vor.u32 %v10233_v31, %v8544_v57  ;;  %v8272_v43 = vld [vmem:[%s14661_s3 + $0x458] sm:$0xf0]  ;;  %v10197_v10 = vld [vmem:[%s14661_s3 + $0x54c] sm:$0xf] }
 0x383   : > { %6402 = vmatpush.bf16.msrb.mxu0 %v8355_v35  ;;  %6368 = vmatmul.bf16.vlgmr.msra.gmra.mxu1 %v11582_v44  ;;  %v8707_v44 = vor.u32 %v10273_v49, %v8704_v26  ;;  %v10165_v35 = vld [vmem:[%s14661_s3 + $0x44c] sm:$0xf]  ;;  %v8528_v41 = vld [vmem:[%s14661_s3 + $0x658] sm:$0xf0] }
 0x384   : > { %6416 = vmatpush.bf16.msrb.mxu1 %v8483_v59  ;;  %6382 = vmatmul.bf16.vlgmr.msra.gmra.mxu2 %v11564_v33  ;;  %v10205_v33 = vld [vmem:[%s14661_s3 + $0x58c] sm:$0xf]  ;;  %v8675_v59 = vor.u32 %v10265_v17, %v8672_v46  ;;  %v8656_v14 = vld [vmem:[%s14661_s3 + $0x758] sm:$0xf0]  ;;  %v8275_v7 = vor.u32 %v10165_v35, %v8272_v43 }
 0x385   : > { %6430 = vmatpush.bf16.msrb.mxu2 %v8611_v8  ;;  %6396 = vmatmul.bf16.vlgmr.msra.gmra.mxu3 %v11601_v53  ;;  %v8432_v53 = vld [vmem:[%s14661_s3 + $0x598] sm:$0xf0]  ;;  %v10229_v12 = vld [vmem:[%s14661_s3 + $0x64c] sm:$0xf] }
 0x386   : > { %6444 = vmatpush.bf16.msrb.mxu3 %v8739_v54  ;;  %v8435_v9 = vor.u32 %v10205_v33, %v8432_v53  ;;  %v8400_v8 = vld [vmem:[%s14661_s3 + $0x558] sm:$0xf0]  ;;  %v10261_v54 = vld [vmem:[%s14661_s3 + $0x74c] sm:$0xf]  ;;  %v8531_v16 = vor.u32 %v10229_v12, %v8528_v41 }
 0x387   : > { %6403 = vmatpush.bf16.msrb.mxu0 %v8339_v4  ;;  %v8403_v50 = vor.u32 %v10197_v10, %v8400_v8  ;;  %v10161_v19 = vld [vmem:[%s14661_s3 + $0x42c] sm:$0xf]  ;;  %v8256_v4 = vld [vmem:[%s14661_s3 + $0x438] sm:$0xf0] }
 0x388   : > { %6417 = vmatpush.bf16.msrb.mxu1 %v8467_v25  ;;  %v10193_v25 = vld [vmem:[%s14661_s3 + $0x52c] sm:$0xf]  ;;  %v8384_v34 = vld [vmem:[%s14661_s3 + $0x538] sm:$0xf0]  ;;  %v8259_v38 = vor.u32 %v10161_v19, %v8256_v4 }
 0x389   : > { %6431 = vmatpush.bf16.msrb.mxu2 %v8595_v27  ;;  %v8659_v27 = vor.u32 %v10261_v54, %v8656_v14  ;;  %v10225_v0 = vld [vmem:[%s14661_s3 + $0x62c] sm:$0xf]  ;;  %v8512_v37 = vld [vmem:[%s14661_s3 + $0x638] sm:$0xf0]  ;;  %v8387_v26 = vor.u32 %v10193_v25, %v8384_v34 }
 0x38a   : > { %6445 = vmatpush.bf16.msrb.mxu3 %v8723_v56  ;;  %v10257_v56 = vld [vmem:[%s14661_s3 + $0x72c] sm:$0xf]  ;;  %v8640_v42 = vld [vmem:[%s14661_s3 + $0x738] sm:$0xf0] }
 0x38b   : > { %6404 = vmatpush.bf16.msrb.mxu0 %v8323_v63  ;;  %v10157_v58 = vld [vmem:[%s14661_s3 + $0x40c] sm:$0xf]  ;;  %v8240_v49 = vld [vmem:[%s14661_s3 + $0x418] sm:$0xf0]  ;;  %v8515_v63 = vor.u32 %v10225_v0, %v8512_v37  ;;  %v8643_v30 = vor.u32 %v10257_v56, %v8640_v42 }
 0x38c   : > { %6418 = vmatpush.bf16.msrb.mxu1 %v8451_v55  ;;  %v10189_v55 = vld [vmem:[%s14661_s3 + $0x50c] sm:$0xf]  ;;  %v8496_v33 = vld [vmem:[%s14661_s3 + $0x618] sm:$0xf0]  ;;  %v8243_v6 = vor.u32 %v10157_v58, %v8240_v49 }
 0x38d   : > { %6432 = vmatpush.bf16.msrb.mxu2 %v8579_v32  ;;  %v8368_v32 = vld [vmem:[%s14661_s3 + $0x518] sm:$0xf0]  ;;  %v10221_v11 = vld [vmem:[%s14661_s3 + $0x60c] sm:$0xf] }
 0x38e   : > { %6446 = vmatpush.bf16.msrb.mxu3 %v8707_v44  ;;  %v10253_v44 = vld [vmem:[%s14661_s3 + $0x70c] sm:$0xf]  ;;  %v8624_v53 = vld [vmem:[%s14661_s3 + $0x718] sm:$0xf0]  ;;  %v8371_v23 = vor.u32 %v10189_v55, %v8368_v32  ;;  %v8499_v52 = vor.u32 %v10221_v11, %v8496_v33 }
 0x38f   : > { %6405 = vmatpush.bf16.msrb.mxu0 %v8307_v22  ;;  %v10313_v45 = vld [vmem:[%s14661_s3 + $0x8ec] sm:$0xf]  ;;  %v8864_v47 = vld [vmem:[%s14661_s3 + $0x8f8] sm:$0xf0]  ;;  %v8627_v3 = vor.u32 %v10253_v44, %v8624_v53 }
 0x390   : > { %6419 = vmatpush.bf16.msrb.mxu1 %v8435_v9  ;;  %v10345_v48 = vld [vmem:[%s14661_s3 + $0x9ec] sm:$0xf]  ;;  %v8992_v22 = vld [vmem:[%s14661_s3 + $0x9f8] sm:$0xf0]  ;;  %v8867_v31 = vor.u32 %v10313_v45, %v8864_v47 }
 0x391   : > { %6433 = vmatpush.bf16.msrb.mxu2 %v8563_v51  ;;  %v10377_v9 = vld [vmem:[%s14661_s3 + $0xaec] sm:$0xf]  ;;  %v9120_v51 = vld [vmem:[%s14661_s3 + $0xaf8] sm:$0xf0]  ;;  %v8995_v57 = vor.u32 %v10345_v48, %v8992_v22  ;;  %v14306_v48 = vpop.f32.mrf.mxu0 }
 0x392   : > { %6447 = vmatpush.bf16.msrb.mxu3 %v8691_v13  ;;  %v10409_v60 = vld [vmem:[%s14661_s3 + $0xbec] sm:$0xf]  ;;  %v9248_v13 = vld [vmem:[%s14661_s3 + $0xbf8] sm:$0xf0]  ;;  %v9123_v17 = vor.u32 %v10377_v9, %v9120_v51  ;;  %v14314_v9 = vpop.f32.mrf.mxu1 }
 0x393   : > { %6406 = vmatpush.bf16.msrb.mxu0 %v8291_v28  ;;  %v10309_v46 = vld [vmem:[%s14661_s3 + $0x8cc] sm:$0xf]  ;;  %v8848_v28 = vld [vmem:[%s14661_s3 + $0x8d8] sm:$0xf0] }
 0x394   : > { %6420 = vmatpush.bf16.msrb.mxu1 %v8419_v62  ;;  %v10341_v62 = vld [vmem:[%s14661_s3 + $0x9cc] sm:$0xf]  ;;  %v8976_v35 = vld [vmem:[%s14661_s3 + $0x9d8] sm:$0xf0]  ;;  %v8851_v12 = vor.u32 %v10309_v46, %v8848_v28 }
 0x395   : > { %6434 = vmatpush.bf16.msrb.mxu2 %v8547_v29  ;;  %v9251_v29 = vor.u32 %v10409_v60, %v9248_v13  ;;  %v10373_v43 = vld [vmem:[%s14661_s3 + $0xacc] sm:$0xf]  ;;  %v9104_v10 = vld [vmem:[%s14661_s3 + $0xad8] sm:$0xf0]  ;;  %v8979_v41 = vor.u32 %v10341_v62, %v8976_v35 }
 0x396   : > { %6448 = vmatpush.bf16.msrb.mxu3 %v8675_v59  ;;  %v10405_v59 = vld [vmem:[%s14661_s3 + $0xbcc] sm:$0xf]  ;;  %v9232_v8 = vld [vmem:[%s14661_s3 + $0xbd8] sm:$0xf0]  ;;  %v9107_v54 = vor.u32 %v10373_v43, %v9104_v10 }
 0x397   : > { %6407 = vmatpush.bf16.msrb.mxu0 %v8275_v7  ;;  %v10305_v14 = vld [vmem:[%s14661_s3 + $0x8ac] sm:$0xf]  ;;  %v8832_v7 = vld [vmem:[%s14661_s3 + $0x8b8] sm:$0xf0] }
 0x398   : > { %6421 = vmatpush.bf16.msrb.mxu1 %v8403_v50  ;;  %v10337_v50 = vld [vmem:[%s14661_s3 + $0x9ac] sm:$0xf]  ;;  %v8960_v19 = vld [vmem:[%s14661_s3 + $0x9b8] sm:$0xf0]  ;;  %v8835_v34 = vor.u32 %v10305_v14, %v8832_v7 }
 0x399   : > { %6435 = vmatpush.bf16.msrb.mxu2 %v8531_v16  ;;  %v9235_v16 = vor.u32 %v10405_v59, %v9232_v8  ;;  %v10369_v4 = vld [vmem:[%s14661_s3 + $0xaac] sm:$0xf]  ;;  %v9088_v25 = vld [vmem:[%s14661_s3 + $0xab8] sm:$0xf0]  ;;  %v8963_v0 = vor.u32 %v10337_v50, %v8960_v19  ;;  %v14360_v50 = vpop.f32.mrf.mxu3 }
 0x39a   : > { %6449 = vmatpush.bf16.msrb.mxu3 %v8659_v27  ;;  %v9216_v27 = vld [vmem:[%s14661_s3 + $0xbb8] sm:$0xf0]  ;;  %v9091_v37 = vor.u32 %v10369_v4, %v9088_v25  ;;  %v10333_v56 = vld [vmem:[%s14661_s3 + $0x98c] sm:$0xf]  ;;  %v14371_v4 = vld [vmem:[%s14662_s4] sm:$0xf] }
 0x39b   : > { %6408 = vmatpush.bf16.msrb.mxu0 %v8259_v38  ;;  %v8944_v42 = vld [vmem:[%s14661_s3 + $0x998] sm:$0xf0]  ;;  %v10365_v38 = vld [vmem:[%s14661_s3 + $0xa8c] sm:$0xf]  ;;  %v3108_v25 = vperm.slane %v14371_v4, 2 }
 0x39c   : > { %6422 = vmatpush.bf16.msrb.mxu1 %v8387_v26  ;;  %v9072_v58 = vld [vmem:[%s14661_s3 + $0xa98] sm:$0xf0]  ;;  %v10397_v49 = vld [vmem:[%s14661_s3 + $0xb8c] sm:$0xf]  ;;  %v8947_v55 = vor.u32 %v10333_v56, %v8944_v42  ;;  %v14391_v42 = vpop.f32.mrf.mxu1 }
 0x39d   : > { %6436 = vmatpush.bf16.msrb.mxu2 %v8515_v63  ;;  %v9200_v26 = vld [vmem:[%s14661_s3 + $0xb98] sm:$0xf0]  ;;  %v9075_v32 = vor.u32 %v10365_v38, %v9072_v58  ;;  %v10297_v11 = vld [vmem:[%s14661_s3 + $0x86c] sm:$0xf] }
 0x39e   : > { %6450 = vmatpush.bf16.msrb.mxu3 %v8643_v30  ;;  %v8800_v30 = vld [vmem:[%s14661_s3 + $0x878] sm:$0xf0]  ;;  %v10329_v33 = vld [vmem:[%s14661_s3 + $0x96c] sm:$0xf]  ;;  %v9203_v44 = vor.u32 %v10397_v49, %v9200_v26 }
 0x39f   : > { %6409 = vmatpush.bf16.msrb.mxu0 %v8243_v6  ;;  %v8928_v53 = vld [vmem:[%s14661_s3 + $0x978] sm:$0xf0]  ;;  %v10361_v45 = vld [vmem:[%s14661_s3 + $0xa6c] sm:$0xf]  ;;  %v8803_v51 = vor.u32 %v10297_v11, %v8800_v30 }
 0x3a0   : > { %6423 = vmatpush.bf16.msrb.mxu1 %v8371_v23  ;;  %v9056_v47 = vld [vmem:[%s14661_s3 + $0xa78] sm:$0xf0]  ;;  %v10393_v6 = vld [vmem:[%s14661_s3 + $0xb6c] sm:$0xf]  ;;  %v8931_v23 = vor.u32 %v10329_v33, %v8928_v53 }
 0x3a1   : > { %6437 = vmatpush.bf16.msrb.mxu2 %v8499_v52  ;;  %v9184_v22 = vld [vmem:[%s14661_s3 + $0xb78] sm:$0xf0]  ;;  %v9059_v52 = vor.u32 %v10361_v45, %v9056_v47  ;;  %v10293_v60 = vld [vmem:[%s14661_s3 + $0x84c] sm:$0xf] }
 0x3a2   : > { %6451 = vmatpush.bf16.msrb.mxu3 %v8627_v3  ;;  %6410 = vmatmul.bf16.vlgmr.msrb.gmra.mxu0 %v11716_v15  ;;  %v10401_v15 = vld [vmem:[%s14661_s3 + $0xbac] sm:$0xf]  ;;  %v8784_v13 = vld [vmem:[%s14661_s3 + $0x858] sm:$0xf0] }
 0x3a3   : > { %6458 = vmatpush.bf16.msra.mxu0 %v8867_v31  ;;  %6424 = vmatmul.bf16.vlgmr.msrb.gmra.mxu1 %v11729_v21  ;;  %v8816_v21 = vld [vmem:[%s14661_s3 + $0x898] sm:$0xf0]  ;;  %v10325_v3 = vld [vmem:[%s14661_s3 + $0x94c] sm:$0xf]  ;;  %v9187_v31 = vor.u32 %v10393_v6, %v9184_v22 }
 0x3a4   : > { %6472 = vmatpush.bf16.msra.mxu1 %v8995_v57  ;;  %6438 = vmatmul.bf16.vlgmr.msrb.gmra.mxu2 %v11727_v20  ;;  %v10301_v20 = vld [vmem:[%s14661_s3 + $0x88c] sm:$0xf]  ;;  %v8912_v57 = vld [vmem:[%s14661_s3 + $0x958] sm:$0xf0] }
 0x3a5   : > { %6486 = vmatpush.bf16.msra.mxu2 %v9123_v17  ;;  %6452 = vmatmul.bf16.vlgmr.msrb.gmra.mxu3 %v11737_v24  ;;  %v9219_v24 = vor.u32 %v10401_v15, %v9216_v27  ;;  %v8819_v63 = vor.u32 %v10301_v20, %v8816_v21  ;;  %v10357_v17 = vld [vmem:[%s14661_s3 + $0xa4c] sm:$0xf]  ;;  %v9040_v46 = vld [vmem:[%s14661_s3 + $0xa58] sm:$0xf0]  ;;  %v8915_v35 = vor.u32 %v10325_v3, %v8912_v57 }
 0x3a6   : > { %6500 = vmatpush.bf16.msra.mxu3 %v9251_v29  ;;  %v10389_v28 = vld [vmem:[%s14661_s3 + $0xb4c] sm:$0xf]  ;;  %v9168_v62 = vld [vmem:[%s14661_s3 + $0xb58] sm:$0xf0]  ;;  %v8787_v29 = vor.u32 %v10293_v60, %v8784_v13  ;;  %v9043_v43 = vor.u32 %v10357_v17, %v9040_v46 }
 0x3a7   : > { %6459 = vmatpush.bf16.msra.mxu0 %v8851_v12  ;;  %v10289_v10 = vld [vmem:[%s14661_s3 + $0x82c] sm:$0xf]  ;;  %v8768_v59 = vld [vmem:[%s14661_s3 + $0x838] sm:$0xf0]  ;;  %v14349_v12 = vpop.f32.mrf.mxu2 }
 0x3a8   : > { %6473 = vmatpush.bf16.msra.mxu1 %v8979_v41  ;;  %v10321_v8 = vld [vmem:[%s14661_s3 + $0x92c] sm:$0xf]  ;;  %v9171_v41 = vor.u32 %v10389_v28, %v9168_v62  ;;  %v9024_v7 = vld [vmem:[%s14661_s3 + $0xa38] sm:$0xf0]  ;;  %v8771_v15 = vor.u32 %v10289_v10, %v8768_v59  ;;  %v14449_v62 = vpop.f32.mrf.mxu3 }
 0x3a9   : > { %6487 = vmatpush.bf16.msra.mxu2 %v9107_v54  ;;  %v8896_v54 = vld [vmem:[%s14661_s3 + $0x938] sm:$0xf0]  ;;  %v10353_v14 = vld [vmem:[%s14661_s3 + $0xa2c] sm:$0xf] }
 0x3aa   : > { %6501 = vmatpush.bf16.msra.mxu3 %v9235_v16  ;;  %v10385_v16 = vld [vmem:[%s14661_s3 + $0xb2c] sm:$0xf]  ;;  %v9152_v19 = vld [vmem:[%s14661_s3 + $0xb38] sm:$0xf0]  ;;  %v9027_v20 = vor.u32 %v10353_v14, %v9024_v7 }
 0x3ab   : > { %6460 = vmatpush.bf16.msra.mxu0 %v8835_v34  ;;  %v10285_v27 = vld [vmem:[%s14661_s3 + $0x80c] sm:$0xf]  ;;  %v8752_v34 = vld [vmem:[%s14661_s3 + $0x818] sm:$0xf0]  ;;  %v9155_v38 = vor.u32 %v10385_v16, %v9152_v19  ;;  %v14467_v16 = vpop.f32.mrf.mxu1 }
 0x3ac   : > { %6474 = vmatpush.bf16.msra.mxu1 %v8963_v0  ;;  %v14380_v0 = vpop.f32.mrf.mxu0  ;;  %v10317_v21 = vld [vmem:[%s14661_s3 + $0x90c] sm:$0xf]  ;;  %v8880_v56 = vld [vmem:[%s14661_s3 + $0x918] sm:$0xf0]  ;;  %v8755_v11 = vor.u32 %v10285_v27, %v8752_v34 }
 0x3ad   : > { %6488 = vmatpush.bf16.msra.mxu2 %v9091_v37  ;;  %v8899_v37 = vor.u32 %v10321_v8, %v8896_v54  ;;  %v9008_v58 = vld [vmem:[%s14661_s3 + $0xa18] sm:$0xf0]  ;;  %v10381_v49 = vld [vmem:[%s14661_s3 + $0xb0c] sm:$0xf]  ;;  %v8883_v53 = vor.u32 %v10317_v21, %v8880_v56 }
 0x3ae   : > { %6502 = vmatpush.bf16.msra.mxu3 %v9219_v24  ;;  %v10349_v24 = vld [vmem:[%s14661_s3 + $0xa0c] sm:$0xf]  ;;  %v9136_v26 = vld [vmem:[%s14661_s3 + $0xb18] sm:$0xf0] }
 0x3af   : > { %6461 = vmatpush.bf16.msra.mxu0 %v8819_v63  ;;  %v10441_v63 = vld [vmem:[%s14661_s3 + $0xcec] sm:$0xf]  ;;  %v9504_v30 = vld [vmem:[%s14661_s3 + $0xdf8] sm:$0xf0]  ;;  %v9011_v45 = vor.u32 %v10349_v24, %v9008_v58  ;;  %v9139_v22 = vor.u32 %v10381_v49, %v9136_v26  ;;  %v14438_v57 = vpop.f32.mrf.mxu2  ;;  %v6134_v49 = vadd.f32 %v14380_v0, %v3108_v25 }
 0x3b0   : > { %6475 = vmatpush.bf16.msra.mxu1 %v8947_v55  ;;  %v9376_v55 = vld [vmem:[%s14661_s3 + $0xcf8] sm:$0xf0]  ;;  %v10505_v33 = vld [vmem:[%s14661_s3 + $0xeec] sm:$0xf] }
 0x3b1   : > { %6489 = vmatpush.bf16.msra.mxu2 %v9075_v32  ;;  %v10473_v32 = vld [vmem:[%s14661_s3 + $0xdec] sm:$0xf]  ;;  %v9760_v6 = vld [vmem:[%s14661_s3 + $0xff8] sm:$0xf0] }
 0x3b2   : > { %6503 = vmatpush.bf16.msra.mxu3 %v9203_v44  ;;  %v9632_v44 = vld [vmem:[%s14661_s3 + $0xef8] sm:$0xf0]  ;;  %v10537_v47 = vld [vmem:[%s14661_s3 + $0xfec] sm:$0xf] }
 0x3b3   : > { %6462 = vmatpush.bf16.msra.mxu0 %v8803_v51  ;;  %v9379_v51 = vor.u32 %v10441_v63, %v9376_v55  ;;  %v9635_v60 = vor.u32 %v10505_v33, %v9632_v44  ;;  %v10437_v13 = vld [vmem:[%s14661_s3 + $0xccc] sm:$0xf]  ;;  %v9360_v3 = vld [vmem:[%s14661_s3 + $0xcd8] sm:$0xf0]  ;;  %v9763_v17 = vor.u32 %v10537_v47, %v9760_v6 }
 0x3b4   : > { %6476 = vmatpush.bf16.msra.mxu1 %v8931_v23  ;;  %v6132_v23 = vadd.f32 %v14306_v48, %v3108_v25  ;;  %v9488_v48 = vld [vmem:[%s14661_s3 + $0xdd8] sm:$0xf0]  ;;  %v10501_v46 = vld [vmem:[%s14661_s3 + $0xecc] sm:$0xf]  ;;  %v6187_v59 = vpop.f32.mrf.mxu0 }
 0x3b5   : > { %6490 = vmatpush.bf16.msra.mxu2 %v9059_v52  ;;  %v9507_v52 = vor.u32 %v10473_v32, %v9504_v30  ;;  %v9616_v28 = vld [vmem:[%s14661_s3 + $0xed8] sm:$0xf0]  ;;  %v10433_v54 = vld [vmem:[%s14661_s3 + $0xcac] sm:$0xf]  ;;  %v14519_v30 = vpop.f32.mrf.mxu3 }
 0x3b6   : > { %6504 = vmatpush.bf16.msra.mxu3 %v9187_v31  ;;  %v10469_v31 = vld [vmem:[%s14661_s3 + $0xdcc] sm:$0xf]  ;;  %v6146_v10 = vadd.f32 %v14314_v9, %v6132_v23  ;;  %v9344_v14 = vld [vmem:[%s14661_s3 + $0xcb8] sm:$0xf0] }
 0x3b7   : > { %6463 = vmatpush.bf16.msra.mxu0 %v8787_v29  ;;  %v10533_v29 = vld [vmem:[%s14661_s3 + $0xfcc] sm:$0xf]  ;;  %v9491_v8 = vor.u32 %v10469_v31, %v9488_v48  ;;  %v9472_v19 = vld [vmem:[%s14661_s3 + $0xdb8] sm:$0xf0]  ;;  %v14516_v55 = vpop.f32.mrf.mxu2 }
 0x3b8   : > { %6477 = vmatpush.bf16.msra.mxu1 %v8915_v35  ;;  %v9744_v35 = vld [vmem:[%s14661_s3 + $0xfd8] sm:$0xf0]  ;;  %v10465_v7 = vld [vmem:[%s14661_s3 + $0xdac] sm:$0xf] }
 0x3b9   : > { %6491 = vmatpush.bf16.msra.mxu2 %v9043_v43  ;;  %v9363_v43 = vor.u32 %v10437_v13, %v9360_v3  ;;  %v9747_v9 = vor.u32 %v10533_v29, %v9744_v35  ;;  %v9600_v27 = vld [vmem:[%s14661_s3 + $0xeb8] sm:$0xf0]  ;;  %v9475_v21 = vor.u32 %v10465_v7, %v9472_v19  ;;  %v10525_v26 = vld [vmem:[%s14661_s3 + $0xf8c] sm:$0xf] }
 0x3ba   : > { %6505 = vmatpush.bf16.msra.mxu3 %v9171_v41  ;;  %v9619_v41 = vor.u32 %v10501_v46, %v9616_v28  ;;  %v9728_v34 = vld [vmem:[%s14661_s3 + $0xfb8] sm:$0xf0]  ;;  %v10425_v0 = vld [vmem:[%s14661_s3 + $0xc6c] sm:$0xf] }
 0x3bb   : > { %6464 = vmatpush.bf16.msra.mxu0 %v8771_v15  ;;  %v10497_v15 = vld [vmem:[%s14661_s3 + $0xeac] sm:$0xf]  ;;  %v9328_v56 = vld [vmem:[%s14661_s3 + $0xc98] sm:$0xf0] }
 0x3bc   : > { %6478 = vmatpush.bf16.msra.mxu1 %v8899_v37  ;;  %v9347_v37 = vor.u32 %v10433_v54, %v9344_v14  ;;  %v9584_v58 = vld [vmem:[%s14661_s3 + $0xe98] sm:$0xf0]  ;;  %v10489_v47 = vld [vmem:[%s14661_s3 + $0xe6c] sm:$0xf] }
 0x3bd   : > { %6492 = vmatpush.bf16.msra.mxu2 %v9027_v20  ;;  %v6160_v20 = vadd.f32 %v14349_v12, %v6146_v10  ;;  %v9456_v12 = vld [vmem:[%s14661_s3 + $0xd98] sm:$0xf0]  ;;  %v10521_v23 = vld [vmem:[%s14661_s3 + $0xf6c] sm:$0xf] }
 0x3be   : > { %6506 = vmatpush.bf16.msra.mxu3 %v9155_v38  ;;  %v10493_v38 = vld [vmem:[%s14661_s3 + $0xe8c] sm:$0xf]  ;;  %v9712_v63 = vld [vmem:[%s14661_s3 + $0xf98] sm:$0xf0] }
 0x3bf   : > { %6465 = vmatpush.bf16.msra.mxu0 %v8755_v11  ;;  %v6174_v11 = vadd.f32 %v14360_v50, %v6160_v20  ;;  %v9587_v25 = vor.u32 %v10493_v38, %v9584_v58  ;;  %v9312_v44 = vld [vmem:[%s14661_s3 + $0xc78] sm:$0xf0]  ;;  %v9715_v50 = vor.u32 %v10525_v26, %v9712_v63  ;;  %v10453_v46 = vld [vmem:[%s14661_s3 + $0xd4c] sm:$0xf]  ;;  %v6231_v20 = vpop.f32.mrf.mxu3 }
 0x3c0   : > { %6479 = vmatpush.bf16.msra.mxu1 %v8883_v53  ;;  %v10457_v53 = vld [vmem:[%s14661_s3 + $0xd6c] sm:$0xf]  ;;  %v9568_v6 = vld [vmem:[%s14661_s3 + $0xe78] sm:$0xf0]  ;;  %v9315_v13 = vor.u32 %v10425_v0, %v9312_v44 }
 0x3c1   : > { %6493 = vmatpush.bf16.msra.mxu2 %v9011_v45  ;;  %v9440_v45 = vld [vmem:[%s14661_s3 + $0xd78] sm:$0xf0]  ;;  %v6188_v3 = vadd.f32 %v6187_v59, %v6174_v11  ;;  %v10485_v35 = vld [vmem:[%s14661_s3 + $0xe4c] sm:$0xf] }
 0x3c2   : > { %6507 = vmatpush.bf16.msra.mxu3 %v9139_v22  ;;  %6466 = vmatmul.bf16.vlgmr.msra.gmra.mxu0 %v11932_v36  ;;  %v10529_v36 = vld [vmem:[%s14661_s3 + $0xfac] sm:$0xf]  ;;  %v6148_v22 = vadd.f32 %v14391_v42, %v6134_v49  ;;  %v9443_v31 = vor.u32 %v10457_v53, %v9440_v45  ;;  %v9296_v48 = vld [vmem:[%s14661_s3 + $0xc58] sm:$0xf0] }
 0x3c3   : > { %6514 = vmatpush.bf16.msrb.mxu0 %v9379_v51  ;;  %6480 = vmatmul.bf16.vlgmr.msra.gmra.mxu1 %v11945_v40  ;;  %v10429_v40 = vld [vmem:[%s14661_s3 + $0xc8c] sm:$0xf]  ;;  %v9731_v24 = vor.u32 %v10529_v36, %v9728_v34  ;;  %v6189_v51 = vpop.f32.mrf.mxu0  ;;  %v9424_v29 = vld [vmem:[%s14661_s3 + $0xd58] sm:$0xf0]  ;;  %v6202_v54 = vadd.f32 %v14467_v16, %v6188_v3 }
 0x3c4   : > { %6528 = vmatpush.bf16.msrb.mxu1 %v9507_v52  ;;  %6494 = vmatmul.bf16.vlgmr.msra.gmra.mxu2 %v11943_v39  ;;  %v9603_v39 = vor.u32 %v10497_v15, %v9600_v27  ;;  %v9331_v32 = vor.u32 %v10429_v40, %v9328_v56  ;;  %v9696_v52 = vld [vmem:[%s14661_s3 + $0xf78] sm:$0xf0]  ;;  %v10421_v42 = vld [vmem:[%s14661_s3 + $0xc4c] sm:$0xf]  ;;  %v6162_v10 = vadd.f32 %v14438_v57, %v6148_v22  ;;  %v6217_v15 = vpop.f32.mrf.mxu2 }
 0x3c5   : > { %6542 = vmatpush.bf16.msrb.mxu2 %v9635_v60  ;;  %6508 = vmatmul.bf16.vlgmr.msra.gmra.mxu3 %v11953_v18  ;;  %v10461_v18 = vld [vmem:[%s14661_s3 + $0xd8c] sm:$0xf]  ;;  %v14546_v60 = vpop.f32.mrf.mxu1  ;;  %v9699_v28 = vor.u32 %v10521_v23, %v9696_v52  ;;  %v9427_v14 = vor.u32 %v10453_v46, %v9424_v29  ;;  %v9408_v16 = vld [vmem:[%s14661_s3 + $0xd38] sm:$0xf0] }
 0x3c6   : > { %6556 = vmatpush.bf16.msrb.mxu3 %v9763_v17  ;;  %v9459_v33 = vor.u32 %v10461_v18, %v9456_v12  ;;  %v9571_v17 = vor.u32 %v10489_v47, %v9568_v6  ;;  %v10517_v59 = vld [vmem:[%s14661_s3 + $0xf4c] sm:$0xf]  ;;  %v9536_v34 = vld [vmem:[%s14661_s3 + $0xe38] sm:$0xf0] }
 0x3c7   : > { %6515 = vmatpush.bf16.msrb.mxu0 %v9363_v43  ;;  %v9552_v43 = vld [vmem:[%s14661_s3 + $0xe58] sm:$0xf0]  ;;  %v10417_v57 = vld [vmem:[%s14661_s3 + $0xc2c] sm:$0xf] }
 0x3c8   : > { %6529 = vmatpush.bf16.msrb.mxu1 %v9491_v8  ;;  %v9680_v8 = vld [vmem:[%s14661_s3 + $0xf58] sm:$0xf0]  ;;  %v9555_v7 = vor.u32 %v10485_v35, %v9552_v43  ;;  %v10449_v19 = vld [vmem:[%s14661_s3 + $0xd2c] sm:$0xf] }
 0x3c9   : > { %6543 = vmatpush.bf16.msrb.mxu2 %v9619_v41  ;;  %v9299_v41 = vor.u32 %v10421_v42, %v9296_v48  ;;  %v9683_v27 = vor.u32 %v10517_v59, %v9680_v8  ;;  %v10481_v36 = vld [vmem:[%s14661_s3 + $0xe2c] sm:$0xf]  ;;  %v9664_v40 = vld [vmem:[%s14661_s3 + $0xf38] sm:$0xf0]  ;;  %v9411_v12 = vor.u32 %v10449_v19, %v9408_v16 }
 0x3ca   : > { %6557 = vmatpush.bf16.msrb.mxu3 %v9747_v9  ;;  %v9280_v9 = vld [vmem:[%s14661_s3 + $0xc38] sm:$0xf0]  ;;  %v9539_v38 = vor.u32 %v10481_v36, %v9536_v34  ;;  %v10445_v49 = vld [vmem:[%s14661_s3 + $0xd0c] sm:$0xf] }
 0x3cb   : > { %6516 = vmatpush.bf16.msrb.mxu0 %v9347_v37  ;;  %v6176_v37 = vadd.f32 %v14449_v62, %v6162_v10  ;;  %v9283_v18 = vor.u32 %v10417_v57, %v9280_v9  ;;  %v10413_v62 = vld [vmem:[%s14661_s3 + $0xc0c] sm:$0xf]  ;;  %v9264_v58 = vld [vmem:[%s14661_s3 + $0xc18] sm:$0xf0] }
 0x3cc   : > { %6530 = vmatpush.bf16.msrb.mxu1 %v9475_v21  ;;  %v6243_v21 = vpop.f32.mrf.mxu0  ;;  %v9392_v63 = vld [vmem:[%s14661_s3 + $0xd18] sm:$0xf0]  ;;  %v9267_v0 = vor.u32 %v10413_v62, %v9264_v58  ;;  %v6271_v45 = vpop.f32.mrf.mxu2 }
 0x3cd   : > { %6544 = vmatpush.bf16.msrb.mxu2 %v9603_v39  ;;  %v10513_v39 = vld [vmem:[%s14661_s3 + $0xf2c] sm:$0xf]  ;;  %v6257_v56 = vpop.f32.mrf.mxu1  ;;  %v6190_v11 = vadd.f32 %v6189_v51, %v6176_v37  ;;  %v9395_v53 = vor.u32 %v10445_v49, %v9392_v63  ;;  %v6285_v51 = vpop.f32.mrf.mxu3 }
 0x3ce   : > { %6558 = vmatpush.bf16.msrb.mxu3 %v9731_v24  ;;  %v6216_v24 = vadd.f32 %v14516_v55, %v6202_v54  ;;  %v9667_v26 = vor.u32 %v10513_v39, %v9664_v40  ;;  %v10477_v55 = vld [vmem:[%s14661_s3 + $0xe0c] sm:$0xf] }
 0x3cf   : > { %6517 = vmatpush.bf16.msrb.mxu0 %v9331_v32  ;;  %v9520_v32 = vld [vmem:[%s14661_s3 + $0xe18] sm:$0xf0]  ;;  %v6204_v6 = vadd.f32 %v14546_v60, %v6190_v11 }
 0x3d0   : > { %6531 = vmatpush.bf16.msrb.mxu1 %v9459_v33  ;;  %v10509_v33 = vld [vmem:[%s14661_s3 + $0xf0c] sm:$0xf]  ;;  %v6230_v44 = vadd.f32 %v14519_v30, %v6216_v24 }
 0x3d1   : > { %6545 = vmatpush.bf16.msrb.mxu2 %v9587_v25  ;;  %v9648_v25 = vld [vmem:[%s14661_s3 + $0xf18] sm:$0xf0]  ;;  %v6218_v23 = vadd.f32 %v6217_v15, %v6204_v6 }
 0x3d2   : > { %6559 = vmatpush.bf16.msrb.mxu3 %v9715_v50  ;;  %v9523_v50 = vor.u32 %v10477_v55, %v9520_v32  ;;  %v9651_v47 = vor.u32 %v10509_v33, %v9648_v25  ;;  %v6244_v22 = vadd.f32 %v6243_v21, %v6230_v44  ;;  %v3109_v21 = vperm.slane %v14371_v4, 3 }
 0x3d3   : > { %6518 = vmatpush.bf16.msrb.mxu0 %v9315_v13  ;;  %v6232_v30 = vadd.f32 %v6231_v20, %v6218_v23 }
 0x3d4   : > { %6532 = vmatpush.bf16.msrb.mxu1 %v9443_v31  ;;  %v6245_v52 = vpop.f32.mrf.mxu0  ;;  %v6258_v3 = vadd.f32 %v6257_v56, %v6244_v22 }
 0x3d5   : > { %6546 = vmatpush.bf16.msrb.mxu2 %v9571_v17  ;;  %v6259_v13 = vpop.f32.mrf.mxu1  ;;  %v6246_v60 = vadd.f32 %v6245_v52, %v6232_v30  ;;  %v6273_v17 = vpop.f32.mrf.mxu2 }
 0x3d6   : > { %6560 = vmatpush.bf16.msrb.mxu3 %v9699_v28  ;;  %v6272_v31 = vadd.f32 %v6271_v45, %v6258_v3  ;;  %v6287_v48 = vpop.f32.mrf.mxu3 }
 0x3d7   : > { %6519 = vmatpush.bf16.msrb.mxu0 %v9299_v41  ;;  %v6260_v29 = vadd.f32 %v6259_v13, %v6246_v60 }
 0x3d8   : > { %6533 = vmatpush.bf16.msrb.mxu1 %v9427_v14  ;;  %v6286_v42 = vadd.f32 %v6285_v51, %v6272_v31 }
 0x3d9   : > { %6547 = vmatpush.bf16.msrb.mxu2 %v9555_v7  ;;  %v6274_v43 = vadd.f32 %v6273_v17, %v6260_v29 }
 0x3da   : > { %6561 = vmatpush.bf16.msrb.mxu3 %v9683_v27 }
 0x3db   : > { %6520 = vmatpush.bf16.msrb.mxu0 %v9283_v18 }
 0x3dc   : > { %6534 = vmatpush.bf16.msrb.mxu1 %v9411_v12 }
 0x3dd   : > { %6548 = vmatpush.bf16.msrb.mxu2 %v9539_v38 }
 0x3de   : > { %6562 = vmatpush.bf16.msrb.mxu3 %v9667_v26 }
 0x3df   : > { %6521 = vmatpush.bf16.msrb.mxu0 %v9267_v0  ;;  %v6299_v46 = vpop.f32.mrf.mxu0 }
 0x3e0   : > { %6535 = vmatpush.bf16.msrb.mxu1 %v9395_v53  ;;  %v6313_v28 = vpop.f32.mrf.mxu1  ;;  %v6300_v35 = vadd.f32 %v6299_v46, %v6286_v42 }
 0x3e1   : > { %6549 = vmatpush.bf16.msrb.mxu2 %v9523_v50 }
 0x3e2   : > { %6563 = vmatpush.bf16.msrb.mxu3 %v9651_v47  ;;  %6522 = vmatmul.bf16.vlgmr.msrb.gmra.mxu0 %v12143_v61  ;;  %v6314_v10 = vadd.f32 %v6313_v28, %v6300_v35  ;;  %v6288_v61 = vadd.f32 %v6287_v48, %v6274_v43 }
 0x3e3   : > { %6536 = vmatmul.bf16.vlgmr.msrb.gmra.mxu1 %v12156_v2 }
 0x3e4   : > { %6550 = vmatmul.bf16.vlgmr.msrb.gmra.mxu2 %v12154_v1 }
 0x3e5   : > { %6564 = vmatmul.bf16.vlgmr.msrb.gmra.mxu3 %v12164_v5 }
 0x3e7   : > { %v6327_v59 = vpop.f32.mrf.mxu2  ;;  %v6301_v2 = vpop.f32.mrf.mxu0 }
 0x3e8   : > { %v6328_v8 = vadd.f32 %v6327_v59, %v6314_v10  ;;  %v6341_v41 = vpop.f32.mrf.mxu3  ;;  %v6302_v1 = vadd.f32 %v6301_v2, %v6288_v61  ;;  %v6315_v14 = vpop.f32.mrf.mxu1 }
 0x3ea   : > { %v6342_v54 = vadd.f32 %v6341_v41, %v6328_v8  ;;  %v6316_v5 = vadd.f32 %v6315_v14, %v6302_v1 }
 0x3ec   : > { %v6572_v7 = vmax.f32 %v6342_v54, 0.0 }
 0x3ee   : > { %6580 = vst [vmem:[%s14663_s5 + $0x10] sm:$0xff] %v6572_v7 }
 0x3ef   : > { %v6329_v57 = vpop.f32.mrf.mxu2 }
 0x3f0   : > { %v6330_v9 = vadd.f32 %v6329_v57, %v6316_v5  ;;  %v6343_v19 = vpop.f32.mrf.mxu3 }
 0x3f2   : > { %v6344_v15 = vadd.f32 %v6343_v19, %v6330_v9 }
 0x3f4   : > { %v6576_v27 = vmax.f32 %v6344_v15, 0.0 }
 0x3f6   : > { %6584 = vst [vmem:[%s14663_s5 + $0x30] sm:$0xff] %v6576_v27 }
 0x3ff   : > { %v6355_v16 = vpop.f32.mrf.mxu0 }
 0x400   : > { %v6369_v36 = vpop.f32.mrf.mxu1  ;;  %v6356_v40 = vadd.f32 %v6355_v16, %v3109_v21 }
 0x402   : > { %v6370_v24 = vadd.f32 %v6369_v36, %v6356_v40 }
 0x407   : > { %v6383_v34 = vpop.f32.mrf.mxu2  ;;  %v6357_v20 = vpop.f32.mrf.mxu0 }
 0x408   : > { %v6397_v37 = vpop.f32.mrf.mxu3  ;;  %v6371_v39 = vpop.f32.mrf.mxu1  ;;  %v6384_v62 = vadd.f32 %v6383_v34, %v6370_v24  ;;  %v6358_v58 = vadd.f32 %v6357_v20, %v3109_v21 }
 0x40a   : > { %v6398_v26 = vadd.f32 %v6397_v37, %v6384_v62  ;;  %v6372_v55 = vadd.f32 %v6371_v39, %v6358_v58 }
 0x40f   : > { %v6385_v56 = vpop.f32.mrf.mxu2 }
 0x410   : > { %v6399_v18 = vpop.f32.mrf.mxu3  ;;  %v6386_v25 = vadd.f32 %v6385_v56, %v6372_v55 }
 0x412   : > { %v6400_v4 = vadd.f32 %v6399_v18, %v6386_v25 }
 0x41f   : > { %v6411_v12 = vpop.f32.mrf.mxu0 }
 0x420   : > { %v6425_v38 = vpop.f32.mrf.mxu1  ;;  %v6412_v11 = vadd.f32 %v6411_v12, %v6398_v26 }
 0x422   : > { %v6426_v0 = vadd.f32 %v6425_v38, %v6412_v11 }
 0x427   : > { %v6439_v49 = vpop.f32.mrf.mxu2  ;;  %v6413_v32 = vpop.f32.mrf.mxu0 }
 0x428   : > { %v6453_v63 = vpop.f32.mrf.mxu3  ;;  %v6427_v33 = vpop.f32.mrf.mxu1  ;;  %v6440_v45 = vadd.f32 %v6439_v49, %v6426_v0  ;;  %v6414_v6 = vadd.f32 %v6413_v32, %v6400_v4 }
 0x42a   : > { %v6454_v22 = vadd.f32 %v6453_v63, %v6440_v45  ;;  %v6428_v23 = vadd.f32 %v6427_v33, %v6414_v6 }
 0x42f   : > { %v6441_v44 = vpop.f32.mrf.mxu2 }
 0x430   : > { %v6455_v53 = vpop.f32.mrf.mxu3  ;;  %v6442_v3 = vadd.f32 %v6441_v44, %v6428_v23 }
 0x432   : > { %v6456_v17 = vadd.f32 %v6455_v53, %v6442_v3 }
 0x43f   : > { %v6467_v50 = vpop.f32.mrf.mxu0 }
 0x440   : > { %v6481_v47 = vpop.f32.mrf.mxu1  ;;  %v6468_v52 = vadd.f32 %v6467_v50, %v6454_v22 }
 0x442   : > { %v6482_v31 = vadd.f32 %v6481_v47, %v6468_v52 }
 0x447   : > { %v6495_v51 = vpop.f32.mrf.mxu2  ;;  %v6469_v30 = vpop.f32.mrf.mxu0 }
 0x448   : > { %v6509_v13 = vpop.f32.mrf.mxu3  ;;  %v6483_v60 = vpop.f32.mrf.mxu1  ;;  %v6496_v42 = vadd.f32 %v6495_v51, %v6482_v31  ;;  %v6470_v48 = vadd.f32 %v6469_v30, %v6456_v17 }
 0x44a   : > { %v6510_v28 = vadd.f32 %v6509_v13, %v6496_v42  ;;  %v6484_v43 = vadd.f32 %v6483_v60, %v6470_v48 }
 0x44f   : > { %v6497_v46 = vpop.f32.mrf.mxu2 }
 0x450   : > { %v6511_v29 = vpop.f32.mrf.mxu3  ;;  %v6498_v61 = vadd.f32 %v6497_v46, %v6484_v43 }
 0x452   : > { %v6512_v41 = vadd.f32 %v6511_v29, %v6498_v61 }
 0x45f   : > { %v6523_v35 = vpop.f32.mrf.mxu0 }
 0x460   : > { %v6524_v10 = vadd.f32 %v6523_v35, %v6510_v28  ;;  %v6537_v59 = vpop.f32.mrf.mxu1 }
 0x462   : > { %v6538_v8 = vadd.f32 %v6537_v59, %v6524_v10 }
 0x467   : > { %v6551_v2 = vpop.f32.mrf.mxu2  ;;  %v6525_v14 = vpop.f32.mrf.mxu0 }
 0x468   : > { %v6552_v1 = vadd.f32 %v6551_v2, %v6538_v8  ;;  %v6565_v54 = vpop.f32.mrf.mxu3  ;;  %v6526_v5 = vadd.f32 %v6525_v14, %v6512_v41  ;;  %v6539_v9 = vpop.f32.mrf.mxu1 }
 0x46a   : > { %v6566_v7 = vadd.f32 %v6565_v54, %v6552_v1  ;;  %v6540_v19 = vadd.f32 %v6539_v9, %v6526_v5 }
 0x46c   : > { %v6573_v57 = vmax.f32 %v6566_v7, 0.0 }
 0x46e   : > { %6581 = vst [vmem:[%s14663_s5 + $0x18] sm:$0xff] %v6573_v57 }
 0x46f   : > { %v6553_v15 = vpop.f32.mrf.mxu2 }
 0x470   : > { %v6554_v27 = vadd.f32 %v6553_v15, %v6540_v19  ;;  %v6567_v16 = vpop.f32.mrf.mxu3 }
 0x472   : > { %v6568_v36 = vadd.f32 %v6567_v16, %v6554_v27 }
 0x474   : > { %v6577_v34 = vmax.f32 %v6568_v36, 0.0 }
 0x476   : > { %6585 = vst [vmem:[%s14663_s5 + $0x38] sm:$0xff] %v6577_v34 }
 0x477 PF: > { %s15_s22 = sadd.s32 1, %s10621_s22   ;;  %s14664_s18 = smov %s10609_s19 }
 0x478   : > { %p12_p12 = scmp.ge.s32.totalorder %s15_s22, 6   ;;  %s14665_s19 = smov %s10689_s26 }
 0x479   : > { %s14666_s20 = smov %s10617_s21  ;;  %s14667_s21 = smov %s14669_s23 }
 0x47a   :  { %14 = sbr.rel (!%p12_p12) target bundleno = 3 (0x3), region = 124 }

</bundles_post_ra>
